<compile_context>
chip_gen: v6e
topology: v6e:2x2x1
jax: 0.10.0
libtpu: 0.0.40
codegen_flags: <defaults>
</compile_context>

<pallas_src>
import jax
import jax.numpy as jnp
from jax.experimental import pallas as pl
from jax.experimental.pallas import tpu as pltpu  # noqa: F401  (kept per template)

EPS = 1e-5


# ----------------------------- Pallas kernel ------------------------------- #

def _make_conv_bn_relu_kernel(Wp, Ra, count):
    """Fused 3x3 valid conv + batch-stat BatchNorm + ReLU, single block.

    x_ref: (R, Cin)  f32   padded activation, flattened (n, h, w) rows
    w_ref: (9, Cin, Cout) bf16  per-tap weight matrices, tap = dy*3 + dx
    g_ref, b_ref: (1, Cout) f32  BN affine
    m_ref: (Ra, 1) f32  1.0 for valid conv-output rows, 0.0 for margin junk
    o_ref: (Ra, Cout) f32
    """
    inv_cnt = 1.0 / float(count)

    def kernel(x_ref, w_ref, g_ref, b_ref, m_ref, o_ref):
        cout = w_ref.shape[-1]
        acc = jnp.zeros((Ra, cout), jnp.float32)
        # 9-tap accumulation: each tap is a row-shifted slice of the same
        # VMEM-resident activation, fed to the MXU in bf16 with f32 accum.
        for dy in range(3):
            for dx in range(3):
                s = dy * Wp + dx                      # static row shift
                xs = x_ref[s:s + Ra, :].astype(jnp.bfloat16)
                acc = acc + jnp.dot(xs, w_ref[dy * 3 + dx],
                                    preferred_element_type=jnp.float32)
        # Conv bias omitted: exactly cancelled by the BN mean subtraction.
        mask = m_ref[...]                             # (Ra, 1), {0, 1}
        mean = jnp.sum(acc * mask, axis=0, keepdims=True) * inv_cnt
        diff = acc - mean
        var = jnp.sum(diff * diff * mask, axis=0, keepdims=True) * inv_cnt
        y = diff * jax.lax.rsqrt(var + EPS) * g_ref[...] + b_ref[...]
        o_ref[...] = jnp.maximum(y, 0.0)

    return kernel


# ------------------------------ layer wrapper ------------------------------ #

def conv_bn_relu(x_nhwc, w9, gamma, beta, *, pad):
    """Conv2d(3x3, stride 1, padding=pad, bias folded) + BN(batch stats) +
    ReLU, as one fused pallas_call. Input/output NHWC, f32."""
    # Pad Cin to a multiple of 8 (layer 1: 3 -> 8) for an aligned MXU
    # contraction; zero channels x zero weight rows contribute nothing.
    cin = x_nhwc.shape[-1]
    cpad = (-cin) % 8
    if cpad:
        x_nhwc = jnp.pad(x_nhwc, ((0, 0), (0, 0), (0, 0), (0, cpad)))
        w9 = jnp.pad(w9, ((0, 0), (0, cpad), (0, 0)))
    if pad:
        x_nhwc = jnp.pad(x_nhwc, ((0, 0), (pad, pad), (pad, pad), (0, 0)))

    N, Hp, Wp, Cin = x_nhwc.shape
    Ho, Wo = Hp - 2, Wp - 2
    Cout = w9.shape[-1]

    R = N * Hp * Wp                  # flattened padded rows
    Ra = R - (2 * Wp + 2)            # rows reachable by every tap shift
    count = N * Ho * Wo              # number of real conv outputs (BN count)

    x_flat = x_nhwc.reshape(R, Cin)

    # Validity mask over accumulator rows: row r = n*Hp*Wp + h*Wp + w is a
    # real conv output iff h < Ho and w < Wo.
    r = jnp.arange(Ra)
    h = (r // Wp) % Hp
    w = r % Wp
    mask = ((h < Ho) & (w < Wo)).astype(jnp.float32)[:, None]     # (Ra, 1)

    kernel = _make_conv_bn_relu_kernel(Wp, Ra, count)
    y = pl.pallas_call(
        kernel,
        out_shape=jax.ShapeDtypeStruct((Ra, Cout), jnp.float32),
        in_specs=[
            pl.BlockSpec((R, Cin), lambda: (0, 0)),
            pl.BlockSpec((9, Cin, Cout), lambda: (0, 0, 0)),
            pl.BlockSpec((1, Cout), lambda: (0, 0)),
            pl.BlockSpec((1, Cout), lambda: (0, 0)),
            pl.BlockSpec((Ra, 1), lambda: (0, 0)),
        ],
        out_specs=pl.BlockSpec((Ra, Cout), lambda: (0, 0)),
    )(x_flat, w9, gamma, beta, mask)

    # Compact back to (N, Ho, Wo, Cout); margin rows (junk) are sliced away.
    y = jnp.pad(y, ((0, R - Ra), (0, 0)))
    y = y.reshape(N, Hp, Wp, Cout)[:, :Ho, :Wo, :]
    return y


def maxpool2(x_nhwc):
    """MaxPool2d(kernel=2, stride=2), floor mode, NHWC (XLA glue)."""
    N, H, W, C = x_nhwc.shape
    H2, W2 = H // 2, W // 2
    x = x_nhwc[:, : 2 * H2, : 2 * W2, :].reshape(N, H2, 2, W2, 2, C)
    return jnp.max(x, axis=(2, 4))


# ------------------------------ full forward ------------------------------- #

def cnn_encoder_forward(x_nchw, params):
    # NCHW -> NHWC (channels last -> lane dim) for the kernels.
    x = jnp.transpose(x_nchw, (0, 2, 3, 1))
    x = maxpool2(conv_bn_relu(x, *params["layer1"], pad=0))
    x = maxpool2(conv_bn_relu(x, *params["layer2"], pad=0))
    x = conv_bn_relu(x, *params["layer3"], pad=1)
    x = conv_bn_relu(x, *params["layer4"], pad=1)
    # NHWC -> NCHW to match PyTorch output convention.
    return jnp.transpose(x, (0, 3, 1, 2))


# --------------------------- deterministic params --------------------------- #

def init_params(key):
    def layer(key, c_in, c_out):
        k_w, k_g, k_be = jax.random.split(key, 3)
        # PyTorch Conv2d weight (Cout, Cin, 3, 3) -> (3, 3, Cin, Cout)
        # -> (9, Cin, Cout) per-tap matrices, pre-cast to bf16 for the MXU.
        w_t = 0.05 * jax.random.normal(k_w, (c_out, c_in, 3, 3), jnp.float32)
        w9 = (jnp.transpose(w_t, (2, 3, 1, 0))
              .reshape(9, c_in, c_out).astype(jnp.bfloat16))
        # Conv bias intentionally omitted: it is an exact no-op under the
        # training-mode BatchNorm that follows.
        gamma = 1.0 + 0.1 * jax.random.normal(k_g, (1, c_out), jnp.float32)
        beta = 0.1 * jax.random.normal(k_be, (1, c_out), jnp.float32)
        return (w9, gamma, beta)

    k1, k2, k3, k4 = jax.random.split(key, 4)
    return {
        "layer1": layer(k1, 3, 64),
        "layer2": layer(k2, 64, 64),
        "layer3": layer(k3, 64, 64),
        "layer4": layer(k4, 64, 64),
    }


# ----------------------------------- main ----------------------------------- #

if __name__ == "__main__":
    key = jax.random.PRNGKey(0)
    k_params, k_x = jax.random.split(key)
    params = init_params(k_params)

    # Small NCHW input consistent with the module (3 input channels).
    x = jax.random.normal(k_x, (2, 3, 16, 16), jnp.float32)

    out = jax.jit(cnn_encoder_forward)(x, params)
    out = jax.block_until_ready(out)

    # 16 -conv-> 14 -pool-> 7 -conv-> 5 -pool-> 2 -> (pad1 conv) 2 -> 2
    assert out.shape == (2, 64, 2, 2), out.shape
    assert out.dtype == jnp.float32
    assert bool(jnp.all(jnp.isfinite(out)))
    print("KERNEL_OK")
</pallas_src>

<mosaic_0001>
module attributes {stable_mosaic.version = 11 : i64} {
  func.func @kernel(%arg0: memref<512x8xf32, #tpu.memory_space<vmem>>, %arg1: memref<9x8x64xbf16, #tpu.memory_space<vmem>>, %arg2: memref<1x64xf32, #tpu.memory_space<vmem>>, %arg3: memref<1x64xf32, #tpu.memory_space<vmem>>, %arg4: memref<478x1xf32, #tpu.memory_space<vmem>>, %arg5: memref<478x64xf32, #tpu.memory_space<vmem>>) attributes {dimension_semantics = [], scalar_prefetch = 0 : i64, scratch_operands = 0 : i64, tpu.core_type = #tpu.core_type<tc>} {
    %cst = arith.constant 0.000000e+00 : f32
    %0 = vector.broadcast %cst : f32 to vector<478x64xf32>
    %c0 = arith.constant 0 : index
    %c0_0 = arith.constant 0 : index
    %1 = vector.load %arg0[%c0, %c0_0] : memref<512x8xf32, #tpu.memory_space<vmem>>, vector<478x8xf32>
    %2 = arith.truncf %1 : vector<478x8xf32> to vector<478x8xbf16>
    %c0_1 = arith.constant 0 : index
    %c0_2 = arith.constant 0 : index
    %c0_3 = arith.constant 0 : index
    %3 = vector.load %arg1[%c0_1, %c0_2, %c0_3] : memref<9x8x64xbf16, #tpu.memory_space<vmem>>, vector<1x8x64xbf16>
    %4 = vector.shape_cast %3 : vector<1x8x64xbf16> to vector<8x64xbf16>
    %cst_4 = arith.constant dense<0.000000e+00> : vector<478x64xf32>
    %5 = tpu.matmul %2, %4, %cst_4 {dimension_numbers = #tpu.dot_dimension_numbers<[1], [0], [0], [1], [0, 0, 1, 1], [], []>} : vector<478x8xbf16>, vector<8x64xbf16>, vector<478x64xf32> -> vector<478x64xf32>
    %6 = arith.addf %0, %5 : vector<478x64xf32>
    %c1 = arith.constant 1 : index
    %c0_5 = arith.constant 0 : index
    %7 = vector.load %arg0[%c1, %c0_5] : memref<512x8xf32, #tpu.memory_space<vmem>>, vector<478x8xf32>
    %8 = arith.truncf %7 : vector<478x8xf32> to vector<478x8xbf16>
    %c1_6 = arith.constant 1 : index
    %c0_7 = arith.constant 0 : index
    %c0_8 = arith.constant 0 : index
    %9 = vector.load %arg1[%c1_6, %c0_7, %c0_8] : memref<9x8x64xbf16, #tpu.memory_space<vmem>>, vector<1x8x64xbf16>
    %10 = vector.shape_cast %9 : vector<1x8x64xbf16> to vector<8x64xbf16>
    %cst_9 = arith.constant dense<0.000000e+00> : vector<478x64xf32>
    %11 = tpu.matmul %8, %10, %cst_9 {dimension_numbers = #tpu.dot_dimension_numbers<[1], [0], [0], [1], [0, 0, 1, 1], [], []>} : vector<478x8xbf16>, vector<8x64xbf16>, vector<478x64xf32> -> vector<478x64xf32>
    %12 = arith.addf %6, %11 : vector<478x64xf32>
    %c2 = arith.constant 2 : index
    %c0_10 = arith.constant 0 : index
    %13 = vector.load %arg0[%c2, %c0_10] : memref<512x8xf32, #tpu.memory_space<vmem>>, vector<478x8xf32>
    %14 = arith.truncf %13 : vector<478x8xf32> to vector<478x8xbf16>
    %c2_11 = arith.constant 2 : index
    %c0_12 = arith.constant 0 : index
    %c0_13 = arith.constant 0 : index
    %15 = vector.load %arg1[%c2_11, %c0_12, %c0_13] : memref<9x8x64xbf16, #tpu.memory_space<vmem>>, vector<1x8x64xbf16>
    %16 = vector.shape_cast %15 : vector<1x8x64xbf16> to vector<8x64xbf16>
    %cst_14 = arith.constant dense<0.000000e+00> : vector<478x64xf32>
    %17 = tpu.matmul %14, %16, %cst_14 {dimension_numbers = #tpu.dot_dimension_numbers<[1], [0], [0], [1], [0, 0, 1, 1], [], []>} : vector<478x8xbf16>, vector<8x64xbf16>, vector<478x64xf32> -> vector<478x64xf32>
    %18 = arith.addf %12, %17 : vector<478x64xf32>
    %c16 = arith.constant 16 : index
    %c0_15 = arith.constant 0 : index
    %19 = vector.load %arg0[%c16, %c0_15] : memref<512x8xf32, #tpu.memory_space<vmem>>, vector<478x8xf32>
    %20 = arith.truncf %19 : vector<478x8xf32> to vector<478x8xbf16>
    %c3 = arith.constant 3 : index
    %c0_16 = arith.constant 0 : index
    %c0_17 = arith.constant 0 : index
    %21 = vector.load %arg1[%c3, %c0_16, %c0_17] : memref<9x8x64xbf16, #tpu.memory_space<vmem>>, vector<1x8x64xbf16>
    %22 = vector.shape_cast %21 : vector<1x8x64xbf16> to vector<8x64xbf16>
    %cst_18 = arith.constant dense<0.000000e+00> : vector<478x64xf32>
    %23 = tpu.matmul %20, %22, %cst_18 {dimension_numbers = #tpu.dot_dimension_numbers<[1], [0], [0], [1], [0, 0, 1, 1], [], []>} : vector<478x8xbf16>, vector<8x64xbf16>, vector<478x64xf32> -> vector<478x64xf32>
    %24 = arith.addf %18, %23 : vector<478x64xf32>
    %c17 = arith.constant 17 : index
    %c0_19 = arith.constant 0 : index
    %25 = vector.load %arg0[%c17, %c0_19] : memref<512x8xf32, #tpu.memory_space<vmem>>, vector<478x8xf32>
    %26 = arith.truncf %25 : vector<478x8xf32> to vector<478x8xbf16>
    %c4 = arith.constant 4 : index
    %c0_20 = arith.constant 0 : index
    %c0_21 = arith.constant 0 : index
    %27 = vector.load %arg1[%c4, %c0_20, %c0_21] : memref<9x8x64xbf16, #tpu.memory_space<vmem>>, vector<1x8x64xbf16>
    %28 = vector.shape_cast %27 : vector<1x8x64xbf16> to vector<8x64xbf16>
    %cst_22 = arith.constant dense<0.000000e+00> : vector<478x64xf32>
    %29 = tpu.matmul %26, %28, %cst_22 {dimension_numbers = #tpu.dot_dimension_numbers<[1], [0], [0], [1], [0, 0, 1, 1], [], []>} : vector<478x8xbf16>, vector<8x64xbf16>, vector<478x64xf32> -> vector<478x64xf32>
    %30 = arith.addf %24, %29 : vector<478x64xf32>
    %c18 = arith.constant 18 : index
    %c0_23 = arith.constant 0 : index
    %31 = vector.load %arg0[%c18, %c0_23] : memref<512x8xf32, #tpu.memory_space<vmem>>, vector<478x8xf32>
    %32 = arith.truncf %31 : vector<478x8xf32> to vector<478x8xbf16>
    %c5 = arith.constant 5 : index
    %c0_24 = arith.constant 0 : index
    %c0_25 = arith.constant 0 : index
    %33 = vector.load %arg1[%c5, %c0_24, %c0_25] : memref<9x8x64xbf16, #tpu.memory_space<vmem>>, vector<1x8x64xbf16>
    %34 = vector.shape_cast %33 : vector<1x8x64xbf16> to vector<8x64xbf16>
    %cst_26 = arith.constant dense<0.000000e+00> : vector<478x64xf32>
    %35 = tpu.matmul %32, %34, %cst_26 {dimension_numbers = #tpu.dot_dimension_numbers<[1], [0], [0], [1], [0, 0, 1, 1], [], []>} : vector<478x8xbf16>, vector<8x64xbf16>, vector<478x64xf32> -> vector<478x64xf32>
    %36 = arith.addf %30, %35 : vector<478x64xf32>
    %c32 = arith.constant 32 : index
    %c0_27 = arith.constant 0 : index
    %37 = vector.load %arg0[%c32, %c0_27] : memref<512x8xf32, #tpu.memory_space<vmem>>, vector<478x8xf32>
    %38 = arith.truncf %37 : vector<478x8xf32> to vector<478x8xbf16>
    %c6 = arith.constant 6 : index
    %c0_28 = arith.constant 0 : index
    %c0_29 = arith.constant 0 : index
    %39 = vector.load %arg1[%c6, %c0_28, %c0_29] : memref<9x8x64xbf16, #tpu.memory_space<vmem>>, vector<1x8x64xbf16>
    %40 = vector.shape_cast %39 : vector<1x8x64xbf16> to vector<8x64xbf16>
    %cst_30 = arith.constant dense<0.000000e+00> : vector<478x64xf32>
    %41 = tpu.matmul %38, %40, %cst_30 {dimension_numbers = #tpu.dot_dimension_numbers<[1], [0], [0], [1], [0, 0, 1, 1], [], []>} : vector<478x8xbf16>, vector<8x64xbf16>, vector<478x64xf32> -> vector<478x64xf32>
    %42 = arith.addf %36, %41 : vector<478x64xf32>
    %c33 = arith.constant 33 : index
    %c0_31 = arith.constant 0 : index
    %43 = vector.load %arg0[%c33, %c0_31] : memref<512x8xf32, #tpu.memory_space<vmem>>, vector<478x8xf32>
    %44 = arith.truncf %43 : vector<478x8xf32> to vector<478x8xbf16>
    %c7 = arith.constant 7 : index
    %c0_32 = arith.constant 0 : index
    %c0_33 = arith.constant 0 : index
    %45 = vector.load %arg1[%c7, %c0_32, %c0_33] : memref<9x8x64xbf16, #tpu.memory_space<vmem>>, vector<1x8x64xbf16>
    %46 = vector.shape_cast %45 : vector<1x8x64xbf16> to vector<8x64xbf16>
    %cst_34 = arith.constant dense<0.000000e+00> : vector<478x64xf32>
    %47 = tpu.matmul %44, %46, %cst_34 {dimension_numbers = #tpu.dot_dimension_numbers<[1], [0], [0], [1], [0, 0, 1, 1], [], []>} : vector<478x8xbf16>, vector<8x64xbf16>, vector<478x64xf32> -> vector<478x64xf32>
    %48 = arith.addf %42, %47 : vector<478x64xf32>
    %c34 = arith.constant 34 : index
    %c0_35 = arith.constant 0 : index
    %49 = vector.load %arg0[%c34, %c0_35] : memref<512x8xf32, #tpu.memory_space<vmem>>, vector<478x8xf32>
    %50 = arith.truncf %49 : vector<478x8xf32> to vector<478x8xbf16>
    %c8 = arith.constant 8 : index
    %c0_36 = arith.constant 0 : index
    %c0_37 = arith.constant 0 : index
    %51 = vector.load %arg1[%c8, %c0_36, %c0_37] : memref<9x8x64xbf16, #tpu.memory_space<vmem>>, vector<1x8x64xbf16>
    %52 = vector.shape_cast %51 : vector<1x8x64xbf16> to vector<8x64xbf16>
    %cst_38 = arith.constant dense<0.000000e+00> : vector<478x64xf32>
    %53 = tpu.matmul %50, %52, %cst_38 {dimension_numbers = #tpu.dot_dimension_numbers<[1], [0], [0], [1], [0, 0, 1, 1], [], []>} : vector<478x8xbf16>, vector<8x64xbf16>, vector<478x64xf32> -> vector<478x64xf32>
    %54 = arith.addf %48, %53 : vector<478x64xf32>
    %c0_39 = arith.constant 0 : index
    %c0_40 = arith.constant 0 : index
    %55 = vector.load %arg4[%c0_39, %c0_40] : memref<478x1xf32, #tpu.memory_space<vmem>>, vector<478x1xf32>
    %56 = vector.broadcast %55 : vector<478x1xf32> to vector<478x64xf32>
    %57 = arith.mulf %54, %56 : vector<478x64xf32>
    %cst_41 = arith.constant dense<0.000000e+00> : vector<64xf32>
    %58 = vector.multi_reduction <add>, %57, %cst_41 [0] : vector<478x64xf32> to vector<64xf32>
    %59 = vector.shape_cast %58 : vector<64xf32> to vector<1x64xf32>
    %cst_42 = arith.constant 0.00255102036 : f32
    %60 = vector.broadcast %cst_42 : f32 to vector<1x64xf32>
    %61 = arith.mulf %59, %60 : vector<1x64xf32>
    %62 = vector.broadcast %61 : vector<1x64xf32> to vector<478x64xf32>
    %63 = arith.subf %54, %62 : vector<478x64xf32>
    %64 = arith.mulf %63, %63 : vector<478x64xf32>
    %65 = vector.broadcast %55 : vector<478x1xf32> to vector<478x64xf32>
    %66 = arith.mulf %64, %65 : vector<478x64xf32>
    %cst_43 = arith.constant dense<0.000000e+00> : vector<64xf32>
    %67 = vector.multi_reduction <add>, %66, %cst_43 [0] : vector<478x64xf32> to vector<64xf32>
    %68 = vector.shape_cast %67 : vector<64xf32> to vector<1x64xf32>
    %cst_44 = arith.constant 0.00255102036 : f32
    %69 = vector.broadcast %cst_44 : f32 to vector<1x64xf32>
    %70 = arith.mulf %68, %69 : vector<1x64xf32>
    %cst_45 = arith.constant 9.99999974E-6 : f32
    %71 = vector.broadcast %cst_45 : f32 to vector<1x64xf32>
    %72 = arith.addf %70, %71 : vector<1x64xf32>
    %73 = math.rsqrt %72 : vector<1x64xf32>
    %74 = vector.broadcast %73 : vector<1x64xf32> to vector<478x64xf32>
    %75 = arith.mulf %63, %74 : vector<478x64xf32>
    %c0_46 = arith.constant 0 : index
    %c0_47 = arith.constant 0 : index
    %76 = vector.load %arg2[%c0_46, %c0_47] : memref<1x64xf32, #tpu.memory_space<vmem>>, vector<1x64xf32>
    %77 = vector.broadcast %76 : vector<1x64xf32> to vector<478x64xf32>
    %78 = arith.mulf %75, %77 : vector<478x64xf32>
    %c0_48 = arith.constant 0 : index
    %c0_49 = arith.constant 0 : index
    %79 = vector.load %arg3[%c0_48, %c0_49] : memref<1x64xf32, #tpu.memory_space<vmem>>, vector<1x64xf32>
    %80 = vector.broadcast %79 : vector<1x64xf32> to vector<478x64xf32>
    %81 = arith.addf %78, %80 : vector<478x64xf32>
    %cst_50 = arith.constant 0.000000e+00 : f32
    %82 = vector.broadcast %cst_50 : f32 to vector<478x64xf32>
    %83 = arith.maximumf %81, %82 : vector<478x64xf32>
    %c0_51 = arith.constant 0 : index
    %c0_52 = arith.constant 0 : index
    %84 = vector.load %arg5[%c0_51, %c0_52] : memref<478x64xf32, #tpu.memory_space<vmem>>, vector<478x64xf32>
    tpu.vector_store %arg5[%c0_51, %c0_52], %83 {strides = array<i32>} : memref<478x64xf32, #tpu.memory_space<vmem>>, vector<478x64xf32>,
    return
  }
}

module attributes {stable_mosaic.version = 11 : i64} {
  func.func @kernel(%arg0: memref<98x64xf32, #tpu.memory_space<vmem>>, %arg1: memref<9x64x64xbf16, #tpu.memory_space<vmem>>, %arg2: memref<1x64xf32, #tpu.memory_space<vmem>>, %arg3: memref<1x64xf32, #tpu.memory_space<vmem>>, %arg4: memref<82x1xf32, #tpu.memory_space<vmem>>, %arg5: memref<82x64xf32, #tpu.memory_space<vmem>>) attributes {dimension_semantics = [], scalar_prefetch = 0 : i64, scratch_operands = 0 : i64, tpu.core_type = #tpu.core_type<tc>} {
    %cst = arith.constant 0.000000e+00 : f32
    %0 = vector.broadcast %cst : f32 to vector<82x64xf32>
    %c0 = arith.constant 0 : index
    %c0_0 = arith.constant 0 : index
    %1 = vector.load %arg0[%c0, %c0_0] : memref<98x64xf32, #tpu.memory_space<vmem>>, vector<82x64xf32>
    %2 = arith.truncf %1 : vector<82x64xf32> to vector<82x64xbf16>
    %c0_1 = arith.constant 0 : index
    %c0_2 = arith.constant 0 : index
    %c0_3 = arith.constant 0 : index
    %3 = vector.load %arg1[%c0_1, %c0_2, %c0_3] : memref<9x64x64xbf16, #tpu.memory_space<vmem>>, vector<1x64x64xbf16>
    %4 = vector.shape_cast %3 : vector<1x64x64xbf16> to vector<64x64xbf16>
    %cst_4 = arith.constant dense<0.000000e+00> : vector<82x64xf32>
    %5 = tpu.matmul %2, %4, %cst_4 {dimension_numbers = #tpu.dot_dimension_numbers<[1], [0], [0], [1], [0, 0, 1, 1], [], []>} : vector<82x64xbf16>, vector<64x64xbf16>, vector<82x64xf32> -> vector<82x64xf32>
    %6 = arith.addf %0, %5 : vector<82x64xf32>
    %c1 = arith.constant 1 : index
    %c0_5 = arith.constant 0 : index
    %7 = vector.load %arg0[%c1, %c0_5] : memref<98x64xf32, #tpu.memory_space<vmem>>, vector<82x64xf32>
    %8 = arith.truncf %7 : vector<82x64xf32> to vector<82x64xbf16>
    %c1_6 = arith.constant 1 : index
    %c0_7 = arith.constant 0 : index
    %c0_8 = arith.constant 0 : index
    %9 = vector.load %arg1[%c1_6, %c0_7, %c0_8] : memref<9x64x64xbf16, #tpu.memory_space<vmem>>, vector<1x64x64xbf16>
    %10 = vector.shape_cast %9 : vector<1x64x64xbf16> to vector<64x64xbf16>
    %cst_9 = arith.constant dense<0.000000e+00> : vector<82x64xf32>
    %11 = tpu.matmul %8, %10, %cst_9 {dimension_numbers = #tpu.dot_dimension_numbers<[1], [0], [0], [1], [0, 0, 1, 1], [], []>} : vector<82x64xbf16>, vector<64x64xbf16>, vector<82x64xf32> -> vector<82x64xf32>
    %12 = arith.addf %6, %11 : vector<82x64xf32>
    %c2 = arith.constant 2 : index
    %c0_10 = arith.constant 0 : index
    %13 = vector.load %arg0[%c2, %c0_10] : memref<98x64xf32, #tpu.memory_space<vmem>>, vector<82x64xf32>
    %14 = arith.truncf %13 : vector<82x64xf32> to vector<82x64xbf16>
    %c2_11 = arith.constant 2 : index
    %c0_12 = arith.constant 0 : index
    %c0_13 = arith.constant 0 : index
    %15 = vector.load %arg1[%c2_11, %c0_12, %c0_13] : memref<9x64x64xbf16, #tpu.memory_space<vmem>>, vector<1x64x64xbf16>
    %16 = vector.shape_cast %15 : vector<1x64x64xbf16> to vector<64x64xbf16>
    %cst_14 = arith.constant dense<0.000000e+00> : vector<82x64xf32>
    %17 = tpu.matmul %14, %16, %cst_14 {dimension_numbers = #tpu.dot_dimension_numbers<[1], [0], [0], [1], [0, 0, 1, 1], [], []>} : vector<82x64xbf16>, vector<64x64xbf16>, vector<82x64xf32> -> vector<82x64xf32>
    %18 = arith.addf %12, %17 : vector<82x64xf32>
    %c7 = arith.constant 7 : index
    %c0_15 = arith.constant 0 : index
    %19 = vector.load %arg0[%c7, %c0_15] : memref<98x64xf32, #tpu.memory_space<vmem>>, vector<82x64xf32>
    %20 = arith.truncf %19 : vector<82x64xf32> to vector<82x64xbf16>
    %c3 = arith.constant 3 : index
    %c0_16 = arith.constant 0 : index
    %c0_17 = arith.constant 0 : index
    %21 = vector.load %arg1[%c3, %c0_16, %c0_17] : memref<9x64x64xbf16, #tpu.memory_space<vmem>>, vector<1x64x64xbf16>
    %22 = vector.shape_cast %21 : vector<1x64x64xbf16> to vector<64x64xbf16>
    %cst_18 = arith.constant dense<0.000000e+00> : vector<82x64xf32>
    %23 = tpu.matmul %20, %22, %cst_18 {dimension_numbers = #tpu.dot_dimension_numbers<[1], [0], [0], [1], [0, 0, 1, 1], [], []>} : vector<82x64xbf16>, vector<64x64xbf16>, vector<82x64xf32> -> vector<82x64xf32>
    %24 = arith.addf %18, %23 : vector<82x64xf32>
    %c8 = arith.constant 8 : index
    %c0_19 = arith.constant 0 : index
    %25 = vector.load %arg0[%c8, %c0_19] : memref<98x64xf32, #tpu.memory_space<vmem>>, vector<82x64xf32>
    %26 = arith.truncf %25 : vector<82x64xf32> to vector<82x64xbf16>
    %c4 = arith.constant 4 : index
    %c0_20 = arith.constant 0 : index
    %c0_21 = arith.constant 0 : index
    %27 = vector.load %arg1[%c4, %c0_20, %c0_21] : memref<9x64x64xbf16, #tpu.memory_space<vmem>>, vector<1x64x64xbf16>
    %28 = vector.shape_cast %27 : vector<1x64x64xbf16> to vector<64x64xbf16>
    %cst_22 = arith.constant dense<0.000000e+00> : vector<82x64xf32>
    %29 = tpu.matmul %26, %28, %cst_22 {dimension_numbers = #tpu.dot_dimension_numbers<[1], [0], [0], [1], [0, 0, 1, 1], [], []>} : vector<82x64xbf16>, vector<64x64xbf16>, vector<82x64xf32> -> vector<82x64xf32>
    %30 = arith.addf %24, %29 : vector<82x64xf32>
    %c9 = arith.constant 9 : index
    %c0_23 = arith.constant 0 : index
    %31 = vector.load %arg0[%c9, %c0_23] : memref<98x64xf32, #tpu.memory_space<vmem>>, vector<82x64xf32>
    %32 = arith.truncf %31 : vector<82x64xf32> to vector<82x64xbf16>
    %c5 = arith.constant 5 : index
    %c0_24 = arith.constant 0 : index
    %c0_25 = arith.constant 0 : index
    %33 = vector.load %arg1[%c5, %c0_24, %c0_25] : memref<9x64x64xbf16, #tpu.memory_space<vmem>>, vector<1x64x64xbf16>
    %34 = vector.shape_cast %33 : vector<1x64x64xbf16> to vector<64x64xbf16>
    %cst_26 = arith.constant dense<0.000000e+00> : vector<82x64xf32>
    %35 = tpu.matmul %32, %34, %cst_26 {dimension_numbers = #tpu.dot_dimension_numbers<[1], [0], [0], [1], [0, 0, 1, 1], [], []>} : vector<82x64xbf16>, vector<64x64xbf16>, vector<82x64xf32> -> vector<82x64xf32>
    %36 = arith.addf %30, %35 : vector<82x64xf32>
    %c14 = arith.constant 14 : index
    %c0_27 = arith.constant 0 : index
    %37 = vector.load %arg0[%c14, %c0_27] : memref<98x64xf32, #tpu.memory_space<vmem>>, vector<82x64xf32>
    %38 = arith.truncf %37 : vector<82x64xf32> to vector<82x64xbf16>
    %c6 = arith.constant 6 : index
    %c0_28 = arith.constant 0 : index
    %c0_29 = arith.constant 0 : index
    %39 = vector.load %arg1[%c6, %c0_28, %c0_29] : memref<9x64x64xbf16, #tpu.memory_space<vmem>>, vector<1x64x64xbf16>
    %40 = vector.shape_cast %39 : vector<1x64x64xbf16> to vector<64x64xbf16>
    %cst_30 = arith.constant dense<0.000000e+00> : vector<82x64xf32>
    %41 = tpu.matmul %38, %40, %cst_30 {dimension_numbers = #tpu.dot_dimension_numbers<[1], [0], [0], [1], [0, 0, 1, 1], [], []>} : vector<82x64xbf16>, vector<64x64xbf16>, vector<82x64xf32> -> vector<82x64xf32>
    %42 = arith.addf %36, %41 : vector<82x64xf32>
    %c15 = arith.constant 15 : index
    %c0_31 = arith.constant 0 : index
    %43 = vector.load %arg0[%c15, %c0_31] : memref<98x64xf32, #tpu.memory_space<vmem>>, vector<82x64xf32>
    %44 = arith.truncf %43 : vector<82x64xf32> to vector<82x64xbf16>
    %c7_32 = arith.constant 7 : index
    %c0_33 = arith.constant 0 : index
    %c0_34 = arith.constant 0 : index
    %45 = vector.load %arg1[%c7_32, %c0_33, %c0_34] : memref<9x64x64xbf16, #tpu.memory_space<vmem>>, vector<1x64x64xbf16>
    %46 = vector.shape_cast %45 : vector<1x64x64xbf16> to vector<64x64xbf16>
    %cst_35 = arith.constant dense<0.000000e+00> : vector<82x64xf32>
    %47 = tpu.matmul %44, %46, %cst_35 {dimension_numbers = #tpu.dot_dimension_numbers<[1], [0], [0], [1], [0, 0, 1, 1], [], []>} : vector<82x64xbf16>, vector<64x64xbf16>, vector<82x64xf32> -> vector<82x64xf32>
    %48 = arith.addf %42, %47 : vector<82x64xf32>
    %c16 = arith.constant 16 : index
    %c0_36 = arith.constant 0 : index
    %49 = vector.load %arg0[%c16, %c0_36] : memref<98x64xf32, #tpu.memory_space<vmem>>, vector<82x64xf32>
    %50 = arith.truncf %49 : vector<82x64xf32> to vector<82x64xbf16>
    %c8_37 = arith.constant 8 : index
    %c0_38 = arith.constant 0 : index
    %c0_39 = arith.constant 0 : index
    %51 = vector.load %arg1[%c8_37, %c0_38, %c0_39] : memref<9x64x64xbf16, #tpu.memory_space<vmem>>, vector<1x64x64xbf16>
    %52 = vector.shape_cast %51 : vector<1x64x64xbf16> to vector<64x64xbf16>
    %cst_40 = arith.constant dense<0.000000e+00> : vector<82x64xf32>
    %53 = tpu.matmul %50, %52, %cst_40 {dimension_numbers = #tpu.dot_dimension_numbers<[1], [0], [0], [1], [0, 0, 1, 1], [], []>} : vector<82x64xbf16>, vector<64x64xbf16>, vector<82x64xf32> -> vector<82x64xf32>
    %54 = arith.addf %48, %53 : vector<82x64xf32>
    %c0_41 = arith.constant 0 : index
    %c0_42 = arith.constant 0 : index
    %55 = vector.load %arg4[%c0_41, %c0_42] : memref<82x1xf32, #tpu.memory_space<vmem>>, vector<82x1xf32>
    %56 = vector.broadcast %55 : vector<82x1xf32> to vector<82x64xf32>
    %57 = arith.mulf %54, %56 : vector<82x64xf32>
    %cst_43 = arith.constant dense<0.000000e+00> : vector<64xf32>
    %58 = vector.multi_reduction <add>, %57, %cst_43 [0] : vector<82x64xf32> to vector<64xf32>
    %59 = vector.shape_cast %58 : vector<64xf32> to vector<1x64xf32>
    %cst_44 = arith.constant 2.000000e-02 : f32
    %60 = vector.broadcast %cst_44 : f32 to vector<1x64xf32>
    %61 = arith.mulf %59, %60 : vector<1x64xf32>
    %62 = vector.broadcast %61 : vector<1x64xf32> to vector<82x64xf32>
    %63 = arith.subf %54, %62 : vector<82x64xf32>
    %64 = arith.mulf %63, %63 : vector<82x64xf32>
    %65 = vector.broadcast %55 : vector<82x1xf32> to vector<82x64xf32>
    %66 = arith.mulf %64, %65 : vector<82x64xf32>
    %cst_45 = arith.constant dense<0.000000e+00> : vector<64xf32>
    %67 = vector.multi_reduction <add>, %66, %cst_45 [0] : vector<82x64xf32> to vector<64xf32>
    %68 = vector.shape_cast %67 : vector<64xf32> to vector<1x64xf32>
    %cst_46 = arith.constant 2.000000e-02 : f32
    %69 = vector.broadcast %cst_46 : f32 to vector<1x64xf32>
    %70 = arith.mulf %68, %69 : vector<1x64xf32>
    %cst_47 = arith.constant 9.99999974E-6 : f32
    %71 = vector.broadcast %cst_47 : f32 to vector<1x64xf32>
    %72 = arith.addf %70, %71 : vector<1x64xf32>
    %73 = math.rsqrt %72 : vector<1x64xf32>
    %74 = vector.broadcast %73 : vector<1x64xf32> to vector<82x64xf32>
    %75 = arith.mulf %63, %74 : vector<82x64xf32>
    %c0_48 = arith.constant 0 : index
    %c0_49 = arith.constant 0 : index
    %76 = vector.load %arg2[%c0_48, %c0_49] : memref<1x64xf32, #tpu.memory_space<vmem>>, vector<1x64xf32>
    %77 = vector.broadcast %76 : vector<1x64xf32> to vector<82x64xf32>
    %78 = arith.mulf %75, %77 : vector<82x64xf32>
    %c0_50 = arith.constant 0 : index
    %c0_51 = arith.constant 0 : index
    %79 = vector.load %arg3[%c0_50, %c0_51] : memref<1x64xf32, #tpu.memory_space<vmem>>, vector<1x64xf32>
    %80 = vector.broadcast %79 : vector<1x64xf32> to vector<82x64xf32>
    %81 = arith.addf %78, %80 : vector<82x64xf32>
    %cst_52 = arith.constant 0.000000e+00 : f32
    %82 = vector.broadcast %cst_52 : f32 to vector<82x64xf32>
    %83 = arith.maximumf %81, %82 : vector<82x64xf32>
    %c0_53 = arith.constant 0 : index
    %c0_54 = arith.constant 0 : index
    %84 = vector.load %arg5[%c0_53, %c0_54] : memref<82x64xf32, #tpu.memory_space<vmem>>, vector<82x64xf32>
    tpu.vector_store %arg5[%c0_53, %c0_54], %83 {strides = array<i32>} : memref<82x64xf32, #tpu.memory_space<vmem>>, vector<82x64xf32>,
    return
  }
}

module attributes {stable_mosaic.version = 11 : i64} {
  func.func @kernel(%arg0: memref<32x64xf32, #tpu.memory_space<vmem>>, %arg1: memref<9x64x64xbf16, #tpu.memory_space<vmem>>, %arg2: memref<1x64xf32, #tpu.memory_space<vmem>>, %arg3: memref<1x64xf32, #tpu.memory_space<vmem>>, %arg4: memref<22x1xf32, #tpu.memory_space<vmem>>, %arg5: memref<22x64xf32, #tpu.memory_space<vmem>>) attributes {dimension_semantics = [], scalar_prefetch = 0 : i64, scratch_operands = 0 : i64, tpu.core_type = #tpu.core_type<tc>} {
    %cst = arith.constant 0.000000e+00 : f32
    %0 = vector.broadcast %cst : f32 to vector<22x64xf32>
    %c0 = arith.constant 0 : index
    %c0_0 = arith.constant 0 : index
    %1 = vector.load %arg0[%c0, %c0_0] : memref<32x64xf32, #tpu.memory_space<vmem>>, vector<22x64xf32>
    %2 = arith.truncf %1 : vector<22x64xf32> to vector<22x64xbf16>
    %c0_1 = arith.constant 0 : index
    %c0_2 = arith.constant 0 : index
    %c0_3 = arith.constant 0 : index
    %3 = vector.load %arg1[%c0_1, %c0_2, %c0_3] : memref<9x64x64xbf16, #tpu.memory_space<vmem>>, vector<1x64x64xbf16>
    %4 = vector.shape_cast %3 : vector<1x64x64xbf16> to vector<64x64xbf16>
    %cst_4 = arith.constant dense<0.000000e+00> : vector<22x64xf32>
    %5 = tpu.matmul %2, %4, %cst_4 {dimension_numbers = #tpu.dot_dimension_numbers<[1], [0], [0], [1], [0, 0, 1, 1], [], []>} : vector<22x64xbf16>, vector<64x64xbf16>, vector<22x64xf32> -> vector<22x64xf32>
    %6 = arith.addf %0, %5 : vector<22x64xf32>
    %c1 = arith.constant 1 : index
    %c0_5 = arith.constant 0 : index
    %7 = vector.load %arg0[%c1, %c0_5] : memref<32x64xf32, #tpu.memory_space<vmem>>, vector<22x64xf32>
    %8 = arith.truncf %7 : vector<22x64xf32> to vector<22x64xbf16>
    %c1_6 = arith.constant 1 : index
    %c0_7 = arith.constant 0 : index
    %c0_8 = arith.constant 0 : index
    %9 = vector.load %arg1[%c1_6, %c0_7, %c0_8] : memref<9x64x64xbf16, #tpu.memory_space<vmem>>, vector<1x64x64xbf16>
    %10 = vector.shape_cast %9 : vector<1x64x64xbf16> to vector<64x64xbf16>
    %cst_9 = arith.constant dense<0.000000e+00> : vector<22x64xf32>
    %11 = tpu.matmul %8, %10, %cst_9 {dimension_numbers = #tpu.dot_dimension_numbers<[1], [0], [0], [1], [0, 0, 1, 1], [], []>} : vector<22x64xbf16>, vector<64x64xbf16>, vector<22x64xf32> -> vector<22x64xf32>
    %12 = arith.addf %6, %11 : vector<22x64xf32>
    %c2 = arith.constant 2 : index
    %c0_10 = arith.constant 0 : index
    %13 = vector.load %arg0[%c2, %c0_10] : memref<32x64xf32, #tpu.memory_space<vmem>>, vector<22x64xf32>
    %14 = arith.truncf %13 : vector<22x64xf32> to vector<22x64xbf16>
    %c2_11 = arith.constant 2 : index
    %c0_12 = arith.constant 0 : index
    %c0_13 = arith.constant 0 : index
    %15 = vector.load %arg1[%c2_11, %c0_12, %c0_13] : memref<9x64x64xbf16, #tpu.memory_space<vmem>>, vector<1x64x64xbf16>
    %16 = vector.shape_cast %15 : vector<1x64x64xbf16> to vector<64x64xbf16>
    %cst_14 = arith.constant dense<0.000000e+00> : vector<22x64xf32>
    %17 = tpu.matmul %14, %16, %cst_14 {dimension_numbers = #tpu.dot_dimension_numbers<[1], [0], [0], [1], [0, 0, 1, 1], [], []>} : vector<22x64xbf16>, vector<64x64xbf16>, vector<22x64xf32> -> vector<22x64xf32>
    %18 = arith.addf %12, %17 : vector<22x64xf32>
    %c4 = arith.constant 4 : index
    %c0_15 = arith.constant 0 : index
    %19 = vector.load %arg0[%c4, %c0_15] : memref<32x64xf32, #tpu.memory_space<vmem>>, vector<22x64xf32>
    %20 = arith.truncf %19 : vector<22x64xf32> to vector<22x64xbf16>
    %c3 = arith.constant 3 : index
    %c0_16 = arith.constant 0 : index
    %c0_17 = arith.constant 0 : index
    %21 = vector.load %arg1[%c3, %c0_16, %c0_17] : memref<9x64x64xbf16, #tpu.memory_space<vmem>>, vector<1x64x64xbf16>
    %22 = vector.shape_cast %21 : vector<1x64x64xbf16> to vector<64x64xbf16>
    %cst_18 = arith.constant dense<0.000000e+00> : vector<22x64xf32>
    %23 = tpu.matmul %20, %22, %cst_18 {dimension_numbers = #tpu.dot_dimension_numbers<[1], [0], [0], [1], [0, 0, 1, 1], [], []>} : vector<22x64xbf16>, vector<64x64xbf16>, vector<22x64xf32> -> vector<22x64xf32>
    %24 = arith.addf %18, %23 : vector<22x64xf32>
    %c5 = arith.constant 5 : index
    %c0_19 = arith.constant 0 : index
    %25 = vector.load %arg0[%c5, %c0_19] : memref<32x64xf32, #tpu.memory_space<vmem>>, vector<22x64xf32>
    %26 = arith.truncf %25 : vector<22x64xf32> to vector<22x64xbf16>
    %c4_20 = arith.constant 4 : index
    %c0_21 = arith.constant 0 : index
    %c0_22 = arith.constant 0 : index
    %27 = vector.load %arg1[%c4_20, %c0_21, %c0_22] : memref<9x64x64xbf16, #tpu.memory_space<vmem>>, vector<1x64x64xbf16>
    %28 = vector.shape_cast %27 : vector<1x64x64xbf16> to vector<64x64xbf16>
    %cst_23 = arith.constant dense<0.000000e+00> : vector<22x64xf32>
    %29 = tpu.matmul %26, %28, %cst_23 {dimension_numbers = #tpu.dot_dimension_numbers<[1], [0], [0], [1], [0, 0, 1, 1], [], []>} : vector<22x64xbf16>, vector<64x64xbf16>, vector<22x64xf32> -> vector<22x64xf32>
    %30 = arith.addf %24, %29 : vector<22x64xf32>
    %c6 = arith.constant 6 : index
    %c0_24 = arith.constant 0 : index
    %31 = vector.load %arg0[%c6, %c0_24] : memref<32x64xf32, #tpu.memory_space<vmem>>, vector<22x64xf32>
    %32 = arith.truncf %31 : vector<22x64xf32> to vector<22x64xbf16>
    %c5_25 = arith.constant 5 : index
    %c0_26 = arith.constant 0 : index
    %c0_27 = arith.constant 0 : index
    %33 = vector.load %arg1[%c5_25, %c0_26, %c0_27] : memref<9x64x64xbf16, #tpu.memory_space<vmem>>, vector<1x64x64xbf16>
    %34 = vector.shape_cast %33 : vector<1x64x64xbf16> to vector<64x64xbf16>
    %cst_28 = arith.constant dense<0.000000e+00> : vector<22x64xf32>
    %35 = tpu.matmul %32, %34, %cst_28 {dimension_numbers = #tpu.dot_dimension_numbers<[1], [0], [0], [1], [0, 0, 1, 1], [], []>} : vector<22x64xbf16>, vector<64x64xbf16>, vector<22x64xf32> -> vector<22x64xf32>
    %36 = arith.addf %30, %35 : vector<22x64xf32>
    %c8 = arith.constant 8 : index
    %c0_29 = arith.constant 0 : index
    %37 = vector.load %arg0[%c8, %c0_29] : memref<32x64xf32, #tpu.memory_space<vmem>>, vector<22x64xf32>
    %38 = arith.truncf %37 : vector<22x64xf32> to vector<22x64xbf16>
    %c6_30 = arith.constant 6 : index
    %c0_31 = arith.constant 0 : index
    %c0_32 = arith.constant 0 : index
    %39 = vector.load %arg1[%c6_30, %c0_31, %c0_32] : memref<9x64x64xbf16, #tpu.memory_space<vmem>>, vector<1x64x64xbf16>
    %40 = vector.shape_cast %39 : vector<1x64x64xbf16> to vector<64x64xbf16>
    %cst_33 = arith.constant dense<0.000000e+00> : vector<22x64xf32>
    %41 = tpu.matmul %38, %40, %cst_33 {dimension_numbers = #tpu.dot_dimension_numbers<[1], [0], [0], [1], [0, 0, 1, 1], [], []>} : vector<22x64xbf16>, vector<64x64xbf16>, vector<22x64xf32> -> vector<22x64xf32>
    %42 = arith.addf %36, %41 : vector<22x64xf32>
    %c9 = arith.constant 9 : index
    %c0_34 = arith.constant 0 : index
    %43 = vector.load %arg0[%c9, %c0_34] : memref<32x64xf32, #tpu.memory_space<vmem>>, vector<22x64xf32>
    %44 = arith.truncf %43 : vector<22x64xf32> to vector<22x64xbf16>
    %c7 = arith.constant 7 : index
    %c0_35 = arith.constant 0 : index
    %c0_36 = arith.constant 0 : index
    %45 = vector.load %arg1[%c7, %c0_35, %c0_36] : memref<9x64x64xbf16, #tpu.memory_space<vmem>>, vector<1x64x64xbf16>
    %46 = vector.shape_cast %45 : vector<1x64x64xbf16> to vector<64x64xbf16>
    %cst_37 = arith.constant dense<0.000000e+00> : vector<22x64xf32>
    %47 = tpu.matmul %44, %46, %cst_37 {dimension_numbers = #tpu.dot_dimension_numbers<[1], [0], [0], [1], [0, 0, 1, 1], [], []>} : vector<22x64xbf16>, vector<64x64xbf16>, vector<22x64xf32> -> vector<22x64xf32>
    %48 = arith.addf %42, %47 : vector<22x64xf32>
    %c10 = arith.constant 10 : index
    %c0_38 = arith.constant 0 : index
    %49 = vector.load %arg0[%c10, %c0_38] : memref<32x64xf32, #tpu.memory_space<vmem>>, vector<22x64xf32>
    %50 = arith.truncf %49 : vector<22x64xf32> to vector<22x64xbf16>
    %c8_39 = arith.constant 8 : index
    %c0_40 = arith.constant 0 : index
    %c0_41 = arith.constant 0 : index
    %51 = vector.load %arg1[%c8_39, %c0_40, %c0_41] : memref<9x64x64xbf16, #tpu.memory_space<vmem>>, vector<1x64x64xbf16>
    %52 = vector.shape_cast %51 : vector<1x64x64xbf16> to vector<64x64xbf16>
    %cst_42 = arith.constant dense<0.000000e+00> : vector<22x64xf32>
    %53 = tpu.matmul %50, %52, %cst_42 {dimension_numbers = #tpu.dot_dimension_numbers<[1], [0], [0], [1], [0, 0, 1, 1], [], []>} : vector<22x64xbf16>, vector<64x64xbf16>, vector<22x64xf32> -> vector<22x64xf32>
    %54 = arith.addf %48, %53 : vector<22x64xf32>
    %c0_43 = arith.constant 0 : index
    %c0_44 = arith.constant 0 : index
    %55 = vector.load %arg4[%c0_43, %c0_44] : memref<22x1xf32, #tpu.memory_space<vmem>>, vector<22x1xf32>
    %56 = vector.broadcast %55 : vector<22x1xf32> to vector<22x64xf32>
    %57 = arith.mulf %54, %56 : vector<22x64xf32>
    %cst_45 = arith.constant dense<0.000000e+00> : vector<64xf32>
    %58 = vector.multi_reduction <add>, %57, %cst_45 [0] : vector<22x64xf32> to vector<64xf32>
    %59 = vector.shape_cast %58 : vector<64xf32> to vector<1x64xf32>
    %cst_46 = arith.constant 1.250000e-01 : f32
    %60 = vector.broadcast %cst_46 : f32 to vector<1x64xf32>
    %61 = arith.mulf %59, %60 : vector<1x64xf32>
    %62 = vector.broadcast %61 : vector<1x64xf32> to vector<22x64xf32>
    %63 = arith.subf %54, %62 : vector<22x64xf32>
    %64 = arith.mulf %63, %63 : vector<22x64xf32>
    %65 = vector.broadcast %55 : vector<22x1xf32> to vector<22x64xf32>
    %66 = arith.mulf %64, %65 : vector<22x64xf32>
    %cst_47 = arith.constant dense<0.000000e+00> : vector<64xf32>
    %67 = vector.multi_reduction <add>, %66, %cst_47 [0] : vector<22x64xf32> to vector<64xf32>
    %68 = vector.shape_cast %67 : vector<64xf32> to vector<1x64xf32>
    %cst_48 = arith.constant 1.250000e-01 : f32
    %69 = vector.broadcast %cst_48 : f32 to vector<1x64xf32>
    %70 = arith.mulf %68, %69 : vector<1x64xf32>
    %cst_49 = arith.constant 9.99999974E-6 : f32
    %71 = vector.broadcast %cst_49 : f32 to vector<1x64xf32>
    %72 = arith.addf %70, %71 : vector<1x64xf32>
    %73 = math.rsqrt %72 : vector<1x64xf32>
    %74 = vector.broadcast %73 : vector<1x64xf32> to vector<22x64xf32>
    %75 = arith.mulf %63, %74 : vector<22x64xf32>
    %c0_50 = arith.constant 0 : index
    %c0_51 = arith.constant 0 : index
    %76 = vector.load %arg2[%c0_50, %c0_51] : memref<1x64xf32, #tpu.memory_space<vmem>>, vector<1x64xf32>
    %77 = vector.broadcast %76 : vector<1x64xf32> to vector<22x64xf32>
    %78 = arith.mulf %75, %77 : vector<22x64xf32>
    %c0_52 = arith.constant 0 : index
    %c0_53 = arith.constant 0 : index
    %79 = vector.load %arg3[%c0_52, %c0_53] : memref<1x64xf32, #tpu.memory_space<vmem>>, vector<1x64xf32>
    %80 = vector.broadcast %79 : vector<1x64xf32> to vector<22x64xf32>
    %81 = arith.addf %78, %80 : vector<22x64xf32>
    %cst_54 = arith.constant 0.000000e+00 : f32
    %82 = vector.broadcast %cst_54 : f32 to vector<22x64xf32>
    %83 = arith.maximumf %81, %82 : vector<22x64xf32>
    %c0_55 = arith.constant 0 : index
    %c0_56 = arith.constant 0 : index
    %84 = vector.load %arg5[%c0_55, %c0_56] : memref<22x64xf32, #tpu.memory_space<vmem>>, vector<22x64xf32>
    tpu.vector_store %arg5[%c0_55, %c0_56], %83 {strides = array<i32>} : memref<22x64xf32, #tpu.memory_space<vmem>>, vector<22x64xf32>,
    return
  }
}

</mosaic_0001>

<bundles_post_ra>
// kernel: cnn_encoder_forward.6
= control target key start
LH: loop header
LB: loop body
LE: loop exit
PB: predicated region body
PF: predicated region fallthrough
CT: control target
= control target key end

     0   :  { %v1283_v1 = vmov 0   ;;  %vm72_vm0 = vcmask 523264   ;;  %vm894_vm1 = vcmask 521216   ;;  %s1557_s1 = inlined_call_operand.vmem [shape: bf16[9,64,64], index: 1, kind: input, shape index: {}]   ;;  %s1558_s0 = inlined_call_operand.vmem [shape: f32[32,64], index: 0, kind: input, shape index: {}]   ;;  %s1559_s4 = inlined_call_operand.vmem [shape: f32[22,1], index: 4, kind: input, shape index: {}]   ;;  %s1560_s2 = inlined_call_operand.vmem [shape: f32[1,64], index: 2, kind: input, shape index: {}]   ;;  %s1561_s3 = inlined_call_operand.vmem [shape: f32[1,64], index: 3, kind: input, shape index: {}]   ;;  %s1562_s5 = inlined_call_operand.vmem [shape: f32[22,64], index: 5, kind: output, shape index: {}]  }
   0x1   :  { %v1245_v0 = vld [vmem:[%s1557_s1 + $0x38] sm:$0xff]   ;;  %1243 = vset.pattern.permute.xlu0 %v1283_v1  ;;  %1244 = vset.pattern.permute.xlu1 %v1283_v1  ;;  %v1247_v3 = vld [vmem:[%s1557_s1 + $0x30] sm:$0xff]   ;;  %v1249_v5 = vld [vmem:[%s1557_s1 + $0x28] sm:$0xff]  }
   0x2   :  { %v1246_v2 = vld [vmem:[%s1557_s1 + $0x18] sm:$0xff]   ;;  %1134 = vmatprep.subr.bf16.mxu0 %v1245_v0  ;;  %v1248_v4 = vld [vmem:[%s1557_s1 + $0x10] sm:$0xff]   ;;  %v1250_v6 = vld [vmem:[%s1557_s1 + $0x8] sm:$0xff]  }
   0x3   :  { %1146 = vmatprep.subr.bf16.mxu1 %v1246_v2  ;;  %1135 = vmatpush3.bf16.msra.mxu0 %v1245_v0  ;;  %v1251_v7 = vld [vmem:[%s1557_s1 + $0x20] sm:$0xff]   ;;  %v1341_v9 = vld [vmem:[%s1558_s0 + $0x9] sm:$0xff]  ;;  %v36_v15 = vld [vmem:[%s1558_s0 + $0x11] sm:$0x3f] }
   0x4   :  { %1147 = vmatpush3.bf16.msra.mxu1 %v1246_v2  ;;  %1136 = vmatprep.subr.bf16.mxu0 %v1247_v3  ;;  %v34_v8 = vld [vmem:[%s1558_s0 + $0x1] sm:$0xff]  ;;  %v23_v16 = vld [vmem:[%s1558_s0 + $0x10] sm:$0x3f]  ;;  %v1253_v17 = vld [vmem:[%s1557_s1 + $0x58] sm:$0xff]   ;;  %v38_v19 = vpack.c.bf16 %v36_v15, %v36_v15 }
   0x5   :  { %1148 = vmatprep.subr.bf16.mxu1 %v1248_v4  ;;  %v21_v10 = vld [vmem:[%s1558_s0] sm:$0xff]  ;;  %v37_v12 = vpack.c.bf16 %v1341_v9, %v34_v8  ;;  %v1353_v13 = vld [vmem:[%s1558_s0 + $0x8] sm:$0xff]  ;;  %v1254_v18 = vld [vmem:[%s1557_s1 + $0x78] sm:$0xff]   ;;  %v25_v20 = vpack.c.bf16 %v23_v16, %v23_v16 }
   0x6   :  { %v1252_v11 = vld [vmem:[%s1557_s1] sm:$0xff]   ;;  %v24_v14 = vpack.c.bf16 %v1353_v13, %v21_v10  ;;  %v1255_v21 = vld [vmem:[%s1557_s1 + $0x50] sm:$0xff]   ;;  %v1257_v26 = vld [vmem:[%s1557_s1 + $0x48] sm:$0xff]  }
   0x7   :  { %1137 = vmatpush3.bf16.msra.mxu0 %v1247_v3  ;;  %1142 = vmatprep.mubr.msk.bf16.mxu0 %vm72_vm0, %v37_v12  ;;  %v1256_v22 = vld [vmem:[%s1557_s1 + $0x70] sm:$0xff]   ;;  %v205_v23 = vld [vmem:[%s1558_s0 + $0x2] sm:$0xff]  ;;  %v1261_v34 = vld [vmem:[%s1557_s1 + $0x98] sm:$0xff]  }
   0x8   :  { %1149 = vmatpush3.bf16.msra.mxu1 %v1248_v4  ;;  %1138 = vmatprep.subr.bf16.mxu0 %v1249_v5  ;;  %v1383_v24 = vld [vmem:[%s1558_s0 + $0xa] sm:$0xff]  ;;  %v1259_v31 = vld [vmem:[%s1557_s1 + $0x40] sm:$0xff]   ;;  %v207_v33 = vld [vmem:[%s1558_s0 + $0x12] sm:$0x3f] }
   0x9   :  { %1150 = vmatprep.subr.bf16.mxu1 %v1250_v6  ;;  %1154 = vmatprep.mubr.msk.bf16.mxu1 %vm72_vm0, %v24_v14  ;;  %v208_v25 = vpack.c.bf16 %v1383_v24, %v205_v23  ;;  %v300_v27 = vld [vmem:[%s1558_s0 + $0x4] sm:$0xff]  ;;  %v301_v28 = vld [vmem:[%s1558_s0 + $0xc] sm:$0xff]  ;;  %v302_v35 = vld [vmem:[%s1558_s0 + $0x14] sm:$0x3f]  ;;  %v209_v37 = vpack.c.bf16 %v207_v33, %v207_v33 }
   0xa   :  { %v1258_v29 = vld [vmem:[%s1557_s1 + $0x68] sm:$0xff]   ;;  %v303_v30 = vpack.c.bf16 %v301_v28, %v300_v27  ;;  %v1260_v32 = vld [vmem:[%s1557_s1 + $0x60] sm:$0xff]   ;;  %v1262_v36 = vld [vmem:[%s1557_s1 + $0xb8] sm:$0xff]   ;;  %v304_v41 = vpack.c.bf16 %v302_v35, %v302_v35 }
   0xb   :  { %1139 = vmatpush3.bf16.msra.mxu0 %v1249_v5  ;;  %v395_v38 = vld [vmem:[%s1558_s0 + $0x5] sm:$0xff]  ;;  %v396_v39 = vld [vmem:[%s1558_s0 + $0xd] sm:$0xff]  ;;  %v397_v51 = vld [vmem:[%s1558_s0 + $0x15] sm:$0x3f] }
   0xc   :  { %1151 = vmatpush3.bf16.msra.mxu1 %v1250_v6  ;;  %1140 = vmatprep.subr.bf16.mxu0 %v1251_v7  ;;  %v490_v40 = vld [vmem:[%s1558_s0 + $0x6] sm:$0xff]  ;;  %v491_v42 = vld [vmem:[%s1558_s0 + $0xe] sm:$0xff]  ;;  %v398_v45 = vpack.c.bf16 %v396_v39, %v395_v38  ;;  %v1269_v52 = vld [vmem:[%s1557_s1 + $0xd8] sm:$0xff]   ;;  %v399_v57 = vpack.c.bf16 %v397_v51, %v397_v51 }
   0xd   :  { %1152 = vmatprep.subr.bf16.mxu1 %v1252_v11  ;;  %v1263_v43 = vld [vmem:[%s1557_s1 + $0x90] sm:$0xff]   ;;  %v493_v46 = vpack.c.bf16 %v491_v42, %v490_v40  ;;  %v1265_v47 = vld [vmem:[%s1557_s1 + $0x88] sm:$0xff]   ;;  %v1267_v49 = vld [vmem:[%s1557_s1 + $0x80] sm:$0xff]  }
   0xe   :  { %v1264_v44 = vld [vmem:[%s1557_s1 + $0xb0] sm:$0xff]   ;;  %v1266_v48 = vld [vmem:[%s1557_s1 + $0xa8] sm:$0xff]   ;;  %v1268_v50 = vld [vmem:[%s1557_s1 + $0xa0] sm:$0xff]  }
   0xf   :  { %1141 = vmatpush3.bf16.msra.mxu0 %v1251_v7  ;;  %v492_v53 = vld [vmem:[%s1558_s0 + $0x16] sm:$0x3f]  ;;  %v870_v54 = vld [vmem:[%s1559_s4] sm:$0xff]  ;;  %v872_v55 = vld [vmem:[%s1559_s4 + $0x10] sm:$0x3f] }
  0x10   :  { %1153 = vmatpush3.bf16.msra.mxu1 %v1252_v11  ;;  %1158 = vmatprep.subr.bf16.mxu0 %v1253_v17  ;;  %v1270_v56 = vld [vmem:[%s1557_s1 + $0xf8] sm:$0xff]   ;;  %v586_v58 = vld [vmem:[%s1558_s0 + $0x10] sm:$0xff]  ;;  %v871_v59 = vld [vmem:[%s1559_s4 + $0x8] sm:$0xff]  ;;  %v494_v60 = vpack.c.bf16 %v492_v53, %v492_v53 }
  0x11   :  { %1170 = vmatprep.subr.bf16.mxu1 %v1254_v18  ;;  %875 = vperm.xlu0 %1243, %v870_v54   ;;  %v681_v61 = vld [vmem:[%s1558_s0 + $0x11] sm:$0xff]  ;;  %v588_v0 = vpack.c.bf16 %v586_v58, %v1353_v13  ;;  %v1273_v2 = vld [vmem:[%s1557_s1 + $0xc8] sm:$0xff]   ;;  %v1275_v4 = vld [vmem:[%s1557_s1 + $0xc0] sm:$0xff]  }
  0x12   :  { %1143 = vmatmul.mubr.msk.bf16.vlgmr.msra.gmra.mxu0 %vm72_vm0, %v38_v19  ;;  %885 = vperm.xlu1 %1244, %v872_v55   ;;  %v1271_v62 = vld [vmem:[%s1557_s1 + $0xd0] sm:$0xff]   ;;  %v683_v1 = vpack.c.bf16 %v681_v61, %v1341_v9  ;;  %v1274_v3 = vld [vmem:[%s1557_s1 + $0xe8] sm:$0xff]   ;;  %v1276_v5 = vld [vmem:[%s1557_s1 + $0xe0] sm:$0xff]  }
  0x13   :  { %1155 = vmatmul.mubr.msk.bf16.vlgmr.msra.gmra.mxu1 %vm72_vm0, %v25_v20  ;;  %1159 = vmatpush3.bf16.msra.mxu0 %v1253_v17  ;;  %v1272_v63 = vld [vmem:[%s1557_s1 + $0xf0] sm:$0xff]   ;;  %v587_v6 = vld [vmem:[%s1558_s0 + $0x18] sm:$0x3f]  ;;  %v1279_v14 = vld [vmem:[%s1557_s1 + $0x108] sm:$0xff]  }
  0x14   :  { %1171 = vmatpush3.bf16.msra.mxu1 %v1254_v18  ;;  %1160 = vmatprep.subr.bf16.mxu0 %v1255_v21  ;;  %v1277_v7 = vld [vmem:[%s1557_s1 + $0x118] sm:$0xff]   ;;  %v589_v10 = vpack.c.bf16 %v587_v6, %v587_v6  ;;  %v1278_v12 = vld [vmem:[%s1557_s1 + $0x110] sm:$0xff]   ;;  %v1280_v15 = vld [vmem:[%s1557_s1 + $0x100] sm:$0xff]  }
  0x15   :  { %1172 = vmatprep.subr.bf16.mxu1 %v1256_v22  ;;  %1166 = vmatprep.mubr.msk.bf16.mxu0 %vm72_vm0, %v208_v25  ;;  %v682_v8 = vld [vmem:[%s1558_s0 + $0x19] sm:$0x3f] }
  0x16   :  { %1178 = vmatprep.mubr.msk.bf16.mxu1 %vm72_vm0, %v303_v30  ;;  %880 = vperm.xlu0 %1243, %v871_v59   ;;  %v776_v9 = vld [vmem:[%s1558_s0 + $0x12] sm:$0xff]  ;;  %v684_v11 = vpack.c.bf16 %v682_v8, %v682_v8  ;;  %v777_v16 = vld [vmem:[%s1558_s0 + $0x1a] sm:$0x3f] }
  0x17   :  { %1161 = vmatpush3.bf16.msra.mxu0 %v1255_v21  ;;  %v778_v13 = vpack.c.bf16 %v776_v9, %v1383_v24  ;;  %v779_v17 = vpack.c.bf16 %v777_v16, %v777_v16 }
  0x18   :  { %1173 = vmatpush3.bf16.msra.mxu1 %v1256_v22  ;;  %1162 = vmatprep.subr.bf16.mxu0 %v1257_v26 }
  0x19   :  { %1174 = vmatprep.subr.bf16.mxu1 %v1258_v29 }
  0x1b   :  { %1163 = vmatpush3.bf16.msra.mxu0 %v1257_v26 }
  0x1c   :  { %1175 = vmatpush3.bf16.msra.mxu1 %v1258_v29  ;;  %1164 = vmatprep.subr.bf16.mxu0 %v1259_v31 }
  0x1d   :  { %1176 = vmatprep.subr.bf16.mxu1 %v1260_v32 }
  0x1f   :  { %1165 = vmatpush3.bf16.msra.mxu0 %v1259_v31 }
  0x20   :  { %1177 = vmatpush3.bf16.msra.mxu1 %v1260_v32  ;;  %1182 = vmatprep.subr.bf16.mxu0 %v1261_v34 }
  0x21   :  { %1194 = vmatprep.subr.bf16.mxu1 %v1262_v36 }
  0x22   :  { %1167 = vmatmul.mubr.msk.bf16.vlgmr.msra.gmra.mxu0 %vm72_vm0, %v209_v37 }
  0x23   :  { %1183 = vmatpush3.bf16.msra.mxu0 %v1261_v34  ;;  %1179 = vmatmul.mubr.msk.bf16.vlgmr.msra.gmra.mxu1 %vm72_vm0, %v304_v41 }
  0x24   :  { %1195 = vmatpush3.bf16.msra.mxu1 %v1262_v36  ;;  %1184 = vmatprep.subr.bf16.mxu0 %v1263_v43 }
  0x25   :  { %1196 = vmatprep.subr.bf16.mxu1 %v1264_v44  ;;  %1190 = vmatprep.mubr.msk.bf16.mxu0 %vm72_vm0, %v398_v45 }
  0x26   :  { %1202 = vmatprep.mubr.msk.bf16.mxu1 %vm72_vm0, %v493_v46 }
  0x27   :  { %1185 = vmatpush3.bf16.msra.mxu0 %v1263_v43 }
  0x28   :  { %1197 = vmatpush3.bf16.msra.mxu1 %v1264_v44  ;;  %1186 = vmatprep.subr.bf16.mxu0 %v1265_v47 }
  0x29   :  { %1198 = vmatprep.subr.bf16.mxu1 %v1266_v48 }
  0x2b   :  { %1187 = vmatpush3.bf16.msra.mxu0 %v1265_v47 }
  0x2c   :  { %1199 = vmatpush3.bf16.msra.mxu1 %v1266_v48  ;;  %1188 = vmatprep.subr.bf16.mxu0 %v1267_v49 }
  0x2d   :  { %1200 = vmatprep.subr.bf16.mxu1 %v1268_v50 }
  0x2f   :  { %1189 = vmatpush3.bf16.msra.mxu0 %v1267_v49 }
  0x30   :  { %1201 = vmatpush3.bf16.msra.mxu1 %v1268_v50  ;;  %1206 = vmatprep.subr.bf16.mxu0 %v1269_v52 }
  0x31   :  { %1218 = vmatprep.subr.bf16.mxu1 %v1270_v56 }
  0x32   :  { %1191 = vmatmul.mubr.msk.bf16.vlgmr.msra.gmra.mxu0 %vm72_vm0, %v399_v57 }
  0x33   :  { %1207 = vmatpush3.bf16.msra.mxu0 %v1269_v52  ;;  %1203 = vmatmul.mubr.msk.bf16.vlgmr.msra.gmra.mxu1 %vm72_vm0, %v494_v60 }
  0x34   :  { %1219 = vmatpush3.bf16.msra.mxu1 %v1270_v56  ;;  %1208 = vmatprep.subr.bf16.mxu0 %v1271_v62 }
  0x35   :  { %1220 = vmatprep.subr.bf16.mxu1 %v1272_v63  ;;  %1214 = vmatprep.mubr.msk.bf16.mxu0 %vm72_vm0, %v588_v0 }
  0x36   :  { %1226 = vmatprep.mubr.msk.bf16.mxu1 %vm72_vm0, %v683_v1 }
  0x37   :  { %1209 = vmatpush3.bf16.msra.mxu0 %v1271_v62 }
  0x38   :  { %1221 = vmatpush3.bf16.msra.mxu1 %v1272_v63  ;;  %1210 = vmatprep.subr.bf16.mxu0 %v1273_v2 }
  0x39   :  { %1222 = vmatprep.subr.bf16.mxu1 %v1274_v3 }
  0x3b   :  { %1211 = vmatpush3.bf16.msra.mxu0 %v1273_v2 }
  0x3c   :  { %1223 = vmatpush3.bf16.msra.mxu1 %v1274_v3  ;;  %1212 = vmatprep.subr.bf16.mxu0 %v1275_v4 }
  0x3d   :  { %1224 = vmatprep.subr.bf16.mxu1 %v1276_v5 }
  0x3f   :  { %1213 = vmatpush3.bf16.msra.mxu0 %v1275_v4 }
  0x40   :  { %1225 = vmatpush3.bf16.msra.mxu1 %v1276_v5  ;;  %1230 = vmatprep.subr.bf16.mxu0 %v1277_v7 }
  0x42   :  { %1215 = vmatmul.mubr.msk.bf16.vlgmr.msra.gmra.mxu0 %vm72_vm0, %v589_v10 }
  0x43   :  { %1231 = vmatpush3.bf16.msra.mxu0 %v1277_v7  ;;  %1227 = vmatmul.mubr.msk.bf16.vlgmr.msra.gmra.mxu1 %vm72_vm0, %v684_v11 }
  0x44   :  { %1232 = vmatprep.subr.bf16.mxu0 %v1278_v12  ;;  %1238 = vmatprep.mubr.msk.bf16.mxu0 %vm72_vm0, %v778_v13 }
  0x47   :  { %1233 = vmatpush3.bf16.msra.mxu0 %v1278_v12 }
  0x48   :  { %1234 = vmatprep.subr.bf16.mxu0 %v1279_v14 }
  0x4b   :  { %1235 = vmatpush3.bf16.msra.mxu0 %v1279_v14 }
  0x4c   :  { %1236 = vmatprep.subr.bf16.mxu0 %v1280_v15 }
  0x4f   :  { %1237 = vmatpush3.bf16.msra.mxu0 %v1280_v15 }
  0x52   :  { %1239 = vmatmul.mubr.msk.bf16.vlgmr.msra.gmra.mxu0 %vm72_vm0, %v779_v17 }
  0x8c   :  { %v876_v5 = vpop.permute.xlu0 %875 }
  0x8d   :  { %v886_v13 = vpop.permute.xlu1 %885 }
  0x91   :  { %v881_v17 = vpop.permute.xlu0 %880 }
  0xd2   :  { %v1144_v18 = vpop.f32.mrf.mxu0 }
  0xd3   :  { %v1156_v19 = vpop.f32.mrf.mxu1 }
  0xd4   :  { %v113_v20 = vpop.f32.mrf.mxu0  ;;  %v200_v44 = vadd.f32 %v1156_v19, %v1144_v18 }
  0xd5   :  { %v191_v21 = vpop.f32.mrf.mxu1 }
  0xd6   :  { %v1145_v22 = vpop.f32.mrf.mxu0  ;;  %v192_v41 = vadd.f32 %v191_v21, %v113_v20 }
  0xd7   :  { %v1157_v23 = vpop.f32.mrf.mxu1 }
  0xd8   :  { %v116_v24 = vpop.f32.mrf.mxu0 }
  0xd9   :  { %v194_v25 = vpop.f32.mrf.mxu1 }
  0xda   :  { %v195_v48 = vadd.f32 %v194_v25, %v116_v24 }
  0xe2   :  { %v1168_v26 = vpop.f32.mrf.mxu0 }
  0xe3   :  { %v1180_v27 = vpop.f32.mrf.mxu1  ;;  %v299_v49 = vadd.f32 %v1168_v26, %v200_v44 }
  0xe4   :  { %v283_v28 = vpop.f32.mrf.mxu0 }
  0xe5   :  { %v378_v29 = vpop.f32.mrf.mxu1  ;;  %v297_v45 = vadd.f32 %v283_v28, %v192_v41  ;;  %v394_v55 = vadd.f32 %v1180_v27, %v299_v49 }
  0xe6   :  { %v1169_v30 = vpop.f32.mrf.mxu0 }
  0xe7   :  { %v1181_v31 = vpop.f32.mrf.mxu1  ;;  %v392_v52 = vadd.f32 %v378_v29, %v297_v45 }
  0xe8   :  { %v286_v32 = vpop.f32.mrf.mxu0 }
  0xe9   :  { %v381_v33 = vpop.f32.mrf.mxu1  ;;  %v298_v53 = vadd.f32 %v286_v32, %v195_v48 }
  0xeb   :  { %v393_v57 = vadd.f32 %v381_v33, %v298_v53 }
  0xf2   :  { %v1192_v34 = vpop.f32.mrf.mxu0 }
  0xf3   :  { %v1204_v35 = vpop.f32.mrf.mxu1  ;;  %v489_v58 = vadd.f32 %v1192_v34, %v394_v55  ;;  %v1078_v55 = vld [vmem:[%s1560_s2] ss:$0 sm:$0xff] }
  0xf4   :  { %v473_v36 = vpop.f32.mrf.mxu0 }
  0xf5   :  { %v568_v37 = vpop.f32.mrf.mxu1  ;;  %v487_v56 = vadd.f32 %v473_v36, %v392_v52  ;;  %v584_v61 = vadd.f32 %v1204_v35, %v489_v58 }
  0xf6   :  { %v1193_v38 = vpop.f32.mrf.mxu0 }
  0xf7   :  { %v1205_v39 = vpop.f32.mrf.mxu1  ;;  %v582_v59 = vadd.f32 %v568_v37, %v487_v56 }
  0xf8   :  { %v476_v40 = vpop.f32.mrf.mxu0 }
  0xf9   :  { %v571_v42 = vpop.f32.mrf.mxu1  ;;  %v488_v60 = vadd.f32 %v476_v40, %v393_v57 }
  0xfb   :  { %v583_v0 = vadd.f32 %v571_v42, %v488_v60 }
 0x102   :  { %v1216_v43 = vpop.f32.mrf.mxu0 }
 0x103   :  { %v1228_v46 = vpop.f32.mrf.mxu1  ;;  %v679_v1 = vadd.f32 %v1216_v43, %v584_v61 }
 0x104   :  { %v663_v47 = vpop.f32.mrf.mxu0 }
 0x105   :  { %v758_v50 = vpop.f32.mrf.mxu1  ;;  %v677_v62 = vadd.f32 %v663_v47, %v582_v59  ;;  %v774_v8 = vadd.f32 %v1228_v46, %v679_v1  ;;  %v1079_v59 = vld [vmem:[%s1561_s3] ss:$0 sm:$0xff] }
 0x106   :  { %v1217_v51 = vpop.f32.mrf.mxu0 }
 0x107   :  { %v1229_v54 = vpop.f32.mrf.mxu1  ;;  %v772_v3 = vadd.f32 %v758_v50, %v677_v62 }
 0x108   :  { %v666_v63 = vpop.f32.mrf.mxu0 }
 0x109   :  { %v678_v4 = vadd.f32 %v666_v63, %v583_v0  ;;  %v761_v6 = vpop.f32.mrf.mxu1 }
 0x10b   :  { %v773_v11 = vadd.f32 %v761_v6, %v678_v4 }
 0x112   :  { %v1240_v2 = vpop.f32.mrf.mxu0 }
 0x113   :  { %v869_v12 = vadd.f32 %v1240_v2, %v774_v8 }
 0x114   :  { %v853_v7 = vpop.f32.mrf.mxu0 }
 0x115   :  { %v867_v9 = vadd.f32 %v853_v7, %v772_v3  ;;  %v890_v18 = vmul.f32 %v886_v13, %v869_v12 }
 0x116   :  { %v1241_v10 = vpop.f32.mrf.mxu0 }
 0x117   :  { %v888_v15 = vmul.f32 %v876_v5, %v867_v9  ;;  %v895_v23 = vsel %vm894_vm1, %v890_v18, 0.0 }
 0x118   :  { %v856_v14 = vpop.f32.mrf.mxu0 }
 0x119   :  { %v868_v16 = vadd.f32 %v856_v14, %v773_v11  ;;  %v891_v20 = vsel %vm72_vm0, %v888_v15, 0.0 }
 0x11b   :  { %v889_v19 = vmul.f32 %v881_v17, %v868_v16 }
 0x11d   :  { %v892_v21 = vsel %vm72_vm0, %v889_v19, 0.0 }
 0x11e   :  { %v893_v22 = vadd.f32 %v892_v21, %v891_v20 }
 0x120   :  { %v896_v24 = vadd.f32 %v895_v23, %v893_v22 }
 0x122   :  { %v897_v25 = vrot.slane %v896_v24, 4 }
 0x124   :  { %v898_v26 = vadd.f32 %v897_v25, %v896_v24 }
 0x126   :  { %v899_v27 = vrot.slane %v898_v26, 2 }
 0x128   :  { %v900_v28 = vadd.f32 %v899_v27, %v898_v26 }
 0x12a   :  { %v901_v29 = vrot.slane %v900_v28, 1 }
 0x12c   :  { %v902_v30 = vadd.f32 %v901_v29, %v900_v28 }
 0x12e   :  { %v903_v31 = vmul.f32 0.125, %v902_v30 }
 0x130   :  { %v904_v32 = vsub.f32 %v867_v9, %v903_v31  ;;  %v905_v33 = vsub.f32 %v868_v16, %v903_v31  ;;  %v906_v34 = vsub.f32 %v869_v12, %v903_v31 }
 0x132   :  { %v907_v35 = vmul.f32 %v904_v32, %v904_v32  ;;  %v908_v36 = vmul.f32 %v905_v33, %v905_v33  ;;  %v909_v37 = vmul.f32 %v906_v34, %v906_v34 }
 0x134   :  { %v910_v38 = vmul.f32 %v907_v35, %v876_v5  ;;  %v911_v39 = vmul.f32 %v908_v36, %v881_v17  ;;  %v912_v40 = vmul.f32 %v909_v37, %v886_v13 }
 0x136   :  { %v913_v41 = vsel %vm72_vm0, %v910_v38, 0.0  ;;  %v914_v42 = vsel %vm72_vm0, %v911_v39, 0.0  ;;  %v916_v44 = vsel %vm894_vm1, %v912_v40, 0.0 }
 0x137   :  { %v915_v43 = vadd.f32 %v914_v42, %v913_v41 }
 0x139   :  { %v917_v45 = vadd.f32 %v916_v44, %v915_v43 }
 0x13b   :  { %v918_v46 = vrot.slane %v917_v45, 4 }
 0x13d   :  { %v919_v47 = vadd.f32 %v918_v46, %v917_v45 }
 0x13f   :  { %v920_v48 = vrot.slane %v919_v47, 2 }
 0x141   :  { %v921_v49 = vadd.f32 %v920_v48, %v919_v47 }
 0x143   :  { %v922_v50 = vrot.slane %v921_v49, 1 }
 0x145   :  { %v923_v51 = vadd.f32 %v922_v50, %v921_v49 }
 0x147   :  { %v924_v52 = vmul.f32 0.125, %v923_v51 }
 0x149   :  { %v925_v53 = vadd.f32 1e-05, %v924_v52 }
 0x14b   :  { %1281 = vrsqrt.f32 %v925_v53 }
 0x158   :  { %v1282_v54 = vpop.eup %1281 }
 0x159   :  { %v927_v56 = vmul.f32 %v1282_v54, %v904_v32  ;;  %v928_v57 = vmul.f32 %v1282_v54, %v905_v33  ;;  %v929_v58 = vmul.f32 %v1282_v54, %v906_v34 }
 0x15b   :  { %v937_v60 = vmul.f32 %v1078_v55, %v927_v56  ;;  %v938_v61 = vmul.f32 %v1078_v55, %v928_v57  ;;  %v939_v62 = vmul.f32 %v1078_v55, %v929_v58 }
 0x15d   :  { %v947_v63 = vadd.f32 %v1079_v59, %v937_v60  ;;  %v948_v0 = vadd.f32 %v1079_v59, %v938_v61  ;;  %v949_v1 = vadd.f32 %v1079_v59, %v939_v62 }
 0x15f   :  { %v950_v2 = vmax.f32 %v947_v63, 0.0  ;;  %v951_v3 = vmax.f32 %v948_v0, 0.0  ;;  %v952_v4 = vmax.f32 %v949_v1, 0.0 }
 0x161   :  { %953 = vst.msk [vmem:[%s1562_s5] sm:$0xff] %vm72_vm0, %v950_v2  ;;  %954 = vst.msk [vmem:[%s1562_s5 + $0x8] sm:$0xff] %vm72_vm0, %v951_v3 }
 0x162   :  { %955 = vst.msk [vmem:[%s1562_s5 + $0x10] sm:$0x3f] %vm894_vm1, %v952_v4 }

// kernel: cnn_encoder_forward.5
= control target key start
LH: loop header
LB: loop body
LE: loop exit
PB: predicated region body
PF: predicated region fallthrough
CT: control target
= control target key end

     0   :  { %v2147_v1 = vmov 0   ;;  %vm96_vm0 = vcmask 523264   ;;  %vm1526_vm1 = vcmask 517120   ;;  %s2980_s1 = inlined_call_operand.vmem [shape: bf16[9,64,64], index: 1, kind: input, shape index: {}]   ;;  %s2981_s0 = inlined_call_operand.vmem [shape: f32[98,64], index: 0, kind: input, shape index: {}]   ;;  %s2982_s4 = inlined_call_operand.vmem [shape: f32[82,1], index: 4, kind: input, shape index: {}]   ;;  %s2983_s2 = inlined_call_operand.vmem [shape: f32[1,64], index: 2, kind: input, shape index: {}]   ;;  %s2984_s3 = inlined_call_operand.vmem [shape: f32[1,64], index: 3, kind: input, shape index: {}]   ;;  %s2985_s5 = inlined_call_operand.vmem [shape: f32[82,64], index: 5, kind: output, shape index: {}]  }
   0x1   :  { %v2109_v0 = vld [vmem:[%s2980_s1 + $0x38] sm:$0xff]   ;;  %2107 = vset.pattern.permute.xlu0 %v2147_v1  ;;  %2108 = vset.pattern.permute.xlu1 %v2147_v1  ;;  %v2110_v2 = vld [vmem:[%s2980_s1 + $0x30] sm:$0xff]   ;;  %v2111_v3 = vld [vmem:[%s2980_s1 + $0x28] sm:$0xff]  }
   0x2   :  { %1918 = vmatprep.subr.bf16.mxu0 %v2109_v0  ;;  %2098 = vmatprep.subr.bf16.mxu1 %v2109_v0  ;;  %v46_v4 = vld [vmem:[%s2981_s0 + $0x1] sm:$0xff]  ;;  %v2193_v5 = vld [vmem:[%s2981_s0 + $0x9] sm:$0xff]  ;;  %v2216_v11 = vld [vmem:[%s2981_s0 + $0x11] sm:$0xff] }
   0x3   :  { %1919 = vmatpush3.bf16.msra.mxu0 %v2109_v0  ;;  %2102 = vmatpush3.bf16.msra.mxu1 %v2109_v0  ;;  %v2198_v6 = vld [vmem:[%s2981_s0 + $0x41] sm:$0xff]  ;;  %v57_v7 = vpack.c.bf16 %v2193_v5, %v46_v4  ;;  %v2204_v8 = vld [vmem:[%s2981_s0 + $0x49] sm:$0xff]  ;;  %v2221_v12 = vld [vmem:[%s2981_s0 + $0x19] sm:$0xff] }
   0x4   :  { %1920 = vmatprep.subr.bf16.mxu0 %v2110_v2  ;;  %2099 = vmatprep.subr.bf16.mxu1 %v2110_v2  ;;  %v61_v9 = vpack.c.bf16 %v2204_v8, %v2198_v6  ;;  %v2112_v10 = vld [vmem:[%s2980_s1 + $0x20] sm:$0xff]   ;;  %v56_v13 = vld [vmem:[%s2981_s0 + $0x51] sm:$0x3]  ;;  %v2113_v14 = vld [vmem:[%s2980_s1 + $0x18] sm:$0xff]   ;;  %v58_v19 = vpack.c.bf16 %v2221_v12, %v2216_v11 }
   0x5   :  { %1926 = vmatprep.mubr.msk.bf16.mxu0 %vm96_vm0, %v57_v7  ;;  %v2232_v15 = vld [vmem:[%s2981_s0 + $0x39] sm:$0xff]  ;;  %v2242_v18 = vld [vmem:[%s2981_s0 + $0x21] sm:$0xff]  ;;  %v62_v20 = vpack.c.bf16 %v56_v13, %v56_v13  ;;  %v2249_v21 = vld [vmem:[%s2981_s0 + $0x29] sm:$0xff] }
   0x6   :  { %1934 = vmatprep.mubr.msk.bf16.mxu1 %vm96_vm0, %v61_v9  ;;  %v2114_v16 = vld [vmem:[%s2980_s1 + $0x58] sm:$0xff]   ;;  %v808_v17 = vpack.c.bf16 %v2198_v6, %v2232_v15  ;;  %v21_v22 = vld [vmem:[%s2981_s0] sm:$0xff]  ;;  %v2115_v23 = vld [vmem:[%s2980_s1 + $0x10] sm:$0xff]   ;;  %v59_v26 = vpack.c.bf16 %v2249_v21, %v2242_v18 }
   0x7   :  { %1921 = vmatpush3.bf16.msra.mxu0 %v2110_v2  ;;  %2103 = vmatpush3.bf16.msra.mxu1 %v2110_v2  ;;  %v2116_v24 = vld [vmem:[%s2980_s1 + $0x50] sm:$0xff]   ;;  %v2263_v25 = vld [vmem:[%s2981_s0 + $0x8] sm:$0xff]  ;;  %v2119_v34 = vld [vmem:[%s2980_s1] sm:$0xff]  }
   0x8   :  { %1922 = vmatprep.subr.bf16.mxu0 %v2111_v3  ;;  %2100 = vmatprep.subr.bf16.mxu1 %v2111_v3  ;;  %v32_v27 = vpack.c.bf16 %v2263_v25, %v21_v22  ;;  %v2273_v28 = vld [vmem:[%s2981_s0 + $0x31] sm:$0xff]  ;;  %v2117_v29 = vld [vmem:[%s2980_s1 + $0x8] sm:$0xff]   ;;  %v2120_v35 = vld [vmem:[%s2980_s1 + $0x40] sm:$0xff]  }
   0x9   :  { %v2118_v30 = vld [vmem:[%s2980_s1 + $0x48] sm:$0xff]   ;;  %v60_v31 = vpack.c.bf16 %v2232_v15, %v2273_v28  ;;  %v2300_v37 = vld [vmem:[%s2981_s0 + $0x10] sm:$0xff]  ;;  %v2306_v38 = vld [vmem:[%s2981_s0 + $0x18] sm:$0xff] }
   0xa   :  { %v317_v32 = vld [vmem:[%s2981_s0 + $0x2] sm:$0xff]  ;;  %v318_v33 = vld [vmem:[%s2981_s0 + $0xa] sm:$0xff]  ;;  %v319_v39 = vld [vmem:[%s2981_s0 + $0x12] sm:$0xff]  ;;  %v2336_v46 = vpack.c.bf16 %v2306_v38, %v2300_v37 }
   0xb   :  { %1923 = vmatpush3.bf16.msra.mxu0 %v2111_v3  ;;  %2104 = vmatpush3.bf16.msra.mxu1 %v2111_v3  ;;  %v328_v36 = vpack.c.bf16 %v318_v33, %v317_v32  ;;  %v320_v40 = vld [vmem:[%s2981_s0 + $0x1a] sm:$0xff]  ;;  %v2328_v44 = vld [vmem:[%s2981_s0 + $0x28] sm:$0xff]  ;;  %v2123_v49 = vld [vmem:[%s2980_s1 + $0x70] sm:$0xff]  }
   0xc   :  { %1924 = vmatprep.subr.bf16.mxu0 %v2112_v10  ;;  %2101 = vmatprep.subr.bf16.mxu1 %v2112_v10  ;;  %v2121_v41 = vld [vmem:[%s2980_s1 + $0x78] sm:$0xff]   ;;  %v2323_v43 = vld [vmem:[%s2981_s0 + $0x20] sm:$0xff]  ;;  %v329_v47 = vpack.c.bf16 %v320_v40, %v319_v39  ;;  %v322_v48 = vld [vmem:[%s2981_s0 + $0x2a] sm:$0xff] }
   0xd   :  { %v2122_v42 = vld [vmem:[%s2980_s1 + $0x98] sm:$0xff]   ;;  %v321_v45 = vld [vmem:[%s2981_s0 + $0x22] sm:$0xff]  ;;  %v2346_v50 = vpack.c.bf16 %v2328_v44, %v2323_v43  ;;  %v2351_v52 = vld [vmem:[%s2981_s0 + $0x30] sm:$0xff]  ;;  %v647_v32 = vpack.c.bf16 %v2323_v43, %v2306_v38 }
   0xe   :  { %v330_v51 = vpack.c.bf16 %v322_v48, %v321_v45  ;;  %v2356_v53 = vld [vmem:[%s2981_s0 + $0x38] sm:$0xff]  ;;  %v2124_v55 = vld [vmem:[%s2980_s1 + $0x90] sm:$0xff]   ;;  %v2125_v57 = vld [vmem:[%s2980_s1 + $0x68] sm:$0xff]  }
   0xf   :  { %1925 = vmatpush3.bf16.msra.mxu0 %v2112_v10  ;;  %2105 = vmatpush3.bf16.msra.mxu1 %v2112_v10  ;;  %v323_v54 = vld [vmem:[%s2981_s0 + $0x32] sm:$0xff]  ;;  %v324_v56 = vld [vmem:[%s2981_s0 + $0x3a] sm:$0xff]  ;;  %v2126_v58 = vld [vmem:[%s2980_s1 + $0x88] sm:$0xff]   ;;  %v2397_v63 = vpack.c.bf16 %v2356_v53, %v2351_v52 }
  0x10   :  { %1938 = vmatprep.subr.bf16.mxu1 %v2113_v14  ;;  %1958 = vmatprep.subr.bf16.mxu0 %v2114_v16  ;;  %v2379_v59 = vld [vmem:[%s2981_s0 + $0x40] sm:$0xff]  ;;  %v2386_v60 = vld [vmem:[%s2981_s0 + $0x48] sm:$0xff]  ;;  %v331_v0 = vpack.c.bf16 %v324_v56, %v323_v54  ;;  %v31_v7 = vld [vmem:[%s2981_s0 + $0x50] sm:$0x3] }
  0x11   :  { %v325_v61 = vld [vmem:[%s2981_s0 + $0x42] sm:$0xff]  ;;  %v326_v62 = vld [vmem:[%s2981_s0 + $0x4a] sm:$0xff]  ;;  %v2401_v1 = vpack.c.bf16 %v2386_v60, %v2379_v59  ;;  %v327_v9 = vld [vmem:[%s2981_s0 + $0x52] sm:$0x3]  ;;  %v649_v48 = vpack.c.bf16 %v2379_v59, %v2356_v53 }
  0x12   :  { %1927 = vmatmul.mubr.msk.bf16.vlgmr.msra.gmra.mxu0 %vm96_vm0, %v58_v19  ;;  %1935 = vmatmul.mubr.msk.bf16.vlgmr.msra.gmra.mxu1 %vm96_vm0, %v62_v20  ;;  %v332_v2 = vpack.c.bf16 %v326_v62, %v325_v61  ;;  %v2127_v3 = vld [vmem:[%s2980_s1 + $0x60] sm:$0xff]   ;;  %v2427_v13 = vld [vmem:[%s2981_s0 + $0xf] sm:$0xff]  ;;  %v37_v19 = vpack.c.bf16 %v31_v7, %v31_v7  ;;  %v333_v20 = vpack.c.bf16 %v327_v9, %v327_v9  ;;  %v486_v54 = vld [vmem:[%s2981_s0 + $0x57] sm:$0x3] }
  0x13   :  { %1939 = vmatpush3.bf16.msra.mxu1 %v2113_v14  ;;  %1959 = vmatpush3.bf16.msra.mxu0 %v2114_v16  ;;  %v2128_v4 = vld [vmem:[%s2980_s1 + $0x80] sm:$0xff]   ;;  %v2129_v14 = vld [vmem:[%s2980_s1 + $0xb8] sm:$0xff]   ;;  %v2131_v33 = vld [vmem:[%s2980_s1 + $0xb0] sm:$0xff]   ;;  %v492_v62 = vpack.c.bf16 %v486_v54, %v486_v54 }
  0x14   :  { %1940 = vmatprep.subr.bf16.mxu1 %v2115_v23  ;;  %1960 = vmatprep.subr.bf16.mxu0 %v2116_v24  ;;  %v476_v10 = vld [vmem:[%s2981_s0 + $0x7] sm:$0xff]  ;;  %v2130_v16 = vld [vmem:[%s2980_s1 + $0xd8] sm:$0xff]   ;;  %v2522_v45 = vld [vmem:[%s2981_s0 + $0x50] sm:$0xff] }
  0x15   :  { %1930 = vmatprep.mubr.msk.bf16.mxu0 %vm96_vm0, %v59_v26  ;;  %1946 = vmatprep.mubr.msk.bf16.mxu1 %vm96_vm0, %v32_v27  ;;  %v487_v22 = vpack.c.bf16 %v2427_v13, %v476_v10  ;;  %v2455_v26 = vld [vmem:[%s2981_s0 + $0x51] sm:$0xff]  ;;  %v2460_v27 = vld [vmem:[%s2981_s0 + $0x27] sm:$0xff]  ;;  %v2493_v38 = vld [vmem:[%s2981_s0 + $0x3f] sm:$0xff] }
  0x16   :  { %v2133_v39 = vld [vmem:[%s2980_s1 + $0xa8] sm:$0xff]   ;;  %v1430_v40 = vld [vmem:[%s2982_s4] sm:$0xff]  ;;  %v954_v59 = vld [vmem:[%s2981_s0 + $0x16] sm:$0xff] }
  0x17   :  { %1941 = vmatpush3.bf16.msra.mxu1 %v2115_v23  ;;  %1961 = vmatpush3.bf16.msra.mxu0 %v2116_v24  ;;  %v646_v23 = vpack.c.bf16 %v2300_v37, %v2263_v25  ;;  %v2443_v24 = vld [vmem:[%s2981_s0 + $0x17] sm:$0xff]  ;;  %v2450_v25 = vld [vmem:[%s2981_s0 + $0x1f] sm:$0xff]  ;;  %v2511_v43 = vld [vmem:[%s2981_s0 + $0x47] sm:$0xff] }
  0x18   :  { %1942 = vmatprep.subr.bf16.mxu1 %v2117_v29  ;;  %1962 = vmatprep.subr.bf16.mxu0 %v2118_v30  ;;  %v2488_v37 = vld [vmem:[%s2981_s0 + $0x37] sm:$0xff]  ;;  %v2136_v53 = vld [vmem:[%s2980_s1 + $0xc0] sm:$0xff]   ;;  %v1431_v56 = vld [vmem:[%s2982_s4 + $0x8] sm:$0xff] }
  0x19   :  { %1443 = vperm.xlu0 %2107, %v1430_v40   ;;  %v2138_v61 = vld [vmem:[%s2980_s1 + $0x118] sm:$0xff]   ;;  %v1435_v7 = vld [vmem:[%s2982_s4 + $0x28] sm:$0xff]  ;;  %v1436_v9 = vld [vmem:[%s2982_s4 + $0x30] sm:$0xff] }
  0x1a   :  { %1931 = vmatmul.mubr.msk.bf16.gmra.mxu0 %vm96_vm0, %v60_v31  ;;  %v488_v31 = vpack.c.bf16 %v2450_v25, %v2443_v24  ;;  %v1437_v10 = vld [vmem:[%s2982_s4 + $0x38] sm:$0xff]  ;;  %v1440_v6 = vld [vmem:[%s2982_s4 + $0x50] sm:$0x3] }
  0x1b   :  { %1943 = vmatpush3.bf16.msra.mxu1 %v2117_v29  ;;  %1963 = vmatpush3.bf16.msra.mxu0 %v2118_v30  ;;  %v2465_v29 = vld [vmem:[%s2981_s0 + $0x2f] sm:$0xff]  ;;  %v809_v30 = vpack.c.bf16 %v2455_v26, %v2204_v8  ;;  %v1124_v26 = vpack.c.bf16 %v2460_v27, %v2450_v25 }
  0x1c   :  { %1944 = vmatprep.subr.bf16.mxu1 %v2119_v34  ;;  %1964 = vmatprep.subr.bf16.mxu0 %v2120_v35 }
  0x1d   :  { %1966 = vmatprep.mubr.msk.bf16.mxu0 %vm96_vm0, %v328_v36  ;;  %v2132_v36 = vld [vmem:[%s2980_s1 + $0xd0] sm:$0xff]   ;;  %1448 = vperm.xlu0 %2107, %v1431_v56  }
  0x1f   :  { %1945 = vmatpush3.bf16.msra.mxu1 %v2119_v34  ;;  %1965 = vmatpush3.bf16.msra.mxu0 %v2120_v35  ;;  %v489_v34 = vpack.c.bf16 %v2465_v29, %v2460_v27  ;;  %v648_v35 = vpack.c.bf16 %v2351_v52, %v2328_v44  ;;  %v2516_v44 = vld [vmem:[%s2981_s0 + $0x4f] sm:$0xff]  ;;  %v2135_v52 = vld [vmem:[%s2980_s1 + $0xa0] sm:$0xff]  }
  0x20   :  { %1978 = vmatprep.subr.bf16.mxu1 %v2121_v41  ;;  %1998 = vmatprep.subr.bf16.mxu0 %v2122_v42  ;;  %v1281_v27 = vld [vmem:[%s2981_s0 + $0x60] sm:$0x3] }
  0x22   :  { %1947 = vmatmul.mubr.msk.bf16.vlgmr.msra.gmra.mxu1 %vm96_vm0, %v2336_v46  ;;  %1967 = vmatmul.mubr.msk.bf16.vlgmr.msra.gmra.mxu0 %vm96_vm0, %v329_v47  ;;  %v490_v47 = vpack.c.bf16 %v2493_v38, %v2488_v37 }
  0x23   :  { %1979 = vmatpush3.bf16.msra.mxu1 %v2121_v41  ;;  %1999 = vmatpush3.bf16.msra.mxu0 %v2122_v42  ;;  %v1432_v41 = vld [vmem:[%s2982_s4 + $0x10] sm:$0xff]  ;;  %v2134_v42 = vld [vmem:[%s2980_s1 + $0xc8] sm:$0xff]  }
  0x24   :  { %1980 = vmatprep.subr.bf16.mxu1 %v2123_v49  ;;  %1950 = vmatprep.mubr.msk.bf16.mxu1 %vm96_vm0, %v2346_v50 }
  0x25   :  { %1970 = vmatprep.mubr.msk.bf16.mxu0 %vm96_vm0, %v330_v51  ;;  %2000 = vmatprep.subr.bf16.mxu0 %v2124_v55  ;;  %v650_v51 = vpack.c.bf16 %v2522_v45, %v2386_v60  ;;  %v2137_v60 = vld [vmem:[%s2980_s1 + $0xf8] sm:$0xff]  }
  0x26   :  { %1453 = vperm.xlu1 %2108, %v1432_v41   ;;  %v2143_v41 = vld [vmem:[%s2980_s1 + $0xe0] sm:$0xff]  }
  0x27   :  { %1981 = vmatpush3.bf16.msra.mxu1 %v2123_v49  ;;  %2001 = vmatpush3.bf16.msra.mxu0 %v2124_v55  ;;  %v491_v49 = vpack.c.bf16 %v2516_v44, %v2511_v43  ;;  %v645_v55 = vld [vmem:[%s2981_s0 + $0x58] sm:$0x3] }
  0x28   :  { %1982 = vmatprep.subr.bf16.mxu1 %v2125_v57  ;;  %2002 = vmatprep.subr.bf16.mxu0 %v2126_v58 }
  0x2a   :  { %1951 = vmatmul.mubr.msk.bf16.gmra.mxu1 %vm96_vm0, %v2397_v63  ;;  %1971 = vmatmul.mubr.msk.bf16.gmra.mxu0 %vm96_vm0, %v331_v0  ;;  %v651_v0 = vpack.c.bf16 %v645_v55, %v645_v55 }
  0x2b   :  { %1983 = vmatpush3.bf16.msra.mxu1 %v2125_v57  ;;  %1954 = vmatprep.mubr.msk.bf16.mxu1 %vm96_vm0, %v2401_v1  ;;  %v1433_v57 = vld [vmem:[%s2982_s4 + $0x18] sm:$0xff] }
  0x2c   :  { %1974 = vmatprep.mubr.msk.bf16.mxu0 %vm96_vm0, %v332_v2  ;;  %2003 = vmatpush3.bf16.msra.mxu0 %v2126_v58  ;;  %v953_v58 = vld [vmem:[%s2981_s0 + $0xe] sm:$0xff]  ;;  %v805_v2 = vpack.c.bf16 %v2216_v11, %v2193_v5  ;;  %v955_v5 = vld [vmem:[%s2981_s0 + $0x1e] sm:$0xff]  ;;  %v956_v11 = vld [vmem:[%s2981_s0 + $0x26] sm:$0xff] }
  0x2d   :  { %1984 = vmatprep.subr.bf16.mxu1 %v2127_v3  ;;  %2004 = vmatprep.subr.bf16.mxu0 %v2128_v4 }
  0x2e   :  { %1458 = vperm.xlu1 %2108, %v1433_v57  }
  0x2f   :  { %1985 = vmatpush3.bf16.msra.mxu1 %v2127_v3  ;;  %v964_v3 = vpack.c.bf16 %v954_v59, %v953_v58 }
  0x30   :  { %2005 = vmatpush3.bf16.msra.mxu0 %v2128_v4  ;;  %2018 = vmatprep.subr.bf16.mxu1 %v2129_v14  ;;  %v1434_v4 = vld [vmem:[%s2982_s4 + $0x20] sm:$0xff] }
  0x31   :  { %2038 = vmatprep.subr.bf16.mxu0 %v2130_v16  ;;  %1463 = vperm.xlu0 %2107, %v1434_v4  }
  0x32   :  { %1955 = vmatmul.mubr.msk.bf16.gmra.mxu1 %vm96_vm0, %v37_v19  ;;  %1975 = vmatmul.mubr.msk.bf16.gmra.mxu0 %vm96_vm0, %v333_v20  ;;  %v957_v19 = vld [vmem:[%s2981_s0 + $0x2e] sm:$0xff]  ;;  %v958_v20 = vld [vmem:[%s2981_s0 + $0x36] sm:$0xff] }
  0x33   :  { %1986 = vmatprep.mubr.msk.bf16.mxu1 %vm96_vm0, %v487_v22  ;;  %2006 = vmatprep.mubr.msk.bf16.mxu0 %vm96_vm0, %v646_v23  ;;  %v2139_v22 = vld [vmem:[%s2980_s1 + $0xf0] sm:$0xff]   ;;  %v807_v23 = vpack.c.bf16 %v2273_v28, %v2249_v21  ;;  %v960_v21 = vld [vmem:[%s2981_s0 + $0x46] sm:$0xff] }
  0x34   :  { %1468 = vperm.xlu1 %2108, %v1435_v7   ;;  %v1438_v28 = vld [vmem:[%s2982_s4 + $0x40] sm:$0xff] }
  0x35   :  { %1473 = vperm.xlu0 %2107, %v1436_v9  }
  0x38   :  { %1478 = vperm.xlu1 %2108, %v1437_v10  }
  0x39   :  { %1483 = vperm.xlu0 %2107, %v1438_v28  }
  0x3a   :  { %1987 = vmatmul.mubr.msk.bf16.vlgmr.msra.gmra.mxu1 %vm96_vm0, %v488_v31  ;;  %2007 = vmatmul.mubr.msk.bf16.vlgmr.msra.gmra.mxu0 %vm96_vm0, %v647_v32  ;;  %v966_v31 = vpack.c.bf16 %v958_v20, %v957_v19  ;;  %v1439_v32 = vld [vmem:[%s2982_s4 + $0x48] sm:$0xff] }
  0x3b   :  { %2019 = vmatpush3.bf16.msra.mxu1 %v2129_v14  ;;  %2039 = vmatpush3.bf16.msra.mxu0 %v2130_v16  ;;  %v806_v14 = vpack.c.bf16 %v2242_v18, %v2221_v12  ;;  %v965_v16 = vpack.c.bf16 %v956_v11, %v955_v5  ;;  %v2140_v12 = vld [vmem:[%s2980_s1 + $0x110] sm:$0xff]   ;;  %v959_v18 = vld [vmem:[%s2981_s0 + $0x3e] sm:$0xff] }
  0x3c   :  { %2020 = vmatprep.subr.bf16.mxu1 %v2131_v33  ;;  %1990 = vmatprep.mubr.msk.bf16.mxu1 %vm96_vm0, %v489_v34  ;;  %v2142_v34 = vld [vmem:[%s2980_s1 + $0x108] sm:$0xff]  }
  0x3d   :  { %2010 = vmatprep.mubr.msk.bf16.mxu0 %vm96_vm0, %v648_v35  ;;  %2040 = vmatprep.subr.bf16.mxu0 %v2132_v36  ;;  %v961_v35 = vld [vmem:[%s2981_s0 + $0x4e] sm:$0xff] }
  0x3e   :  { %1488 = vperm.xlu1 %2108, %v1439_v32   ;;  %1493 = vperm.xlu0 %2107, %v1440_v6  }
  0x3f   :  { %2021 = vmatpush3.bf16.msra.mxu1 %v2131_v33  ;;  %2041 = vmatpush3.bf16.msra.mxu0 %v2132_v36  ;;  %v2141_v33 = vld [vmem:[%s2980_s1 + $0xe8] sm:$0xff]   ;;  %v962_v36 = vld [vmem:[%s2981_s0 + $0x56] sm:$0xff] }
  0x40   :  { %2022 = vmatprep.subr.bf16.mxu1 %v2133_v39  ;;  %2042 = vmatprep.subr.bf16.mxu0 %v2134_v42  ;;  %v968_v40 = vpack.c.bf16 %v962_v36, %v961_v35 }
  0x42   :  { %1991 = vmatmul.mubr.msk.bf16.gmra.mxu1 %vm96_vm0, %v490_v47  ;;  %2011 = vmatmul.mubr.msk.bf16.gmra.mxu0 %vm96_vm0, %v649_v48  ;;  %v804_v47 = vld [vmem:[%s2981_s0 + $0x59] sm:$0x3]  ;;  %v963_v48 = vld [vmem:[%s2981_s0 + $0x5e] sm:$0x3] }
  0x43   :  { %2023 = vmatpush3.bf16.msra.mxu1 %v2133_v39  ;;  %1994 = vmatprep.mubr.msk.bf16.mxu1 %vm96_vm0, %v491_v49  ;;  %v967_v39 = vpack.c.bf16 %v960_v21, %v959_v18  ;;  %v810_v8 = vpack.c.bf16 %v804_v47, %v804_v47  ;;  %v969_v15 = vpack.c.bf16 %v963_v48, %v963_v48 }
  0x44   :  { %2014 = vmatprep.mubr.msk.bf16.mxu0 %vm96_vm0, %v650_v51  ;;  %2043 = vmatpush3.bf16.msra.mxu0 %v2134_v42  ;;  %v2144_v42 = vld [vmem:[%s2980_s1 + $0x100] sm:$0xff]  }
  0x45   :  { %2024 = vmatprep.subr.bf16.mxu1 %v2135_v52  ;;  %2044 = vmatprep.subr.bf16.mxu0 %v2136_v53 }
  0x47   :  { %2025 = vmatpush3.bf16.msra.mxu1 %v2135_v52 }
  0x48   :  { %2045 = vmatpush3.bf16.msra.mxu0 %v2136_v53  ;;  %2058 = vmatprep.subr.bf16.mxu1 %v2137_v60 }
  0x49   :  { %2078 = vmatprep.subr.bf16.mxu0 %v2138_v61 }
  0x4a   :  { %1995 = vmatmul.mubr.msk.bf16.gmra.mxu1 %vm96_vm0, %v492_v62  ;;  %2015 = vmatmul.mubr.msk.bf16.gmra.mxu0 %vm96_vm0, %v651_v0 }
  0x4b   :  { %2026 = vmatprep.mubr.msk.bf16.mxu1 %vm96_vm0, %v805_v2  ;;  %2046 = vmatprep.mubr.msk.bf16.mxu0 %vm96_vm0, %v964_v3 }
  0x52   :  { %2027 = vmatmul.mubr.msk.bf16.vlgmr.msra.gmra.mxu1 %vm96_vm0, %v806_v14  ;;  %2047 = vmatmul.mubr.msk.bf16.vlgmr.msra.gmra.mxu0 %vm96_vm0, %v965_v16 }
  0x53   :  { %2059 = vmatpush3.bf16.msra.mxu1 %v2137_v60  ;;  %2079 = vmatpush3.bf16.msra.mxu0 %v2138_v61 }
  0x54   :  { %2060 = vmatprep.subr.bf16.mxu1 %v2139_v22  ;;  %2030 = vmatprep.mubr.msk.bf16.mxu1 %vm96_vm0, %v807_v23 }
  0x55   :  { %2050 = vmatprep.mubr.msk.bf16.mxu0 %vm96_vm0, %v966_v31  ;;  %2080 = vmatprep.subr.bf16.mxu0 %v2140_v12 }
  0x57   :  { %2061 = vmatpush3.bf16.msra.mxu1 %v2139_v22  ;;  %2081 = vmatpush3.bf16.msra.mxu0 %v2140_v12 }
  0x58   :  { %2062 = vmatprep.subr.bf16.mxu1 %v2141_v33  ;;  %2082 = vmatprep.subr.bf16.mxu0 %v2142_v34 }
  0x5a   :  { %2031 = vmatmul.mubr.msk.bf16.gmra.mxu1 %vm96_vm0, %v808_v17  ;;  %2051 = vmatmul.mubr.msk.bf16.gmra.mxu0 %vm96_vm0, %v967_v39  ;;  %v1123_v17 = vpack.c.bf16 %v2443_v24, %v2427_v13  ;;  %v1280_v13 = vld [vmem:[%s2981_s0 + $0x58] sm:$0xff]  ;;  %v1126_v24 = vpack.c.bf16 %v2511_v43, %v2493_v38 }
  0x5b   :  { %2063 = vmatpush3.bf16.msra.mxu1 %v2141_v33  ;;  %2034 = vmatprep.mubr.msk.bf16.mxu1 %vm96_vm0, %v809_v30  ;;  %v1125_v30 = vpack.c.bf16 %v2488_v37, %v2465_v29  ;;  %v1287_v37 = vpack.c.bf16 %v1281_v27, %v1281_v27 }
  0x5c   :  { %2054 = vmatprep.mubr.msk.bf16.mxu0 %vm96_vm0, %v968_v40  ;;  %2083 = vmatpush3.bf16.msra.mxu0 %v2142_v34 }
  0x5d   :  { %2064 = vmatprep.subr.bf16.mxu1 %v2143_v41  ;;  %2084 = vmatprep.subr.bf16.mxu0 %v2144_v42 }
  0x5f   :  { %2065 = vmatpush3.bf16.msra.mxu1 %v2143_v41 }
  0x60   :  { %2085 = vmatpush3.bf16.msra.mxu0 %v2144_v42 }
  0x62   :  { %2035 = vmatmul.mubr.msk.bf16.gmra.mxu1 %vm96_vm0, %v810_v8  ;;  %2055 = vmatmul.mubr.msk.bf16.gmra.mxu0 %vm96_vm0, %v969_v15 }
  0x63   :  { %2066 = vmatprep.mubr.msk.bf16.mxu1 %vm96_vm0, %v1123_v17  ;;  %2086 = vmatprep.mubr.msk.bf16.mxu0 %vm96_vm0, %v2336_v46  ;;  %v1121_v46 = vld [vmem:[%s2981_s0 + $0x57] sm:$0xff] }
  0x64   :  { %v1127_v25 = vpack.c.bf16 %v1121_v46, %v2516_v44 }
  0x6a   :  { %2067 = vmatmul.mubr.msk.bf16.vlgmr.msra.gmra.mxu1 %vm96_vm0, %v1124_v26  ;;  %2087 = vmatmul.mubr.msk.bf16.vlgmr.msra.gmra.mxu0 %vm96_vm0, %v2346_v50  ;;  %v1286_v50 = vpack.c.bf16 %v1280_v13, %v2522_v45 }
  0x6b   :  { %2070 = vmatprep.mubr.msk.bf16.mxu1 %vm96_vm0, %v1125_v30  ;;  %2090 = vmatprep.mubr.msk.bf16.mxu0 %vm96_vm0, %v2397_v63  ;;  %v1122_v63 = vld [vmem:[%s2981_s0 + $0x5f] sm:$0x3] }
  0x6c   :  { %v1128_v29 = vpack.c.bf16 %v1122_v63, %v1122_v63 }
  0x72   :  { %2071 = vmatmul.mubr.msk.bf16.gmra.mxu1 %vm96_vm0, %v1126_v24  ;;  %2091 = vmatmul.mubr.msk.bf16.gmra.mxu0 %vm96_vm0, %v2401_v1 }
  0x73   :  { %2074 = vmatprep.mubr.msk.bf16.mxu1 %vm96_vm0, %v1127_v25  ;;  %2094 = vmatprep.mubr.msk.bf16.mxu0 %vm96_vm0, %v1286_v50 }
  0x7a   :  { %2075 = vmatmul.mubr.msk.bf16.gmra.mxu1 %vm96_vm0, %v1128_v29  ;;  %2095 = vmatmul.mubr.msk.bf16.gmra.mxu0 %vm96_vm0, %v1287_v37 }
  0xd2   :  { %v1928_v38 = vpop.f32.mrf.mxu0  ;;  %v1936_v1 = vpop.f32.mrf.mxu1 }
  0xd4   :  { %v149_v43 = vpop.f32.mrf.mxu0  ;;  %v181_v44 = vpop.f32.mrf.mxu1 }
  0xd6   :  { %v1929_v45 = vpop.f32.mrf.mxu0  ;;  %v1937_v49 = vpop.f32.mrf.mxu1 }
  0xd8   :  { %v152_v51 = vpop.f32.mrf.mxu0  ;;  %v184_v55 = vpop.f32.mrf.mxu1 }
  0xda   :  { %v1932_v52 = vpop.f32.mrf.mxu0 }
  0xdc   :  { %v165_v53 = vpop.f32.mrf.mxu0 }
  0xde   :  { %v1933_v54 = vpop.f32.mrf.mxu0 }
  0xe0   :  { %v168_v56 = vpop.f32.mrf.mxu0 }
  0xe2   :  { %v1948_v57 = vpop.f32.mrf.mxu1  ;;  %v1968_v58 = vpop.f32.mrf.mxu0 }
  0xe3   :  { %v280_v59 = vadd.f32 %v1948_v57, %v1928_v38 }
  0xe4   :  { %v271_v60 = vpop.f32.mrf.mxu1  ;;  %v419_v61 = vpop.f32.mrf.mxu0 }
  0xe5   :  { %v2699_v62 = vadd.f32 %v1968_v58, %v280_v59  ;;  %v272_v0 = vadd.f32 %v271_v60, %v149_v43 }
  0xe6   :  { %v1949_v2 = vpop.f32.mrf.mxu1  ;;  %v1969_v3 = vpop.f32.mrf.mxu0 }
  0xe7   :  { %v2701_v4 = vadd.f32 %v419_v61, %v272_v0  ;;  %v283_v7 = vadd.f32 %v1949_v2, %v1929_v45 }
  0xe8   :  { %v274_v5 = vpop.f32.mrf.mxu1  ;;  %v422_v11 = vpop.f32.mrf.mxu0 }
  0xe9   :  { %v2703_v9 = vadd.f32 %v1969_v3, %v283_v7  ;;  %v275_v10 = vadd.f32 %v274_v5, %v152_v51 }
  0xea   :  { %v1952_v14 = vpop.f32.mrf.mxu1  ;;  %v1972_v16 = vpop.f32.mrf.mxu0 }
  0xeb   :  { %v2705_v19 = vadd.f32 %v422_v11, %v275_v10  ;;  %v296_v20 = vadd.f32 %v1952_v14, %v1932_v52 }
  0xec   :  { %v287_v22 = vpop.f32.mrf.mxu1  ;;  %v435_v23 = vpop.f32.mrf.mxu0 }
  0xed   :  { %v2707_v31 = vadd.f32 %v1972_v16, %v296_v20  ;;  %v288_v12 = vadd.f32 %v287_v22, %v165_v53 }
  0xee   :  { %v1953_v18 = vpop.f32.mrf.mxu1  ;;  %v1973_v21 = vpop.f32.mrf.mxu0 }
  0xef   :  { %v2709_v28 = vadd.f32 %v435_v23, %v288_v12  ;;  %v299_v32 = vadd.f32 %v1953_v18, %v1933_v54 }
  0xf0   :  { %v290_v33 = vpop.f32.mrf.mxu1  ;;  %v438_v34 = vpop.f32.mrf.mxu0 }
  0xf1   :  { %v2711_v35 = vadd.f32 %v1973_v21, %v299_v32  ;;  %v291_v36 = vadd.f32 %v290_v33, %v168_v56 }
  0xf2   :  { %v1956_v39 = vpop.f32.mrf.mxu1  ;;  %v1976_v40 = vpop.f32.mrf.mxu0 }
  0xf3   :  { %v2713_v41 = vadd.f32 %v438_v34, %v291_v36  ;;  %v312_v42 = vadd.f32 %v1956_v39, %v1936_v1 }
  0xf4   :  { %v303_v47 = vpop.f32.mrf.mxu1  ;;  %v451_v48 = vpop.f32.mrf.mxu0 }
  0xf5   :  { %v2715_v6 = vadd.f32 %v1976_v40, %v312_v42  ;;  %v304_v8 = vadd.f32 %v303_v47, %v181_v44 }
  0xf6   :  { %v1957_v15 = vpop.f32.mrf.mxu1  ;;  %v1977_v17 = vpop.f32.mrf.mxu0 }
  0xf7   :  { %v2717_v26 = vadd.f32 %v451_v48, %v304_v8 }
  0xf8   :  { %v306_v30 = vpop.f32.mrf.mxu1  ;;  %v454_v46 = vpop.f32.mrf.mxu0 }
  0xf9   :  { %v307_v13 = vadd.f32 %v306_v30, %v184_v55  ;;  %v2759_v30 = vpop.permute.xlu0 %1443 }
  0xfa   :  { %v1988_v24 = vpop.f32.mrf.mxu1  ;;  %v2008_v25 = vpop.f32.mrf.mxu0 }
  0xfb   :  { %v2719_v50 = vadd.f32 %v454_v46, %v307_v13  ;;  %v626_v34 = vadd.f32 %v1988_v24, %v2699_v62 }
  0xfc   :  { %v578_v63 = vpop.f32.mrf.mxu1  ;;  %v737_v27 = vpop.f32.mrf.mxu0 }
  0xfd   :  { %v624_v36 = vadd.f32 %v578_v63, %v2701_v4  ;;  %v785_v8 = vadd.f32 %v2008_v25, %v626_v34 }
  0xfe   :  { %v1989_v29 = vpop.f32.mrf.mxu1  ;;  %v2009_v37 = vpop.f32.mrf.mxu0 }
  0xff   :  { %v627_v42 = vadd.f32 %v1989_v29, %v2703_v9  ;;  %v783_v15 = vadd.f32 %v737_v27, %v624_v36 }
 0x100   :  { %v581_v38 = vpop.f32.mrf.mxu1  ;;  %v740_v1 = vpop.f32.mrf.mxu0 }
 0x101   :  { %v625_v17 = vadd.f32 %v581_v38, %v2705_v19  ;;  %v786_v13 = vadd.f32 %v2009_v37, %v627_v42  ;;  %v2768_v37 = vpop.permute.xlu0 %1448 }
 0x102   :  { %v1992_v43 = vpop.f32.mrf.mxu1  ;;  %v2012_v45 = vpop.f32.mrf.mxu0 }
 0x103   :  { %v630_v63 = vadd.f32 %v1992_v43, %v2707_v31  ;;  %v784_v29 = vadd.f32 %v740_v1, %v625_v17 }
 0x104   :  { %v594_v44 = vpop.f32.mrf.mxu1  ;;  %v2721_v49 = vpop.f32.mrf.mxu0 }
 0x105   :  { %v789_v31 = vadd.f32 %v2012_v45, %v630_v63 }
 0x106   :  { %v1993_v51 = vpop.f32.mrf.mxu1  ;;  %v2723_v52 = vpop.f32.mrf.mxu0 }
 0x107   :  { %v631_v27 = vadd.f32 %v1993_v51, %v2711_v35 }
 0x108   :  { %v597_v53 = vpop.f32.mrf.mxu1  ;;  %v2725_v54 = vpop.f32.mrf.mxu0 }
 0x109   :  { %v629_v43 = vadd.f32 %v597_v53, %v2713_v41  ;;  %v790_v35 = vadd.f32 %v2723_v52, %v631_v27  ;;  %v2782_v52 = vpop.permute.xlu0 %1463 }
 0x10a   :  { %v2727_v55 = vpop.f32.mrf.mxu1  ;;  %v2729_v56 = vpop.f32.mrf.mxu0 }
 0x10b   :  { %v788_v45 = vadd.f32 %v2725_v54, %v629_v43  ;;  %v634_v41 = vadd.f32 %v2727_v55, %v2715_v6 }
 0x10c   :  { %v2731_v57 = vpop.f32.mrf.mxu1  ;;  %v2733_v58 = vpop.f32.mrf.mxu0 }
 0x10e   :  { %v1997_v59 = vpop.f32.mrf.mxu1  ;;  %v2017_v60 = vpop.f32.mrf.mxu0 }
 0x10f   :  { %v628_v60 = vadd.f32 %v594_v44, %v2709_v28 }
 0x110   :  { %v2735_v61 = vpop.f32.mrf.mxu1  ;;  %v2737_v0 = vpop.f32.mrf.mxu0 }
 0x111   :  { %v787_v1 = vadd.f32 %v2721_v49, %v628_v60  ;;  %v632_v49 = vadd.f32 %v2731_v57, %v2717_v26 }
 0x112   :  { %v2028_v2 = vpop.f32.mrf.mxu1  ;;  %v2048_v3 = vpop.f32.mrf.mxu0 }
 0x113   :  { %v944_v4 = vadd.f32 %v2028_v2, %v785_v8  ;;  %v2770_v2 = vpop.permute.xlu1 %1453  ;;  %v791_v63 = vadd.f32 %v2733_v58, %v632_v49 }
 0x114   :  { %v896_v7 = vpop.f32.mrf.mxu1  ;;  %v1055_v5 = vpop.f32.mrf.mxu0 }
 0x115   :  { %v942_v24 = vadd.f32 %v896_v7, %v783_v15  ;;  %v1103_v34 = vadd.f32 %v2048_v3, %v944_v4 }
 0x116   :  { %v2029_v11 = vpop.f32.mrf.mxu1  ;;  %v2049_v10 = vpop.f32.mrf.mxu0 }
 0x117   :  { %v945_v25 = vadd.f32 %v2029_v11, %v786_v13  ;;  %v1101_v36 = vadd.f32 %v1055_v5, %v942_v24  ;;  %v793_v24 = vadd.f32 %v2729_v56, %v634_v41 }
 0x118   :  { %v899_v14 = vpop.f32.mrf.mxu1  ;;  %v1058_v16 = vpop.f32.mrf.mxu0 }
 0x119   :  { %v1104_v28 = vadd.f32 %v2049_v10, %v945_v25 }
 0x11a   :  { %v2032_v20 = vpop.f32.mrf.mxu1  ;;  %v2739_v22 = vpop.f32.mrf.mxu0 }
 0x11b   :  { %v948_v51 = vadd.f32 %v2032_v20, %v789_v31  ;;  %v2784_v20 = vpop.permute.xlu1 %1458 }
 0x11c   :  { %v912_v23 = vpop.f32.mrf.mxu1  ;;  %v2741_v12 = vpop.f32.mrf.mxu0 }
 0x11d   :  { %v946_v8 = vadd.f32 %v912_v23, %v787_v1  ;;  %v1107_v13 = vadd.f32 %v2739_v22, %v948_v51 }
 0x11e   :  { %v2033_v18 = vpop.f32.mrf.mxu1  ;;  %v2743_v21 = vpop.f32.mrf.mxu0 }
 0x11f   :  { %v1105_v26 = vadd.f32 %v2741_v12, %v946_v8 }
 0x120   :  { %v915_v32 = vpop.f32.mrf.mxu1  ;;  %v2745_v33 = vpop.f32.mrf.mxu0 }
 0x121   :  { %v947_v4 = vadd.f32 %v915_v32, %v788_v45 }
 0x122   :  { %v2749_v39 = vpop.f32.mrf.mxu1  ;;  %v2751_v40 = vpop.f32.mrf.mxu0 }
 0x123   :  { %v952_v56 = vadd.f32 %v2749_v39, %v793_v24 }
 0x124   :  { %v2754_v47 = vpop.f32.mrf.mxu1  ;;  %v2756_v48 = vpop.f32.mrf.mxu0 }
 0x125   :  { %v950_v58 = vadd.f32 %v2754_v47, %v791_v63 }
 0x126   :  { %v2037_v46 = vpop.f32.mrf.mxu1  ;;  %v2057_v62 = vpop.f32.mrf.mxu0 }
 0x127   :  { %v943_v46 = vadd.f32 %v899_v14, %v784_v29  ;;  %v949_v62 = vadd.f32 %v2033_v18, %v790_v35  ;;  %v633_v29 = vadd.f32 %v2735_v61, %v2719_v50  ;;  %v1111_v35 = vadd.f32 %v2751_v40, %v952_v56 }
 0x128   :  { %v2762_v59 = vpop.f32.mrf.mxu1  ;;  %v2764_v9 = vpop.f32.mrf.mxu0  ;;  %v1109_v51 = vadd.f32 %v2756_v48, %v950_v58 }
 0x129   :  { %v1102_v14 = vadd.f32 %v1058_v16, %v943_v46  ;;  %v1108_v25 = vadd.f32 %v2743_v21, %v949_v62  ;;  %v2811_v21 = vpop.permute.xlu1 %1468  ;;  %v792_v1 = vadd.f32 %v2737_v0, %v633_v29 }
 0x12a   :  { %v2068_v19 = vpop.f32.mrf.mxu1  ;;  %v2088_v38 = vpop.f32.mrf.mxu0 }
 0x12b   :  { %v1262_v44 = vadd.f32 %v2068_v19, %v1103_v34  ;;  %v951_v8 = vadd.f32 %v2762_v59, %v792_v1 }
 0x12c   :  { %v1214_v7 = vpop.f32.mrf.mxu1  ;;  %v1373_v42 = vpop.f32.mrf.mxu0 }
 0x12d   :  { %v1260_v11 = vadd.f32 %v1214_v7, %v1101_v36  ;;  %v2786_v16 = vadd.f32 %v2088_v38, %v1262_v44  ;;  %v1106_v38 = vadd.f32 %v2745_v33, %v947_v4  ;;  %v2809_v36 = vpop.permute.xlu0 %1473  ;;  %v2832_v40 = vpop.permute.xlu1 %1478 }
 0x12e   :  { %v2069_v3 = vpop.f32.mrf.mxu1  ;;  %v2089_v5 = vpop.f32.mrf.mxu0 }
 0x12f   :  { %v2775_v15 = vadd.f32 %v1373_v42, %v1260_v11  ;;  %v1263_v17 = vadd.f32 %v2069_v3, %v1104_v28  ;;  %v1498_v27 = vmul.f32 %v2770_v2, %v2786_v16 }
 0x130   :  { %v1217_v53 = vpop.f32.mrf.mxu1  ;;  %v1376_v10 = vpop.f32.mrf.mxu0 }
 0x131   :  { %v1261_v23 = vadd.f32 %v1217_v53, %v1102_v14  ;;  %v1496_v54 = vmul.f32 %v2759_v30, %v2775_v15  ;;  %v2792_v57 = vadd.f32 %v2089_v5, %v1263_v17  ;;  %v1510_v28 = vsel %vm96_vm0, %v1498_v27, 0.0  ;;  %v2830_v62 = vpop.permute.xlu0 %1483 }
 0x132   :  { %v2072_v6 = vpop.f32.mrf.mxu1  ;;  %v2092_v55 = vpop.f32.mrf.mxu0 }
 0x133   :  { %v2794_v18 = vadd.f32 %v1376_v10, %v1261_v23  ;;  %v1266_v22 = vadd.f32 %v2072_v6, %v1107_v13  ;;  %v1507_v50 = vsel %vm96_vm0, %v1496_v54, 0.0  ;;  %v1499_v46 = vmul.f32 %v2784_v20, %v2792_v57 }
 0x134   :  { %v1230_v32 = vpop.f32.mrf.mxu1  ;;  %v1389_v60 = vpop.f32.mrf.mxu0 }
 0x135   :  { %v1497_v12 = vmul.f32 %v2768_v37, %v2794_v18  ;;  %v1264_v19 = vadd.f32 %v1230_v32, %v1105_v26  ;;  %v2818_v39 = vadd.f32 %v2092_v55, %v1266_v22  ;;  %v1512_v17 = vsel %vm96_vm0, %v1499_v46, 0.0  ;;  %v2842_v58 = vpop.permute.xlu0 %1493 }
 0x136   :  { %v2073_v61 = vpop.f32.mrf.mxu1  ;;  %v2093_v34 = vpop.f32.mrf.mxu0  ;;  %v1110_v55 = vadd.f32 %v2764_v9, %v951_v8 }
 0x137   :  { %v1508_v31 = vsel %vm96_vm0, %v1497_v12, 0.0  ;;  %v2816_v43 = vadd.f32 %v1389_v60, %v1264_v19  ;;  %v1267_v33 = vadd.f32 %v2073_v61, %v1108_v25  ;;  %v1502_v0 = vmul.f32 %v2809_v36, %v2818_v39  ;;  %v1489_v9 = vpop.permute.xlu1 %1488 }
 0x138   :  { %v1509_v7 = vadd.f32 %v1508_v31, %v1507_v50  ;;  %v1233_v47 = vpop.f32.mrf.mxu1  ;;  %v1392_v42 = vpop.f32.mrf.mxu0 }
 0x139   :  { %v1500_v44 = vmul.f32 %v2782_v52, %v2816_v43  ;;  %v1265_v11 = vadd.f32 %v1233_v47, %v1106_v38  ;;  %v1426_v45 = vadd.f32 %v2093_v34, %v1267_v33  ;;  %v1518_v32 = vsel %vm96_vm0, %v1502_v0, 0.0 }
 0x13a   :  { %v1511_v3 = vadd.f32 %v1510_v28, %v1509_v7  ;;  %v2076_v5 = vpop.f32.mrf.mxu1  ;;  %v2096_v14 = vpop.f32.mrf.mxu0 }
 0x13b   :  { %v1424_v41 = vadd.f32 %v1392_v42, %v1265_v11  ;;  %v1514_v48 = vsel %vm96_vm0, %v1500_v44, 0.0  ;;  %v1270_v13 = vadd.f32 %v2076_v5, %v1111_v35  ;;  %v1503_v26 = vmul.f32 %v2832_v40, %v1426_v45 }
 0x13c   :  { %v1513_v49 = vadd.f32 %v1512_v17, %v1511_v3  ;;  %v1246_v53 = vpop.f32.mrf.mxu1  ;;  %v1405_v10 = vpop.f32.mrf.mxu0 }
 0x13d   :  { %v1501_v23 = vmul.f32 %v2811_v21, %v1424_v41  ;;  %v1268_v59 = vadd.f32 %v1246_v53, %v1109_v51  ;;  %v1429_v60 = vadd.f32 %v2096_v14, %v1270_v13  ;;  %v1520_v38 = vsel %vm96_vm0, %v1503_v26, 0.0 }
 0x13e   :  { %v1515_v4 = vadd.f32 %v1514_v48, %v1513_v49  ;;  %v2077_v54 = vpop.f32.mrf.mxu1  ;;  %v2097_v6 = vpop.f32.mrf.mxu0 }
 0x13f   :  { %v1516_v24 = vsel %vm96_vm0, %v1501_v23, 0.0  ;;  %v1427_v63 = vadd.f32 %v1405_v10, %v1268_v59  ;;  %v1506_v61 = vmul.f32 %v2842_v58, %v1429_v60 }
 0x140   :  { %v1517_v29 = vadd.f32 %v1516_v24, %v1515_v4  ;;  %v1249_v22 = vpop.f32.mrf.mxu1  ;;  %v1408_v19 = vpop.f32.mrf.mxu0 }
 0x141   :  { %v1504_v25 = vmul.f32 %v2830_v62, %v1427_v63  ;;  %v1269_v27 = vadd.f32 %v1249_v22, %v1110_v55  ;;  %v1527_v47 = vsel %vm1526_vm1, %v1506_v61, 0.0 }
 0x142   :  { %v1519_v12 = vadd.f32 %v1518_v32, %v1517_v29 }
 0x143   :  { %v1428_v56 = vadd.f32 %v1408_v19, %v1269_v27  ;;  %v1522_v34 = vsel %vm96_vm0, %v1504_v25, 0.0 }
 0x144   :  { %v1521_v50 = vadd.f32 %v1520_v38, %v1519_v12 }
 0x145   :  { %v1505_v46 = vmul.f32 %v1489_v9, %v1428_v56 }
 0x146   :  { %v1523_v31 = vadd.f32 %v1522_v34, %v1521_v50 }
 0x147   :  { %v1524_v33 = vsel %vm96_vm0, %v1505_v46, 0.0 }
 0x148   :  { %v1525_v7 = vadd.f32 %v1524_v33, %v1523_v31 }
 0x14a   :  { %v1528_v42 = vadd.f32 %v1527_v47, %v1525_v7 }
 0x14c   :  { %v1529_v1 = vrot.slane %v1528_v42, 4 }
 0x14e   :  { %v1530_v28 = vadd.f32 %v1529_v1, %v1528_v42 }
 0x150   :  { %v1531_v44 = vrot.slane %v1530_v28, 2 }
 0x152   :  { %v1532_v11 = vadd.f32 %v1531_v44, %v1530_v28 }
 0x154   :  { %v1533_v35 = vrot.slane %v1532_v11, 1 }
 0x156   :  { %v1534_v51 = vadd.f32 %v1533_v35, %v1532_v11 }
 0x158   :  { %v1535_v3 = vmul.f32 0.02, %v1534_v51 }
 0x15a   :  { %v2849_v5 = vsub.f32 %v2775_v15, %v1535_v3  ;;  %v2852_v14 = vsub.f32 %v2794_v18, %v1535_v3  ;;  %v2855_v8 = vsub.f32 %v2786_v16, %v1535_v3  ;;  %v2858_v17 = vsub.f32 %v2792_v57, %v1535_v3 }
 0x15b   :  { %v2861_v0 = vsub.f32 %v2816_v43, %v1535_v3  ;;  %v2863_v49 = vsub.f32 %v1424_v41, %v1535_v3  ;;  %v2866_v53 = vsub.f32 %v2818_v39, %v1535_v3  ;;  %v2868_v10 = vsub.f32 %v1426_v45, %v1535_v3 }
 0x15c   :  { %v2870_v15 = vsub.f32 %v1427_v63, %v1535_v3  ;;  %v2872_v18 = vsub.f32 %v1428_v56, %v1535_v3  ;;  %v2874_v48 = vsub.f32 %v1429_v60, %v1535_v3  ;;  %v1547_v16 = vmul.f32 %v2849_v5, %v2849_v5 }
 0x15d   :  { %v1548_v57 = vmul.f32 %v2852_v14, %v2852_v14  ;;  %v1549_v43 = vmul.f32 %v2855_v8, %v2855_v8  ;;  %v1550_v39 = vmul.f32 %v2858_v17, %v2858_v17  ;;  %v1551_v23 = vmul.f32 %v2861_v0, %v2861_v0 }
 0x15e   :  { %v1558_v45 = vmul.f32 %v1547_v16, %v2759_v30  ;;  %v1552_v59 = vmul.f32 %v2863_v49, %v2863_v49  ;;  %v1553_v30 = vmul.f32 %v2866_v53, %v2866_v53  ;;  %v1555_v22 = vmul.f32 %v2870_v15, %v2870_v15 }
 0x15f   :  { %v1559_v41 = vmul.f32 %v1548_v57, %v2768_v37  ;;  %v1560_v13 = vmul.f32 %v1549_v43, %v2770_v2  ;;  %v1561_v4 = vmul.f32 %v1550_v39, %v2784_v20  ;;  %v1562_v37 = vmul.f32 %v1551_v23, %v2782_v52 }
 0x160   :  { %v1569_v54 = vsel %vm96_vm0, %v1558_v45, 0.0  ;;  %v1554_v2 = vmul.f32 %v2868_v10, %v2868_v10  ;;  %v1563_v63 = vmul.f32 %v1552_v59, %v2811_v21  ;;  %v1564_v32 = vmul.f32 %v1553_v30, %v2809_v36 }
 0x161   :  { %v1570_v6 = vsel %vm96_vm0, %v1559_v41, 0.0  ;;  %v1572_v26 = vsel %vm96_vm0, %v1560_v13, 0.0  ;;  %v1574_v20 = vsel %vm96_vm0, %v1561_v4, 0.0  ;;  %v1576_v60 = vsel %vm96_vm0, %v1562_v37, 0.0 }
 0x162   :  { %v1571_v55 = vadd.f32 %v1570_v6, %v1569_v54  ;;  %v1556_v52 = vmul.f32 %v2872_v18, %v2872_v18  ;;  %v1565_v27 = vmul.f32 %v1554_v2, %v2832_v40  ;;  %v1578_v12 = vsel %vm96_vm0, %v1563_v63, 0.0 }
 0x163   :  { %v1557_v21 = vmul.f32 %v2874_v48, %v2874_v48  ;;  %v1566_v38 = vmul.f32 %v1555_v22, %v2830_v62  ;;  %v1580_v56 = vsel %vm96_vm0, %v1564_v32, 0.0 }
 0x164   :  { %v1573_v24 = vadd.f32 %v1572_v26, %v1571_v55  ;;  %v1567_v36 = vmul.f32 %v1556_v52, %v1489_v9  ;;  %v1582_v61 = vsel %vm96_vm0, %v1565_v27, 0.0 }
 0x165   :  { %v1568_v46 = vmul.f32 %v1557_v21, %v2842_v58  ;;  %v1584_v31 = vsel %vm96_vm0, %v1566_v38, 0.0  ;;  %v1826_v58 = vld [vmem:[%s2983_s2] ss:$0 sm:$0xff] }
 0x166   :  { %v1575_v29 = vadd.f32 %v1574_v20, %v1573_v24  ;;  %v1586_v33 = vsel %vm96_vm0, %v1567_v36, 0.0 }
 0x167   :  { %v1588_v47 = vsel %vm1526_vm1, %v1568_v46, 0.0 }
 0x168   :  { %v1577_v25 = vadd.f32 %v1576_v60, %v1575_v29 }
 0x16a   :  { %v1579_v19 = vadd.f32 %v1578_v12, %v1577_v25 }
 0x16c   :  { %v1581_v50 = vadd.f32 %v1580_v56, %v1579_v19 }
 0x16e   :  { %v1583_v34 = vadd.f32 %v1582_v61, %v1581_v50 }
 0x170   :  { %v1585_v40 = vadd.f32 %v1584_v31, %v1583_v34 }
 0x172   :  { %v1587_v7 = vadd.f32 %v1586_v33, %v1585_v40 }
 0x174   :  { %v1589_v42 = vadd.f32 %v1588_v47, %v1587_v7 }
 0x176   :  { %v1590_v1 = vrot.slane %v1589_v42, 4 }
 0x178   :  { %v1591_v62 = vadd.f32 %v1590_v1, %v1589_v42 }
 0x17a   :  { %v1592_v28 = vrot.slane %v1591_v62, 2 }
 0x17c   :  { %v1593_v44 = vadd.f32 %v1592_v28, %v1591_v62 }
 0x17e   :  { %v1594_v11 = vrot.slane %v1593_v44, 1 }
 0x180   :  { %v1595_v9 = vadd.f32 %v1594_v11, %v1593_v44 }
 0x182   :  { %v1596_v35 = vmul.f32 0.02, %v1595_v9 }
 0x184   :  { %v1597_v51 = vadd.f32 1e-05, %v1596_v35 }
 0x186   :  { %2145 = vrsqrt.f32 %v1597_v51 }
 0x193   :  { %v2146_v3 = vpop.eup %2145 }
 0x194   :  { %v1599_v16 = vmul.f32 %v2146_v3, %v2849_v5  ;;  %v1600_v57 = vmul.f32 %v2146_v3, %v2852_v14  ;;  %v1601_v43 = vmul.f32 %v2146_v3, %v2855_v8  ;;  %v1602_v39 = vmul.f32 %v2146_v3, %v2858_v17  ;;  %v1827_v14 = vld [vmem:[%s2984_s3] ss:$0 sm:$0xff] }
 0x195   :  { %v1603_v45 = vmul.f32 %v2146_v3, %v2861_v0  ;;  %v1604_v41 = vmul.f32 %v2146_v3, %v2863_v49  ;;  %v1605_v23 = vmul.f32 %v2146_v3, %v2866_v53  ;;  %v1606_v13 = vmul.f32 %v2146_v3, %v2868_v10 }
 0x196   :  { %v1607_v59 = vmul.f32 %v2146_v3, %v2870_v15  ;;  %v1608_v4 = vmul.f32 %v2146_v3, %v2872_v18  ;;  %v1609_v5 = vmul.f32 %v2146_v3, %v2874_v48  ;;  %v1617_v54 = vmul.f32 %v1826_v58, %v1599_v16 }
 0x197   :  { %v1618_v8 = vmul.f32 %v1826_v58, %v1600_v57  ;;  %v1619_v17 = vmul.f32 %v1826_v58, %v1601_v43  ;;  %v1620_v0 = vmul.f32 %v1826_v58, %v1602_v39  ;;  %v1621_v6 = vmul.f32 %v1826_v58, %v1603_v45 }
 0x198   :  { %v1622_v49 = vmul.f32 %v1826_v58, %v1604_v41  ;;  %v1623_v55 = vmul.f32 %v1826_v58, %v1605_v23  ;;  %v1624_v53 = vmul.f32 %v1826_v58, %v1606_v13  ;;  %v1625_v30 = vmul.f32 %v1826_v58, %v1607_v59 }
 0x199   :  { %v1626_v10 = vmul.f32 %v1826_v58, %v1608_v4  ;;  %v1627_v37 = vmul.f32 %v1826_v58, %v1609_v5  ;;  %v1635_v15 = vadd.f32 %v1827_v14, %v1617_v54  ;;  %v1636_v26 = vadd.f32 %v1827_v14, %v1618_v8 }
 0x19a   :  { %v1637_v18 = vadd.f32 %v1827_v14, %v1619_v17  ;;  %v1638_v24 = vadd.f32 %v1827_v14, %v1620_v0  ;;  %v1639_v48 = vadd.f32 %v1827_v14, %v1621_v6  ;;  %v1640_v2 = vadd.f32 %v1827_v14, %v1622_v49 }
 0x19b   :  { %v1641_v63 = vadd.f32 %v1827_v14, %v1623_v55  ;;  %v1642_v20 = vadd.f32 %v1827_v14, %v1624_v53  ;;  %v1643_v29 = vadd.f32 %v1827_v14, %v1625_v30  ;;  %v1644_v22 = vadd.f32 %v1827_v14, %v1626_v10 }
 0x19c   :  { %v1645_v32 = vadd.f32 %v1827_v14, %v1627_v37  ;;  %v1646_v60 = vmax.f32 %v1635_v15, 0.0  ;;  %v1647_v25 = vmax.f32 %v1636_v26, 0.0  ;;  %v1648_v52 = vmax.f32 %v1637_v18, 0.0 }
 0x19d   :  { %v1649_v27 = vmax.f32 %v1638_v24, 0.0  ;;  %v1650_v12 = vmax.f32 %v1639_v48, 0.0  ;;  %v1651_v19 = vmax.f32 %v1640_v2, 0.0  ;;  %v1652_v21 = vmax.f32 %v1641_v63, 0.0 }
 0x19e   :  { %v1653_v38 = vmax.f32 %v1642_v20, 0.0  ;;  %v1654_v56 = vmax.f32 %v1643_v29, 0.0  ;;  %v1655_v50 = vmax.f32 %v1644_v22, 0.0  ;;  %v1656_v36 = vmax.f32 %v1645_v32, 0.0  ;;  %1657 = vst.msk [vmem:[%s2985_s5] sm:$0xff] %vm96_vm0, %v1646_v60  ;;  %1658 = vst.msk [vmem:[%s2985_s5 + $0x8] sm:$0xff] %vm96_vm0, %v1647_v25 }
 0x19f   :  { %1659 = vst.msk [vmem:[%s2985_s5 + $0x10] sm:$0xff] %vm96_vm0, %v1648_v52  ;;  %1660 = vst.msk [vmem:[%s2985_s5 + $0x18] sm:$0xff] %vm96_vm0, %v1649_v27 }
 0x1a0   :  { %1661 = vst.msk [vmem:[%s2985_s5 + $0x20] sm:$0xff] %vm96_vm0, %v1650_v12  ;;  %1662 = vst.msk [vmem:[%s2985_s5 + $0x28] sm:$0xff] %vm96_vm0, %v1651_v19 }
 0x1a1   :  { %1663 = vst.msk [vmem:[%s2985_s5 + $0x30] sm:$0xff] %vm96_vm0, %v1652_v21  ;;  %1664 = vst.msk [vmem:[%s2985_s5 + $0x38] sm:$0xff] %vm96_vm0, %v1653_v38 }
 0x1a2   :  { %1665 = vst.msk [vmem:[%s2985_s5 + $0x40] sm:$0xff] %vm96_vm0, %v1654_v56  ;;  %1666 = vst.msk [vmem:[%s2985_s5 + $0x48] sm:$0xff] %vm96_vm0, %v1655_v50 }
 0x1a3   :  { %1667 = vst.msk [vmem:[%s2985_s5 + $0x50] sm:$0x3] %vm1526_vm1, %v1656_v36 }

// kernel: cnn_encoder_forward.4
= control target key start
LH: loop header
LB: loop body
LE: loop exit
PB: predicated region body
PF: predicated region fallthrough
CT: control target
= control target key end

     0   :  { %vm295_vm0 = vcmask 1043456   ;;  %vm204_vm1 = vcmask 64512   ;;  %vm4984_vm2 = vcmask 523264   ;;  %vm5102_vm3 = vcmask 521216   ;;  %s11166_s1 = inlined_call_operand.vmem [shape: bf16[9,8,64], index: 1, kind: input, shape index: {}]   ;;  %s11167_s0 = inlined_call_operand.vmem [shape: f32[512,8], index: 0, kind: input, shape index: {}]   ;;  %s11168_s4 = inlined_call_operand.vmem [shape: f32[478,1], index: 4, kind: input, shape index: {}]   ;;  %s11169_s2 = inlined_call_operand.vmem [shape: f32[1,64], index: 2, kind: input, shape index: {}]   ;;  %s11170_s3 = inlined_call_operand.vmem [shape: f32[1,64], index: 3, kind: input, shape index: {}]   ;;  %s11171_s5 = inlined_call_operand.vmem [shape: f32[478,64], index: 5, kind: output, shape index: {}]  }
   0x1   :  { %v5738_v0 = vld [vmem:[%s11166_s1 + $0x4] sm:$0xf]  ;;  %v113_v2 = vld [vmem:[%s11167_s0 + $0x9] sm:$0xff]  ;;  %v114_v7 = vld [vmem:[%s11167_s0 + $0x11] sm:$0xff] }
   0x2   :  { %v112_v1 = vld [vmem:[%s11167_s0 + $0x1] sm:$0xff]  ;;  %6857 = vmatprep.subr.msk.bf16.mxu0 %vm295_vm0, %v5738_v0  ;;  %6858 = vmatprep.subr.msk.bf16.mxu1 %vm295_vm0, %v5738_v0  ;;  %v297_v3 = vsel %vm295_vm0, %v5738_v0, 0  ;;  %v145_v6 = vld [vmem:[%s11167_s0 + $0x109] sm:$0xff]  ;;  %v115_v9 = vld [vmem:[%s11167_s0 + $0x19] sm:$0xff] }
   0x3   :  { %v172_v4 = vpack.c.bf16 %v113_v2, %v112_v1  ;;  %v144_v5 = vld [vmem:[%s11167_s0 + $0x101] sm:$0xff]  ;;  %6298 = vmatpush3.bf16.msra.mxu0 %v297_v3  ;;  %6856 = vmatpush3.bf16.msra.mxu1 %v297_v3  ;;  %v146_v10 = vld [vmem:[%s11167_s0 + $0x111] sm:$0xff]  ;;  %v147_v11 = vld [vmem:[%s11167_s0 + $0x119] sm:$0xff]  ;;  %v6934_v12 = vpack.c.bf16 %v115_v9, %v114_v7 }
   0x4   :  { %v188_v8 = vpack.c.bf16 %v145_v6, %v144_v5  ;;  %v189_v13 = vpack.c.bf16 %v147_v11, %v146_v10  ;;  %v5799_v14 = vld [vmem:[%s11166_s1 + $0x8] sm:$0xf]  ;;  %v111_v15 = vld [vmem:[%s11166_s1] sm:$0xf]  ;;  %v118_v24 = vld [vmem:[%s11167_s0 + $0x31] sm:$0xff] }
   0x5   :  { %6299 = vmatprep.mubr.msk.bf16.mxu0 %vm204_vm1, %v172_v4  ;;  %v116_v16 = vld [vmem:[%s11167_s0 + $0x21] sm:$0xff]  ;;  %6860 = vmatprep.subr.msk.bf16.mxu0 %vm295_vm0, %v5799_v14  ;;  %v1121_v17 = vsel %vm295_vm0, %v5799_v14, 0  ;;  %v117_v18 = vld [vmem:[%s11167_s0 + $0x29] sm:$0xff]  ;;  %v663_v23 = vsel %vm295_vm0, %v111_v15, 0  ;;  %v119_v25 = vld [vmem:[%s11167_s0 + $0x39] sm:$0xff] }
   0x6   :  { %6331 = vmatprep.mubr.msk.bf16.mxu1 %vm204_vm1, %v188_v8  ;;  %v148_v19 = vld [vmem:[%s11167_s0 + $0x121] sm:$0xff]  ;;  %v149_v20 = vld [vmem:[%s11167_s0 + $0x129] sm:$0xff]  ;;  %6300 = vmatmul.mubr.msk.bf16.vlgmr.msra.gmra.mxu0 %vm204_vm1, %v6934_v12  ;;  %v6960_v21 = vpack.c.bf16 %v117_v18, %v116_v16  ;;  %v150_v26 = vld [vmem:[%s11167_s0 + $0x131] sm:$0xff]  ;;  %v6991_v32 = vpack.c.bf16 %v119_v25, %v118_v24 }
   0x7   :  { %6332 = vmatmul.mubr.msk.bf16.vlgmr.msra.gmra.mxu1 %vm204_vm1, %v189_v13  ;;  %v190_v22 = vpack.c.bf16 %v149_v20, %v148_v19  ;;  %6422 = vmatpush3.bf16.msra.mxu0 %v1121_v17  ;;  %v151_v27 = vld [vmem:[%s11167_s0 + $0x139] sm:$0xff]  ;;  %v120_v28 = vld [vmem:[%s11167_s0 + $0x41] sm:$0xff]  ;;  %v121_v29 = vld [vmem:[%s11167_s0 + $0x49] sm:$0xff] }
   0x8   :  { %6859 = vmatprep.subr.msk.bf16.mxu1 %vm295_vm0, %v111_v15  ;;  %6303 = vmatprep.mubr.msk.bf16.mxu0 %vm204_vm1, %v6960_v21  ;;  %v152_v30 = vld [vmem:[%s11167_s0 + $0x141] sm:$0xff]  ;;  %v153_v31 = vld [vmem:[%s11167_s0 + $0x149] sm:$0xff]  ;;  %v191_v33 = vpack.c.bf16 %v151_v27, %v150_v26  ;;  %v6993_v34 = vpack.c.bf16 %v121_v29, %v120_v28  ;;  %v122_v36 = vld [vmem:[%s11167_s0 + $0x51] sm:$0xff] }
   0x9   :  { %6335 = vmatprep.mubr.msk.bf16.mxu1 %vm204_vm1, %v190_v22  ;;  %6360 = vmatpush3.bf16.msra.mxu1 %v663_v23  ;;  %v192_v35 = vpack.c.bf16 %v153_v31, %v152_v30  ;;  %v123_v37 = vld [vmem:[%s11167_s0 + $0x59] sm:$0xff]  ;;  %v154_v38 = vld [vmem:[%s11167_s0 + $0x151] sm:$0xff]  ;;  %v124_v40 = vld [vmem:[%s11167_s0 + $0x61] sm:$0xff] }
   0xa   :  { %v155_v39 = vld [vmem:[%s11167_s0 + $0x159] sm:$0xff]  ;;  %v125_v41 = vld [vmem:[%s11167_s0 + $0x69] sm:$0xff]  ;;  %v156_v42 = vld [vmem:[%s11167_s0 + $0x161] sm:$0xff]  ;;  %v7025_v44 = vpack.c.bf16 %v123_v37, %v122_v36 }
   0xb   :  { %v157_v43 = vld [vmem:[%s11167_s0 + $0x169] sm:$0xff]  ;;  %v193_v45 = vpack.c.bf16 %v155_v39, %v154_v38  ;;  %v7027_v46 = vpack.c.bf16 %v125_v41, %v124_v40  ;;  %v126_v48 = vld [vmem:[%s11167_s0 + $0x71] sm:$0xff]  ;;  %v127_v49 = vld [vmem:[%s11167_s0 + $0x79] sm:$0xff] }
   0xc   :  { %v194_v47 = vpack.c.bf16 %v157_v43, %v156_v42  ;;  %v158_v50 = vld [vmem:[%s11167_s0 + $0x171] sm:$0xff]  ;;  %v159_v51 = vld [vmem:[%s11167_s0 + $0x179] sm:$0xff]  ;;  %v128_v52 = vld [vmem:[%s11167_s0 + $0x81] sm:$0xff]  ;;  %v7066_v57 = vpack.c.bf16 %v127_v49, %v126_v48 }
   0xd   :  { %v7053_v53 = vld [vmem:[%s11166_s1 + $0xc] sm:$0xf]  ;;  %v160_v55 = vld [vmem:[%s11167_s0 + $0x181] sm:$0xff]  ;;  %v195_v58 = vpack.c.bf16 %v159_v51, %v158_v50  ;;  %v7071_v59 = vld [vmem:[%s11166_s1 + $0x10] sm:$0xf] }
   0xe   :  { %6304 = vmatmul.mubr.msk.bf16.gmra.mxu0 %vm204_vm1, %v6991_v32  ;;  %v129_v54 = vld [vmem:[%s11167_s0 + $0x89] sm:$0xff]  ;;  %6861 = vmatprep.subr.msk.bf16.mxu1 %vm295_vm0, %v7053_v53  ;;  %v130_v62 = vld [vmem:[%s11167_s0 + $0x91] sm:$0xff]  ;;  %v131_v63 = vld [vmem:[%s11167_s0 + $0x99] sm:$0xff] }
   0xf   :  { %6336 = vmatmul.mubr.msk.bf16.gmra.mxu1 %vm204_vm1, %v191_v33  ;;  %6307 = vmatprep.mubr.msk.bf16.mxu0 %vm204_vm1, %v6993_v34  ;;  %v161_v56 = vld [vmem:[%s11167_s0 + $0x189] sm:$0xff]  ;;  %v7073_v60 = vpack.c.bf16 %v129_v54, %v128_v52  ;;  %v162_v0 = vld [vmem:[%s11167_s0 + $0x191] sm:$0xff]  ;;  %v163_v1 = vld [vmem:[%s11167_s0 + $0x199] sm:$0xff]  ;;  %v7107_v6 = vpack.c.bf16 %v131_v63, %v130_v62  ;;  %v1639_v52 = vsel %vm295_vm0, %v7053_v53, 0 }
  0x10   :  { %6339 = vmatprep.mubr.msk.bf16.mxu1 %vm204_vm1, %v192_v35  ;;  %v196_v61 = vpack.c.bf16 %v161_v56, %v160_v55  ;;  %6862 = vmatprep.subr.msk.bf16.mxu0 %vm295_vm0, %v7071_v59  ;;  %v132_v2 = vld [vmem:[%s11167_s0 + $0xa1] sm:$0xff]  ;;  %v133_v3 = vld [vmem:[%s11167_s0 + $0xa9] sm:$0xff]  ;;  %v197_v7 = vpack.c.bf16 %v163_v1, %v162_v0  ;;  %v134_v10 = vld [vmem:[%s11167_s0 + $0xb1] sm:$0xff] }
  0x11   :  { %v164_v4 = vld [vmem:[%s11167_s0 + $0x1a1] sm:$0xff]  ;;  %v165_v5 = vld [vmem:[%s11167_s0 + $0x1a9] sm:$0xff]  ;;  %v7109_v8 = vpack.c.bf16 %v133_v3, %v132_v2  ;;  %v135_v11 = vld [vmem:[%s11167_s0 + $0xb9] sm:$0xff] }
  0x12   :  { %v198_v9 = vpack.c.bf16 %v165_v5, %v164_v4  ;;  %v166_v13 = vld [vmem:[%s11167_s0 + $0x1b1] sm:$0xff]  ;;  %v167_v14 = vld [vmem:[%s11167_s0 + $0x1b9] sm:$0xff]  ;;  %v136_v15 = vld [vmem:[%s11167_s0 + $0xc1] sm:$0xff]  ;;  %v7141_v19 = vpack.c.bf16 %v135_v11, %v134_v10  ;;  %v2157_v4 = vsel %vm295_vm0, %v7071_v59, 0 }
  0x13   :  { %v137_v16 = vld [vmem:[%s11167_s0 + $0xc9] sm:$0xff]  ;;  %v168_v17 = vld [vmem:[%s11167_s0 + $0x1c1] sm:$0xff]  ;;  %v199_v20 = vpack.c.bf16 %v167_v14, %v166_v13  ;;  %v138_v24 = vld [vmem:[%s11167_s0 + $0xd1] sm:$0xff] }
  0x14   :  { %v169_v18 = vld [vmem:[%s11167_s0 + $0x1c9] sm:$0xff]  ;;  %v7143_v22 = vpack.c.bf16 %v137_v16, %v136_v15  ;;  %v139_v25 = vld [vmem:[%s11167_s0 + $0xd9] sm:$0xff]  ;;  %v170_v26 = vld [vmem:[%s11167_s0 + $0x1d1] sm:$0xff] }
  0x15   :  { %v200_v23 = vpack.c.bf16 %v169_v18, %v168_v17  ;;  %v171_v27 = vld [vmem:[%s11167_s0 + $0x1d9] sm:$0x3f]  ;;  %v140_v28 = vld [vmem:[%s11167_s0 + $0xe1] sm:$0xff]  ;;  %v141_v29 = vld [vmem:[%s11167_s0 + $0xe9] sm:$0xff]  ;;  %v7175_v33 = vpack.c.bf16 %v139_v25, %v138_v24 }
  0x16   :  { %6308 = vmatmul.mubr.msk.bf16.gmra.mxu0 %vm204_vm1, %v7025_v44  ;;  %v21_v30 = vld [vmem:[%s11167_s0] sm:$0xff]  ;;  %v22_v31 = vld [vmem:[%s11167_s0 + $0x8] sm:$0xff]  ;;  %v201_v35 = vpack.c.bf16 %v171_v27, %v170_v26  ;;  %v7177_v36 = vpack.c.bf16 %v141_v29, %v140_v28  ;;  %v142_v38 = vld [vmem:[%s11167_s0 + $0xf1] sm:$0xff] }
  0x17   :  { %6340 = vmatmul.mubr.msk.bf16.gmra.mxu1 %vm204_vm1, %v193_v45  ;;  %6311 = vmatprep.mubr.msk.bf16.mxu0 %vm204_vm1, %v7027_v46  ;;  %v81_v37 = vpack.c.bf16 %v22_v31, %v21_v30  ;;  %v143_v39 = vld [vmem:[%s11167_s0 + $0xf9] sm:$0xff]  ;;  %v23_v40 = vld [vmem:[%s11167_s0 + $0x10] sm:$0xff]  ;;  %v26_v43 = vld [vmem:[%s11167_s0 + $0x28] sm:$0xff] }
  0x18   :  { %6343 = vmatprep.mubr.msk.bf16.mxu1 %vm204_vm1, %v194_v47  ;;  %v24_v41 = vld [vmem:[%s11167_s0 + $0x18] sm:$0xff]  ;;  %v25_v42 = vld [vmem:[%s11167_s0 + $0x20] sm:$0xff]  ;;  %v939_v47 = vld [vmem:[%s11167_s0 + $0xa] sm:$0xff]  ;;  %v7209_v48 = vpack.c.bf16 %v143_v39, %v142_v38 }
  0x19   :  { %v938_v45 = vld [vmem:[%s11167_s0 + $0x2] sm:$0xff]  ;;  %v7211_v49 = vpack.c.bf16 %v24_v41, %v23_v40  ;;  %v7213_v50 = vpack.c.bf16 %v26_v43, %v25_v42  ;;  %v27_v54 = vld [vmem:[%s11167_s0 + $0x30] sm:$0xff]  ;;  %v28_v53 = vld [vmem:[%s11167_s0 + $0x38] sm:$0xff] }
  0x1a   :  { %v998_v51 = vpack.c.bf16 %v939_v47, %v938_v45  ;;  %v7227_v55 = vld [vmem:[%s11166_s1 + $0x14] sm:$0xf]  ;;  %v30_v62 = vld [vmem:[%s11167_s0 + $0x48] sm:$0xff]  ;;  %v7255_v1 = vpack.c.bf16 %v28_v53, %v27_v54  ;;  %v32_v10 = vld [vmem:[%s11167_s0 + $0x58] sm:$0xff] }
  0x1b   :  { %v940_v56 = vld [vmem:[%s11167_s0 + $0x12] sm:$0xff]  ;;  %v942_v63 = vld [vmem:[%s11167_s0 + $0x22] sm:$0xff]  ;;  %v943_v0 = vld [vmem:[%s11167_s0 + $0x2a] sm:$0xff] }
  0x1c   :  { %v1000_v5 = vpack.c.bf16 %v943_v0, %v942_v63  ;;  %v944_v59 = vld [vmem:[%s11167_s0 + $0x32] sm:$0xff]  ;;  %v945_v11 = vld [vmem:[%s11167_s0 + $0x3a] sm:$0xff]  ;;  %v34_v14 = vld [vmem:[%s11167_s0 + $0x68] sm:$0xff] }
  0x1d   :  { %v33_v13 = vld [vmem:[%s11167_s0 + $0x60] sm:$0xff]  ;;  %v947_v16 = vld [vmem:[%s11167_s0 + $0x4a] sm:$0xff]  ;;  %v1001_v18 = vpack.c.bf16 %v945_v11, %v944_v59  ;;  %v36_v25 = vld [vmem:[%s11167_s0 + $0x78] sm:$0xff] }
  0x1e   :  { %6312 = vmatmul.mubr.msk.bf16.gmra.mxu0 %vm204_vm1, %v7066_v57  ;;  %v946_v15 = vld [vmem:[%s11167_s0 + $0x42] sm:$0xff]  ;;  %v35_v24 = vld [vmem:[%s11167_s0 + $0x70] sm:$0xff]  ;;  %v949_v27 = vld [vmem:[%s11167_s0 + $0x5a] sm:$0xff] }
  0x1f   :  { %6344 = vmatmul.mubr.msk.bf16.gmra.mxu1 %vm204_vm1, %v195_v58  ;;  %6315 = vmatprep.mubr.msk.bf16.mxu0 %vm204_vm1, %v7073_v60  ;;  %v941_v58 = vld [vmem:[%s11167_s0 + $0x1a] sm:$0xff]  ;;  %v948_v26 = vld [vmem:[%s11167_s0 + $0x52] sm:$0xff]  ;;  %v38_v29 = vld [vmem:[%s11167_s0 + $0x88] sm:$0xff] }
  0x20   :  { %6347 = vmatprep.mubr.msk.bf16.mxu1 %vm204_vm1, %v196_v61  ;;  %v29_v61 = vld [vmem:[%s11167_s0 + $0x40] sm:$0xff]  ;;  %v999_v2 = vpack.c.bf16 %v941_v58, %v940_v56  ;;  %v951_v31 = vld [vmem:[%s11167_s0 + $0x6a] sm:$0xff]  ;;  %v40_v41 = vld [vmem:[%s11167_s0 + $0x98] sm:$0xff] }
  0x21   :  { %v7257_v3 = vpack.c.bf16 %v30_v62, %v29_v61  ;;  %v37_v28 = vld [vmem:[%s11167_s0 + $0x80] sm:$0xff]  ;;  %v39_v40 = vld [vmem:[%s11167_s0 + $0x90] sm:$0xff]  ;;  %v42_v47 = vld [vmem:[%s11167_s0 + $0xa8] sm:$0xff] }
  0x22   :  { %v950_v30 = vld [vmem:[%s11167_s0 + $0x62] sm:$0xff]  ;;  %v7334_v38 = vpack.c.bf16 %v38_v29, %v37_v28  ;;  %v952_v42 = vld [vmem:[%s11167_s0 + $0x72] sm:$0xff]  ;;  %v953_v43 = vld [vmem:[%s11167_s0 + $0x7a] sm:$0xff]  ;;  %v7366_v54 = vpack.c.bf16 %v40_v41, %v39_v40 }
  0x23   :  { %v1004_v39 = vpack.c.bf16 %v951_v31, %v950_v30  ;;  %v41_v45 = vld [vmem:[%s11167_s0 + $0xa0] sm:$0xff]  ;;  %v1005_v53 = vpack.c.bf16 %v953_v43, %v952_v42  ;;  %v43_v61 = vld [vmem:[%s11167_s0 + $0xb0] sm:$0xff]  ;;  %v44_v62 = vld [vmem:[%s11167_s0 + $0xb8] sm:$0xff] }
  0x24   :  { %v7368_v56 = vpack.c.bf16 %v42_v47, %v41_v45  ;;  %v956_v63 = vld [vmem:[%s11167_s0 + $0x92] sm:$0xff]  ;;  %v957_v0 = vld [vmem:[%s11167_s0 + $0x9a] sm:$0xff]  ;;  %v54_v42 = vld [vmem:[%s11167_s0 + $0x108] sm:$0xff] }
  0x25   :  { %v1007_v59 = vpack.c.bf16 %v957_v0, %v956_v63  ;;  %v51_v31 = vld [vmem:[%s11167_s0 + $0xf0] sm:$0xff]  ;;  %v965_v40 = vld [vmem:[%s11167_s0 + $0xda] sm:$0xff]  ;;  %v966_v43 = vld [vmem:[%s11167_s0 + $0xe2] sm:$0xff] }
  0x26   :  { %6316 = vmatmul.mubr.msk.bf16.gmra.mxu0 %vm204_vm1, %v7107_v6  ;;  %v53_v41 = vld [vmem:[%s11167_s0 + $0x100] sm:$0xff]  ;;  %v967_v45 = vld [vmem:[%s11167_s0 + $0xea] sm:$0xff] }
  0x27   :  { %6348 = vmatmul.mubr.msk.bf16.gmra.mxu1 %vm204_vm1, %v197_v7  ;;  %6319 = vmatprep.mubr.msk.bf16.mxu0 %vm204_vm1, %v7109_v8  ;;  %v7264_v7 = vld [vmem:[%s11166_s1 + $0x18] sm:$0xf]  ;;  %v57_v0 = vld [vmem:[%s11167_s0 + $0x120] sm:$0xff] }
  0x28   :  { %6351 = vmatprep.mubr.msk.bf16.mxu1 %vm204_vm1, %v198_v9  ;;  %v31_v9 = vld [vmem:[%s11167_s0 + $0x50] sm:$0xff]  ;;  %v969_v63 = vld [vmem:[%s11167_s0 + $0xfa] sm:$0xff] }
  0x29   :  { %v7298_v17 = vpack.c.bf16 %v32_v10, %v31_v9  ;;  %v959_v9 = vld [vmem:[%s11167_s0 + $0xaa] sm:$0xff]  ;;  %v7400_v10 = vpack.c.bf16 %v44_v62, %v43_v61  ;;  %v56_v61 = vld [vmem:[%s11167_s0 + $0x118] sm:$0xff] }
  0x2a   :  { %v968_v62 = vld [vmem:[%s11167_s0 + $0xf2] sm:$0xff] }
  0x2e   :  { %6320 = vmatmul.mubr.msk.bf16.gmra.mxu0 %vm204_vm1, %v7141_v19 }
  0x2f   :  { %6352 = vmatmul.mubr.msk.bf16.gmra.mxu1 %vm204_vm1, %v199_v20  ;;  %6323 = vmatprep.mubr.msk.bf16.mxu0 %vm204_vm1, %v7143_v22  ;;  %v7300_v20 = vpack.c.bf16 %v34_v14, %v33_v13  ;;  %v47_v14 = vld [vmem:[%s11167_s0 + $0xd0] sm:$0xff] }
  0x30   :  { %6355 = vmatprep.mubr.msk.bf16.mxu1 %vm204_vm1, %v200_v23  ;;  %v1002_v23 = vpack.c.bf16 %v947_v16, %v946_v15  ;;  %v48_v15 = vld [vmem:[%s11167_s0 + $0xd8] sm:$0xff] }
  0x31   :  { %v960_v16 = vld [vmem:[%s11167_s0 + $0xb2] sm:$0xff] }
  0x36   :  { %6324 = vmatmul.mubr.msk.bf16.gmra.mxu0 %vm204_vm1, %v7175_v33 }
  0x37   :  { %6356 = vmatmul.mubr.msk.bf16.gmra.mxu1 %vm204_vm1, %v201_v35  ;;  %6327 = vmatprep.mubr.msk.bf16.mxu0 %vm204_vm1, %v7177_v36  ;;  %v7332_v35 = vpack.c.bf16 %v36_v25, %v35_v24  ;;  %v50_v24 = vld [vmem:[%s11167_s0 + $0xe8] sm:$0xff] }
  0x38   :  { %6361 = vmatprep.mubr.msk.bf16.mxu1 %vm204_vm1, %v81_v37  ;;  %v1003_v37 = vpack.c.bf16 %v949_v27, %v948_v26  ;;  %v962_v25 = vld [vmem:[%s11167_s0 + $0xc2] sm:$0xff]  ;;  %v963_v26 = vld [vmem:[%s11167_s0 + $0xca] sm:$0xff]  ;;  %v7434_v27 = vpack.c.bf16 %v48_v15, %v47_v14 }
  0x39   :  { %v1010_v30 = vpack.c.bf16 %v963_v26, %v962_v25  ;;  %v59_v15 = vld [vmem:[%s11167_s0 + $0x130] sm:$0xff]  ;;  %v62_v25 = vld [vmem:[%s11167_s0 + $0x148] sm:$0xff] }
  0x3a   :  { %v974_v26 = vld [vmem:[%s11167_s0 + $0x122] sm:$0xff] }
  0x3e   :  { %6328 = vmatmul.mubr.msk.bf16.gmra.mxu0 %vm204_vm1, %v7209_v48 }
  0x3f   :  { %6362 = vmatmul.mubr.msk.bf16.vlgmr.msra.gmra.mxu1 %vm204_vm1, %v7211_v49  ;;  %6423 = vmatprep.mubr.msk.bf16.mxu0 %vm204_vm1, %v998_v51  ;;  %v954_v51 = vld [vmem:[%s11167_s0 + $0x82] sm:$0xff] }
  0x40   :  { %6365 = vmatprep.mubr.msk.bf16.mxu1 %vm204_vm1, %v7213_v50  ;;  %6484 = vmatpush3.bf16.msra.mxu1 %v1639_v52  ;;  %v955_v52 = vld [vmem:[%s11167_s0 + $0x8a] sm:$0xff] }
  0x41   :  { %6863 = vmatprep.subr.msk.bf16.mxu1 %vm295_vm0, %v7227_v55  ;;  %v1006_v58 = vpack.c.bf16 %v955_v52, %v954_v51  ;;  %v7470_v52 = vpack.c.bf16 %v54_v42, %v53_v41  ;;  %v64_v41 = vld [vmem:[%s11167_s0 + $0x158] sm:$0xff] }
  0x42   :  { %v976_v42 = vld [vmem:[%s11167_s0 + $0x132] sm:$0xff] }
  0x46   :  { %6424 = vmatmul.mubr.msk.bf16.vlgmr.msra.gmra.mxu0 %vm204_vm1, %v999_v2  ;;  %v45_v2 = vld [vmem:[%s11167_s0 + $0xc0] sm:$0xff] }
  0x47   :  { %6366 = vmatmul.mubr.msk.bf16.gmra.mxu1 %vm204_vm1, %v7255_v1  ;;  %6546 = vmatpush3.bf16.msra.mxu0 %v2157_v4  ;;  %v46_v4 = vld [vmem:[%s11167_s0 + $0xc8] sm:$0xff] }
  0x48   :  { %6369 = vmatprep.mubr.msk.bf16.mxu1 %vm204_vm1, %v7257_v3  ;;  %6427 = vmatprep.mubr.msk.bf16.mxu0 %vm204_vm1, %v1000_v5  ;;  %v958_v5 = vld [vmem:[%s11167_s0 + $0xa2] sm:$0xff]  ;;  %v7402_v11 = vpack.c.bf16 %v46_v4, %v45_v2 }
  0x49   :  { %6864 = vmatprep.subr.msk.bf16.mxu0 %vm295_vm0, %v7264_v7  ;;  %v1008_v13 = vpack.c.bf16 %v959_v9, %v958_v5  ;;  %v58_v2 = vld [vmem:[%s11167_s0 + $0x128] sm:$0xff] }
  0x4a   :  { %v970_v4 = vld [vmem:[%s11167_s0 + $0x102] sm:$0xff]  ;;  %v971_v5 = vld [vmem:[%s11167_s0 + $0x10a] sm:$0xff] }
  0x4b   :  { %v1014_v14 = vpack.c.bf16 %v971_v5, %v970_v4  ;;  %v68_v4 = vld [vmem:[%s11167_s0 + $0x178] sm:$0xff] }
  0x4c   :  { %v980_v5 = vld [vmem:[%s11167_s0 + $0x152] sm:$0xff] }
  0x4e   :  { %6428 = vmatmul.mubr.msk.bf16.gmra.mxu0 %vm204_vm1, %v1001_v18  ;;  %v961_v18 = vld [vmem:[%s11167_s0 + $0xba] sm:$0xff] }
  0x4f   :  { %6370 = vmatmul.mubr.msk.bf16.gmra.mxu1 %vm204_vm1, %v7298_v17  ;;  %6431 = vmatprep.mubr.msk.bf16.mxu0 %vm204_vm1, %v1002_v23  ;;  %v49_v23 = vld [vmem:[%s11167_s0 + $0xe0] sm:$0xff]  ;;  %v1009_v28 = vpack.c.bf16 %v961_v18, %v960_v16  ;;  %v60_v16 = vld [vmem:[%s11167_s0 + $0x138] sm:$0xff] }
  0x50   :  { %6373 = vmatprep.mubr.msk.bf16.mxu1 %vm204_vm1, %v7300_v20  ;;  %v7436_v29 = vpack.c.bf16 %v50_v24, %v49_v23  ;;  %v972_v18 = vld [vmem:[%s11167_s0 + $0x112] sm:$0xff]  ;;  %v973_v23 = vld [vmem:[%s11167_s0 + $0x11a] sm:$0xff] }
  0x51   :  { %v61_v24 = vld [vmem:[%s11167_s0 + $0x140] sm:$0xff] }
  0x56   :  { %6432 = vmatmul.mubr.msk.bf16.gmra.mxu0 %vm204_vm1, %v1003_v37  ;;  %v52_v37 = vld [vmem:[%s11167_s0 + $0xf8] sm:$0xff] }
  0x57   :  { %6374 = vmatmul.mubr.msk.bf16.gmra.mxu1 %vm204_vm1, %v7332_v35  ;;  %6435 = vmatprep.mubr.msk.bf16.mxu0 %vm204_vm1, %v1004_v39  ;;  %v964_v39 = vld [vmem:[%s11167_s0 + $0xd2] sm:$0xff]  ;;  %v7468_v47 = vpack.c.bf16 %v52_v37, %v51_v31  ;;  %v1015_v31 = vpack.c.bf16 %v973_v23, %v972_v18  ;;  %v7538_v37 = vpack.c.bf16 %v62_v25, %v61_v24  ;;  %v983_v18 = vld [vmem:[%s11167_s0 + $0x16a] sm:$0xff] }
  0x58   :  { %6377 = vmatprep.mubr.msk.bf16.mxu1 %vm204_vm1, %v7334_v38  ;;  %v1011_v51 = vpack.c.bf16 %v965_v40, %v964_v39  ;;  %v63_v40 = vld [vmem:[%s11167_s0 + $0x150] sm:$0xff] }
  0x5e   :  { %6436 = vmatmul.mubr.msk.bf16.gmra.mxu0 %vm204_vm1, %v1005_v53  ;;  %v1012_v53 = vpack.c.bf16 %v967_v45, %v966_v43  ;;  %v977_v43 = vld [vmem:[%s11167_s0 + $0x13a] sm:$0xff] }
  0x5f   :  { %6378 = vmatmul.mubr.msk.bf16.gmra.mxu1 %vm204_vm1, %v7366_v54  ;;  %6439 = vmatprep.mubr.msk.bf16.mxu0 %vm204_vm1, %v1006_v58  ;;  %v55_v58 = vld [vmem:[%s11167_s0 + $0x110] sm:$0xff]  ;;  %v65_v45 = vld [vmem:[%s11167_s0 + $0x160] sm:$0xff] }
  0x60   :  { %6381 = vmatprep.mubr.msk.bf16.mxu1 %vm204_vm1, %v7368_v56  ;;  %v7502_v9 = vpack.c.bf16 %v56_v61, %v55_v58  ;;  %v979_v58 = vld [vmem:[%s11167_s0 + $0x14a] sm:$0xff]  ;;  %v7570_v61 = vpack.c.bf16 %v64_v41, %v63_v40  ;;  %v985_v40 = vld [vmem:[%s11167_s0 + $0x17a] sm:$0xff] }
  0x61   :  { %v73_v41 = vld [vmem:[%s11167_s0 + $0x1a0] sm:$0xff] }
  0x66   :  { %6440 = vmatmul.mubr.msk.bf16.gmra.mxu0 %vm204_vm1, %v1007_v59  ;;  %v1013_v59 = vpack.c.bf16 %v969_v63, %v968_v62  ;;  %v1017_v62 = vpack.c.bf16 %v977_v43, %v976_v42  ;;  %v74_v42 = vld [vmem:[%s11167_s0 + $0x1a8] sm:$0xff] }
  0x67   :  { %6382 = vmatmul.mubr.msk.bf16.gmra.mxu1 %vm204_vm1, %v7400_v10  ;;  %6443 = vmatprep.mubr.msk.bf16.mxu0 %vm204_vm1, %v1008_v13  ;;  %v7504_v13 = vpack.c.bf16 %v58_v2, %v57_v0  ;;  %v67_v2 = vld [vmem:[%s11167_s0 + $0x170] sm:$0xff]  ;;  %v986_v43 = vld [vmem:[%s11167_s0 + $0x182] sm:$0xff] }
  0x68   :  { %6385 = vmatprep.mubr.msk.bf16.mxu1 %vm204_vm1, %v7402_v11  ;;  %v7604_v23 = vpack.c.bf16 %v68_v4, %v67_v2  ;;  %v76_v2 = vld [vmem:[%s11167_s0 + $0x1b8] sm:$0xff] }
  0x69   :  { %v988_v4 = vld [vmem:[%s11167_s0 + $0x192] sm:$0xff] }
  0x6e   :  { %6444 = vmatmul.mubr.msk.bf16.gmra.mxu0 %vm204_vm1, %v1009_v28  ;;  %v975_v28 = vld [vmem:[%s11167_s0 + $0x12a] sm:$0xff] }
  0x6f   :  { %6386 = vmatmul.mubr.msk.bf16.gmra.mxu1 %vm204_vm1, %v7434_v27  ;;  %6447 = vmatprep.mubr.msk.bf16.mxu0 %vm204_vm1, %v1010_v30  ;;  %v7536_v30 = vpack.c.bf16 %v60_v16, %v59_v15  ;;  %v1016_v39 = vpack.c.bf16 %v975_v28, %v974_v26  ;;  %v70_v15 = vld [vmem:[%s11167_s0 + $0x188] sm:$0xff]  ;;  %v71_v28 = vld [vmem:[%s11167_s0 + $0x190] sm:$0xff] }
  0x70   :  { %6389 = vmatprep.mubr.msk.bf16.mxu1 %vm204_vm1, %v7436_v29  ;;  %v982_v16 = vld [vmem:[%s11167_s0 + $0x162] sm:$0xff] }
  0x71   :  { %v1020_v26 = vpack.c.bf16 %v983_v18, %v982_v16  ;;  %v991_v16 = vld [vmem:[%s11167_s0 + $0x1aa] sm:$0xff] }
  0x76   :  { %6448 = vmatmul.mubr.msk.bf16.gmra.mxu0 %vm204_vm1, %v1011_v51  ;;  %v66_v51 = vld [vmem:[%s11167_s0 + $0x168] sm:$0xff] }
  0x77   :  { %6390 = vmatmul.mubr.msk.bf16.gmra.mxu1 %vm204_vm1, %v7468_v47  ;;  %6451 = vmatprep.mubr.msk.bf16.mxu0 %vm204_vm1, %v1012_v53  ;;  %v978_v53 = vld [vmem:[%s11167_s0 + $0x142] sm:$0xff]  ;;  %v7572_v63 = vpack.c.bf16 %v66_v51, %v65_v45  ;;  %v987_v45 = vld [vmem:[%s11167_s0 + $0x18a] sm:$0xff] }
  0x78   :  { %6393 = vmatprep.mubr.msk.bf16.mxu1 %vm204_vm1, %v7470_v52  ;;  %v1018_v0 = vpack.c.bf16 %v979_v58, %v978_v53  ;;  %v7640_v58 = vpack.c.bf16 %v74_v42, %v73_v41  ;;  %v993_v41 = vld [vmem:[%s11167_s0 + $0x1ba] sm:$0xff]  ;;  %v994_v42 = vld [vmem:[%s11167_s0 + $0x1c2] sm:$0xff] }
  0x7e   :  { %6452 = vmatmul.mubr.msk.bf16.gmra.mxu0 %vm204_vm1, %v1013_v59  ;;  %v981_v59 = vld [vmem:[%s11167_s0 + $0x15a] sm:$0xff] }
  0x7f   :  { %6394 = vmatmul.mubr.msk.bf16.gmra.mxu1 %vm204_vm1, %v7502_v9  ;;  %6455 = vmatprep.mubr.msk.bf16.mxu0 %vm204_vm1, %v1014_v14  ;;  %v69_v14 = vld [vmem:[%s11167_s0 + $0x180] sm:$0xff]  ;;  %v1019_v24 = vpack.c.bf16 %v981_v59, %v980_v5 }
  0x80   :  { %6397 = vmatprep.mubr.msk.bf16.mxu1 %vm204_vm1, %v7504_v13  ;;  %v7606_v25 = vpack.c.bf16 %v70_v15, %v69_v14  ;;  %v989_v5 = vld [vmem:[%s11167_s0 + $0x19a] sm:$0xff]  ;;  %v78_v14 = vld [vmem:[%s11167_s0 + $0x1c8] sm:$0xff] }
  0x81   :  { %v77_v59 = vld [vmem:[%s11167_s0 + $0x1c0] sm:$0xff] }
  0x82   :  { %v990_v15 = vld [vmem:[%s11167_s0 + $0x1a2] sm:$0xff] }
  0x86   :  { %6456 = vmatmul.mubr.msk.bf16.gmra.mxu0 %vm204_vm1, %v1015_v31  ;;  %v72_v31 = vld [vmem:[%s11167_s0 + $0x198] sm:$0xff] }
  0x87   :  { %6398 = vmatmul.mubr.msk.bf16.gmra.mxu1 %vm204_vm1, %v7536_v30  ;;  %6459 = vmatprep.mubr.msk.bf16.mxu0 %vm204_vm1, %v1016_v39  ;;  %v984_v39 = vld [vmem:[%s11167_s0 + $0x172] sm:$0xff]  ;;  %v7638_v51 = vpack.c.bf16 %v72_v31, %v71_v28  ;;  %v1024_v28 = vpack.c.bf16 %v991_v16, %v990_v15 }
  0x88   :  { %6401 = vmatprep.mubr.msk.bf16.mxu1 %vm204_vm1, %v7538_v37  ;;  %v1021_v53 = vpack.c.bf16 %v985_v40, %v984_v39  ;;  %v7682_v31 = vld [vmem:[%s11167_s0 + $0x1d0] sm:$0xff]  ;;  %v80_v39 = vld [vmem:[%s11167_s0 + $0x1d8] sm:$0x3f] }
  0x89   :  { %v992_v40 = vld [vmem:[%s11167_s0 + $0x1b2] sm:$0xff] }
  0x8e   :  { %6460 = vmatmul.mubr.msk.bf16.gmra.mxu0 %vm204_vm1, %v1017_v62  ;;  %v1022_v62 = vpack.c.bf16 %v987_v45, %v986_v43  ;;  %v995_v43 = vld [vmem:[%s11167_s0 + $0x1ca] sm:$0xff]  ;;  %v110_v45 = vpack.c.bf16 %v80_v39, %v7682_v31 }
  0x8f   :  { %6402 = vmatmul.mubr.msk.bf16.gmra.mxu1 %vm204_vm1, %v7570_v61  ;;  %6463 = vmatprep.mubr.msk.bf16.mxu0 %vm204_vm1, %v1018_v0  ;;  %v75_v0 = vld [vmem:[%s11167_s0 + $0x1b0] sm:$0xff] }
  0x90   :  { %6405 = vmatprep.mubr.msk.bf16.mxu1 %vm204_vm1, %v7572_v63  ;;  %v7672_v18 = vpack.c.bf16 %v76_v2, %v75_v0  ;;  %v996_v0 = vld [vmem:[%s11167_s0 + $0x1d2] sm:$0xff]  ;;  %v997_v2 = vld [vmem:[%s11167_s0 + $0x1da] sm:$0x3f] }
  0x96   :  { %6464 = vmatmul.mubr.msk.bf16.gmra.mxu0 %vm204_vm1, %v1019_v24  ;;  %v1023_v24 = vpack.c.bf16 %v989_v5, %v988_v4  ;;  %v1027_v4 = vpack.c.bf16 %v997_v2, %v996_v0  ;;  %v2675_v5 = vsel %vm295_vm0, %v7227_v55, 0  ;;  %v3193_v55 = vsel %vm295_vm0, %v7264_v7, 0 }
  0x97   :  { %6406 = vmatmul.mubr.msk.bf16.gmra.mxu1 %vm204_vm1, %v7604_v23  ;;  %6467 = vmatprep.mubr.msk.bf16.mxu0 %vm204_vm1, %v1020_v26  ;;  %v7674_v26 = vpack.c.bf16 %v78_v14, %v77_v59 }
  0x98   :  { %6409 = vmatprep.mubr.msk.bf16.mxu1 %vm204_vm1, %v7606_v25 }
  0x9e   :  { %6468 = vmatmul.mubr.msk.bf16.gmra.mxu0 %vm204_vm1, %v1021_v53  ;;  %v1025_v53 = vpack.c.bf16 %v993_v41, %v992_v40 }
  0x9f   :  { %6410 = vmatmul.mubr.msk.bf16.gmra.mxu1 %vm204_vm1, %v7638_v51  ;;  %6471 = vmatprep.mubr.msk.bf16.mxu0 %vm204_vm1, %v1022_v62  ;;  %v1026_v62 = vpack.c.bf16 %v995_v43, %v994_v42 }
  0xa0   :  { %6413 = vmatprep.mubr.msk.bf16.mxu1 %vm204_vm1, %v7640_v58 }
  0xa6   :  { %6472 = vmatmul.mubr.msk.bf16.gmra.mxu0 %vm204_vm1, %v1023_v24 }
  0xa7   :  { %6414 = vmatmul.mubr.msk.bf16.gmra.mxu1 %vm204_vm1, %v7672_v18  ;;  %6475 = vmatprep.mubr.msk.bf16.mxu0 %vm204_vm1, %v1024_v28 }
  0xa8   :  { %6417 = vmatprep.mubr.msk.bf16.mxu1 %vm204_vm1, %v7674_v26 }
  0xae   :  { %6476 = vmatmul.mubr.msk.bf16.gmra.mxu0 %vm204_vm1, %v1025_v53 }
  0xaf   :  { %6418 = vmatmul.mubr.msk.bf16.gmra.mxu1 %vm204_vm1, %v110_v45  ;;  %6479 = vmatprep.mubr.msk.bf16.mxu0 %vm204_vm1, %v1026_v62 }
  0xb0   :  { %6485 = vmatprep.mubr.msk.bf16.mxu1 %vm204_vm1, %v7211_v49  ;;  %v7722_v49 = vld [vmem:[%s11166_s1 + $0x1c] sm:$0xf] }
  0xb6   :  { %6480 = vmatmul.mubr.msk.bf16.gmra.mxu0 %vm204_vm1, %v1027_v4 }
  0xb7   :  { %6486 = vmatmul.mubr.msk.bf16.vlgmr.msra.gmra.mxu1 %vm204_vm1, %v7213_v50  ;;  %6547 = vmatprep.mubr.msk.bf16.mxu0 %vm204_vm1, %v6934_v12  ;;  %v7735_v50 = vld [vmem:[%s11166_s1 + $0x20] sm:$0xf] }
  0xb8   :  { %6489 = vmatprep.mubr.msk.bf16.mxu1 %vm204_vm1, %v7255_v1  ;;  %6608 = vmatpush3.bf16.msra.mxu1 %v2675_v5 }
  0xb9   :  { %6865 = vmatprep.subr.msk.bf16.mxu1 %vm295_vm0, %v7722_v49 }
  0xbe   :  { %6548 = vmatmul.mubr.msk.bf16.vlgmr.msra.gmra.mxu0 %vm204_vm1, %v6960_v21 }
  0xbf   :  { %6490 = vmatmul.mubr.msk.bf16.gmra.mxu1 %vm204_vm1, %v7257_v3  ;;  %6670 = vmatpush3.bf16.msra.mxu0 %v3193_v55 }
  0xc0   :  { %6493 = vmatprep.mubr.msk.bf16.mxu1 %vm204_vm1, %v7298_v17  ;;  %6551 = vmatprep.mubr.msk.bf16.mxu0 %vm204_vm1, %v6991_v32 }
  0xc1   :  { %6866 = vmatprep.subr.msk.bf16.mxu0 %vm295_vm0, %v7735_v50 }
  0xc6   :  { %v7747_v12 = vpop.f32.mrf.mxu0  ;;  %6552 = vmatmul.mubr.msk.bf16.gmra.mxu0 %vm204_vm1, %v6993_v34 }
  0xc7   :  { %v7749_v1 = vpop.f32.mrf.mxu1  ;;  %6494 = vmatmul.mubr.msk.bf16.gmra.mxu1 %vm204_vm1, %v7300_v20  ;;  %6555 = vmatprep.mubr.msk.bf16.mxu0 %vm204_vm1, %v7025_v44 }
  0xc8   :  { %6497 = vmatprep.mubr.msk.bf16.mxu1 %vm204_vm1, %v7332_v35  ;;  %v7759_v21 = vpop.f32.mrf.mxu0 }
  0xc9   :  { %v7761_v32 = vpop.f32.mrf.mxu1 }
  0xca   :  { %v7763_v3 = vpop.f32.mrf.mxu0 }
  0xcb   :  { %v7765_v7 = vpop.f32.mrf.mxu1 }
  0xcc   :  { %v7767_v17 = vpop.f32.mrf.mxu0 }
  0xcd   :  { %v7769_v20 = vpop.f32.mrf.mxu1 }
  0xce   :  { %v7771_v59 = vpop.f32.mrf.mxu0  ;;  %6556 = vmatmul.mubr.msk.bf16.gmra.mxu0 %vm204_vm1, %v7027_v46 }
  0xcf   :  { %v7773_v34 = vpop.f32.mrf.mxu1  ;;  %6498 = vmatmul.mubr.msk.bf16.gmra.mxu1 %vm204_vm1, %v7334_v38  ;;  %6559 = vmatprep.mubr.msk.bf16.mxu0 %vm204_vm1, %v7066_v57 }
  0xd0   :  { %6501 = vmatprep.mubr.msk.bf16.mxu1 %vm204_vm1, %v7366_v54  ;;  %v7783_v44 = vpop.f32.mrf.mxu0 }
  0xd1   :  { %v7785_v35 = vpop.f32.mrf.mxu1 }
  0xd2   :  { %v7787_v14 = vpop.f32.mrf.mxu0 }
  0xd3   :  { %v7789_v15 = vpop.f32.mrf.mxu1 }
  0xd4   :  { %v7791_v16 = vpop.f32.mrf.mxu0 }
  0xd5   :  { %v7793_v38 = vpop.f32.mrf.mxu1 }
  0xd6   :  { %v7795_v24 = vpop.f32.mrf.mxu0  ;;  %6560 = vmatmul.mubr.msk.bf16.gmra.mxu0 %vm204_vm1, %v7073_v60 }
  0xd7   :  { %v7797_v46 = vpop.f32.mrf.mxu1  ;;  %6502 = vmatmul.mubr.msk.bf16.gmra.mxu1 %vm204_vm1, %v7368_v56  ;;  %6563 = vmatprep.mubr.msk.bf16.mxu0 %vm204_vm1, %v7107_v6 }
  0xd8   :  { %11276 = vst [vmem:[#allocation2_spill] sm:$0xff] %v7797_v46  ;;  %6505 = vmatprep.mubr.msk.bf16.mxu1 %vm204_vm1, %v7400_v10  ;;  %v7807_v57 = vpop.f32.mrf.mxu0 }
  0xd9   :  { %v7809_v54 = vpop.f32.mrf.mxu1 }
  0xda   :  { %11277 = vst [vmem:[#allocation3_spill] sm:$0xff] %v7809_v54  ;;  %v7811_v28 = vpop.f32.mrf.mxu0 }
  0xdb   :  { %v7813_v39 = vpop.f32.mrf.mxu1 }
  0xdc   :  { %11278 = vst [vmem:[#allocation4_spill] sm:$0xff] %v7813_v39  ;;  %v7815_v40 = vpop.f32.mrf.mxu0 }
  0xdd   :  { %v7817_v56 = vpop.f32.mrf.mxu1 }
  0xde   :  { %11279 = vst [vmem:[#allocation5_spill] sm:$0xff] %v7817_v56  ;;  %v7819_v41 = vpop.f32.mrf.mxu0  ;;  %6564 = vmatmul.mubr.msk.bf16.gmra.mxu0 %vm204_vm1, %v7109_v8 }
  0xdf   :  { %v7821_v60 = vpop.f32.mrf.mxu1  ;;  %6506 = vmatmul.mubr.msk.bf16.gmra.mxu1 %vm204_vm1, %v7402_v11  ;;  %6567 = vmatprep.mubr.msk.bf16.mxu0 %vm204_vm1, %v7141_v19 }
  0xe0   :  { %11280 = vst [vmem:[#allocation6_spill] sm:$0xff] %v7821_v60  ;;  %6509 = vmatprep.mubr.msk.bf16.mxu1 %vm204_vm1, %v7434_v27  ;;  %v7831_v6 = vpop.f32.mrf.mxu0 }
  0xe1   :  { %v7833_v10 = vpop.f32.mrf.mxu1 }
  0xe2   :  { %11281 = vst [vmem:[#allocation7_spill] sm:$0xff] %v7833_v10  ;;  %v7835_v42 = vpop.f32.mrf.mxu0 }
  0xe3   :  { %v7837_v43 = vpop.f32.mrf.mxu1 }
  0xe4   :  { %11282 = vst [vmem:[#allocation8_spill] sm:$0xff] %v7837_v43  ;;  %v7839_v45 = vpop.f32.mrf.mxu0 }
  0xe5   :  { %v7841_v11 = vpop.f32.mrf.mxu1 }
  0xe6   :  { %11283 = vst [vmem:[#allocation9_spill] sm:$0xff] %v7841_v11  ;;  %v7843_v53 = vpop.f32.mrf.mxu0  ;;  %6568 = vmatmul.mubr.msk.bf16.gmra.mxu0 %vm204_vm1, %v7143_v22 }
  0xe7   :  { %v7845_v8 = vpop.f32.mrf.mxu1  ;;  %6510 = vmatmul.mubr.msk.bf16.gmra.mxu1 %vm204_vm1, %v7436_v29  ;;  %6571 = vmatprep.mubr.msk.bf16.mxu0 %vm204_vm1, %v7175_v33  ;;  %v2004_v33 = vld [vmem:[%s11167_s0 + $0x101] sm:$0xff] }
  0xe8   :  { %11284 = vst [vmem:[#allocation10_spill] sm:$0xff] %v7845_v8  ;;  %6513 = vmatprep.mubr.msk.bf16.mxu1 %vm204_vm1, %v7468_v47  ;;  %v7855_v19 = vpop.f32.mrf.mxu0  ;;  %v2005_v47 = vld [vmem:[%s11167_s0 + $0x109] sm:$0xff] }
  0xe9   :  { %v7857_v27 = vpop.f32.mrf.mxu1 }
  0xea   :  { %11285 = vst [vmem:[#allocation11_spill] sm:$0xff] %v7857_v27  ;;  %v7859_v62 = vpop.f32.mrf.mxu0 }
  0xeb   :  { %v7861_v0 = vpop.f32.mrf.mxu1 }
  0xec   :  { %11286 = vst [vmem:[#allocation12_spill] sm:$0xff] %v7861_v0  ;;  %v7863_v2 = vpop.f32.mrf.mxu0 }
  0xed   :  { %v7865_v29 = vpop.f32.mrf.mxu1 }
  0xee   :  { %11287 = vst [vmem:[#allocation13_spill] sm:$0xff] %v7865_v29  ;;  %v7867_v4 = vpop.f32.mrf.mxu0  ;;  %6572 = vmatmul.mubr.msk.bf16.gmra.mxu0 %vm204_vm1, %v7177_v36  ;;  %v2006_v36 = vld [vmem:[%s11167_s0 + $0x111] sm:$0xff] }
  0xef   :  { %v7869_v22 = vpop.f32.mrf.mxu1  ;;  %6514 = vmatmul.mubr.msk.bf16.gmra.mxu1 %vm204_vm1, %v7470_v52  ;;  %6575 = vmatprep.mubr.msk.bf16.mxu0 %vm204_vm1, %v7209_v48  ;;  %v2007_v48 = vld [vmem:[%s11167_s0 + $0x119] sm:$0xff] }
  0xf0   :  { %11288 = vst [vmem:[#allocation14_spill] sm:$0xff] %v7869_v22  ;;  %6517 = vmatprep.mubr.msk.bf16.mxu1 %vm204_vm1, %v7502_v9  ;;  %v7885_v5 = vpop.f32.mrf.mxu0  ;;  %v2049_v22 = vpack.c.bf16 %v2005_v47, %v2004_v33  ;;  %v2050_v29 = vpack.c.bf16 %v2007_v48, %v2006_v36  ;;  %v2008_v33 = vld [vmem:[%s11167_s0 + $0x121] sm:$0xff]  ;;  %v2009_v47 = vld [vmem:[%s11167_s0 + $0x129] sm:$0xff] }
  0xf1   :  { %v7887_v52 = vpop.f32.mrf.mxu1 }
  0xf2   :  { %11289 = vst [vmem:[#allocation15_spill] sm:$0xff] %v7887_v52  ;;  %v7895_v9 = vpop.f32.mrf.mxu0 }
  0xf3   :  { %v7897_v55 = vpop.f32.mrf.mxu1 }
  0xf4   :  { %11290 = vst [vmem:[#allocation16_spill] sm:$0xff] %v7897_v55  ;;  %v7899_v0 = vpop.f32.mrf.mxu0 }
  0xf5   :  { %v7901_v27 = vpop.f32.mrf.mxu1 }
  0xf6   :  { %11291 = vst [vmem:[#allocation17_spill] sm:$0xff] %v7901_v27  ;;  %v7903_v8 = vpop.f32.mrf.mxu0  ;;  %6576 = vmatmul.mubr.msk.bf16.gmra.mxu0 %vm204_vm1, %v2049_v22 }
  0xf7   :  { %v7905_v52 = vpop.f32.mrf.mxu1  ;;  %6518 = vmatmul.mubr.msk.bf16.gmra.mxu1 %vm204_vm1, %v7504_v13  ;;  %6579 = vmatprep.mubr.msk.bf16.mxu0 %vm204_vm1, %v2050_v29  ;;  %v2010_v13 = vld [vmem:[%s11167_s0 + $0x131] sm:$0xff] }
  0xf8   :  { %11292 = vst [vmem:[#allocation18_spill] sm:$0xff] %v7905_v52  ;;  %6521 = vmatprep.mubr.msk.bf16.mxu1 %vm204_vm1, %v7536_v30  ;;  %v7919_v36 = vpop.f32.mrf.mxu0  ;;  %v2011_v30 = vld [vmem:[%s11167_s0 + $0x139] sm:$0xff]  ;;  %v2051_v52 = vpack.c.bf16 %v2009_v47, %v2008_v33  ;;  %v2012_v33 = vld [vmem:[%s11167_s0 + $0x141] sm:$0xff]  ;;  %v2013_v47 = vld [vmem:[%s11167_s0 + $0x149] sm:$0xff] }
  0xf9   :  { %v7921_v48 = vpop.f32.mrf.mxu1  ;;  %v2052_v27 = vpack.c.bf16 %v2011_v30, %v2010_v13  ;;  %v2053_v30 = vpack.c.bf16 %v2013_v47, %v2012_v33 }
  0xfa   :  { %11293 = vst [vmem:[#allocation19_spill] sm:$0xff] %v7921_v48  ;;  %v7929_v29 = vpop.f32.mrf.mxu0 }
  0xfb   :  { %v7931_v22 = vpop.f32.mrf.mxu1 }
  0xfc   :  { %11294 = vst [vmem:[#allocation20_spill] sm:$0xff] %v7931_v22  ;;  %v7933_v55 = vpop.f32.mrf.mxu0  ;;  %v4564_v22 = vld [vmem:[%s11168_s4] sm:$0xff] }
  0xfd   :  { %v7935_v11 = vpop.f32.mrf.mxu1 }
  0xfe   :  { %11295 = vst [vmem:[#allocation21_spill] sm:$0xff] %v7935_v11  ;;  %v7937_v43 = vpop.f32.mrf.mxu0  ;;  %6580 = vmatmul.mubr.msk.bf16.gmra.mxu0 %vm204_vm1, %v2051_v52  ;;  %v6872_v11 = vmov 0  }
  0xff   :  { %v6363_v48 = vpop.f32.mrf.mxu1  ;;  %6522 = vmatmul.mubr.msk.bf16.gmra.mxu1 %vm204_vm1, %v7538_v37  ;;  %6583 = vmatprep.mubr.msk.bf16.mxu0 %vm204_vm1, %v2052_v27 }
 0x100   :  { %v708_v10 = vadd.f32 %v6363_v48, %v7747_v12  ;;  %6525 = vmatprep.mubr.msk.bf16.mxu1 %vm204_vm1, %v7570_v61  ;;  %v7952_v13 = vpop.f32.mrf.mxu0  ;;  %v2014_v12 = vld [vmem:[%s11167_s0 + $0x151] sm:$0xff]  ;;  %v2015_v61 = vld [vmem:[%s11167_s0 + $0x159] sm:$0xff]  ;;  %6868 = vset.pattern.permute.xlu0 %v6872_v11 }
 0x101   :  { %v699_v37 = vpop.f32.mrf.mxu1  ;;  %6869 = vset.pattern.permute.xlu1 %v6872_v11  ;;  %v2054_v56 = vpack.c.bf16 %v2015_v61, %v2014_v12  ;;  %4626 = vperm.xlu0 %6868, %v4564_v22   ;;  %v4566_v11 = vld [vmem:[%s11168_s4 + $0x10] sm:$0xff] }
 0x102   :  { %v700_v27 = vadd.f32 %v699_v37, %v7759_v21  ;;  %v7961_v52 = vpop.f32.mrf.mxu0  ;;  %4636 = vperm.xlu1 %6869, %v4566_v11  }
 0x103   :  { %v6364_v48 = vpop.f32.mrf.mxu1 }
 0x104   :  { %v711_v60 = vadd.f32 %v6364_v48, %v7763_v3  ;;  %v7967_v39 = vpop.f32.mrf.mxu0  ;;  %v4565_v3 = vld [vmem:[%s11168_s4 + $0x8] sm:$0xff]  ;;  %v4567_v48 = vld [vmem:[%s11168_s4 + $0x18] sm:$0xff] }
 0x105   :  { %v702_v54 = vpop.f32.mrf.mxu1  ;;  %4631 = vperm.xlu0 %6868, %v4565_v3  }
 0x106   :  { %v703_v21 = vadd.f32 %v702_v54, %v7767_v17  ;;  %v6425_v46 = vpop.f32.mrf.mxu0  ;;  %6584 = vmatmul.mubr.msk.bf16.gmra.mxu0 %vm204_vm1, %v2053_v30  ;;  %v2017_v17 = vld [vmem:[%s11167_s0 + $0x169] sm:$0xff]  ;;  %v4568_v30 = vld [vmem:[%s11168_s4 + $0x20] sm:$0xff]  ;;  %4641 = vperm.xlu1 %6869, %v4567_v48  }
 0x107   :  { %v6367_v37 = vpop.f32.mrf.mxu1  ;;  %6526 = vmatmul.mubr.msk.bf16.gmra.mxu1 %vm204_vm1, %v7572_v63  ;;  %v7980_v33 = vadd.f32 %v6425_v46, %v708_v10  ;;  %6587 = vmatprep.mubr.msk.bf16.mxu0 %vm204_vm1, %v2054_v56  ;;  %v2016_v63 = vld [vmem:[%s11167_s0 + $0x161] sm:$0xff] }
 0x108   :  { %v724_v22 = vadd.f32 %v6367_v37, %v7771_v59  ;;  %6529 = vmatprep.mubr.msk.bf16.mxu1 %vm204_vm1, %v7604_v23  ;;  %v1157_v47 = vpop.f32.mrf.mxu0  ;;  %v2018_v59 = vld [vmem:[%s11167_s0 + $0x171] sm:$0xff]  ;;  %v2019_v23 = vld [vmem:[%s11167_s0 + $0x179] sm:$0xff]  ;;  %v2055_v61 = vpack.c.bf16 %v2017_v17, %v2016_v63 }
 0x109   :  { %11296 = vst [vmem:[#allocation22_spill] sm:$0xff] %v7980_v33  ;;  %v715_v54 = vpop.f32.mrf.mxu1  ;;  %v7998_v56 = vadd.f32 %v1157_v47, %v700_v27  ;;  %v2056_v11 = vpack.c.bf16 %v2019_v23, %v2018_v59  ;;  %4646 = vperm.xlu0 %6868, %v4568_v30   ;;  %v4571_v30 = vld [vmem:[%s11168_s4 + $0x38] sm:$0xff] }
 0x10a   :  { %v716_v46 = vadd.f32 %v715_v54, %v7783_v44  ;;  %v6426_v12 = vpop.f32.mrf.mxu0 }
 0x10b   :  { %v6368_v10 = vpop.f32.mrf.mxu1  ;;  %v8007_v33 = vadd.f32 %v6426_v12, %v711_v60  ;;  %v4570_v60 = vld [vmem:[%s11168_s4 + $0x30] sm:$0xff] }
 0x10c   :  { %v727_v37 = vadd.f32 %v6368_v10, %v7787_v14  ;;  %v1160_v44 = vpop.f32.mrf.mxu0  ;;  %v4569_v14 = vld [vmem:[%s11168_s4 + $0x28] sm:$0xff] }
 0x10d   :  { %v718_v3 = vpop.f32.mrf.mxu1  ;;  %v8010_v63 = vadd.f32 %v1160_v44, %v703_v21  ;;  %v2021_v21 = vld [vmem:[%s11167_s0 + $0x189] sm:$0xff]  ;;  %4651 = vperm.xlu1 %6869, %v4569_v14   ;;  %4656 = vperm.xlu0 %6868, %v4570_v60  }
 0x10e   :  { %v719_v27 = vadd.f32 %v718_v3, %v7791_v16  ;;  %v6429_v54 = vpop.f32.mrf.mxu0  ;;  %6588 = vmatmul.mubr.msk.bf16.gmra.mxu0 %vm204_vm1, %v2055_v61 }
 0x10f   :  { %v6371_v17 = vpop.f32.mrf.mxu1  ;;  %6530 = vmatmul.mubr.msk.bf16.gmra.mxu1 %vm204_vm1, %v7606_v25  ;;  %v8022_v16 = vadd.f32 %v6429_v54, %v724_v22  ;;  %6591 = vmatprep.mubr.msk.bf16.mxu0 %vm204_vm1, %v2056_v11  ;;  %v2020_v25 = vld [vmem:[%s11167_s0 + $0x181] sm:$0xff] }
 0x110   :  { %v740_v47 = vadd.f32 %v6371_v17, %v7795_v24  ;;  %6533 = vmatprep.mubr.msk.bf16.mxu1 %vm204_vm1, %v7638_v51  ;;  %v1173_v23 = vpop.f32.mrf.mxu0  ;;  %v2022_v24 = vld [vmem:[%s11167_s0 + $0x191] sm:$0xff]  ;;  %v2023_v51 = vld [vmem:[%s11167_s0 + $0x199] sm:$0xff]  ;;  %v2057_v48 = vpack.c.bf16 %v2021_v21, %v2020_v25 }
 0x111   :  { %v731_v59 = vpop.f32.mrf.mxu1  ;;  %v8040_v10 = vadd.f32 %v1173_v23, %v716_v46  ;;  %v4572_v11 = vld [vmem:[%s11168_s4 + $0x40] sm:$0xff]  ;;  %v2058_v17 = vpack.c.bf16 %v2023_v51, %v2022_v24  ;;  %4661 = vperm.xlu1 %6869, %v4571_v30   ;;  %v4575_v30 = vld [vmem:[%s11168_s4 + $0x58] sm:$0xff] }
 0x112   :  { %v732_v22 = vadd.f32 %v731_v59, %v7807_v57  ;;  %v6430_v61 = vpop.f32.mrf.mxu0  ;;  %4666 = vperm.xlu0 %6868, %v4572_v11   ;;  %v4576_v11 = vld [vmem:[%s11168_s4 + $0x60] sm:$0xff] }
 0x113   :  { %v6372_v12 = vpop.f32.mrf.mxu1  ;;  %v8049_v44 = vadd.f32 %v6430_v61, %v727_v37  ;;  %v4574_v37 = vld [vmem:[%s11168_s4 + $0x50] sm:$0xff] }
 0x114   :  { %v743_v3 = vadd.f32 %v6372_v12, %v7811_v28  ;;  %v1176_v57 = vpop.f32.mrf.mxu0  ;;  %v4573_v28 = vld [vmem:[%s11168_s4 + $0x48] sm:$0xff] }
 0x115   :  { %v734_v54 = vpop.f32.mrf.mxu1  ;;  %v8052_v14 = vadd.f32 %v1176_v57, %v719_v27  ;;  %v2025_v27 = vld [vmem:[%s11167_s0 + $0x1a9] sm:$0xff]  ;;  %4671 = vperm.xlu1 %6869, %v4573_v28  }
 0x116   :  { %v735_v46 = vadd.f32 %v734_v54, %v7815_v40  ;;  %v6433_v25 = vpop.f32.mrf.mxu0  ;;  %6592 = vmatmul.mubr.msk.bf16.gmra.mxu0 %vm204_vm1, %v2057_v48  ;;  %4676 = vperm.xlu0 %6868, %v4574_v37   ;;  %v1514_v37 = vld [vmem:[%s11167_s0 + $0x1e0] sm:$0xff] }
 0x117   :  { %v6375_v60 = vpop.f32.mrf.mxu1  ;;  %6534 = vmatmul.mubr.msk.bf16.gmra.mxu1 %vm204_vm1, %v7640_v58  ;;  %v8064_v40 = vadd.f32 %v6433_v25, %v740_v47  ;;  %6595 = vmatprep.mubr.msk.bf16.mxu0 %vm204_vm1, %v2058_v17  ;;  %v2024_v58 = vld [vmem:[%s11167_s0 + $0x1a1] sm:$0xff]  ;;  %v2027_v47 = vld [vmem:[%s11167_s0 + $0x1b9] sm:$0xff] }
 0x118   :  { %v756_v21 = vadd.f32 %v6375_v60, %v7819_v41  ;;  %6537 = vmatprep.mubr.msk.bf16.mxu1 %vm204_vm1, %v7672_v18  ;;  %v1189_v23 = vpop.f32.mrf.mxu0  ;;  %v1513_v41 = vld [vmem:[%s11167_s0 + $0x1d8] sm:$0xff]  ;;  %v2059_v48 = vpack.c.bf16 %v2025_v27, %v2024_v58 }
 0x119   :  { %v747_v59 = vpop.f32.mrf.mxu1  ;;  %v2026_v18 = vld [vmem:[%s11167_s0 + $0x1b1] sm:$0xff]  ;;  %v8085_v51 = vadd.f32 %v1189_v23, %v732_v22  ;;  %v1544_v57 = vpack.c.bf16 %v1513_v41, %v7682_v31  ;;  %4681 = vperm.xlu1 %6869, %v4575_v30   ;;  %v1515_v31 = vld [vmem:[%s11167_s0 + $0x1e8] sm:$0x3f] }
 0x11a   :  { %v748_v24 = vadd.f32 %v747_v59, %v7831_v6  ;;  %v6434_v61 = vpop.f32.mrf.mxu0  ;;  %v2060_v6 = vpack.c.bf16 %v2027_v47, %v2026_v18  ;;  %4686 = vperm.xlu0 %6868, %v4576_v11   ;;  %v2029_v59 = vld [vmem:[%s11167_s0 + $0x1c9] sm:$0xff]  ;;  %v2030_v23 = vld [vmem:[%s11167_s0 + $0x1d1] sm:$0xff]  ;;  %v2493_v47 = vld [vmem:[%s11167_s0 + $0x1a] sm:$0xff]  ;;  %v1545_v11 = vpack.c.bf16 %v1515_v31, %v1514_v37 }
 0x11b   :  { %v6376_v12 = vpop.f32.mrf.mxu1  ;;  %v8094_v54 = vadd.f32 %v6434_v61, %v743_v3  ;;  %v2492_v18 = vld [vmem:[%s11167_s0 + $0x12] sm:$0xff] }
 0x11c   :  { %v759_v17 = vadd.f32 %v6376_v12, %v7835_v42  ;;  %v1192_v60 = vpop.f32.mrf.mxu0  ;;  %v4577_v42 = vld [vmem:[%s11168_s4 + $0x68] sm:$0xff] }
 0x11d   :  { %v750_v22 = vpop.f32.mrf.mxu1  ;;  %v8098_v28 = vadd.f32 %v1192_v60, %v735_v46  ;;  %4691 = vperm.xlu1 %6869, %v4577_v42  }
 0x11e   :  { %v751_v25 = vadd.f32 %v750_v22, %v7839_v45  ;;  %v6437_v27 = vpop.f32.mrf.mxu0  ;;  %6596 = vmatmul.mubr.msk.bf16.gmra.mxu0 %vm204_vm1, %v2059_v48  ;;  %v4578_v45 = vld [vmem:[%s11168_s4 + $0x70] sm:$0xff]  ;;  %v4580_v22 = vld [vmem:[%s11168_s4 + $0x80] sm:$0xff] }
 0x11f   :  { %v6379_v58 = vpop.f32.mrf.mxu1  ;;  %6538 = vmatmul.mubr.msk.bf16.gmra.mxu1 %vm204_vm1, %v7674_v26  ;;  %v8116_v46 = vadd.f32 %v6437_v27, %v756_v21  ;;  %6599 = vmatprep.mubr.msk.bf16.mxu0 %vm204_vm1, %v2060_v6  ;;  %v2028_v26 = vld [vmem:[%s11167_s0 + $0x1c1] sm:$0xff]  ;;  %v2031_v21 = vld [vmem:[%s11167_s0 + $0x1d9] sm:$0xff] }
 0x120   :  { %v772_v3 = vadd.f32 %v6379_v58, %v7843_v53  ;;  %6541 = vmatprep.mubr.msk.bf16.mxu1 %vm204_vm1, %v1544_v57  ;;  %v1205_v53 = vpop.f32.mrf.mxu0  ;;  %4696 = vperm.xlu0 %6868, %v4578_v45   ;;  %v2061_v57 = vpack.c.bf16 %v2029_v59, %v2028_v26  ;;  %v4579_v6 = vld [vmem:[%s11168_s4 + $0x78] sm:$0xff]  ;;  %v2062_v27 = vpack.c.bf16 %v2031_v21, %v2030_v23  ;;  %v2032_v45 = vld [vmem:[%s11167_s0 + $0x1e1] sm:$0xff] }
 0x121   :  { %v763_v41 = vpop.f32.mrf.mxu1  ;;  %v8139_v61 = vadd.f32 %v1205_v53, %v748_v24  ;;  %4701 = vperm.xlu1 %6869, %v4579_v6   ;;  %v2495_v53 = vld [vmem:[%s11167_s0 + $0x2a] sm:$0xff]  ;;  %v2496_v21 = vld [vmem:[%s11167_s0 + $0x32] sm:$0xff] }
 0x122   :  { %v764_v12 = vadd.f32 %v763_v41, %v7855_v19  ;;  %v6438_v30 = vpop.f32.mrf.mxu0  ;;  %v2552_v19 = vpack.c.bf16 %v2493_v47, %v2492_v18  ;;  %v2494_v41 = vld [vmem:[%s11167_s0 + $0x22] sm:$0xff] }
 0x123   :  { %v6380_v48 = vpop.f32.mrf.mxu1  ;;  %v8148_v58 = vadd.f32 %v6438_v30, %v759_v17  ;;  %v4582_v17 = vld [vmem:[%s11168_s4 + $0x90] sm:$0xff]  ;;  %v3010_v47 = vld [vmem:[%s11167_s0 + $0x20] sm:$0xff] }
 0x124   :  { %v775_v60 = vadd.f32 %v6380_v48, %v7859_v62  ;;  %v1208_v42 = vpop.f32.mrf.mxu0  ;;  %4706 = vperm.xlu0 %6868, %v4580_v22   ;;  %v2033_v62 = vld [vmem:[%s11167_s0 + $0x1e9] sm:$0x3f] }
 0x125   :  { %v766_v24 = vpop.f32.mrf.mxu1  ;;  %v8151_v31 = vadd.f32 %v1208_v42, %v751_v25  ;;  %v3011_v48 = vld [vmem:[%s11167_s0 + $0x28] sm:$0xff]  ;;  %v2063_v22 = vpack.c.bf16 %v2033_v62, %v2032_v45 }
 0x126   :  { %v767_v37 = vadd.f32 %v766_v24, %v7863_v2  ;;  %v6441_v59 = vpop.f32.mrf.mxu0  ;;  %6600 = vmatmul.mubr.msk.bf16.gmra.mxu0 %vm204_vm1, %v2061_v57  ;;  %v4581_v2 = vld [vmem:[%s11168_s4 + $0x88] sm:$0xff]  ;;  %v4584_v24 = vld [vmem:[%s11168_s4 + $0xa0] sm:$0xff] }
 0x127   :  { %v6383_v26 = vpop.f32.mrf.mxu1  ;;  %6542 = vmatmul.mubr.msk.bf16.gmra.mxu1 %vm204_vm1, %v1545_v11  ;;  %v8168_v23 = vadd.f32 %v6441_v59, %v772_v3  ;;  %6603 = vmatprep.mubr.msk.bf16.mxu0 %vm204_vm1, %v2062_v27  ;;  %v2497_v3 = vld [vmem:[%s11167_s0 + $0x3a] sm:$0xff]  ;;  %v2553_v27 = vpack.c.bf16 %v2495_v53, %v2494_v41 }
 0x128   :  { %v788_v25 = vadd.f32 %v6383_v26, %v7867_v4  ;;  %6609 = vmatprep.mubr.msk.bf16.mxu1 %vm204_vm1, %v2552_v19  ;;  %v1221_v4 = vpop.f32.mrf.mxu0  ;;  %4711 = vperm.xlu1 %6869, %v4581_v2   ;;  %v4583_v19 = vld [vmem:[%s11168_s4 + $0x98] sm:$0xff]  ;;  %v2554_v59 = vpack.c.bf16 %v2497_v3, %v2496_v21  ;;  %v2499_v21 = vld [vmem:[%s11167_s0 + $0x4a] sm:$0xff] }
 0x129   :  { %v779_v18 = vpop.f32.mrf.mxu1  ;;  %4716 = vperm.xlu0 %6868, %v4582_v17   ;;  %v8191_v11 = vadd.f32 %v1221_v4, %v764_v12  ;;  %v3711_v17 = vsel %vm295_vm0, %v7722_v49, 0  ;;  %v3013_v4 = vld [vmem:[%s11167_s0 + $0x38] sm:$0xff] }
 0x12a   :  { %v780_v30 = vadd.f32 %v779_v18, %v7885_v5  ;;  %v6442_v6 = vpop.f32.mrf.mxu0  ;;  %v3070_v5 = vpack.c.bf16 %v3011_v48, %v3010_v47  ;;  %v3012_v18 = vld [vmem:[%s11167_s0 + $0x30] sm:$0xff]  ;;  %v2501_v47 = vld [vmem:[%s11167_s0 + $0x5a] sm:$0xff] }
 0x12b   :  { %v6384_v57 = vpop.f32.mrf.mxu1  ;;  %v8200_v26 = vadd.f32 %v6442_v6, %v775_v60  ;;  %v4585_v60 = vld [vmem:[%s11168_s4 + $0xa8] sm:$0xff]  ;;  %v3014_v6 = vld [vmem:[%s11167_s0 + $0x40] sm:$0xff] }
 0x12c   :  { %v791_v42 = vadd.f32 %v6384_v57, %v7895_v9  ;;  %v1224_v2 = vpop.f32.mrf.mxu0  ;;  %4721 = vperm.xlu1 %6869, %v4583_v19   ;;  %v2498_v9 = vld [vmem:[%s11167_s0 + $0x42] sm:$0xff] }
 0x12d   :  { %v782_v12 = vpop.f32.mrf.mxu1  ;;  %4726 = vperm.xlu0 %6868, %v4584_v24   ;;  %v8203_v62 = vadd.f32 %v1224_v2, %v767_v37  ;;  %v2555_v24 = vpack.c.bf16 %v2499_v21, %v2498_v9  ;;  %v2502_v21 = vld [vmem:[%s11167_s0 + $0x62] sm:$0xff] }
 0x12e   :  { %v783_v45 = vadd.f32 %v782_v12, %v7899_v0  ;;  %v6445_v53 = vpop.f32.mrf.mxu0  ;;  %6604 = vmatmul.mubr.msk.bf16.gmra.mxu0 %vm204_vm1, %v2063_v22  ;;  %v4586_v0 = vld [vmem:[%s11168_s4 + $0xb0] sm:$0xff]  ;;  %v3015_v22 = vld [vmem:[%s11167_s0 + $0x48] sm:$0xff] }
 0x12f   :  { %v6387_v41 = vpop.f32.mrf.mxu1  ;;  %6610 = vmatmul.mubr.msk.bf16.vlgmr.msra.gmra.mxu1 %vm204_vm1, %v2553_v27  ;;  %v8219_v37 = vadd.f32 %v6445_v53, %v788_v25  ;;  %6671 = vmatprep.mubr.msk.bf16.mxu0 %vm204_vm1, %v3070_v5  ;;  %v2500_v25 = vld [vmem:[%s11167_s0 + $0x52] sm:$0xff]  ;;  %v4229_v53 = vsel %vm295_vm0, %v7735_v50, 0  ;;  %v3072_v9 = vpack.c.bf16 %v3015_v22, %v3014_v6  ;;  %v2503_v50 = vld [vmem:[%s11167_s0 + $0x6a] sm:$0xff] }
 0x130   :  { %v804_v49 = vadd.f32 %v6387_v41, %v7903_v8  ;;  %6613 = vmatprep.mubr.msk.bf16.mxu1 %vm204_vm1, %v2554_v59  ;;  %v1237_v8 = vpop.f32.mrf.mxu0  ;;  %6732 = vmatpush3.bf16.msra.mxu1 %v3711_v17  ;;  %v3071_v59 = vpack.c.bf16 %v3013_v4, %v3012_v18  ;;  %v4587_v5 = vld [vmem:[%s11168_s4 + $0xb8] sm:$0xff]  ;;  %v2556_v2 = vpack.c.bf16 %v2501_v47, %v2500_v25  ;;  %v3019_v22 = vld [vmem:[%s11167_s0 + $0x68] sm:$0xff] }
 0x131   :  { %v795_v3 = vpop.f32.mrf.mxu1  ;;  %4731 = vperm.xlu1 %6869, %v4585_v60   ;;  %v8239_v57 = vadd.f32 %v1237_v8, %v780_v30  ;;  %4736 = vperm.xlu0 %6868, %v4586_v0   ;;  %v3017_v8 = vld [vmem:[%s11167_s0 + $0x58] sm:$0xff] }
 0x132   :  { %v796_v48 = vadd.f32 %v795_v3, %v7919_v36  ;;  %v6446_v19 = vpop.f32.mrf.mxu0  ;;  %v4588_v36 = vld [vmem:[%s11168_s4 + $0xc0] sm:$0xff]  ;;  %v3016_v3 = vld [vmem:[%s11167_s0 + $0x50] sm:$0xff] }
 0x133   :  { %v6388_v27 = vpop.f32.mrf.mxu1  ;;  %v8254_v12 = vadd.f32 %v6446_v19, %v791_v42  ;;  %v2504_v25 = vld [vmem:[%s11167_s0 + $0x72] sm:$0xff] }
 0x134   :  { %v807_v30 = vadd.f32 %v6388_v27, %v7929_v29  ;;  %v1240_v41 = vpop.f32.mrf.mxu0 }
 0x135   :  { %v798_v17 = vpop.f32.mrf.mxu1  ;;  %4741 = vperm.xlu1 %6869, %v4587_v5   ;;  %v8259_v0 = vadd.f32 %v1240_v41, %v783_v45  ;;  %4746 = vperm.xlu0 %6868, %v4588_v36   ;;  %v4590_v45 = vld [vmem:[%s11168_s4 + $0xd0] sm:$0xff]  ;;  %v2557_v5 = vpack.c.bf16 %v2503_v50, %v2502_v21  ;;  %v3073_v36 = vpack.c.bf16 %v3017_v8, %v3016_v3  ;;  %v2506_v50 = vld [vmem:[%s11167_s0 + $0x82] sm:$0xff]  ;;  %v3021_v8 = vld [vmem:[%s11167_s0 + $0x78] sm:$0xff] }
 0x136   :  { %v799_v60 = vadd.f32 %v798_v17, %v7933_v55  ;;  %v6449_v42 = vpop.f32.mrf.mxu0  ;;  %6672 = vmatmul.mubr.msk.bf16.vlgmr.msra.gmra.mxu0 %vm204_vm1, %v3071_v59  ;;  %v4589_v55 = vld [vmem:[%s11168_s4 + $0xc8] sm:$0xff]  ;;  %v4592_v17 = vld [vmem:[%s11168_s4 + $0xe0] sm:$0xff]  ;;  %v3020_v3 = vld [vmem:[%s11167_s0 + $0x70] sm:$0xff] }
 0x137   :  { %v6391_v29 = vpop.f32.mrf.mxu1  ;;  %6614 = vmatmul.mubr.msk.bf16.gmra.mxu1 %vm204_vm1, %v2555_v24  ;;  %v8276_v4 = vadd.f32 %v6449_v42, %v804_v49  ;;  %6794 = vmatpush3.bf16.msra.mxu0 %v4229_v53  ;;  %v3018_v49 = vld [vmem:[%s11167_s0 + $0x60] sm:$0xff] }
 0x138   :  { %v820_v18 = vadd.f32 %v6391_v29, %v7937_v43  ;;  %6617 = vmatprep.mubr.msk.bf16.mxu1 %vm204_vm1, %v2556_v2  ;;  %v1253_v6 = vpop.f32.mrf.mxu0  ;;  %6675 = vmatprep.mubr.msk.bf16.mxu0 %vm204_vm1, %v3072_v9  ;;  %v2505_v43 = vld [vmem:[%s11167_s0 + $0x7a] sm:$0xff] }
 0x139   :  { %v811_v47 = vpop.f32.mrf.mxu1  ;;  %4751 = vperm.xlu1 %6869, %v4589_v55   ;;  %v8299_v19 = vadd.f32 %v1253_v6, %v796_v48  ;;  %4756 = vperm.xlu0 %6868, %v4590_v45   ;;  %v4591_v2 = vld [vmem:[%s11168_s4 + $0xd8] sm:$0xff]  ;;  %v3074_v48 = vpack.c.bf16 %v3019_v22, %v3018_v49  ;;  %v3023_v49 = vld [vmem:[%s11167_s0 + $0x88] sm:$0xff] }
 0x13a   :  { %v812_v27 = vadd.f32 %v811_v47, %v7952_v13  ;;  %v6450_v59 = vpop.f32.mrf.mxu0  ;;  %v2558_v13 = vpack.c.bf16 %v2505_v43, %v2504_v25  ;;  %v2508_v25 = vld [vmem:[%s11167_s0 + $0x92] sm:$0xff]  ;;  %v3022_v43 = vld [vmem:[%s11167_s0 + $0x80] sm:$0xff] }
 0x13b   :  { %v6392_v24 = vpop.f32.mrf.mxu1  ;;  %v8308_v53 = vadd.f32 %v6450_v59, %v807_v30  ;;  %v4594_v30 = vld [vmem:[%s11168_s4 + $0xf0] sm:$0xff] }
 0x13c   :  { %v823_v41 = vadd.f32 %v6392_v24, %v7961_v52  ;;  %v1256_v29 = vpop.f32.mrf.mxu0  ;;  %v2507_v52 = vld [vmem:[%s11167_s0 + $0x8a] sm:$0xff] }
 0x13d   :  { %v814_v9 = vpop.f32.mrf.mxu1  ;;  %4761 = vperm.xlu1 %6869, %v4591_v2   ;;  %v8311_v42 = vadd.f32 %v1256_v29, %v799_v60  ;;  %4766 = vperm.xlu0 %6868, %v4592_v17   ;;  %v4595_v2 = vld [vmem:[%s11168_s4 + $0xf8] sm:$0xff]  ;;  %v4596_v17 = vld [vmem:[%s11168_s4 + $0x100] sm:$0xff] }
 0x13e   :  { %v815_v21 = vadd.f32 %v814_v9, %v7967_v39  ;;  %v6453_v45 = vpop.f32.mrf.mxu0  ;;  %6676 = vmatmul.mubr.msk.bf16.gmra.mxu0 %vm204_vm1, %v3073_v36  ;;  %v4593_v39 = vld [vmem:[%s11168_s4 + $0xe8] sm:$0xff]  ;;  %v3075_v36 = vpack.c.bf16 %v3021_v8, %v3020_v3  ;;  %v3076_v9 = vpack.c.bf16 %v3023_v49, %v3022_v43  ;;  %v3024_v8 = vld [vmem:[%s11167_s0 + $0x90] sm:$0xff]  ;;  %v3026_v43 = vld [vmem:[%s11167_s0 + $0xa0] sm:$0xff] }
 0x13f   :  { %v6395_v55 = vpop.f32.mrf.mxu1  ;;  %6618 = vmatmul.mubr.msk.bf16.gmra.mxu1 %vm204_vm1, %v2557_v5  ;;  %v8327_v60 = vadd.f32 %v6453_v45, %v820_v18  ;;  %6679 = vmatprep.mubr.msk.bf16.mxu0 %vm204_vm1, %v3074_v48  ;;  %v2509_v18 = vld [vmem:[%s11167_s0 + $0x9a] sm:$0xff]  ;;  %v2559_v5 = vpack.c.bf16 %v2507_v52, %v2506_v50  ;;  %v2510_v50 = vld [vmem:[%s11167_s0 + $0xa2] sm:$0xff] }
 0x140   :  { %6621 = vmatprep.mubr.msk.bf16.mxu1 %vm204_vm1, %v2558_v13  ;;  %v1269_v6 = vpop.f32.mrf.mxu0  ;;  %v2560_v48 = vpack.c.bf16 %v2509_v18, %v2508_v25  ;;  %v836_v45 = vadd.f32 %v6395_v55, %v7749_v1  ;;  %v4597_v1 = vld [vmem:[%s11168_s4 + $0x108] sm:$0xff]  ;;  %v3025_v25 = vld [vmem:[%s11167_s0 + $0x98] sm:$0xff] }
 0x141   :  { %v827_v47 = vpop.f32.mrf.mxu1  ;;  %4771 = vperm.xlu1 %6869, %v4593_v39   ;;  %v8349_v22 = vadd.f32 %v1269_v6, %v812_v27  ;;  %4776 = vperm.xlu0 %6868, %v4594_v30   ;;  %v2512_v6 = vld [vmem:[%s11167_s0 + $0xb2] sm:$0xff]  ;;  %v3027_v49 = vld [vmem:[%s11167_s0 + $0xa8] sm:$0xff] }
 0x142   :  { %v6454_v59 = vpop.f32.mrf.mxu0  ;;  %v828_v55 = vadd.f32 %v827_v47, %v7761_v32  ;;  %v2513_v47 = vld [vmem:[%s11167_s0 + $0xba] sm:$0xff] }
 0x143   :  { %v6396_v24 = vpop.f32.mrf.mxu1  ;;  %v8357_v13 = vadd.f32 %v6454_v59, %v823_v41  ;;  %v2511_v41 = vld [vmem:[%s11167_s0 + $0xaa] sm:$0xff] }
 0x144   :  { %v1272_v27 = vpop.f32.mrf.mxu0  ;;  %v839_v59 = vadd.f32 %v6396_v24, %v7765_v7  ;;  %v2562_v7 = vpack.c.bf16 %v2513_v47, %v2512_v6  ;;  %v3078_v24 = vpack.c.bf16 %v3027_v49, %v3026_v43  ;;  %v3029_v47 = vld [vmem:[%s11167_s0 + $0xb8] sm:$0xff] }
 0x145   :  { %v830_v29 = vpop.f32.mrf.mxu1  ;;  %4781 = vperm.xlu1 %6869, %v4595_v2   ;;  %v8360_v39 = vadd.f32 %v1272_v27, %v815_v21  ;;  %4786 = vperm.xlu0 %6868, %v4596_v17   ;;  %v4598_v21 = vld [vmem:[%s11168_s4 + $0x110] sm:$0xff]  ;;  %v2561_v17 = vpack.c.bf16 %v2511_v41, %v2510_v50  ;;  %v4600_v27 = vld [vmem:[%s11168_s4 + $0x120] sm:$0xff] }
 0x146   :  { %v6457_v30 = vpop.f32.mrf.mxu0  ;;  %6680 = vmatmul.mubr.msk.bf16.gmra.mxu0 %vm204_vm1, %v3075_v36  ;;  %v2516_v43 = vld [vmem:[%s11167_s0 + $0xd2] sm:$0xff] }
 0x147   :  { %v6399_v52 = vpop.f32.mrf.mxu1  ;;  %6622 = vmatmul.mubr.msk.bf16.gmra.mxu1 %vm204_vm1, %v2559_v5  ;;  %v8377_v3 = vadd.f32 %v6457_v30, %v836_v45  ;;  %6683 = vmatprep.mubr.msk.bf16.mxu0 %vm204_vm1, %v3076_v9  ;;  %v4599_v9 = vld [vmem:[%s11168_s4 + $0x118] sm:$0xff]  ;;  %v831_v45 = vadd.f32 %v830_v29, %v7769_v20  ;;  %v2515_v20 = vld [vmem:[%s11167_s0 + $0xca] sm:$0xff] }
 0x148   :  { %6625 = vmatprep.mubr.msk.bf16.mxu1 %vm204_vm1, %v2560_v48  ;;  %v1285_v32 = vpop.f32.mrf.mxu0  ;;  %v3077_v48 = vpack.c.bf16 %v3025_v25, %v3024_v8  ;;  %v852_v50 = vadd.f32 %v6399_v52, %v7773_v34  ;;  %v4601_v34 = vld [vmem:[%s11168_s4 + $0x128] sm:$0xff]  ;;  %v4602_v29 = vld [vmem:[%s11168_s4 + $0x130] sm:$0xff] }
 0x149   :  { %v843_v18 = vpop.f32.mrf.mxu1  ;;  %4791 = vperm.xlu1 %6869, %v4597_v1   ;;  %v8400_v5 = vadd.f32 %v1285_v32, %v828_v55  ;;  %4796 = vperm.xlu0 %6868, %v4598_v21   ;;  %v2514_v55 = vld [vmem:[%s11167_s0 + $0xc2] sm:$0xff]  ;;  %v3028_v32 = vld [vmem:[%s11167_s0 + $0xb0] sm:$0xff] }
 0x14a   :  { %v6458_v2 = vpop.f32.mrf.mxu0  ;;  %v844_v52 = vadd.f32 %v843_v18, %v7785_v35  ;;  %v2517_v18 = vld [vmem:[%s11167_s0 + $0xda] sm:$0xff] }
 0x14b   :  { %v6400_v36 = vpop.f32.mrf.mxu1  ;;  %v8409_v30 = vadd.f32 %v6458_v2, %v839_v59  ;;  %v3030_v59 = vld [vmem:[%s11167_s0 + $0xc0] sm:$0xff]  ;;  %v3031_v2 = vld [vmem:[%s11167_s0 + $0xc8] sm:$0xff] }
 0x14c   :  { %v1288_v21 = vpop.f32.mrf.mxu0 }
 0x14d   :  { %v846_v1 = vpop.f32.mrf.mxu1  ;;  %4801 = vperm.xlu1 %6869, %v4599_v9   ;;  %v8412_v41 = vadd.f32 %v1288_v21, %v831_v45  ;;  %4806 = vperm.xlu0 %6868, %v4600_v27   ;;  %v2563_v45 = vpack.c.bf16 %v2515_v20, %v2514_v55  ;;  %v4604_v21 = vld [vmem:[%s11168_s4 + $0x140] sm:$0xff] }
 0x14e   :  { %v6461_v25 = vpop.f32.mrf.mxu0  ;;  %6684 = vmatmul.mubr.msk.bf16.gmra.mxu0 %vm204_vm1, %v3077_v48 }
 0x14f   :  { %v6403_v8 = vpop.f32.mrf.mxu1  ;;  %6626 = vmatmul.mubr.msk.bf16.gmra.mxu1 %vm204_vm1, %v2561_v17  ;;  %v8429_v6 = vadd.f32 %v6461_v25, %v852_v50  ;;  %6687 = vmatprep.mubr.msk.bf16.mxu0 %vm204_vm1, %v3078_v24  ;;  %v855_v17 = vadd.f32 %v6400_v36, %v7789_v15  ;;  %v4603_v24 = vld [vmem:[%s11168_s4 + $0x138] sm:$0xff]  ;;  %v847_v50 = vadd.f32 %v846_v1, %v7793_v38  ;;  %v2519_v38 = vld [vmem:[%s11167_s0 + $0xea] sm:$0xff] }
 0x150   :  { %6629 = vmatprep.mubr.msk.bf16.mxu1 %vm204_vm1, %v2562_v7  ;;  %v1301_v35 = vpop.f32.mrf.mxu0  ;;  %v3079_v7 = vpack.c.bf16 %v3029_v47, %v3028_v32  ;;  %v2564_v15 = vpack.c.bf16 %v2517_v18, %v2516_v43  ;;  %v3080_v36 = vpack.c.bf16 %v3031_v2, %v3030_v59  ;;  %v2518_v32 = vld [vmem:[%s11167_s0 + $0xe2] sm:$0xff]  ;;  %v3032_v2 = vld [vmem:[%s11167_s0 + $0xd0] sm:$0xff] }
 0x151   :  { %11297 = vst [vmem:[#allocation23_spill] sm:$0xff] %v8429_v6  ;;  %v859_v49 = vpop.f32.mrf.mxu1  ;;  %4811 = vperm.xlu1 %6869, %v4601_v34   ;;  %v8452_v48 = vadd.f32 %v1301_v35, %v844_v52  ;;  %4816 = vperm.xlu0 %6868, %v4602_v29   ;;  %v11300_v52 = vld [vmem:[#allocation2_spill] sm:$0xff]  ;;  %v4605_v1 = vld [vmem:[%s11168_s4 + $0x148] sm:$0xff] }
 0x152   :  { %v6462_v27 = vpop.f32.mrf.mxu0  ;;  %v868_v55 = vadd.f32 %v6403_v8, %v11300_v52  ;;  %v4606_v8 = vld [vmem:[%s11168_s4 + $0x150] sm:$0xff]  ;;  %v11302_v43 = vld [vmem:[#allocation3_spill] sm:$0xff] }
 0x153   :  { %11298 = vst [vmem:[#allocation24_spill] sm:$0xff] %v8452_v48  ;;  %v6404_v9 = vpop.f32.mrf.mxu1  ;;  %v8461_v25 = vadd.f32 %v6462_v27, %v855_v17  ;;  %v860_v18 = vadd.f32 %v859_v49, %v11302_v43  ;;  %v3033_v17 = vld [vmem:[%s11167_s0 + $0xd8] sm:$0xff] }
 0x154   :  { %v1304_v29 = vpop.f32.mrf.mxu0  ;;  %v2520_v27 = vld [vmem:[%s11167_s0 + $0xf2] sm:$0xff] }
 0x155   :  { %11299 = vst [vmem:[#allocation25_spill] sm:$0xff] %v8461_v25  ;;  %v862_v34 = vpop.f32.mrf.mxu1  ;;  %4821 = vperm.xlu1 %6869, %v4603_v24   ;;  %v8464_v20 = vadd.f32 %v1304_v29, %v847_v50  ;;  %4826 = vperm.xlu0 %6868, %v4604_v21   ;;  %v3034_v24 = vld [vmem:[%s11167_s0 + $0xe0] sm:$0xff]  ;;  %v3035_v21 = vld [vmem:[%s11167_s0 + $0xe8] sm:$0xff]  ;;  %v11304_v50 = vld [vmem:[#allocation4_spill] sm:$0xff] }
 0x156   :  { %v6465_v35 = vpop.f32.mrf.mxu0  ;;  %6688 = vmatmul.mubr.msk.bf16.gmra.mxu0 %vm204_vm1, %v3079_v7  ;;  %v2521_v7 = vld [vmem:[%s11167_s0 + $0xfa] sm:$0xff] }
 0x157   :  { %11301 = vst [vmem:[#allocation2_spill] sm:$0xff] %v8464_v20  ;;  %v6407_v47 = vpop.f32.mrf.mxu1  ;;  %6630 = vmatmul.mubr.msk.bf16.gmra.mxu1 %vm204_vm1, %v2563_v45  ;;  %v8481_v59 = vadd.f32 %v6465_v35, %v868_v55  ;;  %6691 = vmatprep.mubr.msk.bf16.mxu0 %vm204_vm1, %v3080_v36  ;;  %v2565_v55 = vpack.c.bf16 %v2519_v38, %v2518_v32  ;;  %v4607_v43 = vld [vmem:[%s11168_s4 + $0x158] sm:$0xff] }
 0x158   :  { %6633 = vmatprep.mubr.msk.bf16.mxu1 %vm204_vm1, %v2564_v15  ;;  %v1317_v49 = vpop.f32.mrf.mxu0  ;;  %v871_v15 = vadd.f32 %v6404_v9, %v11304_v50  ;;  %v3081_v35 = vpack.c.bf16 %v3033_v17, %v3032_v2  ;;  %v11306_v20 = vld [vmem:[#allocation5_spill] sm:$0xff]  ;;  %v2566_v9 = vpack.c.bf16 %v2521_v7, %v2520_v27  ;;  %v11308_v50 = vld [vmem:[#allocation6_spill] sm:$0xff]  ;;  %v3036_v7 = vld [vmem:[%s11167_s0 + $0xf0] sm:$0xff] }
 0x159   :  { %11303 = vst [vmem:[#allocation3_spill] sm:$0xff] %v8481_v59  ;;  %v875_v45 = vpop.f32.mrf.mxu1  ;;  %4831 = vperm.xlu1 %6869, %v4605_v1   ;;  %v8504_v36 = vadd.f32 %v1317_v49, %v860_v18  ;;  %4836 = vperm.xlu0 %6868, %v4606_v8   ;;  %v4608_v59 = vld [vmem:[%s11168_s4 + $0x160] sm:$0xff]  ;;  %v863_v25 = vadd.f32 %v862_v34, %v11306_v20  ;;  %v2523_v34 = vld [vmem:[%s11167_s0 + $0x10a] sm:$0xff] }
 0x15a   :  { %v6466_v52 = vpop.f32.mrf.mxu0  ;;  %v3082_v18 = vpack.c.bf16 %v3035_v21, %v3034_v24  ;;  %v884_v32 = vadd.f32 %v6407_v47, %v11308_v50  ;;  %v2522_v2 = vld [vmem:[%s11167_s0 + $0x102] sm:$0xff]  ;;  %v4610_v20 = vld [vmem:[%s11168_s4 + $0x170] sm:$0xff]  ;;  %v3037_v24 = vld [vmem:[%s11167_s0 + $0xf8] sm:$0xff] }
 0x15b   :  { %11305 = vst [vmem:[#allocation4_spill] sm:$0xff] %v8504_v36  ;;  %v6408_v29 = vpop.f32.mrf.mxu1  ;;  %v8513_v1 = vadd.f32 %v6466_v52, %v871_v15  ;;  %v11310_v47 = vld [vmem:[#allocation7_spill] sm:$0xff]  ;;  %v2524_v21 = vld [vmem:[%s11167_s0 + $0x112] sm:$0xff]  ;;  %v3038_v52 = vld [vmem:[%s11167_s0 + $0x100] sm:$0xff]  ;;  %v2567_v50 = vpack.c.bf16 %v2523_v34, %v2522_v2 }
 0x15c   :  { %v1320_v8 = vpop.f32.mrf.mxu0 }
 0x15d   :  { %11307 = vst [vmem:[#allocation5_spill] sm:$0xff] %v8513_v1  ;;  %v878_v49 = vpop.f32.mrf.mxu1  ;;  %4841 = vperm.xlu1 %6869, %v4607_v43   ;;  %v8516_v38 = vadd.f32 %v1320_v8, %v863_v25  ;;  %4846 = vperm.xlu0 %6868, %v4608_v59   ;;  %v4609_v25 = vld [vmem:[%s11168_s4 + $0x168] sm:$0xff]  ;;  %v876_v59 = vadd.f32 %v875_v45, %v11310_v47  ;;  %v4611_v47 = vld [vmem:[%s11168_s4 + $0x178] sm:$0xff] }
 0x15e   :  { %v6469_v36 = vpop.f32.mrf.mxu0  ;;  %6692 = vmatmul.mubr.msk.bf16.gmra.mxu0 %vm204_vm1, %v3081_v35  ;;  %v11312_v35 = vld [vmem:[#allocation8_spill] sm:$0xff] }
 0x15f   :  { %11309 = vst [vmem:[#allocation6_spill] sm:$0xff] %v8516_v38  ;;  %v6411_v17 = vpop.f32.mrf.mxu1  ;;  %6634 = vmatmul.mubr.msk.bf16.gmra.mxu1 %vm204_vm1, %v2565_v55  ;;  %v8533_v27 = vadd.f32 %v6469_v36, %v884_v32  ;;  %6695 = vmatprep.mubr.msk.bf16.mxu0 %vm204_vm1, %v3082_v18  ;;  %v2525_v36 = vld [vmem:[%s11167_s0 + $0x11a] sm:$0xff]  ;;  %v3039_v55 = vld [vmem:[%s11167_s0 + $0x108] sm:$0xff]  ;;  %v887_v43 = vadd.f32 %v6408_v29, %v11312_v35 }
 0x160   :  { %6637 = vmatprep.mubr.msk.bf16.mxu1 %vm204_vm1, %v2566_v9  ;;  %v1333_v45 = vpop.f32.mrf.mxu0  ;;  %v3083_v32 = vpack.c.bf16 %v3037_v24, %v3036_v7  ;;  %v11314_v38 = vld [vmem:[#allocation9_spill] sm:$0xff]  ;;  %v2568_v29 = vpack.c.bf16 %v2525_v36, %v2524_v21  ;;  %v11316_v35 = vld [vmem:[#allocation10_spill] sm:$0xff]  ;;  %v3040_v36 = vld [vmem:[%s11167_s0 + $0x110] sm:$0xff] }
 0x161   :  { %11311 = vst [vmem:[#allocation7_spill] sm:$0xff] %v8533_v27  ;;  %v891_v15 = vpop.f32.mrf.mxu1  ;;  %4851 = vperm.xlu1 %6869, %v4609_v25   ;;  %v8556_v9 = vadd.f32 %v1333_v45, %v876_v59  ;;  %4856 = vperm.xlu0 %6868, %v4610_v20   ;;  %v4612_v27 = vld [vmem:[%s11168_s4 + $0x180] sm:$0xff]  ;;  %v879_v1 = vadd.f32 %v878_v49, %v11314_v38  ;;  %v2527_v49 = vld [vmem:[%s11167_s0 + $0x12a] sm:$0xff] }
 0x162   :  { %v6470_v8 = vpop.f32.mrf.mxu0  ;;  %v3084_v59 = vpack.c.bf16 %v3039_v55, %v3038_v52  ;;  %v900_v2 = vadd.f32 %v6411_v17, %v11316_v35  ;;  %v2526_v7 = vld [vmem:[%s11167_s0 + $0x122] sm:$0xff]  ;;  %v4614_v38 = vld [vmem:[%s11168_s4 + $0x190] sm:$0xff]  ;;  %v3041_v52 = vld [vmem:[%s11167_s0 + $0x118] sm:$0xff] }
 0x163   :  { %11313 = vst [vmem:[#allocation8_spill] sm:$0xff] %v8556_v9  ;;  %v6412_v18 = vpop.f32.mrf.mxu1  ;;  %v8565_v25 = vadd.f32 %v6470_v8, %v887_v43  ;;  %v11318_v17 = vld [vmem:[#allocation11_spill] sm:$0xff]  ;;  %v2528_v55 = vld [vmem:[%s11167_s0 + $0x132] sm:$0xff]  ;;  %v3042_v8 = vld [vmem:[%s11167_s0 + $0x120] sm:$0xff]  ;;  %v2569_v35 = vpack.c.bf16 %v2527_v49, %v2526_v7 }
 0x164   :  { %v1336_v20 = vpop.f32.mrf.mxu0 }
 0x165   :  { %11315 = vst [vmem:[#allocation9_spill] sm:$0xff] %v8565_v25  ;;  %v894_v45 = vpop.f32.mrf.mxu1  ;;  %4861 = vperm.xlu1 %6869, %v4611_v47   ;;  %v8568_v34 = vadd.f32 %v1336_v20, %v879_v1  ;;  %4866 = vperm.xlu0 %6868, %v4612_v27   ;;  %v4613_v1 = vld [vmem:[%s11168_s4 + $0x188] sm:$0xff]  ;;  %v892_v27 = vadd.f32 %v891_v15, %v11318_v17  ;;  %v4615_v17 = vld [vmem:[%s11168_s4 + $0x198] sm:$0xff] }
 0x166   :  { %v6473_v9 = vpop.f32.mrf.mxu0  ;;  %6696 = vmatmul.mubr.msk.bf16.gmra.mxu0 %vm204_vm1, %v3083_v32  ;;  %v11320_v32 = vld [vmem:[#allocation12_spill] sm:$0xff] }
 0x167   :  { %11317 = vst [vmem:[#allocation10_spill] sm:$0xff] %v8568_v34  ;;  %v6415_v24 = vpop.f32.mrf.mxu1  ;;  %6638 = vmatmul.mubr.msk.bf16.gmra.mxu1 %vm204_vm1, %v2567_v50  ;;  %v8585_v21 = vadd.f32 %v6473_v9, %v900_v2  ;;  %6699 = vmatprep.mubr.msk.bf16.mxu0 %vm204_vm1, %v3084_v59  ;;  %v2529_v9 = vld [vmem:[%s11167_s0 + $0x13a] sm:$0xff]  ;;  %v3043_v50 = vld [vmem:[%s11167_s0 + $0x128] sm:$0xff]  ;;  %v903_v47 = vadd.f32 %v6412_v18, %v11320_v32 }
 0x168   :  { %6641 = vmatprep.mubr.msk.bf16.mxu1 %vm204_vm1, %v2568_v29  ;;  %v1349_v15 = vpop.f32.mrf.mxu0  ;;  %v3085_v2 = vpack.c.bf16 %v3041_v52, %v3040_v36  ;;  %v11322_v34 = vld [vmem:[#allocation13_spill] sm:$0xff]  ;;  %v2570_v18 = vpack.c.bf16 %v2529_v9, %v2528_v55  ;;  %v11324_v32 = vld [vmem:[#allocation14_spill] sm:$0xff]  ;;  %v3044_v9 = vld [vmem:[%s11167_s0 + $0x130] sm:$0xff] }
 0x169   :  { %11319 = vst [vmem:[#allocation11_spill] sm:$0xff] %v8585_v21  ;;  %v907_v43 = vpop.f32.mrf.mxu1  ;;  %4871 = vperm.xlu1 %6869, %v4613_v1   ;;  %v8608_v29 = vadd.f32 %v1349_v15, %v892_v27  ;;  %4876 = vperm.xlu0 %6868, %v4614_v38   ;;  %v4616_v21 = vld [vmem:[%s11168_s4 + $0x1a0] sm:$0xff]  ;;  %v895_v25 = vadd.f32 %v894_v45, %v11322_v34  ;;  %v2531_v45 = vld [vmem:[%s11167_s0 + $0x14a] sm:$0xff] }
 0x16a   :  { %v6474_v20 = vpop.f32.mrf.mxu0  ;;  %v3086_v27 = vpack.c.bf16 %v3043_v50, %v3042_v8  ;;  %v916_v7 = vadd.f32 %v6415_v24, %v11324_v32  ;;  %v2530_v36 = vld [vmem:[%s11167_s0 + $0x142] sm:$0xff]  ;;  %v4618_v34 = vld [vmem:[%s11168_s4 + $0x1b0] sm:$0xff]  ;;  %v3045_v8 = vld [vmem:[%s11167_s0 + $0x138] sm:$0xff] }
 0x16b   :  { %11321 = vst [vmem:[#allocation12_spill] sm:$0xff] %v8608_v29  ;;  %v6416_v59 = vpop.f32.mrf.mxu1  ;;  %v8617_v1 = vadd.f32 %v6474_v20, %v903_v47  ;;  %v11326_v24 = vld [vmem:[#allocation15_spill] sm:$0xff]  ;;  %v2532_v50 = vld [vmem:[%s11167_s0 + $0x152] sm:$0xff]  ;;  %v3046_v20 = vld [vmem:[%s11167_s0 + $0x140] sm:$0xff]  ;;  %v2571_v32 = vpack.c.bf16 %v2531_v45, %v2530_v36 }
 0x16c   :  { %v1352_v38 = vpop.f32.mrf.mxu0 }
 0x16d   :  { %11323 = vst [vmem:[#allocation13_spill] sm:$0xff] %v8617_v1  ;;  %v910_v15 = vpop.f32.mrf.mxu1  ;;  %4881 = vperm.xlu1 %6869, %v4615_v17   ;;  %v8620_v49 = vadd.f32 %v1352_v38, %v895_v25  ;;  %4886 = vperm.xlu0 %6868, %v4616_v21   ;;  %v4617_v25 = vld [vmem:[%s11168_s4 + $0x1a8] sm:$0xff]  ;;  %v908_v21 = vadd.f32 %v907_v43, %v11326_v24  ;;  %v4619_v24 = vld [vmem:[%s11168_s4 + $0x1b8] sm:$0xff] }
 0x16e   :  { %v6477_v29 = vpop.f32.mrf.mxu0  ;;  %6700 = vmatmul.mubr.msk.bf16.gmra.mxu0 %vm204_vm1, %v3085_v2  ;;  %v11328_v2 = vld [vmem:[#allocation16_spill] sm:$0xff] }
 0x16f   :  { %11325 = vst [vmem:[#allocation14_spill] sm:$0xff] %v8620_v49  ;;  %v6419_v52 = vpop.f32.mrf.mxu1  ;;  %6642 = vmatmul.mubr.msk.bf16.gmra.mxu1 %vm204_vm1, %v2569_v35  ;;  %v8637_v55 = vadd.f32 %v6477_v29, %v916_v7  ;;  %6703 = vmatprep.mubr.msk.bf16.mxu0 %vm204_vm1, %v3086_v27  ;;  %v2533_v29 = vld [vmem:[%s11167_s0 + $0x15a] sm:$0xff]  ;;  %v3047_v35 = vld [vmem:[%s11167_s0 + $0x148] sm:$0xff]  ;;  %v919_v17 = vadd.f32 %v6416_v59, %v11328_v2 }
 0x170   :  { %6645 = vmatprep.mubr.msk.bf16.mxu1 %vm204_vm1, %v2570_v18  ;;  %v1365_v43 = vpop.f32.mrf.mxu0  ;;  %v3087_v7 = vpack.c.bf16 %v3045_v8, %v3044_v9  ;;  %v11330_v49 = vld [vmem:[#allocation17_spill] sm:$0xff]  ;;  %v2572_v59 = vpack.c.bf16 %v2533_v29, %v2532_v50  ;;  %v11332_v2 = vld [vmem:[#allocation18_spill] sm:$0xff]  ;;  %v2535_v8 = vld [vmem:[%s11167_s0 + $0x16a] sm:$0xff] }
 0x171   :  { %11327 = vst [vmem:[#allocation15_spill] sm:$0xff] %v8637_v55  ;;  %v923_v47 = vpop.f32.mrf.mxu1  ;;  %4891 = vperm.xlu1 %6869, %v4617_v25   ;;  %v8660_v18 = vadd.f32 %v1365_v43, %v908_v21  ;;  %4896 = vperm.xlu0 %6868, %v4618_v34   ;;  %v4620_v55 = vld [vmem:[%s11168_s4 + $0x1c0] sm:$0xff]  ;;  %v911_v1 = vadd.f32 %v910_v15, %v11330_v49  ;;  %v4622_v50 = vld [vmem:[%s11168_s4 + $0x1d0] sm:$0xff]  ;;  %v11334_v29 = vld [vmem:[#allocation19_spill] sm:$0xff] }
 0x172   :  { %v6478_v38 = vpop.f32.mrf.mxu0  ;;  %v3088_v21 = vpack.c.bf16 %v3047_v35, %v3046_v20  ;;  %v932_v36 = vadd.f32 %v6419_v52, %v11332_v2  ;;  %v2534_v9 = vld [vmem:[%s11167_s0 + $0x162] sm:$0xff] }
 0x173   :  { %11329 = vst [vmem:[#allocation16_spill] sm:$0xff] %v8660_v18  ;;  %v6420_v27 = vpop.f32.mrf.mxu1  ;;  %v8669_v25 = vadd.f32 %v6478_v38, %v919_v17  ;;  %v4621_v52 = vld [vmem:[%s11168_s4 + $0x1c8] sm:$0xff]  ;;  %v11336_v35 = vld [vmem:[#allocation22_spill] sm:$0xff]  ;;  %v3049_v38 = vld [vmem:[%s11167_s0 + $0x158] sm:$0xff] }
 0x174   :  { %v1368_v34 = vpop.f32.mrf.mxu0  ;;  %v11338_v18 = vld [vmem:[#allocation21_spill] sm:$0xff] }
 0x175   :  { %11331 = vst [vmem:[#allocation17_spill] sm:$0xff] %v8669_v25  ;;  %v926_v43 = vpop.f32.mrf.mxu1  ;;  %4901 = vperm.xlu1 %6869, %v4619_v24   ;;  %v8672_v45 = vadd.f32 %v1368_v34, %v911_v1  ;;  %4906 = vperm.xlu0 %6868, %v4620_v55   ;;  %v3048_v1 = vld [vmem:[%s11167_s0 + $0x150] sm:$0xff]  ;;  %v924_v55 = vadd.f32 %v923_v47, %v11334_v29  ;;  %v2537_v47 = vld [vmem:[%s11167_s0 + $0x17a] sm:$0xff] }
 0x176   :  { %v6481_v15 = vpop.f32.mrf.mxu0  ;;  %6704 = vmatmul.mubr.msk.bf16.gmra.mxu0 %vm204_vm1, %v3087_v7  ;;  %v11337_v34 = vld [vmem:[#allocation20_spill] sm:$0xff]  ;;  %v4623_v25 = vld [vmem:[%s11168_s4 + $0x1d8] sm:$0x3f]  ;;  %v927_v48 = vadd.f32 %v926_v43, %v11338_v18  ;;  %v2538_v18 = vld [vmem:[%s11167_s0 + $0x182] sm:$0xff] }
 0x177   :  { %11333 = vst [vmem:[#allocation18_spill] sm:$0xff] %v8672_v45  ;;  %v6487_v49 = vpop.f32.mrf.mxu1  ;;  %6646 = vmatmul.mubr.msk.bf16.gmra.mxu1 %vm204_vm1, %v2571_v32  ;;  %v8692_v20 = vadd.f32 %v6481_v15, %v932_v36  ;;  %6707 = vmatprep.mubr.msk.bf16.mxu0 %vm204_vm1, %v3088_v21  ;;  %v2536_v32 = vld [vmem:[%s11167_s0 + $0x172] sm:$0xff]  ;;  %v3051_v21 = vld [vmem:[%s11167_s0 + $0x168] sm:$0xff]  ;;  %v935_v2 = vadd.f32 %v6420_v27, %v11337_v34 }
 0x178   :  { %v1916_v17 = vadd.f32 %v6487_v49, %v11336_v35  ;;  %6649 = vmatprep.mubr.msk.bf16.mxu1 %vm204_vm1, %v2572_v59  ;;  %v1381_v7 = vpop.f32.mrf.mxu0  ;;  %v3050_v59 = vld [vmem:[%s11167_s0 + $0x160] sm:$0xff]  ;;  %v2573_v35 = vpack.c.bf16 %v2535_v8, %v2534_v9  ;;  %v2574_v45 = vpack.c.bf16 %v2537_v47, %v2536_v32  ;;  %v3053_v43 = vld [vmem:[%s11167_s0 + $0x178] sm:$0xff] }
 0x179   :  { %11335 = vst [vmem:[#allocation19_spill] sm:$0xff] %v8692_v20  ;;  %v1675_v24 = vpop.f32.mrf.mxu1  ;;  %4911 = vperm.xlu1 %6869, %v4621_v52   ;;  %v8713_v36 = vadd.f32 %v1381_v7, %v924_v55  ;;  %4916 = vperm.xlu0 %6868, %v4622_v50   ;;  %v3089_v20 = vpack.c.bf16 %v3049_v38, %v3048_v1  ;;  %v2540_v50 = vld [vmem:[%s11167_s0 + $0x192] sm:$0xff]  ;;  %v3055_v38 = vld [vmem:[%s11167_s0 + $0x188] sm:$0xff] }
 0x17a   :  { %v1914_v15 = vadd.f32 %v1675_v24, %v7998_v56  ;;  %v6482_v49 = vpop.f32.mrf.mxu0  ;;  %v3090_v52 = vpack.c.bf16 %v3051_v21, %v3050_v59 }
 0x17b   :  { %v6488_v29 = vpop.f32.mrf.mxu1  ;;  %v8720_v6 = vadd.f32 %v6482_v49, %v935_v2 }
 0x17c   :  { %v1917_v27 = vadd.f32 %v6488_v29, %v8007_v33  ;;  %v1384_v55 = vpop.f32.mrf.mxu0  ;;  %v2539_v33 = vld [vmem:[%s11167_s0 + $0x18a] sm:$0xff] }
 0x17d   :  { %v1678_v7 = vpop.f32.mrf.mxu1  ;;  %4921 = vperm.xlu1 %6869, %v4623_v25   ;;  %v8723_v56 = vadd.f32 %v1384_v55, %v927_v48  ;;  %v2575_v21 = vpack.c.bf16 %v2539_v33, %v2538_v18  ;;  %v2544_v33 = vld [vmem:[%s11167_s0 + $0x1b2] sm:$0xff] }
 0x17e   :  { %v1915_v9 = vadd.f32 %v1678_v7, %v8010_v63  ;;  %v6549_v1 = vpop.f32.mrf.mxu0  ;;  %6708 = vmatmul.mubr.msk.bf16.gmra.mxu0 %vm204_vm1, %v3089_v20  ;;  %v3052_v63 = vld [vmem:[%s11167_s0 + $0x170] sm:$0xff] }
 0x17f   :  { %v6491_v8 = vpop.f32.mrf.mxu1  ;;  %6650 = vmatmul.mubr.msk.bf16.gmra.mxu1 %vm204_vm1, %v2573_v35  ;;  %v8735_v48 = vadd.f32 %v6549_v1, %v1916_v17  ;;  %6711 = vmatprep.mubr.msk.bf16.mxu0 %vm204_vm1, %v3090_v52  ;;  %v3054_v17 = vld [vmem:[%s11167_s0 + $0x180] sm:$0xff]  ;;  %v3091_v34 = vpack.c.bf16 %v3053_v43, %v3052_v63 }
 0x180   :  { %v1920_v25 = vadd.f32 %v6491_v8, %v8022_v16  ;;  %6653 = vmatprep.mubr.msk.bf16.mxu1 %vm204_vm1, %v2574_v45  ;;  %v2193_v16 = vpop.f32.mrf.mxu0  ;;  %v2541_v45 = vld [vmem:[%s11167_s0 + $0x19a] sm:$0xff]  ;;  %v3092_v35 = vpack.c.bf16 %v3055_v38, %v3054_v17 }
 0x181   :  { %v1691_v20 = vpop.f32.mrf.mxu1  ;;  %v8758_v47 = vadd.f32 %v2193_v16, %v1914_v15  ;;  %v2576_v29 = vpack.c.bf16 %v2541_v45, %v2540_v50  ;;  %v2543_v15 = vld [vmem:[%s11167_s0 + $0x1aa] sm:$0xff]  ;;  %v3058_v43 = vld [vmem:[%s11167_s0 + $0x1a0] sm:$0xff] }
 0x182   :  { %v1918_v32 = vadd.f32 %v1691_v20, %v8040_v10  ;;  %v6550_v59 = vpop.f32.mrf.mxu0  ;;  %v3059_v50 = vld [vmem:[%s11167_s0 + $0x1a8] sm:$0xff] }
 0x183   :  { %v6492_v24 = vpop.f32.mrf.mxu1  ;;  %v8761_v49 = vadd.f32 %v6550_v59, %v1917_v27 }
 0x184   :  { %v1921_v2 = vadd.f32 %v6492_v24, %v8049_v44  ;;  %v2196_v55 = vpop.f32.mrf.mxu0  ;;  %v2542_v44 = vld [vmem:[%s11167_s0 + $0x1a2] sm:$0xff] }
 0x185   :  { %v1694_v52 = vpop.f32.mrf.mxu1  ;;  %v8764_v8 = vadd.f32 %v2196_v55, %v1915_v9  ;;  %v3057_v9 = vld [vmem:[%s11167_s0 + $0x198] sm:$0xff]  ;;  %v2577_v38 = vpack.c.bf16 %v2543_v15, %v2542_v44 }
 0x186   :  { %v1919_v7 = vadd.f32 %v1694_v52, %v8052_v14  ;;  %v6553_v10 = vpop.f32.mrf.mxu0  ;;  %6712 = vmatmul.mubr.msk.bf16.gmra.mxu0 %vm204_vm1, %v3091_v34  ;;  %v3056_v14 = vld [vmem:[%s11167_s0 + $0x190] sm:$0xff] }
 0x187   :  { %v6495_v1 = vpop.f32.mrf.mxu1  ;;  %6654 = vmatmul.mubr.msk.bf16.gmra.mxu1 %vm204_vm1, %v2575_v21  ;;  %v8775_v18 = vadd.f32 %v6553_v10, %v1920_v25  ;;  %6715 = vmatprep.mubr.msk.bf16.mxu0 %vm204_vm1, %v3092_v35  ;;  %v2545_v25 = vld [vmem:[%s11167_s0 + $0x1ba] sm:$0xff]  ;;  %v3093_v24 = vpack.c.bf16 %v3057_v9, %v3056_v14  ;;  %v2548_v15 = vld [vmem:[%s11167_s0 + $0x1d2] sm:$0xff] }
 0x188   :  { %v1924_v27 = vadd.f32 %v6495_v1, %v8064_v40  ;;  %6657 = vmatprep.mubr.msk.bf16.mxu1 %vm204_vm1, %v2576_v29  ;;  %v2209_v40 = vpop.f32.mrf.mxu0  ;;  %v2578_v34 = vpack.c.bf16 %v2545_v25, %v2544_v33  ;;  %v3094_v29 = vpack.c.bf16 %v3059_v50, %v3058_v43  ;;  %v3062_v9 = vld [vmem:[%s11167_s0 + $0x1c0] sm:$0xff]  ;;  %v3063_v33 = vld [vmem:[%s11167_s0 + $0x1c8] sm:$0xff] }
 0x189   :  { %v1707_v63 = vpop.f32.mrf.mxu1  ;;  %v8798_v16 = vadd.f32 %v2209_v40, %v1918_v32  ;;  %v2547_v32 = vld [vmem:[%s11167_s0 + $0x1ca] sm:$0xff] }
 0x18a   :  { %v1922_v20 = vadd.f32 %v1707_v63, %v8085_v51  ;;  %v6554_v17 = vpop.f32.mrf.mxu0 }
 0x18b   :  { %v6496_v45 = vpop.f32.mrf.mxu1  ;;  %v8801_v21 = vadd.f32 %v6554_v17, %v1921_v2 }
 0x18c   :  { %v1925_v59 = vadd.f32 %v6496_v45, %v8094_v54  ;;  %v2212_v52 = vpop.f32.mrf.mxu0  ;;  %v2546_v54 = vld [vmem:[%s11167_s0 + $0x1c2] sm:$0xff] }
 0x18d   :  { %v1710_v35 = vpop.f32.mrf.mxu1  ;;  %v8804_v1 = vadd.f32 %v2212_v52, %v1919_v7  ;;  %v3061_v7 = vld [vmem:[%s11167_s0 + $0x1b8] sm:$0xff]  ;;  %v2579_v50 = vpack.c.bf16 %v2547_v32, %v2546_v54  ;;  %v3066_v32 = vld [vmem:[%s11167_s0 + $0x1e0] sm:$0xff] }
 0x18e   :  { %v1923_v55 = vadd.f32 %v1710_v35, %v8098_v28  ;;  %v6557_v51 = vpop.f32.mrf.mxu0  ;;  %6716 = vmatmul.mubr.msk.bf16.gmra.mxu0 %vm204_vm1, %v3093_v24  ;;  %v3060_v28 = vld [vmem:[%s11167_s0 + $0x1b0] sm:$0xff] }
 0x18f   :  { %v6499_v10 = vpop.f32.mrf.mxu1  ;;  %6658 = vmatmul.mubr.msk.bf16.gmra.mxu1 %vm204_vm1, %v2577_v38  ;;  %v8815_v44 = vadd.f32 %v6557_v51, %v1924_v27  ;;  %6719 = vmatprep.mubr.msk.bf16.mxu0 %vm204_vm1, %v3094_v29  ;;  %v2549_v27 = vld [vmem:[%s11167_s0 + $0x1da] sm:$0xff]  ;;  %v3095_v45 = vpack.c.bf16 %v3061_v7, %v3060_v28 }
 0x190   :  { %v1928_v2 = vadd.f32 %v6499_v10, %v8116_v46  ;;  %6661 = vmatprep.mubr.msk.bf16.mxu1 %vm204_vm1, %v2578_v34  ;;  %v2225_v46 = vpop.f32.mrf.mxu0  ;;  %v2580_v24 = vpack.c.bf16 %v2549_v27, %v2548_v15  ;;  %v3096_v34 = vpack.c.bf16 %v3063_v33, %v3062_v9  ;;  %v3528_v7 = vld [vmem:[%s11167_s0 + $0x21] sm:$0xff]  ;;  %v3529_v15 = vld [vmem:[%s11167_s0 + $0x29] sm:$0xff] }
 0x191   :  { %v1723_v14 = vpop.f32.mrf.mxu1  ;;  %v8838_v40 = vadd.f32 %v2225_v46, %v1922_v20  ;;  %v2551_v20 = vld [vmem:[%s11167_s0 + $0x1ea] sm:$0x3f] }
 0x192   :  { %v1926_v63 = vadd.f32 %v1723_v14, %v8139_v61  ;;  %v6558_v43 = vpop.f32.mrf.mxu0 }
 0x193   :  { %v6500_v25 = vpop.f32.mrf.mxu1  ;;  %v8841_v38 = vadd.f32 %v6558_v43, %v1925_v59 }
 0x194   :  { %v1929_v17 = vadd.f32 %v6500_v25, %v8148_v58  ;;  %v2228_v35 = vpop.f32.mrf.mxu0  ;;  %v2550_v58 = vld [vmem:[%s11167_s0 + $0x1e2] sm:$0xff] }
 0x195   :  { %v1726_v29 = vpop.f32.mrf.mxu1  ;;  %v8844_v10 = vadd.f32 %v2228_v35, %v1923_v55  ;;  %v3065_v55 = vld [vmem:[%s11167_s0 + $0x1d8] sm:$0xff]  ;;  %v2581_v33 = vpack.c.bf16 %v2551_v20, %v2550_v58  ;;  %v3532_v20 = vld [vmem:[%s11167_s0 + $0x41] sm:$0xff] }
 0x196   :  { %v1927_v52 = vadd.f32 %v1726_v29, %v8151_v31  ;;  %v6561_v61 = vpop.f32.mrf.mxu0  ;;  %6720 = vmatmul.mubr.msk.bf16.gmra.mxu0 %vm204_vm1, %v3095_v45  ;;  %v3064_v31 = vld [vmem:[%s11167_s0 + $0x1d0] sm:$0xff] }
 0x197   :  { %v6503_v51 = vpop.f32.mrf.mxu1  ;;  %6662 = vmatmul.mubr.msk.bf16.gmra.mxu1 %vm204_vm1, %v2579_v50  ;;  %v8855_v54 = vadd.f32 %v6561_v61, %v1928_v2  ;;  %6723 = vmatprep.mubr.msk.bf16.mxu0 %vm204_vm1, %v3096_v34  ;;  %v3067_v2 = vld [vmem:[%s11167_s0 + $0x1e8] sm:$0xff]  ;;  %v3097_v25 = vpack.c.bf16 %v3065_v55, %v3064_v31 }
 0x198   :  { %v1932_v59 = vadd.f32 %v6503_v51, %v8168_v23  ;;  %6665 = vmatprep.mubr.msk.bf16.mxu1 %vm204_vm1, %v2580_v24  ;;  %v2241_v23 = vpop.f32.mrf.mxu0  ;;  %v3098_v45 = vpack.c.bf16 %v3067_v2, %v3066_v32  ;;  %v3588_v24 = vpack.c.bf16 %v3529_v15, %v3528_v7  ;;  %v4046_v55 = vld [vmem:[%s11167_s0 + $0x22] sm:$0xff]  ;;  %v4047_v32 = vld [vmem:[%s11167_s0 + $0x2a] sm:$0xff] }
 0x199   :  { %v1739_v28 = vpop.f32.mrf.mxu1  ;;  %v8878_v46 = vadd.f32 %v2241_v23, %v1926_v63  ;;  %v3069_v63 = vld [vmem:[%s11167_s0 + $0x1f8] sm:$0x3f] }
 0x19a   :  { %v1930_v14 = vadd.f32 %v1739_v28, %v8191_v11  ;;  %v6562_v9 = vpop.f32.mrf.mxu0 }
 0x19b   :  { %v6504_v27 = vpop.f32.mrf.mxu1  ;;  %v8881_v50 = vadd.f32 %v6562_v9, %v1929_v17 }
 0x19c   :  { %v1933_v43 = vadd.f32 %v6504_v27, %v8200_v26  ;;  %v2244_v29 = vpop.f32.mrf.mxu0  ;;  %v3068_v26 = vld [vmem:[%s11167_s0 + $0x1f0] sm:$0xff] }
 0x19d   :  { %v1742_v34 = vpop.f32.mrf.mxu1  ;;  %v8884_v51 = vadd.f32 %v2244_v29, %v1927_v52  ;;  %v3531_v52 = vld [vmem:[%s11167_s0 + $0x39] sm:$0xff]  ;;  %v3099_v15 = vpack.c.bf16 %v3069_v63, %v3068_v26  ;;  %v3536_v63 = vld [vmem:[%s11167_s0 + $0x61] sm:$0xff] }
 0x19e   :  { %v1931_v35 = vadd.f32 %v1742_v34, %v8203_v62  ;;  %v6565_v11 = vpop.f32.mrf.mxu0  ;;  %6724 = vmatmul.mubr.msk.bf16.gmra.mxu0 %vm204_vm1, %v3097_v25  ;;  %v3530_v62 = vld [vmem:[%s11167_s0 + $0x31] sm:$0xff] }
 0x19f   :  { %v6507_v61 = vpop.f32.mrf.mxu1  ;;  %6666 = vmatmul.mubr.msk.bf16.gmra.mxu1 %vm204_vm1, %v2581_v33  ;;  %v8895_v58 = vadd.f32 %v6565_v11, %v1932_v59  ;;  %6727 = vmatprep.mubr.msk.bf16.mxu0 %vm204_vm1, %v3098_v45  ;;  %v3533_v59 = vld [vmem:[%s11167_s0 + $0x49] sm:$0xff]  ;;  %v3589_v27 = vpack.c.bf16 %v3531_v52, %v3530_v62  ;;  %v4106_v45 = vpack.c.bf16 %v4047_v32, %v4046_v55 }
 0x1a0   :  { %v1936_v17 = vadd.f32 %v6507_v61, %v8219_v37  ;;  %6733 = vmatprep.mubr.msk.bf16.mxu1 %vm204_vm1, %v3588_v24  ;;  %v2257_v37 = vpop.f32.mrf.mxu0  ;;  %v3590_v25 = vpack.c.bf16 %v3533_v59, %v3532_v20  ;;  %v4050_v52 = vld [vmem:[%s11167_s0 + $0x42] sm:$0xff]  ;;  %v4051_v20 = vld [vmem:[%s11167_s0 + $0x4a] sm:$0xff] }
 0x1a1   :  { %v1755_v31 = vpop.f32.mrf.mxu1  ;;  %v8918_v23 = vadd.f32 %v2257_v37, %v1930_v14  ;;  %v3535_v14 = vld [vmem:[%s11167_s0 + $0x59] sm:$0xff] }
 0x1a2   :  { %v1934_v28 = vadd.f32 %v1755_v31, %v8239_v57  ;;  %v6566_v7 = vpop.f32.mrf.mxu0 }
 0x1a3   :  { %v6508_v2 = vpop.f32.mrf.mxu1  ;;  %v8921_v33 = vadd.f32 %v6566_v7, %v1933_v43 }
 0x1a4   :  { %v1937_v9 = vadd.f32 %v6508_v2, %v8254_v12  ;;  %v2260_v34 = vpop.f32.mrf.mxu0  ;;  %v3534_v12 = vld [vmem:[%s11167_s0 + $0x51] sm:$0xff] }
 0x1a5   :  { %v1758_v24 = vpop.f32.mrf.mxu1  ;;  %v8924_v61 = vadd.f32 %v2260_v34, %v1931_v35  ;;  %v4049_v35 = vld [vmem:[%s11167_s0 + $0x3a] sm:$0xff]  ;;  %v3591_v32 = vpack.c.bf16 %v3535_v14, %v3534_v12 }
 0x1a6   :  { %v1935_v29 = vadd.f32 %v1758_v24, %v8259_v0  ;;  %v6569_v57 = vpop.f32.mrf.mxu0  ;;  %6728 = vmatmul.mubr.msk.bf16.gmra.mxu0 %vm204_vm1, %v3099_v15  ;;  %v4048_v0 = vld [vmem:[%s11167_s0 + $0x32] sm:$0xff]  ;;  %v3540_v14 = vld [vmem:[%s11167_s0 + $0x81] sm:$0xff] }
 0x1a7   :  { %v6511_v11 = vpop.f32.mrf.mxu1  ;;  %6734 = vmatmul.mubr.msk.bf16.vlgmr.msra.gmra.mxu1 %vm204_vm1, %v3589_v27  ;;  %v8935_v26 = vadd.f32 %v6569_v57, %v1936_v17  ;;  %6795 = vmatprep.mubr.msk.bf16.mxu0 %vm204_vm1, %v4106_v45  ;;  %v3537_v17 = vld [vmem:[%s11167_s0 + $0x69] sm:$0xff]  ;;  %v4107_v2 = vpack.c.bf16 %v4049_v35, %v4048_v0 }
 0x1a8   :  { %v1940_v43 = vadd.f32 %v6511_v11, %v8276_v4  ;;  %6737 = vmatprep.mubr.msk.bf16.mxu1 %vm204_vm1, %v3590_v25  ;;  %v2273_v4 = vpop.f32.mrf.mxu0  ;;  %v3592_v27 = vpack.c.bf16 %v3537_v17, %v3536_v63  ;;  %v4108_v25 = vpack.c.bf16 %v4051_v20, %v4050_v52  ;;  %v4054_v35 = vld [vmem:[%s11167_s0 + $0x62] sm:$0xff]  ;;  %v4055_v63 = vld [vmem:[%s11167_s0 + $0x6a] sm:$0xff] }
 0x1a9   :  { %v1771_v62 = vpop.f32.mrf.mxu1  ;;  %v8958_v37 = vadd.f32 %v2273_v4, %v1934_v28  ;;  %v3539_v28 = vld [vmem:[%s11167_s0 + $0x79] sm:$0xff] }
 0x1aa   :  { %v1938_v31 = vadd.f32 %v1771_v62, %v8299_v19  ;;  %v6570_v55 = vpop.f32.mrf.mxu0 }
 0x1ab   :  { %v6512_v59 = vpop.f32.mrf.mxu1  ;;  %v8961_v15 = vadd.f32 %v6570_v55, %v1937_v9 }
 0x1ac   :  { %v1941_v7 = vadd.f32 %v6512_v59, %v8308_v53  ;;  %v2276_v24 = vpop.f32.mrf.mxu0  ;;  %v3538_v53 = vld [vmem:[%s11167_s0 + $0x71] sm:$0xff] }
 0x1ad   :  { %v1774_v45 = vpop.f32.mrf.mxu1  ;;  %v8964_v11 = vadd.f32 %v2276_v24, %v1935_v29  ;;  %v4053_v29 = vld [vmem:[%s11167_s0 + $0x5a] sm:$0xff]  ;;  %v3593_v20 = vpack.c.bf16 %v3539_v28, %v3538_v53 }
 0x1ae   :  { %v1939_v34 = vadd.f32 %v1774_v45, %v8311_v42  ;;  %v6573_v19 = vpop.f32.mrf.mxu0  ;;  %6796 = vmatmul.mubr.msk.bf16.vlgmr.msra.gmra.mxu0 %vm204_vm1, %v4107_v2  ;;  %v4052_v42 = vld [vmem:[%s11167_s0 + $0x52] sm:$0xff]  ;;  %v3544_v28 = vld [vmem:[%s11167_s0 + $0xa1] sm:$0xff] }
 0x1af   :  { %v6515_v57 = vpop.f32.mrf.mxu1  ;;  %6738 = vmatmul.mubr.msk.bf16.gmra.mxu1 %vm204_vm1, %v3591_v32  ;;  %v8975_v12 = vadd.f32 %v6573_v19, %v1940_v43  ;;  %6799 = vmatprep.mubr.msk.bf16.mxu0 %vm204_vm1, %v4108_v25  ;;  %v3541_v43 = vld [vmem:[%s11167_s0 + $0x89] sm:$0xff]  ;;  %v4109_v59 = vpack.c.bf16 %v4053_v29, %v4052_v42 }
 0x1b0   :  { %v1944_v9 = vadd.f32 %v6515_v57, %v8327_v60  ;;  %6741 = vmatprep.mubr.msk.bf16.mxu1 %vm204_vm1, %v3592_v27  ;;  %v2289_v60 = vpop.f32.mrf.mxu0  ;;  %v3594_v2 = vpack.c.bf16 %v3541_v43, %v3540_v14  ;;  %v4110_v27 = vpack.c.bf16 %v4055_v63, %v4054_v35  ;;  %v4058_v29 = vld [vmem:[%s11167_s0 + $0x82] sm:$0xff]  ;;  %v4059_v14 = vld [vmem:[%s11167_s0 + $0x8a] sm:$0xff] }
 0x1b1   :  { %v1787_v0 = vpop.f32.mrf.mxu1  ;;  %v8998_v4 = vadd.f32 %v2289_v60, %v1938_v31  ;;  %v3543_v31 = vld [vmem:[%s11167_s0 + $0x99] sm:$0xff] }
 0x1b2   :  { %v1942_v62 = vadd.f32 %v1787_v0, %v8349_v22  ;;  %v6574_v52 = vpop.f32.mrf.mxu0 }
 0x1b3   :  { %v6516_v17 = vpop.f32.mrf.mxu1  ;;  %v9001_v32 = vadd.f32 %v6574_v52, %v1941_v7 }
 0x1b4   :  { %v1945_v55 = vadd.f32 %v6516_v17, %v8357_v13  ;;  %v2292_v45 = vpop.f32.mrf.mxu0  ;;  %v3542_v13 = vld [vmem:[%s11167_s0 + $0x91] sm:$0xff] }
 0x1b5   :  { %v1790_v25 = vpop.f32.mrf.mxu1  ;;  %v9004_v57 = vadd.f32 %v2292_v45, %v1939_v34  ;;  %v4057_v34 = vld [vmem:[%s11167_s0 + $0x7a] sm:$0xff]  ;;  %v3595_v63 = vpack.c.bf16 %v3543_v31, %v3542_v13 }
 0x1b6   :  { %v1943_v24 = vadd.f32 %v1790_v25, %v8360_v39  ;;  %v6577_v22 = vpop.f32.mrf.mxu0  ;;  %6800 = vmatmul.mubr.msk.bf16.gmra.mxu0 %vm204_vm1, %v4109_v59  ;;  %v4056_v39 = vld [vmem:[%s11167_s0 + $0x72] sm:$0xff] }
 0x1b7   :  { %v6519_v19 = vpop.f32.mrf.mxu1  ;;  %6742 = vmatmul.mubr.msk.bf16.gmra.mxu1 %vm204_vm1, %v3593_v20  ;;  %v9015_v53 = vadd.f32 %v6577_v22, %v1944_v9  ;;  %6803 = vmatprep.mubr.msk.bf16.mxu0 %vm204_vm1, %v4110_v27  ;;  %v3545_v9 = vld [vmem:[%s11167_s0 + $0xa9] sm:$0xff]  ;;  %v4111_v17 = vpack.c.bf16 %v4057_v34, %v4056_v39  ;;  %v3548_v39 = vld [vmem:[%s11167_s0 + $0xc1] sm:$0xff] }
 0x1b8   :  { %v1948_v7 = vadd.f32 %v6519_v19, %v8377_v3  ;;  %6745 = vmatprep.mubr.msk.bf16.mxu1 %vm204_vm1, %v3594_v2  ;;  %v2305_v3 = vpop.f32.mrf.mxu0  ;;  %v3596_v59 = vpack.c.bf16 %v3545_v9, %v3544_v28  ;;  %v4112_v2 = vpack.c.bf16 %v4059_v14, %v4058_v29  ;;  %v11344_v9 = vld [vmem:[#allocation24_spill] sm:$0xff] }
 0x1b9   :  { %v1803_v42 = vpop.f32.mrf.mxu1  ;;  %v9038_v60 = vadd.f32 %v2305_v3, %v1942_v62  ;;  %v3547_v62 = vld [vmem:[%s11167_s0 + $0xb9] sm:$0xff]  ;;  %v4063_v3 = vld [vmem:[%s11167_s0 + $0xaa] sm:$0xff] }
 0x1ba   :  { %v1946_v0 = vadd.f32 %v1803_v42, %v8400_v5  ;;  %v6578_v35 = vpop.f32.mrf.mxu0  ;;  %v4062_v42 = vld [vmem:[%s11167_s0 + $0xa2] sm:$0xff] }
 0x1bb   :  { %11339 = vst [vmem:[#allocation22_spill] sm:$0xff] %v9038_v60  ;;  %v6520_v43 = vpop.f32.mrf.mxu1  ;;  %v9041_v20 = vadd.f32 %v6578_v35, %v1945_v55  ;;  %v11342_v55 = vld [vmem:[#allocation23_spill] sm:$0xff] }
 0x1bc   :  { %v1949_v52 = vadd.f32 %v6520_v43, %v8409_v30  ;;  %v2308_v25 = vpop.f32.mrf.mxu0  ;;  %v3546_v30 = vld [vmem:[%s11167_s0 + $0xb1] sm:$0xff] }
 0x1bd   :  { %11340 = vst [vmem:[#allocation20_spill] sm:$0xff] %v9041_v20  ;;  %v1806_v27 = vpop.f32.mrf.mxu1  ;;  %v9044_v19 = vadd.f32 %v2308_v25, %v1943_v24  ;;  %v4061_v24 = vld [vmem:[%s11167_s0 + $0x9a] sm:$0xff] }
 0x1be   :  { %v1947_v45 = vadd.f32 %v1806_v27, %v8412_v41  ;;  %v6581_v5 = vpop.f32.mrf.mxu0  ;;  %6804 = vmatmul.mubr.msk.bf16.gmra.mxu0 %vm204_vm1, %v4111_v17  ;;  %v4060_v41 = vld [vmem:[%s11167_s0 + $0x92] sm:$0xff] }
 0x1bf   :  { %11341 = vst [vmem:[#allocation21_spill] sm:$0xff] %v9044_v19  ;;  %v6523_v22 = vpop.f32.mrf.mxu1  ;;  %6746 = vmatmul.mubr.msk.bf16.gmra.mxu1 %vm204_vm1, %v3595_v63  ;;  %v9055_v31 = vadd.f32 %v6581_v5, %v1948_v7  ;;  %6807 = vmatprep.mubr.msk.bf16.mxu0 %vm204_vm1, %v4112_v2  ;;  %v3549_v7 = vld [vmem:[%s11167_s0 + $0xc9] sm:$0xff]  ;;  %v3597_v63 = vpack.c.bf16 %v3547_v62, %v3546_v30 }
 0x1c0   :  { %v1952_v13 = vadd.f32 %v6523_v22, %v11342_v55  ;;  %6749 = vmatprep.mubr.msk.bf16.mxu1 %vm204_vm1, %v3596_v59  ;;  %v2321_v28 = vpop.f32.mrf.mxu0  ;;  %v4113_v17 = vpack.c.bf16 %v4061_v24, %v4060_v41  ;;  %v11346_v59 = vld [vmem:[#allocation25_spill] sm:$0xff]  ;;  %v3598_v25 = vpack.c.bf16 %v3549_v7, %v3548_v39  ;;  %v4114_v22 = vpack.c.bf16 %v4063_v3, %v4062_v42  ;;  %v11350_v30 = vld [vmem:[#allocation3_spill] sm:$0xff]  ;;  %v11352_v42 = vld [vmem:[#allocation4_spill] sm:$0xff] }
 0x1c1   :  { %11343 = vst [vmem:[#allocation23_spill] sm:$0xff] %v9055_v31  ;;  %v1819_v34 = vpop.f32.mrf.mxu1  ;;  %v9078_v14 = vadd.f32 %v2321_v28, %v1946_v0  ;;  %v11348_v31 = vld [vmem:[#allocation2_spill] sm:$0xff]  ;;  %v3550_v0 = vld [vmem:[%s11167_s0 + $0xd1] sm:$0xff] }
 0x1c2   :  { %v1950_v29 = vadd.f32 %v1819_v34, %v11344_v9  ;;  %v6582_v35 = vpop.f32.mrf.mxu0  ;;  %v3552_v24 = vld [vmem:[%s11167_s0 + $0xe1] sm:$0xff]  ;;  %v4067_v7 = vld [vmem:[%s11167_s0 + $0xca] sm:$0xff] }
 0x1c3   :  { %11345 = vst [vmem:[#allocation24_spill] sm:$0xff] %v9078_v14  ;;  %v6524_v43 = vpop.f32.mrf.mxu1  ;;  %v9081_v27 = vadd.f32 %v6582_v35, %v1949_v52  ;;  %v3551_v52 = vld [vmem:[%s11167_s0 + $0xd9] sm:$0xff]  ;;  %v4066_v28 = vld [vmem:[%s11167_s0 + $0xc2] sm:$0xff] }
 0x1c4   :  { %v1953_v2 = vadd.f32 %v6524_v43, %v11346_v59  ;;  %v2324_v55 = vpop.f32.mrf.mxu0  ;;  %v11354_v59 = vld [vmem:[#allocation5_spill] sm:$0xff] }
 0x1c5   :  { %11347 = vst [vmem:[#allocation25_spill] sm:$0xff] %v9081_v27  ;;  %v1822_v5 = vpop.f32.mrf.mxu1  ;;  %v9084_v20 = vadd.f32 %v2324_v55, %v1947_v45  ;;  %v4064_v45 = vld [vmem:[%s11167_s0 + $0xb2] sm:$0xff]  ;;  %v4116_v55 = vpack.c.bf16 %v4067_v7, %v4066_v28 }
 0x1c6   :  { %v1951_v19 = vadd.f32 %v1822_v5, %v11348_v31  ;;  %v6585_v34 = vpop.f32.mrf.mxu0  ;;  %6808 = vmatmul.mubr.msk.bf16.gmra.mxu0 %vm204_vm1, %v4113_v17  ;;  %v4065_v31 = vld [vmem:[%s11167_s0 + $0xba] sm:$0xff]  ;;  %v11360_v28 = vld [vmem:[#allocation8_spill] sm:$0xff] }
 0x1c7   :  { %11349 = vst [vmem:[#allocation2_spill] sm:$0xff] %v9084_v20  ;;  %v6527_v60 = vpop.f32.mrf.mxu1  ;;  %6750 = vmatmul.mubr.msk.bf16.gmra.mxu1 %vm204_vm1, %v3597_v63  ;;  %v9095_v41 = vadd.f32 %v6585_v34, %v1952_v13  ;;  %6811 = vmatprep.mubr.msk.bf16.mxu0 %vm204_vm1, %v4114_v22  ;;  %v3553_v13 = vld [vmem:[%s11167_s0 + $0xe9] sm:$0xff]  ;;  %v3599_v63 = vpack.c.bf16 %v3551_v52, %v3550_v0 }
 0x1c8   :  { %v1956_v62 = vadd.f32 %v6527_v60, %v11350_v30  ;;  %6753 = vmatprep.mubr.msk.bf16.mxu1 %vm204_vm1, %v3598_v25  ;;  %v2337_v60 = vpop.f32.mrf.mxu0  ;;  %v4115_v17 = vpack.c.bf16 %v4065_v31, %v4064_v45  ;;  %v3600_v5 = vpack.c.bf16 %v3553_v13, %v3552_v24  ;;  %v11358_v0 = vld [vmem:[#allocation7_spill] sm:$0xff] }
 0x1c9   :  { %11351 = vst [vmem:[#allocation3_spill] sm:$0xff] %v9095_v41  ;;  %v1835_v39 = vpop.f32.mrf.mxu1  ;;  %v9118_v9 = vadd.f32 %v2337_v60, %v1950_v29  ;;  %v11356_v41 = vld [vmem:[#allocation6_spill] sm:$0xff]  ;;  %v3554_v29 = vld [vmem:[%s11167_s0 + $0xf1] sm:$0xff] }
 0x1ca   :  { %v1954_v3 = vadd.f32 %v1835_v39, %v11352_v42  ;;  %v6586_v35 = vpop.f32.mrf.mxu0  ;;  %v3556_v31 = vld [vmem:[%s11167_s0 + $0x101] sm:$0xff]  ;;  %v4071_v13 = vld [vmem:[%s11167_s0 + $0xea] sm:$0xff] }
 0x1cb   :  { %11353 = vst [vmem:[#allocation4_spill] sm:$0xff] %v9118_v9  ;;  %v6528_v43 = vpop.f32.mrf.mxu1  ;;  %v9121_v22 = vadd.f32 %v6586_v35, %v1953_v2  ;;  %v3555_v2 = vld [vmem:[%s11167_s0 + $0xf9] sm:$0xff]  ;;  %v4070_v60 = vld [vmem:[%s11167_s0 + $0xe2] sm:$0xff] }
 0x1cc   :  { %v1957_v25 = vadd.f32 %v6528_v43, %v11354_v59  ;;  %v2340_v30 = vpop.f32.mrf.mxu0  ;;  %v11362_v59 = vld [vmem:[#allocation9_spill] sm:$0xff] }
 0x1cd   :  { %11355 = vst [vmem:[#allocation5_spill] sm:$0xff] %v9121_v22  ;;  %v1838_v34 = vpop.f32.mrf.mxu1  ;;  %v9124_v27 = vadd.f32 %v2340_v30, %v1951_v19  ;;  %v4068_v19 = vld [vmem:[%s11167_s0 + $0xd2] sm:$0xff]  ;;  %v4118_v30 = vpack.c.bf16 %v4071_v13, %v4070_v60 }
 0x1ce   :  { %v1955_v20 = vadd.f32 %v1838_v34, %v11356_v41  ;;  %v6589_v39 = vpop.f32.mrf.mxu0  ;;  %6812 = vmatmul.mubr.msk.bf16.gmra.mxu0 %vm204_vm1, %v4115_v17  ;;  %v4069_v41 = vld [vmem:[%s11167_s0 + $0xda] sm:$0xff]  ;;  %v11368_v60 = vld [vmem:[#allocation12_spill] sm:$0xff] }
 0x1cf   :  { %11357 = vst [vmem:[#allocation6_spill] sm:$0xff] %v9124_v27  ;;  %v6531_v14 = vpop.f32.mrf.mxu1  ;;  %6754 = vmatmul.mubr.msk.bf16.gmra.mxu1 %vm204_vm1, %v3599_v63  ;;  %v9135_v45 = vadd.f32 %v6589_v39, %v1956_v62  ;;  %6815 = vmatprep.mubr.msk.bf16.mxu0 %vm204_vm1, %v4116_v55  ;;  %v3557_v62 = vld [vmem:[%s11167_s0 + $0x109] sm:$0xff]  ;;  %v3601_v63 = vpack.c.bf16 %v3555_v2, %v3554_v29 }
 0x1d0   :  { %v1960_v52 = vadd.f32 %v6531_v14, %v11358_v0  ;;  %6757 = vmatprep.mubr.msk.bf16.mxu1 %vm204_vm1, %v3600_v5  ;;  %v2353_v14 = vpop.f32.mrf.mxu0  ;;  %v4117_v17 = vpack.c.bf16 %v4069_v41, %v4068_v19  ;;  %v3602_v34 = vpack.c.bf16 %v3557_v62, %v3556_v31  ;;  %v11366_v29 = vld [vmem:[#allocation11_spill] sm:$0xff] }
 0x1d1   :  { %11359 = vst [vmem:[#allocation7_spill] sm:$0xff] %v9135_v45  ;;  %v1851_v24 = vpop.f32.mrf.mxu1  ;;  %v9158_v42 = vadd.f32 %v2353_v14, %v1954_v3  ;;  %v11364_v45 = vld [vmem:[#allocation10_spill] sm:$0xff]  ;;  %v3558_v3 = vld [vmem:[%s11167_s0 + $0x111] sm:$0xff] }
 0x1d2   :  { %v1958_v7 = vadd.f32 %v1851_v24, %v11360_v28  ;;  %v6590_v35 = vpop.f32.mrf.mxu0  ;;  %v3560_v41 = vld [vmem:[%s11167_s0 + $0x121] sm:$0xff]  ;;  %v4075_v62 = vld [vmem:[%s11167_s0 + $0x10a] sm:$0xff] }
 0x1d3   :  { %11361 = vst [vmem:[#allocation8_spill] sm:$0xff] %v9158_v42  ;;  %v6532_v43 = vpop.f32.mrf.mxu1  ;;  %v9161_v55 = vadd.f32 %v6590_v35, %v1957_v25  ;;  %v3559_v25 = vld [vmem:[%s11167_s0 + $0x119] sm:$0xff]  ;;  %v4074_v14 = vld [vmem:[%s11167_s0 + $0x102] sm:$0xff] }
 0x1d4   :  { %v1961_v5 = vadd.f32 %v6532_v43, %v11362_v59  ;;  %v2356_v0 = vpop.f32.mrf.mxu0  ;;  %v11370_v59 = vld [vmem:[#allocation13_spill] sm:$0xff] }
 0x1d5   :  { %11363 = vst [vmem:[#allocation9_spill] sm:$0xff] %v9161_v55  ;;  %v1854_v39 = vpop.f32.mrf.mxu1  ;;  %v9164_v22 = vadd.f32 %v2356_v0, %v1955_v20  ;;  %v4072_v20 = vld [vmem:[%s11167_s0 + $0xf2] sm:$0xff]  ;;  %v4120_v0 = vpack.c.bf16 %v4075_v62, %v4074_v14 }
 0x1d6   :  { %v1959_v27 = vadd.f32 %v1854_v39, %v11364_v45  ;;  %v6593_v24 = vpop.f32.mrf.mxu0  ;;  %6816 = vmatmul.mubr.msk.bf16.gmra.mxu0 %vm204_vm1, %v4117_v17  ;;  %v4073_v45 = vld [vmem:[%s11167_s0 + $0xfa] sm:$0xff]  ;;  %v11376_v14 = vld [vmem:[#allocation16_spill] sm:$0xff] }
 0x1d7   :  { %11365 = vst [vmem:[#allocation10_spill] sm:$0xff] %v9164_v22  ;;  %v6535_v9 = vpop.f32.mrf.mxu1  ;;  %6758 = vmatmul.mubr.msk.bf16.gmra.mxu1 %vm204_vm1, %v3601_v63  ;;  %v9175_v19 = vadd.f32 %v6593_v24, %v1960_v52  ;;  %6819 = vmatprep.mubr.msk.bf16.mxu0 %vm204_vm1, %v4118_v30  ;;  %v3561_v52 = vld [vmem:[%s11167_s0 + $0x129] sm:$0xff]  ;;  %v3603_v63 = vpack.c.bf16 %v3559_v25, %v3558_v3 }
 0x1d8   :  { %v1964_v2 = vadd.f32 %v6535_v9, %v11366_v29  ;;  %6761 = vmatprep.mubr.msk.bf16.mxu1 %vm204_vm1, %v3602_v34  ;;  %v2369_v9 = vpop.f32.mrf.mxu0  ;;  %v4119_v17 = vpack.c.bf16 %v4073_v45, %v4072_v20  ;;  %v3604_v39 = vpack.c.bf16 %v3561_v52, %v3560_v41  ;;  %v11374_v3 = vld [vmem:[#allocation15_spill] sm:$0xff] }
 0x1d9   :  { %11367 = vst [vmem:[#allocation11_spill] sm:$0xff] %v9175_v19  ;;  %v1867_v31 = vpop.f32.mrf.mxu1  ;;  %v9198_v28 = vadd.f32 %v2369_v9, %v1958_v7  ;;  %v11372_v19 = vld [vmem:[#allocation14_spill] sm:$0xff]  ;;  %v3562_v7 = vld [vmem:[%s11167_s0 + $0x131] sm:$0xff] }
 0x1da   :  { %v1962_v13 = vadd.f32 %v1867_v31, %v11368_v60  ;;  %v6594_v35 = vpop.f32.mrf.mxu0  ;;  %v3564_v45 = vld [vmem:[%s11167_s0 + $0x141] sm:$0xff]  ;;  %v4079_v52 = vld [vmem:[%s11167_s0 + $0x12a] sm:$0xff] }
 0x1db   :  { %11369 = vst [vmem:[#allocation12_spill] sm:$0xff] %v9198_v28  ;;  %v6536_v43 = vpop.f32.mrf.mxu1  ;;  %v9201_v30 = vadd.f32 %v6594_v35, %v1961_v5  ;;  %v3563_v5 = vld [vmem:[%s11167_s0 + $0x139] sm:$0xff]  ;;  %v4078_v9 = vld [vmem:[%s11167_s0 + $0x122] sm:$0xff] }
 0x1dc   :  { %v1965_v34 = vadd.f32 %v6536_v43, %v11370_v59  ;;  %v2372_v29 = vpop.f32.mrf.mxu0  ;;  %v11377_v59 = vld [vmem:[#allocation17_spill] sm:$0xff] }
 0x1dd   :  { %11371 = vst [vmem:[#allocation13_spill] sm:$0xff] %v9201_v30  ;;  %v1870_v24 = vpop.f32.mrf.mxu1  ;;  %v9204_v55 = vadd.f32 %v2372_v29, %v1959_v27  ;;  %v4076_v27 = vld [vmem:[%s11167_s0 + $0x112] sm:$0xff]  ;;  %v4122_v29 = vpack.c.bf16 %v4079_v52, %v4078_v9 }
 0x1de   :  { %v1963_v22 = vadd.f32 %v1870_v24, %v11372_v19  ;;  %v6597_v31 = vpop.f32.mrf.mxu0  ;;  %6820 = vmatmul.mubr.msk.bf16.gmra.mxu0 %vm204_vm1, %v4119_v17  ;;  %v4077_v19 = vld [vmem:[%s11167_s0 + $0x11a] sm:$0xff] }
 0x1df   :  { %11373 = vst [vmem:[#allocation14_spill] sm:$0xff] %v9204_v55  ;;  %v6539_v42 = vpop.f32.mrf.mxu1  ;;  %6762 = vmatmul.mubr.msk.bf16.gmra.mxu1 %vm204_vm1, %v3603_v63  ;;  %v9215_v20 = vadd.f32 %v6597_v31, %v1964_v2  ;;  %6823 = vmatprep.mubr.msk.bf16.mxu0 %vm204_vm1, %v4120_v0  ;;  %v3565_v2 = vld [vmem:[%s11167_s0 + $0x149] sm:$0xff]  ;;  %v3605_v63 = vpack.c.bf16 %v3563_v5, %v3562_v7 }
 0x1e0   :  { %v1968_v25 = vadd.f32 %v6539_v42, %v11374_v3  ;;  %6765 = vmatprep.mubr.msk.bf16.mxu1 %vm204_vm1, %v3604_v39  ;;  %v2385_v42 = vpop.f32.mrf.mxu0  ;;  %v4121_v17 = vpack.c.bf16 %v4077_v19, %v4076_v27  ;;  %v3606_v24 = vpack.c.bf16 %v3565_v2, %v3564_v45  ;;  %v11379_v7 = vld [vmem:[#allocation19_spill] sm:$0xff] }
 0x1e1   :  { %11375 = vst [vmem:[#allocation15_spill] sm:$0xff] %v9215_v20  ;;  %v1883_v41 = vpop.f32.mrf.mxu1  ;;  %v9238_v60 = vadd.f32 %v2385_v42, %v1962_v13  ;;  %v11378_v20 = vld [vmem:[#allocation18_spill] sm:$0xff]  ;;  %v3566_v13 = vld [vmem:[%s11167_s0 + $0x151] sm:$0xff] }
 0x1e2   :  { %v1966_v62 = vadd.f32 %v1883_v41, %v11376_v14  ;;  %v6598_v35 = vpop.f32.mrf.mxu0  ;;  %v3568_v19 = vld [vmem:[%s11167_s0 + $0x161] sm:$0xff]  ;;  %v4083_v2 = vld [vmem:[%s11167_s0 + $0x14a] sm:$0xff] }
 0x1e3   :  { %v6540_v43 = vpop.f32.mrf.mxu1  ;;  %v9241_v0 = vadd.f32 %v6598_v35, %v1965_v34  ;;  %v3567_v34 = vld [vmem:[%s11167_s0 + $0x159] sm:$0xff]  ;;  %v4082_v42 = vld [vmem:[%s11167_s0 + $0x142] sm:$0xff] }
 0x1e4   :  { %v1969_v39 = vadd.f32 %v6540_v43, %v11377_v59  ;;  %v2388_v3 = vpop.f32.mrf.mxu0  ;;  %v3607_v35 = vpack.c.bf16 %v3567_v34, %v3566_v13  ;;  %v4085_v13 = vld [vmem:[%s11167_s0 + $0x15a] sm:$0xff] }
 0x1e5   :  { %v1886_v31 = vpop.f32.mrf.mxu1  ;;  %v9244_v30 = vadd.f32 %v2388_v3, %v1963_v22  ;;  %v4080_v22 = vld [vmem:[%s11167_s0 + $0x132] sm:$0xff]  ;;  %v3572_v34 = vld [vmem:[%s11167_s0 + $0x181] sm:$0xff] }
 0x1e6   :  { %v1967_v55 = vadd.f32 %v1886_v31, %v11378_v20  ;;  %v6601_v41 = vpop.f32.mrf.mxu0  ;;  %6824 = vmatmul.mubr.msk.bf16.gmra.mxu0 %vm204_vm1, %v4121_v17  ;;  %v4081_v20 = vld [vmem:[%s11167_s0 + $0x13a] sm:$0xff] }
 0x1e7   :  { %v6543_v28 = vpop.f32.mrf.mxu1  ;;  %6766 = vmatmul.mubr.msk.bf16.gmra.mxu1 %vm204_vm1, %v3605_v63  ;;  %v9255_v27 = vadd.f32 %v6601_v41, %v1968_v25  ;;  %6827 = vmatprep.mubr.msk.bf16.mxu0 %vm204_vm1, %v4122_v29  ;;  %v3569_v25 = vld [vmem:[%s11167_s0 + $0x169] sm:$0xff]  ;;  %v4123_v63 = vpack.c.bf16 %v4081_v20, %v4080_v22  ;;  %v4124_v29 = vpack.c.bf16 %v4083_v2, %v4082_v42 }
 0x1e8   :  { %v1972_v5 = vadd.f32 %v6543_v28, %v11379_v7  ;;  %6769 = vmatprep.mubr.msk.bf16.mxu1 %vm204_vm1, %v3606_v24  ;;  %v2401_v28 = vpop.f32.mrf.mxu0  ;;  %v3608_v24 = vpack.c.bf16 %v3569_v25, %v3568_v19  ;;  %v4086_v22 = vld [vmem:[%s11167_s0 + $0x162] sm:$0xff]  ;;  %v4087_v20 = vld [vmem:[%s11167_s0 + $0x16a] sm:$0xff] }
 0x1e9   :  { %11380 = vst [vmem:[#allocation16_spill] sm:$0xff] %v9255_v27  ;;  %v1899_v45 = vpop.f32.mrf.mxu1  ;;  %v9278_v52 = vadd.f32 %v2401_v28, %v1966_v62  ;;  %v3571_v62 = vld [vmem:[%s11167_s0 + $0x179] sm:$0xff] }
 0x1ea   :  { %v1970_v9 = vadd.f32 %v1899_v45, %v8713_v36  ;;  %v6602_v43 = vpop.f32.mrf.mxu0 }
 0x1eb   :  { %v6544_v14 = vpop.f32.mrf.mxu1  ;;  %v9281_v59 = vadd.f32 %v6602_v43, %v1969_v39 }
 0x1ec   :  { %v1973_v17 = vadd.f32 %v6544_v14, %v8720_v6  ;;  %v2404_v3 = vpop.f32.mrf.mxu0  ;;  %v3570_v6 = vld [vmem:[%s11167_s0 + $0x171] sm:$0xff] }
 0x1ed   :  { %v1902_v31 = vpop.f32.mrf.mxu1  ;;  %v9284_v7 = vadd.f32 %v2404_v3, %v1967_v55  ;;  %v4084_v55 = vld [vmem:[%s11167_s0 + $0x152] sm:$0xff]  ;;  %v3609_v42 = vpack.c.bf16 %v3571_v62, %v3570_v6  ;;  %v4089_v6 = vld [vmem:[%s11167_s0 + $0x17a] sm:$0xff] }
 0x1ee   :  { %v1971_v41 = vadd.f32 %v1902_v31, %v8723_v56  ;;  %v6605_v27 = vpop.f32.mrf.mxu0  ;;  %6828 = vmatmul.mubr.msk.bf16.gmra.mxu0 %vm204_vm1, %v4123_v63  ;;  %v4125_v2 = vpack.c.bf16 %v4085_v13, %v4084_v55  ;;  %v4126_v63 = vpack.c.bf16 %v4087_v20, %v4086_v22  ;;  %v3576_v62 = vld [vmem:[%s11167_s0 + $0x1a1] sm:$0xff] }
 0x1ef   :  { %v6611_v36 = vpop.f32.mrf.mxu1  ;;  %6770 = vmatmul.mubr.msk.bf16.gmra.mxu1 %vm204_vm1, %v3607_v35  ;;  %v9294_v39 = vadd.f32 %v6605_v27, %v1972_v5  ;;  %6831 = vmatprep.mubr.msk.bf16.mxu0 %vm204_vm1, %v4124_v29  ;;  %v4090_v13 = vld [vmem:[%s11167_s0 + $0x182] sm:$0xff] }
 0x1f0   :  { %v2952_v56 = vadd.f32 %v6611_v36, %v8735_v48  ;;  %6773 = vmatprep.mubr.msk.bf16.mxu1 %vm204_vm1, %v3608_v24  ;;  %v2417_v5 = vpop.f32.mrf.mxu0  ;;  %v3573_v48 = vld [vmem:[%s11167_s0 + $0x189] sm:$0xff] }
 0x1f1   :  { %v2711_v27 = vpop.f32.mrf.mxu1  ;;  %v9317_v19 = vadd.f32 %v2417_v5, %v1970_v9  ;;  %v3610_v35 = vpack.c.bf16 %v3573_v48, %v3572_v34  ;;  %v4091_v34 = vld [vmem:[%s11167_s0 + $0x18a] sm:$0xff] }
 0x1f2   :  { %v2950_v45 = vadd.f32 %v2711_v27, %v8758_v47  ;;  %v6606_v28 = vpop.f32.mrf.mxu0  ;;  %v3574_v47 = vld [vmem:[%s11167_s0 + $0x191] sm:$0xff] }
 0x1f3   :  { %v6612_v25 = vpop.f32.mrf.mxu1  ;;  %v9320_v14 = vadd.f32 %v6606_v28, %v1973_v17 }
 0x1f4   :  { %v2953_v43 = vadd.f32 %v6612_v25, %v8761_v49  ;;  %v2420_v24 = vpop.f32.mrf.mxu0  ;;  %v3575_v49 = vld [vmem:[%s11167_s0 + $0x199] sm:$0xff] }
 0x1f5   :  { %v2714_v29 = vpop.f32.mrf.mxu1  ;;  %v9323_v31 = vadd.f32 %v2420_v24, %v1971_v41  ;;  %v3611_v20 = vpack.c.bf16 %v3575_v49, %v3574_v47  ;;  %v3580_v49 = vld [vmem:[%s11167_s0 + $0x1c1] sm:$0xff] }
 0x1f6   :  { %v2951_v3 = vadd.f32 %v2714_v29, %v8764_v8  ;;  %v6673_v36 = vpop.f32.mrf.mxu0  ;;  %6832 = vmatmul.mubr.msk.bf16.gmra.mxu0 %vm204_vm1, %v4125_v2  ;;  %v4088_v8 = vld [vmem:[%s11167_s0 + $0x172] sm:$0xff] }
 0x1f7   :  { %v6615_v9 = vpop.f32.mrf.mxu1  ;;  %6774 = vmatmul.mubr.msk.bf16.gmra.mxu1 %vm204_vm1, %v3609_v42  ;;  %v9335_v41 = vadd.f32 %v6673_v36, %v2952_v56  ;;  %6835 = vmatprep.mubr.msk.bf16.mxu0 %vm204_vm1, %v4126_v63  ;;  %v3577_v56 = vld [vmem:[%s11167_s0 + $0x1a9] sm:$0xff]  ;;  %v4127_v28 = vpack.c.bf16 %v4089_v6, %v4088_v8 }
 0x1f8   :  { %v2956_v17 = vadd.f32 %v6615_v9, %v8775_v18  ;;  %6777 = vmatprep.mubr.msk.bf16.mxu1 %vm204_vm1, %v3610_v35  ;;  %v3229_v18 = vpop.f32.mrf.mxu0  ;;  %v3612_v2 = vpack.c.bf16 %v3577_v56, %v3576_v62  ;;  %v4128_v35 = vpack.c.bf16 %v4091_v34, %v4090_v13  ;;  %v4094_v6 = vld [vmem:[%s11167_s0 + $0x1a2] sm:$0xff]  ;;  %v4095_v62 = vld [vmem:[%s11167_s0 + $0x1aa] sm:$0xff] }
 0x1f9   :  { %v2727_v55 = vpop.f32.mrf.mxu1  ;;  %v9358_v27 = vadd.f32 %v3229_v18, %v2950_v45  ;;  %v3579_v45 = vld [vmem:[%s11167_s0 + $0x1b9] sm:$0xff] }
 0x1fa   :  { %v2954_v5 = vadd.f32 %v2727_v55, %v8798_v16  ;;  %v6674_v22 = vpop.f32.mrf.mxu0 }
 0x1fb   :  { %v6616_v48 = vpop.f32.mrf.mxu1  ;;  %v9361_v42 = vadd.f32 %v6674_v22, %v2953_v43 }
 0x1fc   :  { %v2957_v25 = vadd.f32 %v6616_v48, %v8801_v21  ;;  %v3232_v24 = vpop.f32.mrf.mxu0  ;;  %v3578_v21 = vld [vmem:[%s11167_s0 + $0x1b1] sm:$0xff] }
 0x1fd   :  { %v2730_v63 = vpop.f32.mrf.mxu1  ;;  %v9364_v9 = vadd.f32 %v3232_v24, %v2951_v3  ;;  %v4093_v3 = vld [vmem:[%s11167_s0 + $0x19a] sm:$0xff]  ;;  %v3613_v34 = vpack.c.bf16 %v3579_v45, %v3578_v21 }
 0x1fe   :  { %v2955_v29 = vadd.f32 %v2730_v63, %v8804_v1  ;;  %v6677_v16 = vpop.f32.mrf.mxu0  ;;  %6836 = vmatmul.mubr.msk.bf16.gmra.mxu0 %vm204_vm1, %v4127_v28  ;;  %v4092_v1 = vld [vmem:[%s11167_s0 + $0x192] sm:$0xff]  ;;  %v3584_v45 = vld [vmem:[%s11167_s0 + $0x1e1] sm:$0xff] }
 0x1ff   :  { %v6619_v36 = vpop.f32.mrf.mxu1  ;;  %6778 = vmatmul.mubr.msk.bf16.gmra.mxu1 %vm204_vm1, %v3611_v20  ;;  %v9375_v47 = vadd.f32 %v6677_v16, %v2956_v17  ;;  %6839 = vmatprep.mubr.msk.bf16.mxu0 %vm204_vm1, %v4128_v35  ;;  %v3581_v17 = vld [vmem:[%s11167_s0 + $0x1c9] sm:$0xff]  ;;  %v4129_v48 = vpack.c.bf16 %v4093_v3, %v4092_v1 }
 0x200   :  { %v2960_v43 = vadd.f32 %v6619_v36, %v8815_v44  ;;  %6781 = vmatprep.mubr.msk.bf16.mxu1 %vm204_vm1, %v3612_v2  ;;  %v3245_v44 = vpop.f32.mrf.mxu0  ;;  %v3614_v28 = vpack.c.bf16 %v3581_v17, %v3580_v49  ;;  %v4130_v2 = vpack.c.bf16 %v4095_v62, %v4094_v6  ;;  %v4098_v3 = vld [vmem:[%s11167_s0 + $0x1c2] sm:$0xff]  ;;  %v4099_v49 = vld [vmem:[%s11167_s0 + $0x1ca] sm:$0xff] }
 0x201   :  { %v2743_v8 = vpop.f32.mrf.mxu1  ;;  %v9398_v18 = vadd.f32 %v3245_v44, %v2954_v5  ;;  %v3583_v5 = vld [vmem:[%s11167_s0 + $0x1d9] sm:$0xff] }
 0x202   :  { %v2958_v55 = vadd.f32 %v2743_v8, %v8838_v40  ;;  %v6678_v13 = vpop.f32.mrf.mxu0 }
 0x203   :  { %v6620_v56 = vpop.f32.mrf.mxu1  ;;  %v9401_v20 = vadd.f32 %v6678_v13, %v2957_v25 }
 0x204   :  { %v2961_v22 = vadd.f32 %v6620_v56, %v8841_v38  ;;  %v3248_v63 = vpop.f32.mrf.mxu0  ;;  %v3582_v38 = vld [vmem:[%s11167_s0 + $0x1d1] sm:$0xff] }
 0x205   :  { %v2746_v35 = vpop.f32.mrf.mxu1  ;;  %v9404_v36 = vadd.f32 %v3248_v63, %v2955_v29  ;;  %v4097_v29 = vld [vmem:[%s11167_s0 + $0x1ba] sm:$0xff]  ;;  %v3615_v62 = vpack.c.bf16 %v3583_v5, %v3582_v38 }
 0x206   :  { %v2959_v24 = vadd.f32 %v2746_v35, %v8844_v10  ;;  %v6681_v40 = vpop.f32.mrf.mxu0  ;;  %6840 = vmatmul.mubr.msk.bf16.gmra.mxu0 %vm204_vm1, %v4129_v48  ;;  %v4096_v10 = vld [vmem:[%s11167_s0 + $0x1b2] sm:$0xff]  ;;  %v4101_v38 = vld [vmem:[%s11167_s0 + $0x1da] sm:$0xff] }
 0x207   :  { %v6623_v16 = vpop.f32.mrf.mxu1  ;;  %6782 = vmatmul.mubr.msk.bf16.gmra.mxu1 %vm204_vm1, %v3613_v34  ;;  %v9415_v21 = vadd.f32 %v6681_v40, %v2960_v43  ;;  %6843 = vmatprep.mubr.msk.bf16.mxu0 %vm204_vm1, %v4130_v2  ;;  %v3585_v43 = vld [vmem:[%s11167_s0 + $0x1e9] sm:$0xff]  ;;  %v4131_v56 = vpack.c.bf16 %v4097_v29, %v4096_v10 }
 0x208   :  { %v2964_v25 = vadd.f32 %v6623_v16, %v8855_v54  ;;  %6785 = vmatprep.mubr.msk.bf16.mxu1 %vm204_vm1, %v3614_v28  ;;  %v3261_v54 = vpop.f32.mrf.mxu0  ;;  %v3616_v48 = vpack.c.bf16 %v3585_v43, %v3584_v45  ;;  %v4132_v28 = vpack.c.bf16 %v4099_v49, %v4098_v3  ;;  %v4103_v10 = vld [vmem:[%s11167_s0 + $0x1ea] sm:$0xff] }
 0x209   :  { %v2759_v1 = vpop.f32.mrf.mxu1  ;;  %v9438_v44 = vadd.f32 %v3261_v54, %v2958_v55 }
 0x20a   :  { %v2962_v8 = vadd.f32 %v2759_v1, %v8878_v46  ;;  %v6682_v6 = vpop.f32.mrf.mxu0 }
 0x20b   :  { %v6624_v17 = vpop.f32.mrf.mxu1  ;;  %v9441_v34 = vadd.f32 %v6682_v6, %v2961_v22 }
 0x20c   :  { %v2965_v13 = vadd.f32 %v6624_v17, %v8881_v50  ;;  %v3264_v35 = vpop.f32.mrf.mxu0  ;;  %v3586_v50 = vld [vmem:[%s11167_s0 + $0x1f1] sm:$0xff] }
 0x20d   :  { %v2762_v2 = vpop.f32.mrf.mxu1  ;;  %v9444_v16 = vadd.f32 %v3264_v35, %v2959_v24  ;;  %v4100_v24 = vld [vmem:[%s11167_s0 + $0x1d2] sm:$0xff] }
 0x20e   :  { %v2963_v63 = vadd.f32 %v2762_v2, %v8884_v51  ;;  %v6685_v46 = vpop.f32.mrf.mxu0  ;;  %6844 = vmatmul.mubr.msk.bf16.gmra.mxu0 %vm204_vm1, %v4131_v56  ;;  %v3587_v51 = vld [vmem:[%s11167_s0 + $0x1f9] sm:$0x3f]  ;;  %v4133_v3 = vpack.c.bf16 %v4101_v38, %v4100_v24 }
 0x20f   :  { %v6627_v40 = vpop.f32.mrf.mxu1  ;;  %6786 = vmatmul.mubr.msk.bf16.gmra.mxu1 %vm204_vm1, %v3615_v62  ;;  %v9452_v22 = vadd.f32 %v6685_v46, %v2964_v25  ;;  %6847 = vmatprep.mubr.msk.bf16.mxu0 %vm204_vm1, %v4132_v28  ;;  %v4102_v25 = vld [vmem:[%s11167_s0 + $0x1e2] sm:$0xff]  ;;  %v3617_v43 = vpack.c.bf16 %v3587_v51, %v3586_v50 }
 0x210   :  { %v2968_v55 = vadd.f32 %v6627_v40, %v8895_v58  ;;  %6789 = vmatprep.mubr.msk.bf16.mxu1 %vm204_vm1, %v3616_v48  ;;  %v3277_v58 = vpop.f32.mrf.mxu0  ;;  %v4134_v6 = vpack.c.bf16 %v4103_v10, %v4102_v25 }
 0x211   :  { %v2775_v5 = vpop.f32.mrf.mxu1  ;;  %v9472_v45 = vadd.f32 %v3277_v58, %v2962_v8 }
 0x212   :  { %v2966_v29 = vadd.f32 %v2775_v5, %v8918_v23  ;;  %v6686_v54 = vpop.f32.mrf.mxu0 }
 0x213   :  { %v6628_v1 = vpop.f32.mrf.mxu1  ;;  %v9475_v17 = vadd.f32 %v6686_v54, %v2965_v13 }
 0x214   :  { %v2969_v49 = vadd.f32 %v6628_v1, %v8921_v33  ;;  %v3280_v56 = vpop.f32.mrf.mxu0  ;;  %v4104_v33 = vld [vmem:[%s11167_s0 + $0x1f2] sm:$0xff] }
 0x215   :  { %v2778_v62 = vpop.f32.mrf.mxu1  ;;  %v9478_v28 = vadd.f32 %v3280_v56, %v2963_v63 }
 0x216   :  { %v2967_v48 = vadd.f32 %v2778_v62, %v8924_v61  ;;  %v6689_v35 = vpop.f32.mrf.mxu0  ;;  %6848 = vmatmul.mubr.msk.bf16.gmra.mxu0 %vm204_vm1, %v4133_v3  ;;  %v4105_v61 = vld [vmem:[%s11167_s0 + $0x1fa] sm:$0x3f] }
 0x217   :  { %v6631_v2 = vpop.f32.mrf.mxu1  ;;  %6790 = vmatmul.mubr.msk.bf16.gmra.mxu1 %vm204_vm1, %v3617_v43  ;;  %v9483_v8 = vadd.f32 %v6689_v35, %v2968_v55  ;;  %6851 = vmatprep.mubr.msk.bf16.mxu0 %vm204_vm1, %v4134_v6  ;;  %v4135_v55 = vpack.c.bf16 %v4105_v61, %v4104_v33 }
 0x218   :  { %v2972_v23 = vadd.f32 %v6631_v2, %v8935_v26  ;;  %v3293_v63 = vpop.f32.mrf.mxu0 }
 0x219   :  { %v2791_v13 = vpop.f32.mrf.mxu1  ;;  %v9493_v46 = vadd.f32 %v3293_v63, %v2966_v29  ;;  %v11383_v63 = vld [vmem:[#allocation22_spill] sm:$0xff] }
 0x21a   :  { %v2970_v40 = vadd.f32 %v2791_v13, %v8958_v37  ;;  %v6690_v26 = vpop.f32.mrf.mxu0 }
 0x21b   :  { %v6632_v50 = vpop.f32.mrf.mxu1  ;;  %v9496_v24 = vadd.f32 %v6690_v26, %v2969_v49 }
 0x21c   :  { %v2973_v51 = vadd.f32 %v6632_v50, %v8961_v15  ;;  %v3296_v5 = vpop.f32.mrf.mxu0 }
 0x21d   :  { %v2794_v38 = vpop.f32.mrf.mxu1  ;;  %v9499_v25 = vadd.f32 %v3296_v5, %v2967_v48 }
 0x21e   :  { %v2971_v58 = vadd.f32 %v2794_v38, %v8964_v11  ;;  %v6693_v1 = vpop.f32.mrf.mxu0  ;;  %6852 = vmatmul.mubr.msk.bf16.gmra.mxu0 %vm204_vm1, %v4135_v55  ;;  %v11385_v55 = vld [vmem:[#allocation20_spill] sm:$0xff] }
 0x21f   :  { %v6635_v10 = vpop.f32.mrf.mxu1  ;;  %v9503_v29 = vadd.f32 %v6693_v1, %v2972_v23 }
 0x220   :  { %v2976_v37 = vadd.f32 %v6635_v10, %v8975_v12  ;;  %v3309_v43 = vpop.f32.mrf.mxu0 }
 0x221   :  { %v2807_v54 = vpop.f32.mrf.mxu1  ;;  %v9506_v3 = vadd.f32 %v3309_v43, %v2970_v40 }
 0x222   :  { %v2974_v15 = vadd.f32 %v2807_v54, %v8998_v4  ;;  %v6694_v6 = vpop.f32.mrf.mxu0  ;;  %v11389_v54 = vld [vmem:[#allocation23_spill] sm:$0xff] }
 0x223   :  { %v6636_v49 = vpop.f32.mrf.mxu1  ;;  %v9509_v62 = vadd.f32 %v6694_v6, %v2973_v51 }
 0x224   :  { %v2977_v11 = vadd.f32 %v6636_v49, %v9001_v32  ;;  %v3312_v48 = vpop.f32.mrf.mxu0 }
 0x225   :  { %v2810_v56 = vpop.f32.mrf.mxu1  ;;  %v9512_v35 = vadd.f32 %v3312_v48, %v2971_v58  ;;  %v11387_v58 = vld [vmem:[#allocation21_spill] sm:$0xff] }
 0x226   :  { %v2975_v2 = vadd.f32 %v2810_v56, %v9004_v57  ;;  %v6697_v23 = vpop.f32.mrf.mxu0  ;;  %v11391_v56 = vld [vmem:[#allocation24_spill] sm:$0xff] }
 0x227   :  { %11381 = vst [vmem:[#allocation17_spill] sm:$0xff] %v9512_v35  ;;  %v6639_v12 = vpop.f32.mrf.mxu1  ;;  %v9515_v61 = vadd.f32 %v6697_v23, %v2976_v37 }
 0x228   :  { %v2980_v33 = vadd.f32 %v6639_v12, %v9015_v53  ;;  %v3325_v13 = vpop.f32.mrf.mxu0 }
 0x229   :  { %11382 = vst [vmem:[#allocation18_spill] sm:$0xff] %v9515_v61  ;;  %v2823_v4 = vpop.f32.mrf.mxu1  ;;  %v9518_v50 = vadd.f32 %v3325_v13, %v2974_v15 }
 0x22a   :  { %v2978_v40 = vadd.f32 %v2823_v4, %v11383_v63  ;;  %v6698_v26 = vpop.f32.mrf.mxu0  ;;  %v11393_v4 = vld [vmem:[#allocation25_spill] sm:$0xff] }
 0x22b   :  { %11384 = vst [vmem:[#allocation19_spill] sm:$0xff] %v9518_v50  ;;  %v6640_v32 = vpop.f32.mrf.mxu1  ;;  %v9521_v38 = vadd.f32 %v6698_v26, %v2977_v11  ;;  %v11395_v26 = vld [vmem:[#allocation2_spill] sm:$0xff] }
 0x22c   :  { %v2981_v51 = vadd.f32 %v6640_v32, %v11385_v55  ;;  %v3328_v5 = vpop.f32.mrf.mxu0 }
 0x22d   :  { %11386 = vst [vmem:[#allocation22_spill] sm:$0xff] %v9521_v38  ;;  %v2826_v57 = vpop.f32.mrf.mxu1  ;;  %v9524_v1 = vadd.f32 %v3328_v5, %v2975_v2 }
 0x22e   :  { %v2979_v10 = vadd.f32 %v2826_v57, %v11387_v58  ;;  %v6701_v37 = vpop.f32.mrf.mxu0  ;;  %v9538_v58 = vpop.permute.xlu0 %4626 }
 0x22f   :  { %11388 = vst [vmem:[#allocation20_spill] sm:$0xff] %v9524_v1  ;;  %v6643_v53 = vpop.f32.mrf.mxu1  ;;  %v9527_v49 = vadd.f32 %v6701_v37, %v2980_v33  ;;  %11397 = vst [vmem:[#allocation2_spill] sm:$0xff] %v9538_v58 }
 0x230   :  { %v2984_v43 = vadd.f32 %v6643_v53, %v11389_v54  ;;  %v3341_v6 = vpop.f32.mrf.mxu0  ;;  %v11398_v53 = vld [vmem:[#allocation3_spill] sm:$0xff] }
 0x231   :  { %11390 = vst [vmem:[#allocation21_spill] sm:$0xff] %v9527_v49  ;;  %v2839_v15 = vpop.f32.mrf.mxu1  ;;  %v9530_v12 = vadd.f32 %v3341_v6, %v2978_v40  ;;  %v9543_v6 = vpop.permute.xlu1 %4636 }
 0x232   :  { %v2982_v48 = vadd.f32 %v2839_v15, %v11391_v56  ;;  %v6702_v23 = vpop.f32.mrf.mxu0  ;;  %11400 = vst [vmem:[#allocation26_spill] sm:$0xff] %v9543_v6 }
 0x233   :  { %11392 = vst [vmem:[#allocation23_spill] sm:$0xff] %v9530_v12  ;;  %v6644_v11 = vpop.f32.mrf.mxu1  ;;  %v9533_v63 = vadd.f32 %v6702_v23, %v2981_v51  ;;  %v11401_v51 = vld [vmem:[#allocation4_spill] sm:$0xff] }
 0x234   :  { %v2985_v13 = vadd.f32 %v6644_v11, %v11393_v4  ;;  %v3344_v32 = vpop.f32.mrf.mxu0 }
 0x235   :  { %11394 = vst [vmem:[#allocation24_spill] sm:$0xff] %v9533_v63  ;;  %v2842_v2 = vpop.f32.mrf.mxu1  ;;  %v9536_v57 = vadd.f32 %v3344_v32, %v2979_v10  ;;  %v11403_v10 = vld [vmem:[#allocation5_spill] sm:$0xff]  ;;  %v9551_v63 = vpop.permute.xlu0 %4631 }
 0x236   :  { %v2983_v55 = vadd.f32 %v2842_v2, %v11395_v26  ;;  %v6705_v5 = vpop.f32.mrf.mxu0  ;;  %11405 = vst [vmem:[#allocation27_spill] sm:$0xff] %v9551_v63  ;;  %v9556_v49 = vpop.permute.xlu1 %4641 }
 0x237   :  { %11396 = vst [vmem:[#allocation25_spill] sm:$0xff] %v9536_v57  ;;  %v6647_v33 = vpop.f32.mrf.mxu1  ;;  %v9541_v40 = vadd.f32 %v6705_v5, %v2984_v43  ;;  %v11406_v43 = vld [vmem:[#allocation6_spill] sm:$0xff]  ;;  %11408 = vst [vmem:[#allocation28_spill] sm:$0xff] %v9556_v49 }
 0x238   :  { %v2988_v37 = vadd.f32 %v6647_v33, %v11398_v53  ;;  %v3357_v15 = vpop.f32.mrf.mxu0 }
 0x239   :  { %11399 = vst [vmem:[#allocation3_spill] sm:$0xff] %v9541_v40  ;;  %v2855_v54 = vpop.f32.mrf.mxu1  ;;  %v9546_v11 = vadd.f32 %v3357_v15, %v2982_v48  ;;  %v11409_v48 = vld [vmem:[#allocation7_spill] sm:$0xff]  ;;  %v9564_v12 = vpop.permute.xlu0 %4646 }
 0x23a   :  { %v2986_v56 = vadd.f32 %v2855_v54, %v11401_v51  ;;  %v6706_v4 = vpop.f32.mrf.mxu0  ;;  %11413 = vst [vmem:[#allocation29_spill] sm:$0xff] %v9564_v12  ;;  %v9569_v1 = vpop.permute.xlu1 %4651 }
 0x23b   :  { %11402 = vst [vmem:[#allocation4_spill] sm:$0xff] %v9546_v11  ;;  %v6648_v23 = vpop.f32.mrf.mxu1  ;;  %v9549_v32 = vadd.f32 %v6706_v4, %v2985_v13  ;;  %v11411_v13 = vld [vmem:[#allocation8_spill] sm:$0xff]  ;;  %11416 = vst [vmem:[#allocation30_spill] sm:$0xff] %v9569_v1 }
 0x23c   :  { %v2989_v2 = vadd.f32 %v6648_v23, %v11403_v10  ;;  %v3360_v57 = vpop.f32.mrf.mxu0 }
 0x23d   :  { %11404 = vst [vmem:[#allocation5_spill] sm:$0xff] %v9549_v32  ;;  %v2858_v26 = vpop.f32.mrf.mxu1  ;;  %v9554_v5 = vadd.f32 %v3360_v57, %v2983_v55  ;;  %v11414_v55 = vld [vmem:[#allocation9_spill] sm:$0xff]  ;;  %v9577_v38 = vpop.permute.xlu0 %4656 }
 0x23e   :  { %v2987_v33 = vadd.f32 %v2858_v26, %v11406_v43  ;;  %v6709_v40 = vpop.f32.mrf.mxu0  ;;  %11421 = vst [vmem:[#allocation31_spill] sm:$0xff] %v9577_v38  ;;  %v9582_v61 = vpop.permute.xlu1 %4661 }
 0x23f   :  { %11407 = vst [vmem:[#allocation6_spill] sm:$0xff] %v9554_v5  ;;  %v6651_v53 = vpop.f32.mrf.mxu1  ;;  %v9559_v15 = vadd.f32 %v6709_v40, %v2988_v37  ;;  %v11417_v37 = vld [vmem:[#allocation10_spill] sm:$0xff]  ;;  %11424 = vst [vmem:[#allocation32_spill] sm:$0xff] %v9582_v61 }
 0x240   :  { %v2992_v54 = vadd.f32 %v6651_v53, %v11409_v48  ;;  %v3373_v23 = vpop.f32.mrf.mxu0 }
 0x241   :  { %11410 = vst [vmem:[#allocation7_spill] sm:$0xff] %v9559_v15  ;;  %v2871_v51 = vpop.f32.mrf.mxu1  ;;  %v9562_v10 = vadd.f32 %v3373_v23, %v2986_v56  ;;  %v11419_v56 = vld [vmem:[#allocation11_spill] sm:$0xff]  ;;  %v9590_v50 = vpop.permute.xlu0 %4666 }
 0x242   :  { %v2990_v4 = vadd.f32 %v2871_v51, %v11411_v13  ;;  %v6710_v11 = vpop.f32.mrf.mxu0  ;;  %v9595_v35 = vpop.permute.xlu1 %4671 }
 0x243   :  { %11412 = vst [vmem:[#allocation8_spill] sm:$0xff] %v9562_v10  ;;  %v6652_v32 = vpop.f32.mrf.mxu1  ;;  %v9567_v26 = vadd.f32 %v6710_v11, %v2989_v2  ;;  %v11422_v11 = vld [vmem:[#allocation12_spill] sm:$0xff] }
 0x244   :  { %v2993_v57 = vadd.f32 %v6652_v32, %v11414_v55  ;;  %v3376_v5 = vpop.f32.mrf.mxu0 }
 0x245   :  { %11415 = vst [vmem:[#allocation9_spill] sm:$0xff] %v9567_v26  ;;  %v2874_v43 = vpop.f32.mrf.mxu1  ;;  %v9572_v53 = vadd.f32 %v3376_v5, %v2987_v33  ;;  %v11425_v33 = vld [vmem:[#allocation13_spill] sm:$0xff] }
 0x246   :  { %v2991_v40 = vadd.f32 %v2874_v43, %v11417_v37  ;;  %v6713_v51 = vpop.f32.mrf.mxu0 }
 0x247   :  { %11418 = vst [vmem:[#allocation10_spill] sm:$0xff] %v9572_v53  ;;  %v6655_v48 = vpop.f32.mrf.mxu1  ;;  %v9575_v13 = vadd.f32 %v6713_v51, %v2992_v54  ;;  %v11426_v54 = vld [vmem:[#allocation14_spill] sm:$0xff] }
 0x248   :  { %v2996_v23 = vadd.f32 %v6655_v48, %v11419_v56  ;;  %v3389_v10 = vpop.f32.mrf.mxu0 }
 0x249   :  { %11420 = vst [vmem:[#allocation11_spill] sm:$0xff] %v9575_v13  ;;  %v2887_v15 = vpop.f32.mrf.mxu1  ;;  %v9580_v32 = vadd.f32 %v3389_v10, %v2990_v4 }
 0x24a   :  { %v2994_v2 = vadd.f32 %v2887_v15, %v11422_v11  ;;  %v6714_v26 = vpop.f32.mrf.mxu0  ;;  %v11428_v15 = vld [vmem:[#allocation15_spill] sm:$0xff] }
 0x24b   :  { %11423 = vst [vmem:[#allocation12_spill] sm:$0xff] %v9580_v32  ;;  %v6656_v55 = vpop.f32.mrf.mxu1  ;;  %v9585_v43 = vadd.f32 %v6714_v26, %v2993_v57 }
 0x24c   :  { %v2997_v5 = vadd.f32 %v6656_v55, %v11425_v33  ;;  %v3392_v48 = vpop.f32.mrf.mxu0 }
 0x24d   :  { %v2890_v37 = vpop.f32.mrf.mxu1  ;;  %v9588_v56 = vadd.f32 %v3392_v48, %v2991_v40 }
 0x24e   :  { %v2995_v51 = vadd.f32 %v2890_v37, %v11426_v54  ;;  %v6717_v53 = vpop.f32.mrf.mxu0 }
 0x24f   :  { %11427 = vst [vmem:[#allocation13_spill] sm:$0xff] %v9588_v56  ;;  %v6659_v13 = vpop.f32.mrf.mxu1  ;;  %v9593_v10 = vadd.f32 %v6717_v53, %v2996_v23  ;;  %v9603_v56 = vpop.permute.xlu0 %4676 }
 0x250   :  { %v3000_v4 = vadd.f32 %v6659_v13, %v11428_v15  ;;  %v3405_v32 = vpop.f32.mrf.mxu0  ;;  %11432 = vst [vmem:[#allocation34_spill] sm:$0xff] %v9603_v56 }
 0x251   :  { %11429 = vst [vmem:[#allocation14_spill] sm:$0xff] %v9593_v10  ;;  %v2903_v11 = vpop.f32.mrf.mxu1  ;;  %v9598_v26 = vadd.f32 %v3405_v32, %v2994_v2  ;;  %v9608_v10 = vpop.permute.xlu1 %4681 }
 0x252   :  { %v2998_v57 = vadd.f32 %v2903_v11, %v9238_v60  ;;  %v6718_v33 = vpop.f32.mrf.mxu0  ;;  %11434 = vst [vmem:[#allocation36_spill] sm:$0xff] %v9608_v10  ;;  %v11435_v60 = vld [vmem:[#allocation16_spill] sm:$0xff] }
 0x253   :  { %11430 = vst [vmem:[#allocation15_spill] sm:$0xff] %v9598_v26  ;;  %v6660_v55 = vpop.f32.mrf.mxu1  ;;  %v9601_v37 = vadd.f32 %v6718_v33, %v2997_v5  ;;  %v9616_v26 = vpop.permute.xlu0 %4686 }
 0x254   :  { %v3001_v40 = vadd.f32 %v6660_v55, %v9241_v0  ;;  %v3408_v54 = vpop.f32.mrf.mxu0  ;;  %11438 = vst [vmem:[#allocation38_spill] sm:$0xff] %v9616_v26 }
 0x255   :  { %11431 = vst [vmem:[#allocation33_spill] sm:$0xff] %v9601_v37  ;;  %v2906_v48 = vpop.f32.mrf.mxu1  ;;  %v9606_v23 = vadd.f32 %v3408_v54, %v2995_v51 }
 0x256   :  { %v2999_v53 = vadd.f32 %v2906_v48, %v9244_v30  ;;  %v6721_v15 = vpop.f32.mrf.mxu0 }
 0x257   :  { %11433 = vst [vmem:[#allocation35_spill] sm:$0xff] %v9606_v23  ;;  %v6663_v13 = vpop.f32.mrf.mxu1  ;;  %v9611_v32 = vadd.f32 %v6721_v15, %v3000_v4  ;;  %v9621_v23 = vpop.permute.xlu1 %4691 }
 0x258   :  { %v3004_v2 = vadd.f32 %v6663_v13, %v11435_v60  ;;  %v3421_v0 = vpop.f32.mrf.mxu0  ;;  %11440 = vst [vmem:[#allocation40_spill] sm:$0xff] %v9621_v23 }
 0x259   :  { %11436 = vst [vmem:[#allocation16_spill] sm:$0xff] %v9611_v32  ;;  %v2919_v11 = vpop.f32.mrf.mxu1  ;;  %v9614_v55 = vadd.f32 %v3421_v0, %v2998_v57  ;;  %v9629_v32 = vpop.permute.xlu0 %4696 }
 0x25a   :  { %v3002_v5 = vadd.f32 %v2919_v11, %v9278_v52  ;;  %v6722_v37 = vpop.f32.mrf.mxu0  ;;  %11443 = vst [vmem:[#allocation43_spill] sm:$0xff] %v9629_v32 }
 0x25b   :  { %11437 = vst [vmem:[#allocation37_spill] sm:$0xff] %v9614_v55  ;;  %v6664_v33 = vpop.f32.mrf.mxu1  ;;  %v9619_v51 = vadd.f32 %v6722_v37, %v3001_v40 }
 0x25c   :  { %v3005_v30 = vadd.f32 %v6664_v33, %v9281_v59  ;;  %v3424_v54 = vpop.f32.mrf.mxu0 }
 0x25d   :  { %11439 = vst [vmem:[#allocation39_spill] sm:$0xff] %v9619_v51  ;;  %v2922_v48 = vpop.f32.mrf.mxu1  ;;  %v9624_v13 = vadd.f32 %v3424_v54, %v2999_v53  ;;  %v9634_v51 = vpop.permute.xlu1 %4701 }
 0x25e   :  { %v3003_v4 = vadd.f32 %v2922_v48, %v9284_v7  ;;  %v6725_v52 = vpop.f32.mrf.mxu0  ;;  %11445 = vst [vmem:[#allocation45_spill] sm:$0xff] %v9634_v51 }
 0x25f   :  { %11441 = vst [vmem:[#allocation41_spill] sm:$0xff] %v9624_v13  ;;  %v6667_v15 = vpop.f32.mrf.mxu1  ;;  %v9627_v60 = vadd.f32 %v6725_v52, %v3004_v2 }
 0x260   :  { %v3008_v57 = vadd.f32 %v6667_v15, %v9294_v39  ;;  %v3437_v0 = vpop.f32.mrf.mxu0 }
 0x261   :  { %11442 = vst [vmem:[#allocation42_spill] sm:$0xff] %v9627_v60  ;;  %v2935_v11 = vpop.f32.mrf.mxu1  ;;  %v9632_v40 = vadd.f32 %v3437_v0, %v3002_v5  ;;  %v9642_v60 = vpop.permute.xlu0 %4706 }
 0x262   :  { %v3006_v59 = vadd.f32 %v2935_v11, %v9317_v19  ;;  %v6726_v33 = vpop.f32.mrf.mxu0  ;;  %v9646_v0 = vpop.permute.xlu1 %4711 }
 0x263   :  { %11444 = vst [vmem:[#allocation44_spill] sm:$0xff] %v9632_v40  ;;  %v6668_v37 = vpop.f32.mrf.mxu1  ;;  %v9637_v53 = vadd.f32 %v6726_v33, %v3005_v30  ;;  %11449 = vst [vmem:[#allocation49_spill] sm:$0xff] %v9646_v0 }
 0x264   :  { %v3009_v7 = vadd.f32 %v6668_v37, %v9320_v14  ;;  %v3440_v39 = vpop.f32.mrf.mxu0 }
 0x265   :  { %11446 = vst [vmem:[#allocation46_spill] sm:$0xff] %v9637_v53  ;;  %v2938_v48 = vpop.f32.mrf.mxu1  ;;  %v9640_v54 = vadd.f32 %v3440_v39, %v3003_v4  ;;  %v9652_v4 = vpop.permute.xlu0 %4716 }
 0x266   :  { %v3007_v2 = vadd.f32 %v2938_v48, %v9323_v31  ;;  %v6729_v15 = vpop.f32.mrf.mxu0  ;;  %11452 = vst [vmem:[#allocation52_spill] sm:$0xff] %v9652_v4 }
 0x267   :  { %11447 = vst [vmem:[#allocation47_spill] sm:$0xff] %v9640_v54  ;;  %v6735_v52 = vpop.f32.mrf.mxu1  ;;  %v9644_v19 = vadd.f32 %v6729_v15, %v3008_v57  ;;  %v9656_v57 = vpop.permute.xlu1 %4721 }
 0x268   :  { %v3453_v5 = vpop.f32.mrf.mxu0  ;;  %11454 = vst [vmem:[#allocation54_spill] sm:$0xff] %v9656_v57 }
 0x269   :  { %11448 = vst [vmem:[#allocation48_spill] sm:$0xff] %v9644_v19  ;;  %v3747_v11 = vpop.f32.mrf.mxu1  ;;  %v9648_v40 = vadd.f32 %v3453_v5, %v3006_v59  ;;  %v3988_v59 = vadd.f32 %v6735_v52, %v9335_v41 }
 0x26a   :  { %v6730_v14 = vpop.f32.mrf.mxu0  ;;  %v3986_v15 = vadd.f32 %v3747_v11, %v9358_v27 }
 0x26b   :  { %11450 = vst [vmem:[#allocation50_spill] sm:$0xff] %v9648_v40  ;;  %v6736_v30 = vpop.f32.mrf.mxu1  ;;  %v9650_v37 = vadd.f32 %v6730_v14, %v3009_v7  ;;  %v9668_v55 = vpop.permute.xlu1 %4731 }
 0x26c   :  { %v3456_v33 = vpop.f32.mrf.mxu0  ;;  %v3989_v40 = vadd.f32 %v6736_v30, %v9361_v42  ;;  %11456 = vst [vmem:[#allocation56_spill] sm:$0xff] %v9668_v55 }
 0x26d   :  { %11451 = vst [vmem:[#allocation51_spill] sm:$0xff] %v9650_v37  ;;  %v3750_v31 = vpop.f32.mrf.mxu1  ;;  %v9654_v48 = vadd.f32 %v3456_v33, %v3007_v2  ;;  %v9662_v37 = vpop.permute.xlu0 %4726 }
 0x26e   :  { %v6797_v54 = vpop.f32.mrf.mxu0  ;;  %11455 = vst [vmem:[#allocation55_spill] sm:$0xff] %v9662_v37  ;;  %v3987_v2 = vadd.f32 %v3750_v31, %v9364_v9 }
 0x26f   :  { %11453 = vst [vmem:[#allocation53_spill] sm:$0xff] %v9654_v48  ;;  %v6739_v39 = vpop.f32.mrf.mxu1  ;;  %v9666_v33 = vadd.f32 %v6797_v54, %v3988_v59 }
 0x270   :  { %v4265_v53 = vpop.f32.mrf.mxu0  ;;  %v3992_v30 = vadd.f32 %v6739_v39, %v9375_v47  ;;  %v9692_v47 = vpop.permute.xlu1 %4741 }
 0x271   :  { %v3763_v19 = vpop.f32.mrf.mxu1  ;;  %v9660_v5 = vadd.f32 %v4265_v53, %v3986_v15  ;;  %v4926_v42 = vmul.f32 %v9543_v6, %v9666_v33  ;;  %v9682_v59 = vpop.permute.xlu0 %4736  ;;  %11459 = vst [vmem:[#allocation59_spill] sm:$0xff] %v9692_v47 }
 0x272   :  { %v6798_v14 = vpop.f32.mrf.mxu0  ;;  %v3990_v9 = vadd.f32 %v3763_v19, %v9398_v18  ;;  %11458 = vst [vmem:[#allocation58_spill] sm:$0xff] %v9682_v59 }
 0x273   :  { %v6740_v7 = vpop.f32.mrf.mxu1  ;;  %v4924_v27 = vmul.f32 %v9538_v58, %v9660_v5  ;;  %v9672_v41 = vadd.f32 %v6798_v14, %v3989_v40  ;;  %v4988_v39 = vsel %vm4984_vm2, %v4926_v42, 0.0 }
 0x274   :  { %v4268_v13 = vpop.f32.mrf.mxu0  ;;  %v3993_v58 = vadd.f32 %v6740_v7, %v9401_v20 }
 0x275   :  { %v3766_v48 = vpop.f32.mrf.mxu1  ;;  %11457 = vst [vmem:[#allocation57_spill] sm:$0xff] %v9672_v41  ;;  %v9674_v53 = vadd.f32 %v4268_v13, %v3987_v2  ;;  %v4985_v13 = vsel %vm4984_vm2, %v4924_v27, 0.0  ;;  %v4927_v40 = vmul.f32 %v9556_v49, %v9672_v41  ;;  %v9706_v7 = vpop.permute.xlu0 %4746 }
 0x276   :  { %v6801_v11 = vpop.f32.mrf.mxu0  ;;  %v3991_v27 = vadd.f32 %v3766_v48, %v9404_v36  ;;  %11460 = vst [vmem:[#allocation60_spill] sm:$0xff] %v9706_v7 }
 0x277   :  { %v6743_v52 = vpop.f32.mrf.mxu1  ;;  %v4925_v54 = vmul.f32 %v9551_v63, %v9674_v53  ;;  %v9690_v19 = vadd.f32 %v6801_v11, %v3992_v30 }
 0x278   :  { %v4281_v15 = vpop.f32.mrf.mxu0 }
 0x279   :  { %v3779_v31 = vpop.f32.mrf.mxu1  ;;  %v4986_v14 = vsel %vm4984_vm2, %v4925_v54, 0.0  ;;  %v9688_v2 = vadd.f32 %v4281_v15, %v3990_v9  ;;  %v4990_v15 = vsel %vm4984_vm2, %v4927_v40, 0.0 }
 0x27a   :  { %v4987_v18 = vadd.f32 %v4986_v14, %v4985_v13  ;;  %v6802_v63 = vpop.f32.mrf.mxu0  ;;  %v4930_v13 = vmul.f32 %v9577_v38, %v9690_v19  ;;  %v3994_v36 = vadd.f32 %v3779_v31, %v9438_v44 }
 0x27b   :  { %v6744_v6 = vpop.f32.mrf.mxu1  ;;  %v4928_v49 = vmul.f32 %v9564_v12, %v9688_v2  ;;  %v9700_v11 = vadd.f32 %v6802_v63, %v3993_v58 }
 0x27c   :  { %v4989_v41 = vadd.f32 %v4988_v39, %v4987_v18  ;;  %v4284_v9 = vpop.f32.mrf.mxu0  ;;  %v9712_v39 = vpop.permute.xlu1 %4751  ;;  %v4996_v44 = vsel %vm4984_vm2, %v4930_v13, 0.0 }
 0x27d   :  { %v3782_v54 = vpop.f32.mrf.mxu1  ;;  %v9702_v30 = vadd.f32 %v4284_v9, %v3991_v27  ;;  %v4992_v48 = vsel %vm4984_vm2, %v4928_v49, 0.0  ;;  %11461 = vst [vmem:[#allocation61_spill] sm:$0xff] %v9712_v39  ;;  %v3996_v27 = vadd.f32 %v6743_v52, %v9415_v21 }
 0x27e   :  { %v4991_v42 = vadd.f32 %v4990_v15, %v4989_v41  ;;  %v6805_v20 = vpop.f32.mrf.mxu0  ;;  %v4931_v41 = vmul.f32 %v9582_v61, %v9700_v11 }
 0x27f   :  { %v6747_v14 = vpop.f32.mrf.mxu1  ;;  %v4929_v18 = vmul.f32 %v9569_v1, %v9702_v30  ;;  %v9723_v1 = vadd.f32 %v6805_v20, %v3996_v27 }
 0x280   :  { %v4993_v40 = vadd.f32 %v4992_v48, %v4991_v42  ;;  %v4297_v58 = vpop.f32.mrf.mxu0  ;;  %v3997_v42 = vadd.f32 %v6744_v6, %v9441_v34  ;;  %v3995_v48 = vadd.f32 %v3782_v54, %v9444_v16  ;;  %v9734_v16 = vpop.permute.xlu1 %4761 }
 0x281   :  { %v3795_v63 = vpop.f32.mrf.mxu1  ;;  %v4994_v9 = vsel %vm4984_vm2, %v4929_v18, 0.0  ;;  %v9718_v15 = vadd.f32 %v4297_v58, %v3994_v36  ;;  %v9727_v18 = vpop.permute.xlu0 %4756  ;;  %v4998_v36 = vsel %vm4984_vm2, %v4931_v41, 0.0  ;;  %11463 = vst [vmem:[#allocation63_spill] sm:$0xff] %v9734_v16  ;;  %v4934_v54 = vmul.f32 %v9603_v56, %v9723_v1 }
 0x282   :  { %v4995_v49 = vadd.f32 %v4994_v9, %v4993_v40  ;;  %v6806_v38 = vpop.f32.mrf.mxu0  ;;  %11462 = vst [vmem:[#allocation62_spill] sm:$0xff] %v9727_v18  ;;  %v3998_v20 = vadd.f32 %v3795_v63, %v9472_v45 }
 0x283   :  { %v6748_v31 = vpop.f32.mrf.mxu1  ;;  %v4932_v21 = vmul.f32 %v9590_v50, %v9718_v15  ;;  %v9730_v13 = vadd.f32 %v6806_v38, %v3997_v42  ;;  %v4000_v38 = vadd.f32 %v6747_v14, %v9452_v22  ;;  %v5004_v56 = vsel %vm4984_vm2, %v4934_v54, 0.0 }
 0x284   :  { %v4997_v52 = vadd.f32 %v4996_v44, %v4995_v49  ;;  %v4300_v12 = vpop.f32.mrf.mxu0  ;;  %v4001_v22 = vadd.f32 %v6748_v31, %v9475_v17 }
 0x285   :  { %v3798_v61 = vpop.f32.mrf.mxu1  ;;  %v9732_v40 = vadd.f32 %v4300_v12, %v3995_v48  ;;  %v5000_v27 = vsel %vm4984_vm2, %v4932_v21, 0.0  ;;  %v4935_v49 = vmul.f32 %v9608_v10, %v9730_v13  ;;  %v9750_v21 = vpop.permute.xlu0 %4766 }
 0x286   :  { %v4999_v58 = vadd.f32 %v4998_v36, %v4997_v52  ;;  %v6809_v6 = vpop.f32.mrf.mxu0  ;;  %11464 = vst [vmem:[#allocation64_spill] sm:$0xff] %v9750_v21  ;;  %v3999_v14 = vadd.f32 %v3798_v61, %v9478_v28 }
 0x287   :  { %v6751_v34 = vpop.f32.mrf.mxu1  ;;  %v4933_v9 = vmul.f32 %v9595_v35, %v9732_v40  ;;  %v9748_v36 = vadd.f32 %v6809_v6, %v4000_v38  ;;  %v5006_v6 = vsel %vm4984_vm2, %v4935_v49, 0.0 }
 0x288   :  { %v5001_v41 = vadd.f32 %v5000_v27, %v4999_v58  ;;  %v4313_v44 = vpop.f32.mrf.mxu0 }
 0x289   :  { %v3811_v12 = vpop.f32.mrf.mxu1  ;;  %v5002_v42 = vsel %vm4984_vm2, %v4933_v9, 0.0  ;;  %v9746_v48 = vadd.f32 %v4313_v44, %v3998_v20  ;;  %v9757_v44 = vpop.permute.xlu1 %4771  ;;  %v4938_v54 = vmul.f32 %v9629_v32, %v9748_v36 }
 0x28a   :  { %v5003_v52 = vadd.f32 %v5002_v42, %v5001_v41  ;;  %v6810_v63 = vpop.f32.mrf.mxu0  ;;  %11465 = vst [vmem:[#allocation65_spill] sm:$0xff] %v9757_v44  ;;  %v4002_v61 = vadd.f32 %v3811_v12, %v9493_v46 }
 0x28b   :  { %v6752_v45 = vpop.f32.mrf.mxu1  ;;  %v4936_v58 = vmul.f32 %v9616_v26, %v9746_v48  ;;  %v9760_v38 = vadd.f32 %v6810_v63, %v4001_v22  ;;  %v9770_v63 = vpop.permute.xlu0 %4776  ;;  %v4004_v22 = vadd.f32 %v6751_v34, %v9483_v8  ;;  %v5012_v46 = vsel %vm4984_vm2, %v4938_v54, 0.0 }
 0x28c   :  { %v5005_v27 = vadd.f32 %v5004_v56, %v5003_v52  ;;  %v4316_v20 = vpop.f32.mrf.mxu0  ;;  %11466 = vst [vmem:[#allocation66_spill] sm:$0xff] %v9770_v63 }
 0x28d   :  { %v3814_v9 = vpop.f32.mrf.mxu1  ;;  %v9762_v41 = vadd.f32 %v4316_v20, %v3999_v14  ;;  %v5008_v56 = vsel %vm4984_vm2, %v4936_v58, 0.0  ;;  %v4939_v14 = vmul.f32 %v9634_v51, %v9760_v38  ;;  %v9779_v32 = vpop.permute.xlu1 %4781 }
 0x28e   :  { %v5007_v17 = vadd.f32 %v5006_v6, %v5005_v27  ;;  %v6813_v28 = vpop.f32.mrf.mxu0  ;;  %11467 = vst [vmem:[#allocation67_spill] sm:$0xff] %v9779_v32 }
 0x28f   :  { %v6755_v31 = vpop.f32.mrf.mxu1  ;;  %v4937_v42 = vmul.f32 %v9621_v23, %v9762_v41  ;;  %v9783_v23 = vadd.f32 %v6813_v28, %v4004_v22 }
 0x290   :  { %v5009_v52 = vadd.f32 %v5008_v56, %v5007_v17  ;;  %v4329_v49 = vpop.f32.mrf.mxu0  ;;  %v4005_v17 = vadd.f32 %v6752_v45, %v9496_v24  ;;  %v4003_v56 = vadd.f32 %v3814_v9, %v9499_v25  ;;  %v9792_v24 = vpop.permute.xlu0 %4786  ;;  %v4008_v22 = vadd.f32 %v6755_v31, %v9503_v29  ;;  %v11471_v31 = vld [vmem:[#allocation17_spill] sm:$0xff] }
 0x291   :  { %v3827_v26 = vpop.f32.mrf.mxu1  ;;  %v5010_v27 = vsel %vm4984_vm2, %v4937_v42, 0.0  ;;  %v9776_v20 = vadd.f32 %v4329_v49, %v4002_v61  ;;  %v5014_v49 = vsel %vm4984_vm2, %v4939_v14, 0.0  ;;  %11468 = vst [vmem:[#allocation68_spill] sm:$0xff] %v9792_v24  ;;  %v4942_v25 = vmul.f32 %v9652_v4, %v9783_v23 }
 0x292   :  { %v5011_v12 = vadd.f32 %v5010_v27, %v5009_v52  ;;  %v6814_v6 = vpop.f32.mrf.mxu0  ;;  %v4006_v45 = vadd.f32 %v3827_v26, %v9506_v3 }
 0x293   :  { %v6756_v58 = vpop.f32.mrf.mxu1  ;;  %v4940_v8 = vmul.f32 %v9642_v60, %v9776_v20  ;;  %v9788_v54 = vadd.f32 %v6814_v6, %v4005_v17  ;;  %v9801_v6 = vpop.permute.xlu1 %4791 }
 0x294   :  { %v5013_v34 = vadd.f32 %v5012_v46, %v5011_v12  ;;  %v4332_v61 = vpop.f32.mrf.mxu0  ;;  %11469 = vst [vmem:[#allocation69_spill] sm:$0xff] %v9801_v6  ;;  %v4009_v29 = vadd.f32 %v6756_v58, %v9509_v62 }
 0x295   :  { %v3830_v42 = vpop.f32.mrf.mxu1  ;;  %v9790_v52 = vadd.f32 %v4332_v61, %v4003_v56  ;;  %v5016_v9 = vsel %vm4984_vm2, %v4940_v8, 0.0  ;;  %v4943_v17 = vmul.f32 %v9656_v57, %v9788_v54 }
 0x296   :  { %v5015_v27 = vadd.f32 %v5014_v49, %v5013_v34  ;;  %v6817_v10 = vpop.f32.mrf.mxu0  ;;  %v5020_v49 = vsel %vm4984_vm2, %v4942_v25, 0.0 }
 0x297   :  { %v6759_v51 = vpop.f32.mrf.mxu1  ;;  %v4941_v28 = vmul.f32 %v9646_v0, %v9790_v52  ;;  %v9808_v26 = vadd.f32 %v6817_v10, %v4008_v22 }
 0x298   :  { %v5017_v14 = vadd.f32 %v5016_v9, %v5015_v27  ;;  %v4345_v12 = vpop.f32.mrf.mxu0  ;;  %v4007_v27 = vadd.f32 %v3830_v42, %v11471_v31 }
 0x299   :  { %v3843_v46 = vpop.f32.mrf.mxu1  ;;  %v5018_v56 = vsel %vm4984_vm2, %v4941_v28, 0.0  ;;  %v9806_v34 = vadd.f32 %v4345_v12, %v4006_v45  ;;  %11470 = vst [vmem:[#allocation70_spill] sm:$0xff] %v9808_v26  ;;  %v9815_v28 = vpop.permute.xlu0 %4796  ;;  %v5022_v45 = vsel %vm4984_vm2, %v4943_v17, 0.0  ;;  %v4946_v25 = vmul.f32 %v9682_v59, %v9808_v26  ;;  %v11475_v12 = vld [vmem:[#allocation19_spill] sm:$0xff] }
 0x29a   :  { %v5019_v3 = vadd.f32 %v5018_v56, %v5017_v14  ;;  %v6818_v61 = vpop.f32.mrf.mxu0  ;;  %11472 = vst [vmem:[#allocation17_spill] sm:$0xff] %v9815_v28  ;;  %v9824_v14 = vpop.permute.xlu1 %4801  ;;  %v4010_v56 = vadd.f32 %v3843_v46, %v11475_v12 }
 0x29b   :  { %v6760_v8 = vpop.f32.mrf.mxu1  ;;  %v4944_v9 = vmul.f32 %v9662_v37, %v9806_v34  ;;  %v9818_v10 = vadd.f32 %v6818_v61, %v4009_v29  ;;  %11474 = vst [vmem:[#allocation72_spill] sm:$0xff] %v9824_v14  ;;  %v5028_v59 = vsel %vm4984_vm2, %v4946_v25, 0.0 }
 0x29c   :  { %v5021_v4 = vadd.f32 %v5020_v49, %v5019_v3  ;;  %v4348_v0 = vpop.f32.mrf.mxu0 }
 0x29d   :  { %v3846_v57 = vpop.f32.mrf.mxu1  ;;  %v9820_v22 = vadd.f32 %v4348_v0, %v4007_v27  ;;  %v5024_v3 = vsel %vm4984_vm2, %v4944_v9, 0.0  ;;  %v11476_v0 = vld [vmem:[#allocation18_spill] sm:$0xff]  ;;  %v4947_v27 = vmul.f32 %v9692_v47, %v9818_v10  ;;  %v9837_v37 = vpop.permute.xlu0 %4806 }
 0x29e   :  { %v5023_v62 = vadd.f32 %v5022_v45, %v5021_v4  ;;  %v6821_v42 = vpop.f32.mrf.mxu0  ;;  %v4012_v31 = vadd.f32 %v6759_v51, %v11476_v0  ;;  %11477 = vst [vmem:[#allocation19_spill] sm:$0xff] %v9837_v37 }
 0x29f   :  { %11473 = vst [vmem:[#allocation71_spill] sm:$0xff] %v9820_v22  ;;  %v6763_v58 = vpop.f32.mrf.mxu1  ;;  %v4945_v49 = vmul.f32 %v9668_v55, %v9820_v22  ;;  %v11478_v55 = vld [vmem:[#allocation22_spill] sm:$0xff]  ;;  %v5030_v25 = vsel %vm4984_vm2, %v4947_v27, 0.0 }
 0x2a0   :  { %v5025_v17 = vadd.f32 %v5024_v3, %v5023_v62  ;;  %v4361_v29 = vpop.f32.mrf.mxu0  ;;  %v4013_v62 = vadd.f32 %v6760_v8, %v11478_v55  ;;  %v11479_v3 = vld [vmem:[#allocation20_spill] sm:$0xff]  ;;  %v9841_v22 = vadd.f32 %v6821_v42, %v4012_v31  ;;  %v11484_v42 = vld [vmem:[#allocation23_spill] sm:$0xff] }
 0x2a1   :  { %v3859_v61 = vpop.f32.mrf.mxu1  ;;  %v5026_v4 = vsel %vm4984_vm2, %v4945_v49, 0.0  ;;  %v9834_v45 = vadd.f32 %v4361_v29, %v4010_v56  ;;  %v4011_v26 = vadd.f32 %v3846_v57, %v11479_v3  ;;  %v9845_v29 = vpop.permute.xlu1 %4811  ;;  %v11485_v3 = vld [vmem:[#allocation21_spill] sm:$0xff] }
 0x2a2   :  { %v5027_v46 = vadd.f32 %v5026_v4, %v5025_v17  ;;  %v6822_v9 = vpop.f32.mrf.mxu0  ;;  %11480 = vst [vmem:[#allocation18_spill] sm:$0xff] %v9841_v22  ;;  %11481 = vst [vmem:[#allocation22_spill] sm:$0xff] %v9845_v29  ;;  %v4950_v57 = vmul.f32 %v9727_v18, %v9841_v22  ;;  %v4014_v31 = vadd.f32 %v3859_v61, %v11484_v42 }
 0x2a3   :  { %v6764_v12 = vpop.f32.mrf.mxu1  ;;  %v4948_v51 = vmul.f32 %v9706_v7, %v9834_v45  ;;  %v9848_v17 = vadd.f32 %v6822_v9, %v4013_v62  ;;  %v4016_v7 = vadd.f32 %v6763_v58, %v11485_v3  ;;  %v11490_v58 = vld [vmem:[#allocation24_spill] sm:$0xff]  ;;  %v11491_v3 = vld [vmem:[#allocation25_spill] sm:$0xff] }
 0x2a4   :  { %v5029_v0 = vadd.f32 %v5028_v59, %v5027_v46  ;;  %v4364_v56 = vpop.f32.mrf.mxu0 }
 0x2a5   :  { %v3862_v49 = vpop.f32.mrf.mxu1  ;;  %11482 = vst [vmem:[#allocation20_spill] sm:$0xff] %v9848_v17  ;;  %v9850_v4 = vadd.f32 %v4364_v56, %v4011_v26  ;;  %v5032_v59 = vsel %vm4984_vm2, %v4948_v51, 0.0  ;;  %v9859_v26 = vpop.permute.xlu0 %4816 }
 0x2a6   :  { %v5031_v47 = vadd.f32 %v5030_v25, %v5029_v0  ;;  %v6825_v8 = vpop.f32.mrf.mxu0  ;;  %11486 = vst [vmem:[#allocation23_spill] sm:$0xff] %v9859_v26  ;;  %v4951_v0 = vmul.f32 %v9734_v16, %v9848_v17  ;;  %v4015_v22 = vadd.f32 %v3862_v49, %v11491_v3  ;;  %v11495_v49 = vld [vmem:[#allocation4_spill] sm:$0xff] }
 0x2a7   :  { %11483 = vst [vmem:[#allocation73_spill] sm:$0xff] %v9850_v4  ;;  %v6767_v55 = vpop.f32.mrf.mxu1  ;;  %v4949_v46 = vmul.f32 %v9712_v39, %v9850_v4  ;;  %v9866_v42 = vadd.f32 %v6825_v8, %v4016_v7  ;;  %v9868_v39 = vpop.permute.xlu1 %4821 }
 0x2a8   :  { %v5033_v27 = vadd.f32 %v5032_v59, %v5031_v47  ;;  %v4377_v62 = vpop.f32.mrf.mxu0  ;;  %11489 = vst [vmem:[#allocation75_spill] sm:$0xff] %v9868_v39  ;;  %v5036_v47 = vsel %vm4984_vm2, %v4950_v57, 0.0  ;;  %v4017_v59 = vadd.f32 %v6764_v12, %v11490_v58 }
 0x2a9   :  { %v3875_v9 = vpop.f32.mrf.mxu1  ;;  %v5034_v56 = vsel %vm4984_vm2, %v4949_v46, 0.0  ;;  %v9864_v25 = vadd.f32 %v4377_v62, %v4014_v31  ;;  %11488 = vst [vmem:[#allocation74_spill] sm:$0xff] %v9866_v42  ;;  %v4954_v62 = vmul.f32 %v9770_v63, %v9866_v42  ;;  %v9882_v58 = vpop.permute.xlu0 %4826 }
 0x2aa   :  { %v5035_v61 = vadd.f32 %v5034_v56, %v5033_v27  ;;  %v6826_v18 = vpop.f32.mrf.mxu0  ;;  %v5038_v27 = vsel %vm4984_vm2, %v4951_v0, 0.0  ;;  %11494 = vst [vmem:[#allocation76_spill] sm:$0xff] %v9882_v58  ;;  %v4018_v3 = vadd.f32 %v3875_v9, %v11495_v49 }
 0x2ab   :  { %11487 = vst [vmem:[#allocation21_spill] sm:$0xff] %v9864_v25  ;;  %v6768_v51 = vpop.f32.mrf.mxu1  ;;  %v4952_v16 = vmul.f32 %v9750_v21, %v9864_v25  ;;  %v9876_v7 = vadd.f32 %v6826_v18, %v4017_v59  ;;  %v5044_v9 = vsel %vm4984_vm2, %v4954_v62, 0.0 }
 0x2ac   :  { %v5037_v17 = vadd.f32 %v5036_v47, %v5035_v61  ;;  %v4380_v31 = vpop.f32.mrf.mxu0 }
 0x2ad   :  { %v3878_v46 = vpop.f32.mrf.mxu1  ;;  %11492 = vst [vmem:[#allocation24_spill] sm:$0xff] %v9876_v7  ;;  %v9878_v8 = vadd.f32 %v4380_v31, %v4015_v22  ;;  %v5040_v61 = vsel %vm4984_vm2, %v4952_v16, 0.0  ;;  %v9888_v22 = vpop.permute.xlu1 %4831  ;;  %v11497_v31 = vld [vmem:[#allocation3_spill] sm:$0xff] }
 0x2ae   :  { %v5039_v57 = vadd.f32 %v5038_v27, %v5037_v17  ;;  %v6829_v12 = vpop.f32.mrf.mxu0  ;;  %11496 = vst [vmem:[#allocation4_spill] sm:$0xff] %v9888_v22  ;;  %v4020_v21 = vadd.f32 %v6767_v55, %v11497_v31  ;;  %v4955_v17 = vmul.f32 %v9779_v32, %v9876_v7 }
 0x2af   :  { %11493 = vst [vmem:[#allocation25_spill] sm:$0xff] %v9878_v8  ;;  %v6771_v56 = vpop.f32.mrf.mxu1  ;;  %v4953_v47 = vmul.f32 %v9757_v44, %v9878_v8  ;;  %v11499_v44 = vld [vmem:[#allocation5_spill] sm:$0xff] }
 0x2b0   :  { %v5041_v0 = vadd.f32 %v5040_v61, %v5039_v57  ;;  %v4393_v59 = vpop.f32.mrf.mxu0  ;;  %v4021_v57 = vadd.f32 %v6768_v51, %v11499_v44  ;;  %v11500_v61 = vld [vmem:[#allocation6_spill] sm:$0xff]  ;;  %v9899_v25 = vadd.f32 %v6829_v12, %v4020_v21  ;;  %v11506_v12 = vld [vmem:[#allocation8_spill] sm:$0xff] }
 0x2b1   :  { %v3891_v18 = vpop.f32.mrf.mxu1  ;;  %v5042_v27 = vsel %vm4984_vm2, %v4953_v47, 0.0  ;;  %v9894_v63 = vadd.f32 %v4393_v59, %v4018_v3  ;;  %v4019_v8 = vadd.f32 %v3878_v46, %v11500_v61  ;;  %v9903_v47 = vpop.permute.xlu0 %4836  ;;  %v5046_v3 = vsel %vm4984_vm2, %v4955_v17, 0.0  ;;  %v11507_v17 = vld [vmem:[#allocation7_spill] sm:$0xff] }
 0x2b2   :  { %v5043_v16 = vadd.f32 %v5042_v27, %v5041_v0  ;;  %v6830_v42 = vpop.f32.mrf.mxu0  ;;  %11501 = vst [vmem:[#allocation5_spill] sm:$0xff] %v9899_v25  ;;  %11502 = vst [vmem:[#allocation6_spill] sm:$0xff] %v9903_v47  ;;  %v9910_v46 = vpop.permute.xlu1 %4841  ;;  %v4958_v21 = vmul.f32 %v9815_v28, %v9899_v25  ;;  %v4022_v27 = vadd.f32 %v3891_v18, %v11506_v12 }
 0x2b3   :  { %11498 = vst [vmem:[#allocation3_spill] sm:$0xff] %v9894_v63  ;;  %v6772_v49 = vpop.f32.mrf.mxu1  ;;  %v4956_v55 = vmul.f32 %v9792_v24, %v9894_v63  ;;  %v9906_v62 = vadd.f32 %v6830_v42, %v4021_v57  ;;  %11505 = vst [vmem:[#allocation79_spill] sm:$0xff] %v9910_v46  ;;  %v4024_v42 = vadd.f32 %v6771_v56, %v11507_v17  ;;  %v11511_v56 = vld [vmem:[#allocation9_spill] sm:$0xff]  ;;  %v11546_v63 = vld [vmem:[#allocation48_spill] sm:$0xff] }
 0x2b4   :  { %v5045_v31 = vadd.f32 %v5044_v9, %v5043_v16  ;;  %v4396_v7 = vpop.f32.mrf.mxu0 }
 0x2b5   :  { %v3894_v32 = vpop.f32.mrf.mxu1  ;;  %11503 = vst [vmem:[#allocation77_spill] sm:$0xff] %v9906_v62  ;;  %v9908_v0 = vadd.f32 %v4396_v7, %v4019_v8  ;;  %v5048_v9 = vsel %vm4984_vm2, %v4956_v55, 0.0  ;;  %v4959_v61 = vmul.f32 %v9824_v14, %v9906_v62  ;;  %v9926_v12 = vpop.permute.xlu0 %4846 }
 0x2b6   :  { %v5047_v59 = vadd.f32 %v5046_v3, %v5045_v31  ;;  %v6833_v51 = vpop.f32.mrf.mxu0  ;;  %11510 = vst [vmem:[#allocation80_spill] sm:$0xff] %v9926_v12 }
 0x2b7   :  { %11504 = vst [vmem:[#allocation78_spill] sm:$0xff] %v9908_v0  ;;  %v6775_v44 = vpop.f32.mrf.mxu1  ;;  %v4957_v16 = vmul.f32 %v9801_v6, %v9908_v0  ;;  %v9924_v24 = vadd.f32 %v6833_v51, %v4024_v42  ;;  %v5052_v6 = vsel %vm4984_vm2, %v4958_v21, 0.0  ;;  %v5054_v51 = vsel %vm4984_vm2, %v4959_v61, 0.0 }
 0x2b8   :  { %v5049_v57 = vadd.f32 %v5048_v9, %v5047_v59  ;;  %v4409_v8 = vpop.f32.mrf.mxu0  ;;  %v4025_v59 = vadd.f32 %v6772_v49, %v11511_v56  ;;  %v11512_v9 = vld [vmem:[#allocation10_spill] sm:$0xff]  ;;  %v11516_v56 = vld [vmem:[#allocation12_spill] sm:$0xff] }
 0x2b9   :  { %v3907_v7 = vpop.f32.mrf.mxu1  ;;  %v5050_v31 = vsel %vm4984_vm2, %v4957_v16, 0.0  ;;  %v9922_v3 = vadd.f32 %v4409_v8, %v4022_v27  ;;  %11509 = vst [vmem:[#allocation7_spill] sm:$0xff] %v9924_v24  ;;  %v4023_v17 = vadd.f32 %v3894_v32, %v11512_v9  ;;  %v9933_v8 = vpop.permute.xlu1 %4851  ;;  %v4962_v21 = vmul.f32 %v9859_v26, %v9924_v24 }
 0x2ba   :  { %v5051_v28 = vadd.f32 %v5050_v31, %v5049_v57  ;;  %v6834_v55 = vpop.f32.mrf.mxu0  ;;  %11513 = vst [vmem:[#allocation9_spill] sm:$0xff] %v9933_v8  ;;  %v4026_v9 = vadd.f32 %v3907_v7, %v11516_v56 }
 0x2bb   :  { %11508 = vst [vmem:[#allocation8_spill] sm:$0xff] %v9922_v3  ;;  %v6776_v18 = vpop.f32.mrf.mxu1  ;;  %v4960_v14 = vmul.f32 %v9837_v37, %v9922_v3  ;;  %v9936_v42 = vadd.f32 %v6834_v55, %v4025_v59  ;;  %v9946_v55 = vpop.permute.xlu0 %4856  ;;  %v11518_v59 = vld [vmem:[#allocation11_spill] sm:$0xff]  ;;  %v5060_v7 = vsel %vm4984_vm2, %v4962_v21, 0.0 }
 0x2bc   :  { %v5053_v62 = vadd.f32 %v5052_v6, %v5051_v28  ;;  %v4412_v27 = vpop.f32.mrf.mxu0  ;;  %11517 = vst [vmem:[#allocation12_spill] sm:$0xff] %v9946_v55 }
 0x2bd   :  { %v3910_v16 = vpop.f32.mrf.mxu1  ;;  %11514 = vst [vmem:[#allocation10_spill] sm:$0xff] %v9936_v42  ;;  %v9938_v57 = vadd.f32 %v4412_v27, %v4023_v17  ;;  %v5056_v6 = vsel %vm4984_vm2, %v4960_v14, 0.0  ;;  %v4028_v17 = vadd.f32 %v6775_v44, %v11518_v59  ;;  %v4963_v27 = vmul.f32 %v9868_v39, %v9936_v42 }
 0x2be   :  { %v5055_v49 = vadd.f32 %v5054_v51, %v5053_v62  ;;  %v6837_v32 = vpop.f32.mrf.mxu0 }
 0x2bf   :  { %11515 = vst [vmem:[#allocation81_spill] sm:$0xff] %v9938_v57  ;;  %v6779_v31 = vpop.f32.mrf.mxu1  ;;  %v4961_v28 = vmul.f32 %v9845_v29, %v9938_v57  ;;  %v9955_v29 = vpop.permute.xlu1 %4861  ;;  %v9959_v57 = vadd.f32 %v6837_v32, %v4028_v17 }
 0x2c0   :  { %v5057_v37 = vadd.f32 %v5056_v6, %v5055_v49  ;;  %v4425_v61 = vpop.f32.mrf.mxu0  ;;  %11520 = vst [vmem:[#allocation82_spill] sm:$0xff] %v9955_v29  ;;  %v4029_v49 = vadd.f32 %v6776_v18, %v9585_v43  ;;  %v11521_v6 = vld [vmem:[#allocation13_spill] sm:$0xff]  ;;  %v9968_v43 = vpop.permute.xlu0 %4866 }
 0x2c1   :  { %v3923_v3 = vpop.f32.mrf.mxu1  ;;  %v5058_v62 = vsel %vm4984_vm2, %v4961_v28, 0.0  ;;  %v9952_v51 = vadd.f32 %v4425_v61, %v4026_v9  ;;  %v4027_v24 = vadd.f32 %v3910_v16, %v11521_v6  ;;  %11522 = vst [vmem:[#allocation13_spill] sm:$0xff] %v9959_v57  ;;  %v5062_v61 = vsel %vm4984_vm2, %v4963_v27, 0.0  ;;  %11525 = vst [vmem:[#allocation85_spill] sm:$0xff] %v9968_v43  ;;  %v11526_v16 = vld [vmem:[#allocation15_spill] sm:$0xff]  ;;  %v11527_v27 = vld [vmem:[#allocation14_spill] sm:$0xff] }
 0x2c2   :  { %v5059_v14 = vadd.f32 %v5058_v62, %v5057_v37  ;;  %v6838_v26 = vpop.f32.mrf.mxu0  ;;  %v4966_v18 = vmul.f32 %v9903_v47, %v9959_v57  ;;  %v4030_v32 = vadd.f32 %v3923_v3, %v11526_v16 }
 0x2c3   :  { %11519 = vst [vmem:[#allocation11_spill] sm:$0xff] %v9952_v51  ;;  %v6780_v56 = vpop.f32.mrf.mxu1  ;;  %v4964_v44 = vmul.f32 %v9882_v58, %v9952_v51  ;;  %v9964_v21 = vadd.f32 %v6838_v26, %v4029_v49  ;;  %v4032_v26 = vadd.f32 %v6779_v31, %v11527_v27  ;;  %v9977_v6 = vpop.permute.xlu1 %4871  ;;  %v11529_v31 = vld [vmem:[#allocation33_spill] sm:$0xff] }
 0x2c4   :  { %v5061_v59 = vadd.f32 %v5060_v7, %v5059_v14  ;;  %v4428_v9 = vpop.f32.mrf.mxu0  ;;  %11528 = vst [vmem:[#allocation15_spill] sm:$0xff] %v9977_v6 }
 0x2c5   :  { %v3926_v28 = vpop.f32.mrf.mxu1  ;;  %11523 = vst [vmem:[#allocation83_spill] sm:$0xff] %v9964_v21  ;;  %v9966_v37 = vadd.f32 %v4428_v9, %v4027_v24  ;;  %v5064_v17 = vsel %vm4984_vm2, %v4964_v44, 0.0 }
 0x2c6   :  { %v5063_v62 = vadd.f32 %v5062_v61, %v5061_v59  ;;  %v6841_v42 = vpop.f32.mrf.mxu0  ;;  %v4967_v59 = vmul.f32 %v9910_v46, %v9964_v21 }
 0x2c7   :  { %11524 = vst [vmem:[#allocation84_spill] sm:$0xff] %v9966_v37  ;;  %v6783_v39 = vpop.f32.mrf.mxu1  ;;  %v4965_v7 = vmul.f32 %v9888_v22, %v9966_v37  ;;  %v9984_v16 = vadd.f32 %v6841_v42, %v4032_v26  ;;  %v5068_v22 = vsel %vm4984_vm2, %v4966_v18, 0.0 }
 0x2c8   :  { %v5065_v14 = vadd.f32 %v5064_v17, %v5063_v62  ;;  %v4441_v49 = vpop.f32.mrf.mxu0  ;;  %v4033_v62 = vadd.f32 %v6780_v56, %v11529_v31  ;;  %v11530_v17 = vld [vmem:[#allocation35_spill] sm:$0xff] }
 0x2c9   :  { %v3939_v24 = vpop.f32.mrf.mxu1  ;;  %v5066_v9 = vsel %vm4984_vm2, %v4965_v7, 0.0  ;;  %v9982_v61 = vadd.f32 %v4441_v49, %v4030_v32  ;;  %v4031_v27 = vadd.f32 %v3926_v28, %v11530_v17  ;;  %v9991_v7 = vpop.permute.xlu0 %4876  ;;  %v5070_v32 = vsel %vm4984_vm2, %v4967_v59, 0.0 }
 0x2ca   :  { %v5067_v3 = vadd.f32 %v5066_v9, %v5065_v14  ;;  %v6842_v47 = vpop.f32.mrf.mxu0  ;;  %11531 = vst [vmem:[#allocation14_spill] sm:$0xff] %v9991_v7  ;;  %v4970_v18 = vmul.f32 %v9946_v55, %v9984_v16  ;;  %v10000_v49 = vpop.permute.xlu1 %4881  ;;  %v11533_v9 = vld [vmem:[#allocation37_spill] sm:$0xff] }
 0x2cb   :  { %v6784_v44 = vpop.f32.mrf.mxu1  ;;  %v4968_v58 = vmul.f32 %v9926_v12, %v9982_v61  ;;  %v9994_v42 = vadd.f32 %v6842_v47, %v4033_v62  ;;  %11532 = vst [vmem:[#allocation33_spill] sm:$0xff] %v10000_v49 }
 0x2cc   :  { %v5069_v57 = vadd.f32 %v5068_v22, %v5067_v3  ;;  %v4444_v21 = vpop.f32.mrf.mxu0  ;;  %v4034_v22 = vadd.f32 %v3939_v24, %v11533_v9  ;;  %v5076_v55 = vsel %vm4984_vm2, %v4970_v18, 0.0 }
 0x2cd   :  { %v3942_v46 = vpop.f32.mrf.mxu1  ;;  %v9996_v26 = vadd.f32 %v4444_v21, %v4031_v27  ;;  %v5072_v3 = vsel %vm4984_vm2, %v4968_v58, 0.0  ;;  %v11534_v21 = vld [vmem:[#allocation16_spill] sm:$0xff]  ;;  %v4971_v27 = vmul.f32 %v9955_v29, %v9994_v42  ;;  %v10013_v12 = vpop.permute.xlu0 %4886 }
 0x2ce   :  { %v5071_v56 = vadd.f32 %v5070_v32, %v5069_v57  ;;  %v6845_v28 = vpop.f32.mrf.mxu0  ;;  %v4036_v17 = vadd.f32 %v6783_v39, %v11534_v21  ;;  %11535 = vst [vmem:[#allocation35_spill] sm:$0xff] %v10013_v12 }
 0x2cf   :  { %v6787_v14 = vpop.f32.mrf.mxu1  ;;  %v4969_v31 = vmul.f32 %v9933_v8, %v9996_v26  ;;  %v11536_v8 = vld [vmem:[#allocation39_spill] sm:$0xff]  ;;  %v5078_v18 = vsel %vm4984_vm2, %v4971_v27, 0.0 }
 0x2d0   :  { %v5073_v59 = vadd.f32 %v5072_v3, %v5071_v56  ;;  %v4457_v62 = vpop.f32.mrf.mxu0  ;;  %v4037_v56 = vadd.f32 %v6784_v44, %v11536_v8  ;;  %v11537_v3 = vld [vmem:[#allocation41_spill] sm:$0xff]  ;;  %v10017_v51 = vadd.f32 %v6845_v28, %v4036_v17  ;;  %v11539_v28 = vld [vmem:[#allocation44_spill] sm:$0xff] }
 0x2d1   :  { %v3955_v47 = vpop.f32.mrf.mxu1  ;;  %v5074_v57 = vsel %vm4984_vm2, %v4969_v31, 0.0  ;;  %v10010_v32 = vadd.f32 %v4457_v62, %v4034_v22  ;;  %v4035_v37 = vadd.f32 %v3942_v46, %v11537_v3  ;;  %v10021_v62 = vpop.permute.xlu1 %4891  ;;  %v11540_v3 = vld [vmem:[#allocation42_spill] sm:$0xff] }
 0x2d2   :  { %v5075_v24 = vadd.f32 %v5074_v57, %v5073_v59  ;;  %v6846_v58 = vpop.f32.mrf.mxu0  ;;  %11538 = vst [vmem:[#allocation37_spill] sm:$0xff] %v10021_v62  ;;  %v4974_v46 = vmul.f32 %v9991_v7, %v10017_v51  ;;  %v4038_v17 = vadd.f32 %v3955_v47, %v11539_v28 }
 0x2d3   :  { %v6788_v9 = vpop.f32.mrf.mxu1  ;;  %v4972_v39 = vmul.f32 %v9968_v43, %v10010_v32  ;;  %v10024_v59 = vadd.f32 %v6846_v58, %v4037_v56  ;;  %v4040_v43 = vadd.f32 %v6787_v14, %v11540_v3  ;;  %v11544_v3 = vld [vmem:[#allocation47_spill] sm:$0xff] }
 0x2d4   :  { %v5077_v21 = vadd.f32 %v5076_v55, %v5075_v24  ;;  %v4460_v22 = vpop.f32.mrf.mxu0  ;;  %v5084_v14 = vsel %vm4984_vm2, %v4974_v46, 0.0 }
 0x2d5   :  { %v3958_v31 = vpop.f32.mrf.mxu1  ;;  %v10026_v57 = vadd.f32 %v4460_v22, %v4035_v37  ;;  %v5080_v55 = vsel %vm4984_vm2, %v4972_v39, 0.0  ;;  %v10035_v37 = vpop.permute.xlu0 %4896 }
 0x2d6   :  { %v5079_v29 = vadd.f32 %v5078_v18, %v5077_v21  ;;  %v6849_v44 = vpop.f32.mrf.mxu0  ;;  %11541 = vst [vmem:[#allocation16_spill] sm:$0xff] %v10035_v37  ;;  %v4975_v21 = vmul.f32 %v10000_v49, %v10024_v59  ;;  %v10044_v7 = vpop.permute.xlu1 %4901 }
 0x2d7   :  { %v6791_v8 = vpop.f32.mrf.mxu1  ;;  %v4973_v24 = vmul.f32 %v9977_v6, %v10026_v57  ;;  %v10042_v28 = vadd.f32 %v6849_v44, %v4040_v43  ;;  %11542 = vst [vmem:[#allocation39_spill] sm:$0xff] %v10044_v7  ;;  %v4039_v6 = vadd.f32 %v3958_v31, %v11544_v3 }
 0x2d8   :  { %v5081_v27 = vadd.f32 %v5080_v55, %v5079_v29  ;;  %v4473_v56 = vpop.f32.mrf.mxu0  ;;  %v11543_v29 = vld [vmem:[#allocation46_spill] sm:$0xff] }
 0x2d9   :  { %v3971_v58 = vpop.f32.mrf.mxu1  ;;  %v5082_v22 = vsel %vm4984_vm2, %v4973_v24, 0.0  ;;  %v10040_v18 = vadd.f32 %v4473_v56, %v4038_v17  ;;  %v4041_v55 = vadd.f32 %v6788_v9, %v11543_v29  ;;  %v5086_v17 = vsel %vm4984_vm2, %v4975_v21, 0.0  ;;  %v10054_v46 = vpop.permute.xlu0 %4906  ;;  %v11545_v9 = vld [vmem:[#allocation50_spill] sm:$0xff] }
 0x2da   :  { %v5083_v47 = vadd.f32 %v5082_v22, %v5081_v27  ;;  %v6850_v39 = vpop.f32.mrf.mxu0  ;;  %v4978_v44 = vmul.f32 %v10035_v37, %v10042_v28  ;;  %v4042_v29 = vadd.f32 %v3971_v58, %v11545_v9  ;;  %v4044_v21 = vadd.f32 %v6791_v8, %v11546_v63  ;;  %v11547_v9 = vld [vmem:[#allocation51_spill] sm:$0xff]  ;;  %v11548_v37 = vld [vmem:[#allocation53_spill] sm:$0xff] }
 0x2db   :  { %v4976_v25 = vmul.f32 %v10013_v12, %v10040_v18  ;;  %v6792_v0 = vpop.f32.mrf.mxu1  ;;  %v4559_v27 = vadd.f32 %v6850_v39, %v4041_v55 }
 0x2dc   :  { %v5085_v49 = vadd.f32 %v5084_v14, %v5083_v47  ;;  %v4476_v24 = vpop.f32.mrf.mxu0 }
 0x2dd   :  { %v4557_v43 = vadd.f32 %v4476_v24, %v4039_v6  ;;  %v5088_v31 = vsel %vm4984_vm2, %v4976_v25, 0.0  ;;  %v3974_v14 = vpop.f32.mrf.mxu1  ;;  %v4979_v6 = vmul.f32 %v10044_v7, %v4559_v27  ;;  %v5092_v24 = vsel %vm4984_vm2, %v4978_v44, 0.0 }
 0x2de   :  { %v5087_v56 = vadd.f32 %v5086_v17, %v5085_v49  ;;  %v6853_v22 = vpop.f32.mrf.mxu0  ;;  %v10062_v49 = vpop.permute.xlu1 %4911  ;;  %v4045_v25 = vadd.f32 %v6792_v0, %v11547_v9 }
 0x2df   :  { %v4977_v3 = vmul.f32 %v10021_v62, %v4557_v43  ;;  %v4043_v62 = vadd.f32 %v3974_v14, %v11548_v37  ;;  %v5094_v8 = vsel %vm4984_vm2, %v4979_v6, 0.0 }
 0x2e0   :  { %v5089_v47 = vadd.f32 %v5088_v31, %v5087_v56  ;;  %v4489_v12 = vpop.f32.mrf.mxu0  ;;  %v4562_v56 = vadd.f32 %v6853_v22, %v4044_v21 }
 0x2e1   :  { %v5090_v39 = vsel %vm4984_vm2, %v4977_v3, 0.0  ;;  %v4560_v55 = vadd.f32 %v4489_v12, %v4042_v29  ;;  %v10069_v12 = vpop.permute.xlu0 %4916 }
 0x2e2   :  { %v5091_v17 = vadd.f32 %v5090_v39, %v5089_v47  ;;  %v6854_v58 = vpop.f32.mrf.mxu0  ;;  %v4982_v44 = vmul.f32 %v10069_v12, %v4562_v56  ;;  %v10074_v39 = vpop.permute.xlu1 %4921 }
 0x2e3   :  { %v4980_v31 = vmul.f32 %v10054_v46, %v4560_v55  ;;  %v4563_v7 = vadd.f32 %v6854_v58, %v4045_v25 }
 0x2e4   :  { %v5093_v4 = vadd.f32 %v5092_v24, %v5091_v17  ;;  %v4492_v63 = vpop.f32.mrf.mxu0 }
 0x2e5   :  { %v4561_v3 = vadd.f32 %v4492_v63, %v4043_v62  ;;  %v5096_v47 = vsel %vm4984_vm2, %v4980_v31, 0.0  ;;  %v4983_v22 = vmul.f32 %v10074_v39, %v4563_v7  ;;  %v5100_v62 = vsel %vm4984_vm2, %v4982_v44, 0.0 }
 0x2e6   :  { %v5095_v29 = vadd.f32 %v5094_v8, %v5093_v4 }
 0x2e7   :  { %v4981_v0 = vmul.f32 %v10062_v49, %v4561_v3  ;;  %v5103_v4 = vsel %vm5102_vm3, %v4983_v22, 0.0 }
 0x2e8   :  { %v5097_v37 = vadd.f32 %v5096_v47, %v5095_v29 }
 0x2e9   :  { %v5098_v14 = vsel %vm4984_vm2, %v4981_v0, 0.0 }
 0x2ea   :  { %v5099_v21 = vadd.f32 %v5098_v14, %v5097_v37 }
 0x2ec   :  { %v5101_v6 = vadd.f32 %v5100_v62, %v5099_v21  ;;  %v11557_v62 = vld [vmem:[#allocation2_spill] sm:$0xff] }
 0x2ee   :  { %v5104_v24 = vadd.f32 %v5103_v4, %v5101_v6  ;;  %v11558_v4 = vld [vmem:[#allocation27_spill] sm:$0xff] }
 0x2f0   :  { %v5105_v17 = vrot.slane %v5104_v24, 4 }
 0x2f2   :  { %v5106_v58 = vadd.f32 %v5105_v17, %v5104_v24 }
 0x2f4   :  { %v5107_v9 = vrot.slane %v5106_v58, 2 }
 0x2f6   :  { %v5108_v25 = vadd.f32 %v5107_v9, %v5106_v58  ;;  %v11559_v58 = vld [vmem:[#allocation26_spill] sm:$0xff] }
 0x2f8   :  { %v5109_v31 = vrot.slane %v5108_v25, 1 }
 0x2fa   :  { %v5110_v63 = vadd.f32 %v5109_v31, %v5108_v25  ;;  %v11560_v31 = vld [vmem:[#allocation28_spill] sm:$0xff] }
 0x2fc   :  { %v10080_v8 = vmul.f32 0.0025510204, %v5110_v63 }
 0x2fe   :  { %v10084_v29 = vsub.f32 %v9982_v61, %v10080_v8  ;;  %v10088_v47 = vsub.f32 %v9996_v26, %v10080_v8  ;;  %v10092_v44 = vsub.f32 %v9984_v16, %v10080_v8  ;;  %v10096_v0 = vsub.f32 %v9994_v42, %v10080_v8 }
 0x2ff   :  { %v10100_v37 = vsub.f32 %v10010_v32, %v10080_v8  ;;  %v10104_v61 = vsub.f32 %v10026_v57, %v10080_v8  ;;  %v10108_v26 = vsub.f32 %v10017_v51, %v10080_v8  ;;  %v10112_v16 = vsub.f32 %v10024_v59, %v10080_v8 }
 0x300   :  { %v10116_v42 = vsub.f32 %v10040_v18, %v10080_v8  ;;  %v10119_v22 = vsub.f32 %v4557_v43, %v10080_v8  ;;  %v10123_v32 = vsub.f32 %v10042_v28, %v10080_v8  ;;  %v10126_v57 = vsub.f32 %v4559_v27, %v10080_v8 }
 0x301   :  { %v10129_v51 = vsub.f32 %v4560_v55, %v10080_v8  ;;  %v10132_v59 = vsub.f32 %v4561_v3, %v10080_v8  ;;  %v10135_v14 = vsub.f32 %v4562_v56, %v10080_v8  ;;  %v10138_v18 = vsub.f32 %v4563_v7, %v10080_v8  ;;  %v11556_v55 = vld [vmem:[#allocation57_spill] sm:$0xff] }
 0x302   :  { %11549 = vst [vmem:[#allocation41_spill] sm:$0xff] %v10119_v22  ;;  %11550 = vst [vmem:[#allocation44_spill] sm:$0xff] %v10123_v32  ;;  %v10142_v43 = vsub.f32 %v9660_v5, %v10080_v8  ;;  %v10146_v28 = vsub.f32 %v9674_v53, %v10080_v8  ;;  %v10150_v27 = vsub.f32 %v9666_v33, %v10080_v8 }
 0x303   :  { %11551 = vst [vmem:[#allocation42_spill] sm:$0xff] %v10126_v57  ;;  %11552 = vst [vmem:[#allocation46_spill] sm:$0xff] %v10129_v51  ;;  %v10154_v3 = vsub.f32 %v11556_v55, %v10080_v8  ;;  %v10162_v5 = vsub.f32 %v9688_v2, %v10080_v8  ;;  %v10168_v33 = vsub.f32 %v9702_v30, %v10080_v8 }
 0x304   :  { %11553 = vst [vmem:[#allocation47_spill] sm:$0xff] %v10132_v59  ;;  %11554 = vst [vmem:[#allocation50_spill] sm:$0xff] %v10135_v14  ;;  %v5172_v7 = vmul.f32 %v10142_v43, %v10142_v43  ;;  %v5173_v56 = vmul.f32 %v10146_v28, %v10146_v28  ;;  %v5174_v53 = vmul.f32 %v10150_v27, %v10150_v27 }
 0x305   :  { %11555 = vst [vmem:[#allocation48_spill] sm:$0xff] %v10138_v18  ;;  %v5175_v21 = vmul.f32 %v10154_v3, %v10154_v3  ;;  %v10176_v17 = vsub.f32 %v9690_v19, %v10080_v8  ;;  %v5176_v2 = vmul.f32 %v10162_v5, %v10162_v5  ;;  %v10183_v30 = vsub.f32 %v9700_v11, %v10080_v8 }
 0x306   :  { %v5232_v6 = vmul.f32 %v5172_v7, %v11557_v62  ;;  %v5233_v24 = vmul.f32 %v5173_v56, %v11558_v4  ;;  %v5234_v9 = vmul.f32 %v5174_v53, %v11559_v58  ;;  %v5177_v25 = vmul.f32 %v10168_v33, %v10168_v33  ;;  %v11561_v62 = vld [vmem:[#allocation29_spill] sm:$0xff] }
 0x307   :  { %v5235_v63 = vmul.f32 %v5175_v21, %v11560_v31  ;;  %v10192_v56 = vsub.f32 %v9718_v15, %v10080_v8  ;;  %v5178_v53 = vmul.f32 %v10176_v17, %v10176_v17  ;;  %v5236_v11 = vmul.f32 %v5176_v2, %v11561_v62 }
 0x308   :  { %v5292_v55 = vsel %vm4984_vm2, %v5232_v6, 0.0  ;;  %v5293_v7 = vsel %vm4984_vm2, %v5233_v24, 0.0  ;;  %v5295_v4 = vsel %vm4984_vm2, %v5234_v9, 0.0  ;;  %v10200_v21 = vsub.f32 %v9732_v40, %v10080_v8  ;;  %v11562_v24 = vld [vmem:[#allocation30_spill] sm:$0xff]  ;;  %v11563_v9 = vld [vmem:[#allocation31_spill] sm:$0xff] }
 0x309   :  { %v5294_v19 = vadd.f32 %v5293_v7, %v5292_v55  ;;  %v5179_v6 = vmul.f32 %v10183_v30, %v10183_v30  ;;  %v5237_v31 = vmul.f32 %v5177_v25, %v11562_v24  ;;  %v5297_v15 = vsel %vm4984_vm2, %v5235_v63, 0.0  ;;  %v11564_v63 = vld [vmem:[#allocation32_spill] sm:$0xff] }
 0x30a   :  { %v10208_v7 = vsub.f32 %v9723_v1, %v10080_v8  ;;  %v5180_v2 = vmul.f32 %v10192_v56, %v10192_v56  ;;  %v5299_v40 = vsel %vm4984_vm2, %v5236_v11, 0.0  ;;  %v5181_v25 = vmul.f32 %v10200_v21, %v10200_v21 }
 0x30b   :  { %v5296_v58 = vadd.f32 %v5295_v4, %v5294_v19  ;;  %v5238_v19 = vmul.f32 %v5178_v53, %v11563_v9  ;;  %v10216_v4 = vsub.f32 %v9730_v13, %v10080_v8  ;;  %v5301_v1 = vsel %vm4984_vm2, %v5237_v31, 0.0 }
 0x30c   :  { %v5182_v53 = vmul.f32 %v10208_v7, %v10208_v7  ;;  %v5240_v11 = vmul.f32 %v5180_v2, %v9590_v50  ;;  %v10232_v9 = vsub.f32 %v9762_v41, %v10080_v8  ;;  %v5241_v31 = vmul.f32 %v5181_v25, %v9595_v35  ;;  %v11565_v2 = vld [vmem:[#allocation34_spill] sm:$0xff]  ;;  %v11566_v25 = vld [vmem:[#allocation36_spill] sm:$0xff] }
 0x30d   :  { %v5298_v55 = vadd.f32 %v5297_v15, %v5296_v58  ;;  %v5239_v58 = vmul.f32 %v5179_v6, %v11564_v63  ;;  %v10224_v15 = vsub.f32 %v9746_v48, %v10080_v8  ;;  %v5303_v13 = vsel %vm4984_vm2, %v5238_v19, 0.0 }
 0x30e   :  { %v5183_v6 = vmul.f32 %v10216_v4, %v10216_v4  ;;  %v5242_v19 = vmul.f32 %v5182_v53, %v11565_v2  ;;  %v5307_v41 = vsel %vm4984_vm2, %v5240_v11, 0.0  ;;  %v5185_v35 = vmul.f32 %v10232_v9, %v10232_v9  ;;  %v11567_v11 = vld [vmem:[#allocation38_spill] sm:$0xff] }
 0x30f   :  { %v5300_v62 = vadd.f32 %v5299_v40, %v5298_v55  ;;  %v5305_v48 = vsel %vm4984_vm2, %v5239_v58, 0.0  ;;  %v5184_v50 = vmul.f32 %v10224_v15, %v10224_v15 }
 0x310   :  { %v5243_v58 = vmul.f32 %v5183_v6, %v11566_v25 }
 0x311   :  { %v5302_v24 = vadd.f32 %v5301_v1, %v5300_v62  ;;  %v10240_v62 = vsub.f32 %v9748_v36, %v10080_v8  ;;  %v10248_v1 = vsub.f32 %v9760_v38, %v10080_v8  ;;  %v5309_v36 = vsel %vm4984_vm2, %v5241_v31, 0.0  ;;  %v11568_v31 = vld [vmem:[#allocation40_spill] sm:$0xff] }
 0x312   :  { %v5311_v38 = vsel %vm4984_vm2, %v5242_v19, 0.0  ;;  %v5245_v2 = vmul.f32 %v5185_v35, %v11568_v31  ;;  %v11569_v19 = vld [vmem:[#allocation43_spill] sm:$0xff] }
 0x313   :  { %v5304_v55 = vadd.f32 %v5303_v13, %v5302_v24  ;;  %v10256_v13 = vsub.f32 %v9776_v20, %v10080_v8  ;;  %v5186_v53 = vmul.f32 %v10240_v62, %v10240_v62  ;;  %v5187_v6 = vmul.f32 %v10248_v1, %v10248_v1 }
 0x314   :  { %v5313_v20 = vsel %vm4984_vm2, %v5243_v58, 0.0  ;;  %v11570_v58 = vld [vmem:[#allocation45_spill] sm:$0xff] }
 0x315   :  { %v5306_v40 = vadd.f32 %v5305_v48, %v5304_v55  ;;  %v5244_v55 = vmul.f32 %v5184_v50, %v11567_v11  ;;  %v5188_v50 = vmul.f32 %v10256_v13, %v10256_v13  ;;  %v5246_v25 = vmul.f32 %v5186_v53, %v11569_v19 }
 0x316   :  { %v5247_v11 = vmul.f32 %v5187_v6, %v11570_v58 }
 0x317   :  { %v5308_v63 = vadd.f32 %v5307_v41, %v5306_v40  ;;  %v10264_v40 = vsub.f32 %v9790_v52, %v10080_v8  ;;  %v5315_v52 = vsel %vm4984_vm2, %v5244_v55, 0.0  ;;  %v5248_v55 = vmul.f32 %v5188_v50, %v9642_v60  ;;  %v11575_v50 = vld [vmem:[#allocation52_spill] sm:$0xff] }
 0x319   :  { %v5310_v24 = vadd.f32 %v5309_v36, %v5308_v63  ;;  %v10272_v63 = vsub.f32 %v9783_v23, %v10080_v8  ;;  %v5189_v35 = vmul.f32 %v10264_v40, %v10264_v40  ;;  %v5317_v23 = vsel %vm4984_vm2, %v5245_v2, 0.0  ;;  %v11572_v2 = vld [vmem:[#allocation49_spill] sm:$0xff] }
 0x31b   :  { %v5312_v48 = vadd.f32 %v5311_v38, %v5310_v24  ;;  %v10280_v24 = vsub.f32 %v9788_v54, %v10080_v8  ;;  %v5190_v53 = vmul.f32 %v10272_v63, %v10272_v63  ;;  %v5319_v54 = vsel %vm4984_vm2, %v5246_v25, 0.0 }
 0x31c   :  { %v5249_v19 = vmul.f32 %v5189_v35, %v11572_v2 }
 0x31d   :  { %v5314_v41 = vadd.f32 %v5313_v20, %v5312_v48  ;;  %v10288_v48 = vsub.f32 %v9806_v34, %v10080_v8  ;;  %v11571_v20 = vld [vmem:[#allocation71_spill] sm:$0xff]  ;;  %v5191_v6 = vmul.f32 %v10280_v24, %v10280_v24  ;;  %v5321_v34 = vsel %vm4984_vm2, %v5247_v11, 0.0  ;;  %v11577_v11 = vld [vmem:[#allocation54_spill] sm:$0xff] }
 0x31e   :  { %v5250_v25 = vmul.f32 %v5190_v53, %v11575_v50  ;;  %v11580_v50 = vld [vmem:[#allocation73_spill] sm:$0xff] }
 0x31f   :  { %v5316_v36 = vadd.f32 %v5315_v52, %v5314_v41  ;;  %v10296_v41 = vsub.f32 %v11571_v20, %v10080_v8  ;;  %v5192_v60 = vmul.f32 %v10288_v48, %v10288_v48  ;;  %v5325_v20 = vsel %vm4984_vm2, %v5249_v19, 0.0  ;;  %v11582_v19 = vld [vmem:[#allocation56_spill] sm:$0xff] }
 0x321   :  { %v5318_v38 = vadd.f32 %v5317_v23, %v5316_v36  ;;  %v11573_v36 = vld [vmem:[#allocation70_spill] sm:$0xff]  ;;  %v5323_v23 = vsel %vm4984_vm2, %v5248_v55, 0.0  ;;  %v5193_v35 = vmul.f32 %v10296_v41, %v10296_v41  ;;  %v11579_v55 = vld [vmem:[#allocation55_spill] sm:$0xff] }
 0x322   :  { %v10304_v58 = vsub.f32 %v11573_v36, %v10080_v8 }
 0x323   :  { %v5320_v31 = vadd.f32 %v5319_v54, %v5318_v38  ;;  %v10312_v54 = vsub.f32 %v9818_v10, %v10080_v8  ;;  %v5327_v10 = vsel %vm4984_vm2, %v5250_v25, 0.0  ;;  %v11585_v25 = vld [vmem:[#allocation58_spill] sm:$0xff] }
 0x324   :  { %11574 = vst [vmem:[#allocation51_spill] sm:$0xff] %v10304_v58  ;;  %v5194_v53 = vmul.f32 %v10304_v58, %v10304_v58 }
 0x325   :  { %v5322_v52 = vadd.f32 %v5321_v34, %v5320_v31  ;;  %11576 = vst [vmem:[#allocation53_spill] sm:$0xff] %v10312_v54  ;;  %v5251_v31 = vmul.f32 %v5191_v6, %v11577_v11  ;;  %v10320_v34 = vsub.f32 %v9834_v45, %v10080_v8  ;;  %v5195_v6 = vmul.f32 %v10312_v54, %v10312_v54 }
 0x327   :  { %v5324_v38 = vadd.f32 %v5323_v23, %v5322_v52  ;;  %11578 = vst [vmem:[#allocation57_spill] sm:$0xff] %v10320_v34  ;;  %v5252_v52 = vmul.f32 %v5192_v60, %v11579_v55  ;;  %v10328_v23 = vsub.f32 %v11580_v50, %v10080_v8  ;;  %v5329_v45 = vsel %vm4984_vm2, %v5251_v31, 0.0  ;;  %v11586_v50 = vld [vmem:[#allocation20_spill] sm:$0xff]  ;;  %v11588_v31 = vld [vmem:[#allocation59_spill] sm:$0xff] }
 0x328   :  { %v5196_v60 = vmul.f32 %v10320_v34, %v10320_v34  ;;  %v10344_v54 = vsub.f32 %v11586_v50, %v10080_v8  ;;  %v11592_v50 = vld [vmem:[#allocation25_spill] sm:$0xff] }
 0x329   :  { %v5326_v2 = vadd.f32 %v5325_v20, %v5324_v38  ;;  %11581 = vst [vmem:[#allocation2_spill] sm:$0xff] %v10328_v23  ;;  %v5253_v38 = vmul.f32 %v5193_v35, %v11582_v19  ;;  %v11583_v20 = vld [vmem:[#allocation18_spill] sm:$0xff]  ;;  %v5331_v55 = vsel %vm4984_vm2, %v5252_v52, 0.0  ;;  %v5197_v35 = vmul.f32 %v10328_v23, %v10328_v23  ;;  %v11591_v52 = vld [vmem:[#allocation60_spill] sm:$0xff] }
 0x32a   :  { %v10336_v58 = vsub.f32 %v11583_v20, %v10080_v8  ;;  %11587 = vst [vmem:[#allocation26_spill] sm:$0xff] %v10344_v54  ;;  %v11589_v20 = vld [vmem:[#allocation21_spill] sm:$0xff]  ;;  %v10360_v23 = vsub.f32 %v11592_v50, %v10080_v8  ;;  %v11598_v50 = vld [vmem:[#allocation24_spill] sm:$0xff] }
 0x32b   :  { %v5328_v36 = vadd.f32 %v5327_v10, %v5326_v2  ;;  %v5254_v2 = vmul.f32 %v5194_v53, %v11585_v25  ;;  %v5333_v19 = vsel %vm4984_vm2, %v5253_v38, 0.0  ;;  %v10352_v34 = vsub.f32 %v11589_v20, %v10080_v8  ;;  %v11594_v38 = vld [vmem:[#allocation61_spill] sm:$0xff]  ;;  %v11595_v20 = vld [vmem:[#allocation74_spill] sm:$0xff] }
 0x32c   :  { %11584 = vst [vmem:[#allocation27_spill] sm:$0xff] %v10336_v58  ;;  %v5198_v53 = vmul.f32 %v10336_v58, %v10336_v58  ;;  %11593 = vst [vmem:[#allocation29_spill] sm:$0xff] %v10360_v23  ;;  %v10368_v58 = vsub.f32 %v11595_v20, %v10080_v8  ;;  %v11601_v20 = vld [vmem:[#allocation3_spill] sm:$0xff] }
 0x32d   :  { %v5330_v11 = vadd.f32 %v5329_v45, %v5328_v36  ;;  %v5255_v36 = vmul.f32 %v5195_v6, %v11588_v31  ;;  %11590 = vst [vmem:[#allocation28_spill] sm:$0xff] %v10352_v34  ;;  %v5335_v25 = vsel %vm4984_vm2, %v5254_v2, 0.0  ;;  %v5199_v6 = vmul.f32 %v10344_v54, %v10344_v54  ;;  %v11597_v2 = vld [vmem:[#allocation62_spill] sm:$0xff] }
 0x32e   :  { %11596 = vst [vmem:[#allocation30_spill] sm:$0xff] %v10368_v58  ;;  %v10376_v54 = vsub.f32 %v11598_v50, %v10080_v8  ;;  %v11604_v50 = vld [vmem:[#allocation78_spill] sm:$0xff] }
 0x32f   :  { %v5332_v10 = vadd.f32 %v5331_v55, %v5330_v11  ;;  %v5256_v11 = vmul.f32 %v5196_v60, %v11591_v52  ;;  %v5337_v31 = vsel %vm4984_vm2, %v5255_v36, 0.0  ;;  %v5200_v60 = vmul.f32 %v10352_v34, %v10352_v34  ;;  %v11600_v36 = vld [vmem:[#allocation63_spill] sm:$0xff] }
 0x330   :  { %11599 = vst [vmem:[#allocation31_spill] sm:$0xff] %v10376_v54  ;;  %v10384_v34 = vsub.f32 %v11601_v20, %v10080_v8  ;;  %v11607_v20 = vld [vmem:[#allocation5_spill] sm:$0xff] }
 0x331   :  { %v5334_v45 = vadd.f32 %v5333_v19, %v5332_v10  ;;  %v5257_v10 = vmul.f32 %v5197_v35, %v11594_v38  ;;  %v5339_v52 = vsel %vm4984_vm2, %v5256_v11, 0.0  ;;  %v5201_v35 = vmul.f32 %v10360_v23, %v10360_v23  ;;  %v11603_v11 = vld [vmem:[#allocation64_spill] sm:$0xff] }
 0x332   :  { %11602 = vst [vmem:[#allocation32_spill] sm:$0xff] %v10384_v34  ;;  %v10392_v23 = vsub.f32 %v11604_v50, %v10080_v8  ;;  %v11610_v50 = vld [vmem:[#allocation77_spill] sm:$0xff] }
 0x333   :  { %v5336_v55 = vadd.f32 %v5335_v25, %v5334_v45  ;;  %v5258_v45 = vmul.f32 %v5198_v53, %v11597_v2  ;;  %v5341_v38 = vsel %vm4984_vm2, %v5257_v10, 0.0  ;;  %v5202_v53 = vmul.f32 %v10368_v58, %v10368_v58  ;;  %v11606_v10 = vld [vmem:[#allocation65_spill] sm:$0xff] }
 0x334   :  { %11605 = vst [vmem:[#allocation34_spill] sm:$0xff] %v10392_v23  ;;  %v10400_v58 = vsub.f32 %v11607_v20, %v10080_v8  ;;  %v11613_v20 = vld [vmem:[#allocation8_spill] sm:$0xff] }
 0x335   :  { %v5338_v19 = vadd.f32 %v5337_v31, %v5336_v55  ;;  %v5259_v55 = vmul.f32 %v5199_v6, %v11600_v36  ;;  %v5343_v2 = vsel %vm4984_vm2, %v5258_v45, 0.0  ;;  %v5203_v6 = vmul.f32 %v10376_v54, %v10376_v54  ;;  %v11609_v45 = vld [vmem:[#allocation66_spill] sm:$0xff] }
 0x336   :  { %11608 = vst [vmem:[#allocation36_spill] sm:$0xff] %v10400_v58  ;;  %v10408_v54 = vsub.f32 %v11610_v50, %v10080_v8  ;;  %v11616_v50 = vld [vmem:[#allocation81_spill] sm:$0xff] }
 0x337   :  { %v5340_v25 = vadd.f32 %v5339_v52, %v5338_v19  ;;  %v5260_v19 = vmul.f32 %v5200_v60, %v11603_v11  ;;  %v5345_v36 = vsel %vm4984_vm2, %v5259_v55, 0.0  ;;  %v5204_v60 = vmul.f32 %v10384_v34, %v10384_v34  ;;  %v11612_v55 = vld [vmem:[#allocation67_spill] sm:$0xff] }
 0x338   :  { %11611 = vst [vmem:[#allocation38_spill] sm:$0xff] %v10408_v54  ;;  %v10416_v34 = vsub.f32 %v11613_v20, %v10080_v8  ;;  %v11619_v20 = vld [vmem:[#allocation7_spill] sm:$0xff] }
 0x339   :  { %v5342_v31 = vadd.f32 %v5341_v38, %v5340_v25  ;;  %v5261_v25 = vmul.f32 %v5201_v35, %v11606_v10  ;;  %v5347_v11 = vsel %vm4984_vm2, %v5260_v19, 0.0  ;;  %v5205_v35 = vmul.f32 %v10392_v23, %v10392_v23  ;;  %v11615_v19 = vld [vmem:[#allocation68_spill] sm:$0xff] }
 0x33a   :  { %11614 = vst [vmem:[#allocation40_spill] sm:$0xff] %v10416_v34  ;;  %v10424_v23 = vsub.f32 %v11616_v50, %v10080_v8  ;;  %v11622_v50 = vld [vmem:[#allocation10_spill] sm:$0xff] }
 0x33b   :  { %v5344_v52 = vadd.f32 %v5343_v2, %v5342_v31  ;;  %v5262_v31 = vmul.f32 %v5202_v53, %v11609_v45  ;;  %v5349_v10 = vsel %vm4984_vm2, %v5261_v25, 0.0  ;;  %v5206_v53 = vmul.f32 %v10400_v58, %v10400_v58  ;;  %v11618_v25 = vld [vmem:[#allocation69_spill] sm:$0xff] }
 0x33c   :  { %11617 = vst [vmem:[#allocation43_spill] sm:$0xff] %v10424_v23  ;;  %v10432_v58 = vsub.f32 %v11619_v20, %v10080_v8  ;;  %v11625_v20 = vld [vmem:[#allocation11_spill] sm:$0xff] }
 0x33d   :  { %v5346_v38 = vadd.f32 %v5345_v36, %v5344_v52  ;;  %v5263_v52 = vmul.f32 %v5203_v6, %v11612_v55  ;;  %v5351_v45 = vsel %vm4984_vm2, %v5262_v31, 0.0  ;;  %v5207_v6 = vmul.f32 %v10408_v54, %v10408_v54  ;;  %v11621_v31 = vld [vmem:[#allocation17_spill] sm:$0xff] }
 0x33e   :  { %11620 = vst [vmem:[#allocation45_spill] sm:$0xff] %v10432_v58  ;;  %v10440_v54 = vsub.f32 %v11622_v50, %v10080_v8  ;;  %v11628_v50 = vld [vmem:[#allocation84_spill] sm:$0xff] }
 0x33f   :  { %v5348_v2 = vadd.f32 %v5347_v11, %v5346_v38  ;;  %v5264_v38 = vmul.f32 %v5204_v60, %v11615_v19  ;;  %v5353_v55 = vsel %vm4984_vm2, %v5263_v52, 0.0  ;;  %v5208_v60 = vmul.f32 %v10416_v34, %v10416_v34  ;;  %v11624_v52 = vld [vmem:[#allocation72_spill] sm:$0xff] }
 0x340   :  { %11623 = vst [vmem:[#allocation71_spill] sm:$0xff] %v10440_v54  ;;  %v10448_v34 = vsub.f32 %v11625_v20, %v10080_v8  ;;  %v11631_v20 = vld [vmem:[#allocation13_spill] sm:$0xff] }
 0x341   :  { %v5350_v36 = vadd.f32 %v5349_v10, %v5348_v2  ;;  %v5265_v2 = vmul.f32 %v5205_v35, %v11618_v25  ;;  %v5355_v19 = vsel %vm4984_vm2, %v5264_v38, 0.0  ;;  %v5209_v35 = vmul.f32 %v10424_v23, %v10424_v23  ;;  %v11627_v38 = vld [vmem:[#allocation19_spill] sm:$0xff] }
 0x342   :  { %11626 = vst [vmem:[#allocation49_spill] sm:$0xff] %v10448_v34  ;;  %v10456_v23 = vsub.f32 %v11628_v50, %v10080_v8  ;;  %v11633_v50 = vld [vmem:[#allocation83_spill] sm:$0xff] }
 0x343   :  { %v5352_v11 = vadd.f32 %v5351_v45, %v5350_v36  ;;  %v5266_v36 = vmul.f32 %v5206_v53, %v11621_v31  ;;  %v5357_v25 = vsel %vm4984_vm2, %v5265_v2, 0.0  ;;  %v5210_v53 = vmul.f32 %v10432_v58, %v10432_v58  ;;  %v11630_v2 = vld [vmem:[#allocation22_spill] sm:$0xff] }
 0x344   :  { %11629 = vst [vmem:[#allocation70_spill] sm:$0xff] %v10456_v23  ;;  %v10464_v58 = vsub.f32 %v11631_v20, %v10080_v8 }
 0x345   :  { %v5354_v10 = vadd.f32 %v5353_v55, %v5352_v11  ;;  %v5267_v11 = vmul.f32 %v5207_v6, %v11624_v52  ;;  %v5359_v31 = vsel %vm4984_vm2, %v5266_v36, 0.0  ;;  %v5211_v6 = vmul.f32 %v10440_v54, %v10440_v54  ;;  %v11632_v36 = vld [vmem:[#allocation23_spill] sm:$0xff] }
 0x346   :  { %v10472_v54 = vsub.f32 %v11633_v50, %v10080_v8  ;;  %v5214_v20 = vmul.f32 %v10464_v58, %v10464_v58 }
 0x347   :  { %v5356_v45 = vadd.f32 %v5355_v19, %v5354_v10  ;;  %v5268_v10 = vmul.f32 %v5208_v60, %v11627_v38  ;;  %v5361_v52 = vsel %vm4984_vm2, %v5267_v11, 0.0  ;;  %v5212_v60 = vmul.f32 %v10448_v34, %v10448_v34  ;;  %v11634_v11 = vld [vmem:[#allocation75_spill] sm:$0xff]  ;;  %v11635_v34 = vld [vmem:[#allocation76_spill] sm:$0xff] }
 0x348   :  { %v5215_v8 = vmul.f32 %v10472_v54, %v10472_v54 }
 0x349   :  { %v5358_v55 = vadd.f32 %v5357_v25, %v5356_v45  ;;  %v5269_v45 = vmul.f32 %v5209_v35, %v11630_v2  ;;  %v5363_v38 = vsel %vm4984_vm2, %v5268_v10, 0.0  ;;  %v5213_v35 = vmul.f32 %v10456_v23, %v10456_v23 }
 0x34b   :  { %v5360_v19 = vadd.f32 %v5359_v31, %v5358_v55  ;;  %v5270_v55 = vmul.f32 %v5210_v53, %v11632_v36  ;;  %v5365_v2 = vsel %vm4984_vm2, %v5269_v45, 0.0  ;;  %v5272_v53 = vmul.f32 %v5212_v60, %v11635_v34  ;;  %v11636_v36 = vld [vmem:[#allocation4_spill] sm:$0xff]  ;;  %v11637_v45 = vld [vmem:[#allocation6_spill] sm:$0xff]  ;;  %v11638_v60 = vld [vmem:[#allocation79_spill] sm:$0xff] }
 0x34c   :  { %v5217_v34 = vmul.f32 %v10088_v47, %v10088_v47 }
 0x34d   :  { %v5362_v25 = vadd.f32 %v5361_v52, %v5360_v19  ;;  %v5271_v19 = vmul.f32 %v5211_v6, %v11634_v11  ;;  %v5367_v10 = vsel %vm4984_vm2, %v5270_v55, 0.0  ;;  %v5216_v6 = vmul.f32 %v10084_v29, %v10084_v29 }
 0x34e   :  { %v5371_v11 = vsel %vm4984_vm2, %v5272_v53, 0.0  ;;  %v5275_v55 = vmul.f32 %v5215_v8, %v11638_v60  ;;  %v5220_v8 = vmul.f32 %v10100_v37, %v10100_v37 }
 0x34f   :  { %v5364_v31 = vadd.f32 %v5363_v38, %v5362_v25  ;;  %v5273_v38 = vmul.f32 %v5213_v35, %v11636_v36  ;;  %v5369_v50 = vsel %vm4984_vm2, %v5271_v19, 0.0  ;;  %v5218_v35 = vmul.f32 %v10092_v44, %v10092_v44  ;;  %v11639_v19 = vld [vmem:[#allocation80_spill] sm:$0xff] }
 0x351   :  { %v5366_v52 = vadd.f32 %v5365_v2, %v5364_v31  ;;  %v5274_v31 = vmul.f32 %v5214_v20, %v11637_v45  ;;  %v5219_v20 = vmul.f32 %v10096_v0, %v10096_v0  ;;  %v5377_v45 = vsel %vm4984_vm2, %v5275_v55, 0.0  ;;  %v11643_v55 = vld [vmem:[#allocation85_spill] sm:$0xff] }
 0x353   :  { %v5368_v25 = vadd.f32 %v5367_v10, %v5366_v52  ;;  %v5373_v52 = vsel %vm4984_vm2, %v5273_v38, 0.0  ;;  %v5375_v36 = vsel %vm4984_vm2, %v5274_v31, 0.0  ;;  %v11641_v38 = vld [vmem:[#allocation12_spill] sm:$0xff]  ;;  %v11642_v31 = vld [vmem:[#allocation82_spill] sm:$0xff] }
 0x355   :  { %v5370_v23 = vadd.f32 %v5369_v50, %v5368_v25  ;;  %v5276_v25 = vmul.f32 %v5216_v6, %v11639_v19  ;;  %v5221_v6 = vmul.f32 %v10104_v61, %v10104_v61 }
 0x357   :  { %v5372_v2 = vadd.f32 %v5371_v11, %v5370_v23  ;;  %v11640_v23 = vld [vmem:[#allocation9_spill] sm:$0xff]  ;;  %v5379_v60 = vsel %vm4984_vm2, %v5276_v25, 0.0  ;;  %v11644_v25 = vld [vmem:[#allocation15_spill] sm:$0xff] }
 0x358   :  { %v5277_v53 = vmul.f32 %v5217_v34, %v11640_v23  ;;  %v5222_v34 = vmul.f32 %v10108_v26, %v10108_v26 }
 0x359   :  { %v5374_v10 = vadd.f32 %v5373_v52, %v5372_v2  ;;  %v5278_v2 = vmul.f32 %v5218_v35, %v11641_v38  ;;  %v5223_v35 = vmul.f32 %v10112_v16, %v10112_v16 }
 0x35a   :  { %v5381_v19 = vsel %vm4984_vm2, %v5277_v53, 0.0  ;;  %v11645_v53 = vld [vmem:[#allocation14_spill] sm:$0xff] }
 0x35b   :  { %v5376_v50 = vadd.f32 %v5375_v36, %v5374_v10  ;;  %v5279_v10 = vmul.f32 %v5219_v20, %v11642_v31  ;;  %v5383_v23 = vsel %vm4984_vm2, %v5278_v2, 0.0  ;;  %v5224_v20 = vmul.f32 %v10116_v42, %v10116_v42  ;;  %v11646_v2 = vld [vmem:[#allocation33_spill] sm:$0xff] }
 0x35d   :  { %v5378_v11 = vadd.f32 %v5377_v45, %v5376_v50  ;;  %v5280_v50 = vmul.f32 %v5220_v8, %v11643_v55  ;;  %v5385_v38 = vsel %vm4984_vm2, %v5279_v10, 0.0  ;;  %v5225_v8 = vmul.f32 %v10119_v22, %v10119_v22  ;;  %v11647_v10 = vld [vmem:[#allocation35_spill] sm:$0xff]  ;;  %v11670_v22 = vld [vmem:[#allocation70_spill] sm:$0xff] }
 0x35f   :  { %v5380_v52 = vadd.f32 %v5379_v60, %v5378_v11  ;;  %v5281_v11 = vmul.f32 %v5221_v6, %v11644_v25  ;;  %v5387_v31 = vsel %vm4984_vm2, %v5280_v50, 0.0  ;;  %v5226_v6 = vmul.f32 %v10123_v32, %v10123_v32  ;;  %v11648_v50 = vld [vmem:[#allocation37_spill] sm:$0xff] }
 0x360   :  { %v11669_v32 = vld [vmem:[#allocation49_spill] sm:$0xff] }
 0x361   :  { %v5382_v36 = vadd.f32 %v5381_v19, %v5380_v52  ;;  %v5282_v52 = vmul.f32 %v5222_v34, %v11645_v53  ;;  %v5389_v55 = vsel %vm4984_vm2, %v5281_v11, 0.0  ;;  %v5227_v34 = vmul.f32 %v10126_v57, %v10126_v57  ;;  %v11649_v11 = vld [vmem:[#allocation16_spill] sm:$0xff]  ;;  %v11668_v57 = vld [vmem:[#allocation71_spill] sm:$0xff] }
 0x363   :  { %v5384_v45 = vadd.f32 %v5383_v23, %v5382_v36  ;;  %v5283_v36 = vmul.f32 %v5223_v35, %v11646_v2  ;;  %v5391_v25 = vsel %vm4984_vm2, %v5282_v52, 0.0  ;;  %v5228_v35 = vmul.f32 %v10129_v51, %v10129_v51  ;;  %v11650_v52 = vld [vmem:[#allocation39_spill] sm:$0xff]  ;;  %v11667_v51 = vld [vmem:[#allocation45_spill] sm:$0xff] }
 0x365   :  { %v5386_v60 = vadd.f32 %v5385_v38, %v5384_v45  ;;  %v5284_v45 = vmul.f32 %v5224_v20, %v11647_v10  ;;  %v5393_v53 = vsel %vm4984_vm2, %v5283_v36, 0.0  ;;  %v5229_v20 = vmul.f32 %v10132_v59, %v10132_v59  ;;  %v11666_v59 = vld [vmem:[#allocation43_spill] sm:$0xff] }
 0x366   :  { %v5288_v36 = vmul.f32 %v5228_v35, %v10054_v46 }
 0x367   :  { %v5388_v19 = vadd.f32 %v5387_v31, %v5386_v60  ;;  %v5285_v60 = vmul.f32 %v5225_v8, %v11648_v50  ;;  %v5395_v2 = vsel %vm4984_vm2, %v5284_v45, 0.0  ;;  %v5230_v8 = vmul.f32 %v10135_v14, %v10135_v14  ;;  %v11665_v14 = vld [vmem:[#allocation40_spill] sm:$0xff] }
 0x368   :  { %v5289_v45 = vmul.f32 %v5229_v20, %v10062_v49 }
 0x369   :  { %v5390_v23 = vadd.f32 %v5389_v55, %v5388_v19  ;;  %v5286_v19 = vmul.f32 %v5226_v6, %v11649_v11  ;;  %v5397_v10 = vsel %vm4984_vm2, %v5285_v60, 0.0  ;;  %v5231_v6 = vmul.f32 %v10138_v18, %v10138_v18  ;;  %v11664_v18 = vld [vmem:[#allocation38_spill] sm:$0xff] }
 0x36a   :  { %v5403_v60 = vsel %vm4984_vm2, %v5288_v36, 0.0  ;;  %v5405_v46 = vsel %vm4984_vm2, %v5289_v45, 0.0 }
 0x36b   :  { %v5392_v38 = vadd.f32 %v5391_v25, %v5390_v23  ;;  %v5287_v23 = vmul.f32 %v5227_v34, %v11650_v52  ;;  %v5290_v34 = vmul.f32 %v5230_v8, %v10069_v12 }
 0x36d   :  { %v5394_v31 = vadd.f32 %v5393_v53, %v5392_v38  ;;  %v5399_v38 = vsel %vm4984_vm2, %v5286_v19, 0.0  ;;  %v5401_v53 = vsel %vm4984_vm2, %v5287_v23, 0.0  ;;  %v5407_v19 = vsel %vm4984_vm2, %v5290_v34, 0.0 }
 0x36f   :  { %v5396_v55 = vadd.f32 %v5395_v2, %v5394_v31  ;;  %v5291_v2 = vmul.f32 %v5231_v6, %v10074_v39 }
 0x371   :  { %v5398_v25 = vadd.f32 %v5397_v10, %v5396_v55  ;;  %v5409_v52 = vsel %vm5102_vm3, %v5291_v2, 0.0 }
 0x373   :  { %v5400_v50 = vadd.f32 %v5399_v38, %v5398_v25 }
 0x375   :  { %v5402_v31 = vadd.f32 %v5401_v53, %v5400_v50 }
 0x377   :  { %v5404_v11 = vadd.f32 %v5403_v60, %v5402_v31 }
 0x379   :  { %v5406_v35 = vadd.f32 %v5405_v46, %v5404_v11 }
 0x37b   :  { %v5408_v55 = vadd.f32 %v5407_v19, %v5406_v35  ;;  %v11651_v35 = vld [vmem:[#allocation51_spill] sm:$0xff]  ;;  %v11652_v19 = vld [vmem:[#allocation53_spill] sm:$0xff] }
 0x37d   :  { %v5410_v10 = vadd.f32 %v5409_v52, %v5408_v55  ;;  %v11653_v55 = vld [vmem:[#allocation57_spill] sm:$0xff]  ;;  %v11654_v52 = vld [vmem:[#allocation2_spill] sm:$0xff] }
 0x37f   :  { %v5411_v49 = vrot.slane %v5410_v10, 4 }
 0x381   :  { %v5412_v20 = vadd.f32 %v5411_v49, %v5410_v10  ;;  %v11655_v10 = vld [vmem:[#allocation27_spill] sm:$0xff]  ;;  %v11656_v49 = vld [vmem:[#allocation26_spill] sm:$0xff] }
 0x383   :  { %v5413_v23 = vrot.slane %v5412_v20, 2 }
 0x385   :  { %v5414_v25 = vadd.f32 %v5413_v23, %v5412_v20  ;;  %v11657_v20 = vld [vmem:[#allocation28_spill] sm:$0xff]  ;;  %v11658_v23 = vld [vmem:[#allocation29_spill] sm:$0xff] }
 0x387   :  { %v5415_v38 = vrot.slane %v5414_v25, 1 }
 0x389   :  { %v5416_v12 = vadd.f32 %v5415_v38, %v5414_v25  ;;  %v11659_v25 = vld [vmem:[#allocation30_spill] sm:$0xff]  ;;  %v11660_v38 = vld [vmem:[#allocation31_spill] sm:$0xff] }
 0x38b   :  { %v5417_v8 = vmul.f32 0.0025510204, %v5416_v12  ;;  %v11661_v12 = vld [vmem:[#allocation32_spill] sm:$0xff] }
 0x38d   :  { %v5418_v36 = vadd.f32 1e-05, %v5417_v8 }
 0x38f   :  { %6870 = vrsqrt.f32 %v5418_v36  ;;  %v11662_v36 = vld [vmem:[#allocation34_spill] sm:$0xff] }
 0x39c   :  { %v6871_v50 = vpop.eup %6870 }
 0x39d   :  { %v5420_v39 = vmul.f32 %v6871_v50, %v10142_v43  ;;  %v5421_v6 = vmul.f32 %v6871_v50, %v10146_v28  ;;  %v5422_v45 = vmul.f32 %v6871_v50, %v10150_v27  ;;  %v5423_v53 = vmul.f32 %v6871_v50, %v10154_v3 }
 0x39e   :  { %v5424_v31 = vmul.f32 %v6871_v50, %v10162_v5  ;;  %v5425_v34 = vmul.f32 %v6871_v50, %v10168_v33  ;;  %v5426_v60 = vmul.f32 %v6871_v50, %v10176_v17  ;;  %v5427_v11 = vmul.f32 %v6871_v50, %v10183_v30 }
 0x39f   :  { %v5428_v2 = vmul.f32 %v6871_v50, %v10192_v56  ;;  %v5429_v46 = vmul.f32 %v6871_v50, %v10200_v21  ;;  %v5430_v43 = vmul.f32 %v6871_v50, %v10208_v7  ;;  %v5431_v28 = vmul.f32 %v6871_v50, %v10216_v4 }
 0x3a0   :  { %v5432_v27 = vmul.f32 %v6871_v50, %v10224_v15  ;;  %v5433_v3 = vmul.f32 %v6871_v50, %v10232_v9  ;;  %v5434_v5 = vmul.f32 %v6871_v50, %v10240_v62  ;;  %v5435_v33 = vmul.f32 %v6871_v50, %v10248_v1 }
 0x3a1   :  { %v5436_v17 = vmul.f32 %v6871_v50, %v10256_v13  ;;  %v5437_v30 = vmul.f32 %v6871_v50, %v10264_v40  ;;  %v5438_v56 = vmul.f32 %v6871_v50, %v10272_v63  ;;  %v5439_v21 = vmul.f32 %v6871_v50, %v10280_v24 }
 0x3a2   :  { %v5440_v7 = vmul.f32 %v6871_v50, %v10288_v48  ;;  %v5441_v4 = vmul.f32 %v6871_v50, %v10296_v41  ;;  %v5442_v15 = vmul.f32 %v6871_v50, %v11651_v35  ;;  %v5443_v9 = vmul.f32 %v6871_v50, %v11652_v19  ;;  %v11663_v19 = vld [vmem:[#allocation36_spill] sm:$0xff] }
 0x3a3   :  { %v5444_v62 = vmul.f32 %v6871_v50, %v11653_v55  ;;  %v5445_v1 = vmul.f32 %v6871_v50, %v11654_v52  ;;  %v5446_v13 = vmul.f32 %v6871_v50, %v11655_v10  ;;  %v5447_v40 = vmul.f32 %v6871_v50, %v11656_v49 }
 0x3a4   :  { %v5448_v63 = vmul.f32 %v6871_v50, %v11657_v20  ;;  %v5449_v24 = vmul.f32 %v6871_v50, %v11658_v23  ;;  %v5450_v48 = vmul.f32 %v6871_v50, %v11659_v25  ;;  %v5451_v41 = vmul.f32 %v6871_v50, %v11660_v38 }
 0x3a5   :  { %v5452_v8 = vmul.f32 %v6871_v50, %v11661_v12  ;;  %v5453_v35 = vmul.f32 %v6871_v50, %v11662_v36  ;;  %v5454_v55 = vmul.f32 %v6871_v50, %v11663_v19  ;;  %v5455_v52 = vmul.f32 %v6871_v50, %v11664_v18 }
 0x3a6   :  { %v5456_v10 = vmul.f32 %v6871_v50, %v11665_v14  ;;  %v5457_v49 = vmul.f32 %v6871_v50, %v11666_v59  ;;  %v5458_v20 = vmul.f32 %v6871_v50, %v11667_v51  ;;  %v5459_v23 = vmul.f32 %v6871_v50, %v11668_v57 }
 0x3a7   :  { %v5460_v25 = vmul.f32 %v6871_v50, %v11669_v32  ;;  %v5461_v38 = vmul.f32 %v6871_v50, %v11670_v22  ;;  %v5462_v12 = vmul.f32 %v6871_v50, %v10464_v58  ;;  %v5463_v36 = vmul.f32 %v6871_v50, %v10472_v54  ;;  %v10611_v58 = vld [vmem:[%s11169_s2] ss:$0 sm:$0xff] }
 0x3a8   :  { %v5464_v19 = vmul.f32 %v6871_v50, %v10084_v29  ;;  %v5465_v18 = vmul.f32 %v6871_v50, %v10088_v47  ;;  %v5466_v14 = vmul.f32 %v6871_v50, %v10092_v44  ;;  %v5467_v59 = vmul.f32 %v6871_v50, %v10096_v0  ;;  %11671 = vst [vmem:[#allocation52_spill] sm:$0xff] %v10611_v58  ;;  %v11672_v47 = vld [vmem:[#allocation41_spill] sm:$0xff]  ;;  %v11673_v44 = vld [vmem:[#allocation44_spill] sm:$0xff]  ;;  %v11676_v58 = vld [vmem:[#allocation47_spill] sm:$0xff] }
 0x3a9   :  { %v5468_v51 = vmul.f32 %v6871_v50, %v10100_v37  ;;  %v5469_v57 = vmul.f32 %v6871_v50, %v10104_v61  ;;  %v5470_v32 = vmul.f32 %v6871_v50, %v10108_v26  ;;  %v5471_v22 = vmul.f32 %v6871_v50, %v10112_v16  ;;  %v11674_v37 = vld [vmem:[#allocation42_spill] sm:$0xff] }
 0x3aa   :  { %v5472_v29 = vmul.f32 %v6871_v50, %v10116_v42  ;;  %v5473_v54 = vmul.f32 %v6871_v50, %v11672_v47  ;;  %v5474_v0 = vmul.f32 %v6871_v50, %v11673_v44  ;;  %v5475_v61 = vmul.f32 %v6871_v50, %v11674_v37  ;;  %v11675_v26 = vld [vmem:[#allocation46_spill] sm:$0xff]  ;;  %v11678_v37 = vld [vmem:[#allocation48_spill] sm:$0xff] }
 0x3ab   :  { %v5476_v16 = vmul.f32 %v6871_v50, %v11675_v26  ;;  %v5477_v42 = vmul.f32 %v6871_v50, %v11676_v58  ;;  %v11677_v47 = vld [vmem:[#allocation50_spill] sm:$0xff]  ;;  %v5479_v26 = vmul.f32 %v6871_v50, %v11678_v37 }
 0x3ac   :  { %v5478_v44 = vmul.f32 %v6871_v50, %v11677_v47 }
 0x3af   :  { %v11679_v58 = vld [vmem:[#allocation52_spill] sm:$0xff] }
 0x3b0   :  { %v5487_v47 = vmul.f32 %v11679_v58, %v5420_v39  ;;  %v5488_v37 = vmul.f32 %v11679_v58, %v5421_v6  ;;  %v5489_v50 = vmul.f32 %v11679_v58, %v5422_v45  ;;  %v5490_v39 = vmul.f32 %v11679_v58, %v5423_v53 }
 0x3b1   :  { %v5491_v6 = vmul.f32 %v11679_v58, %v5424_v31  ;;  %v5492_v45 = vmul.f32 %v11679_v58, %v5425_v34  ;;  %v5493_v53 = vmul.f32 %v11679_v58, %v5426_v60  ;;  %v5494_v31 = vmul.f32 %v11679_v58, %v5427_v11 }
 0x3b2   :  { %v5495_v34 = vmul.f32 %v11679_v58, %v5428_v2  ;;  %v5496_v60 = vmul.f32 %v11679_v58, %v5429_v46  ;;  %v5497_v11 = vmul.f32 %v11679_v58, %v5430_v43  ;;  %v5498_v2 = vmul.f32 %v11679_v58, %v5431_v28 }
 0x3b3   :  { %v5499_v46 = vmul.f32 %v11679_v58, %v5432_v27  ;;  %v5500_v43 = vmul.f32 %v11679_v58, %v5433_v3  ;;  %v5501_v28 = vmul.f32 %v11679_v58, %v5434_v5  ;;  %v5502_v27 = vmul.f32 %v11679_v58, %v5435_v33 }
 0x3b4   :  { %v5503_v3 = vmul.f32 %v11679_v58, %v5436_v17  ;;  %v5504_v5 = vmul.f32 %v11679_v58, %v5437_v30  ;;  %v5505_v33 = vmul.f32 %v11679_v58, %v5438_v56  ;;  %v5506_v17 = vmul.f32 %v11679_v58, %v5439_v21 }
 0x3b5   :  { %v5507_v30 = vmul.f32 %v11679_v58, %v5440_v7  ;;  %v5508_v56 = vmul.f32 %v11679_v58, %v5441_v4  ;;  %v5509_v21 = vmul.f32 %v11679_v58, %v5442_v15  ;;  %v5510_v7 = vmul.f32 %v11679_v58, %v5443_v9 }
 0x3b6   :  { %v5511_v4 = vmul.f32 %v11679_v58, %v5444_v62  ;;  %v5512_v15 = vmul.f32 %v11679_v58, %v5445_v1  ;;  %v5513_v9 = vmul.f32 %v11679_v58, %v5446_v13  ;;  %v5514_v62 = vmul.f32 %v11679_v58, %v5447_v40 }
 0x3b7   :  { %v5515_v1 = vmul.f32 %v11679_v58, %v5448_v63  ;;  %v5516_v13 = vmul.f32 %v11679_v58, %v5449_v24  ;;  %v5517_v40 = vmul.f32 %v11679_v58, %v5450_v48  ;;  %v5518_v63 = vmul.f32 %v11679_v58, %v5451_v41 }
 0x3b8   :  { %v5519_v24 = vmul.f32 %v11679_v58, %v5452_v8  ;;  %v5520_v48 = vmul.f32 %v11679_v58, %v5453_v35  ;;  %v5521_v41 = vmul.f32 %v11679_v58, %v5454_v55  ;;  %v5522_v8 = vmul.f32 %v11679_v58, %v5455_v52 }
 0x3b9   :  { %v5523_v35 = vmul.f32 %v11679_v58, %v5456_v10  ;;  %v5524_v55 = vmul.f32 %v11679_v58, %v5457_v49  ;;  %v5525_v52 = vmul.f32 %v11679_v58, %v5458_v20  ;;  %v5526_v10 = vmul.f32 %v11679_v58, %v5459_v23 }
 0x3ba   :  { %v5527_v49 = vmul.f32 %v11679_v58, %v5460_v25  ;;  %v5528_v20 = vmul.f32 %v11679_v58, %v5461_v38  ;;  %v5529_v23 = vmul.f32 %v11679_v58, %v5462_v12  ;;  %v5530_v25 = vmul.f32 %v11679_v58, %v5463_v36 }
 0x3bb   :  { %v5531_v38 = vmul.f32 %v11679_v58, %v5464_v19  ;;  %v5532_v12 = vmul.f32 %v11679_v58, %v5465_v18  ;;  %v5533_v36 = vmul.f32 %v11679_v58, %v5466_v14  ;;  %v5534_v19 = vmul.f32 %v11679_v58, %v5467_v59 }
 0x3bc   :  { %v5535_v18 = vmul.f32 %v11679_v58, %v5468_v51  ;;  %v5536_v14 = vmul.f32 %v11679_v58, %v5469_v57  ;;  %v5537_v59 = vmul.f32 %v11679_v58, %v5470_v32  ;;  %v5538_v51 = vmul.f32 %v11679_v58, %v5471_v22  ;;  %v10676_v57 = vld [vmem:[%s11170_s3] ss:$0 sm:$0xff] }
 0x3bd   :  { %11680 = vst [vmem:[#allocation54_spill] sm:$0xff] %v10676_v57  ;;  %v5539_v32 = vmul.f32 %v11679_v58, %v5472_v29  ;;  %v5540_v22 = vmul.f32 %v11679_v58, %v5473_v54  ;;  %v5541_v57 = vmul.f32 %v11679_v58, %v5474_v0  ;;  %v5542_v29 = vmul.f32 %v11679_v58, %v5475_v61 }
 0x3be   :  { %v5543_v54 = vmul.f32 %v11679_v58, %v5476_v16  ;;  %v5544_v0 = vmul.f32 %v11679_v58, %v5477_v42  ;;  %v5545_v61 = vmul.f32 %v11679_v58, %v5478_v44  ;;  %v5546_v16 = vmul.f32 %v11679_v58, %v5479_v26 }
 0x3c4   :  { %v11681_v42 = vld [vmem:[#allocation54_spill] sm:$0xff] }
 0x3c5   :  { %v10687_v44 = vadd.f32 %v11681_v42, %v5487_v47  ;;  %v10690_v26 = vadd.f32 %v11681_v42, %v5488_v37  ;;  %v10693_v58 = vadd.f32 %v11681_v42, %v5489_v50  ;;  %v10696_v47 = vadd.f32 %v11681_v42, %v5490_v39 }
 0x3c6   :  { %v10702_v37 = vadd.f32 %v11681_v42, %v5492_v45  ;;  %v10708_v50 = vadd.f32 %v11681_v42, %v5494_v31  ;;  %v10714_v39 = vadd.f32 %v11681_v42, %v5496_v60  ;;  %v10723_v45 = vadd.f32 %v11681_v42, %v5499_v46 }
 0x3c7   :  { %11682 = vst [vmem:[#allocation55_spill] sm:$0xff] %v10687_v44  ;;  %11683 = vst [vmem:[#allocation73_spill] sm:$0xff] %v10690_v26  ;;  %v10699_v44 = vadd.f32 %v11681_v42, %v5491_v6  ;;  %v10705_v26 = vadd.f32 %v11681_v42, %v5493_v53  ;;  %v10720_v6 = vadd.f32 %v11681_v42, %v5498_v2 }
 0x3c8   :  { %11684 = vst [vmem:[#allocation56_spill] sm:$0xff] %v10693_v58  ;;  %11685 = vst [vmem:[#allocation18_spill] sm:$0xff] %v10696_v47  ;;  %v10711_v58 = vadd.f32 %v11681_v42, %v5495_v34  ;;  %v10717_v47 = vadd.f32 %v11681_v42, %v5497_v11  ;;  %v10726_v53 = vadd.f32 %v11681_v42, %v5500_v43 }
 0x3c9   :  { %v10729_v31 = vadd.f32 %v11681_v42, %v5501_v28  ;;  %v10732_v34 = vadd.f32 %v11681_v42, %v5502_v27  ;;  %v10735_v60 = vadd.f32 %v11681_v42, %v5503_v3  ;;  %v10738_v11 = vadd.f32 %v11681_v42, %v5504_v5 }
 0x3ca   :  { %v10741_v2 = vadd.f32 %v11681_v42, %v5505_v33  ;;  %v10744_v46 = vadd.f32 %v11681_v42, %v5506_v17  ;;  %v10747_v43 = vadd.f32 %v11681_v42, %v5507_v30  ;;  %v10750_v28 = vadd.f32 %v11681_v42, %v5508_v56 }
 0x3cb   :  { %v10753_v27 = vadd.f32 %v11681_v42, %v5509_v21  ;;  %v10756_v3 = vadd.f32 %v11681_v42, %v5510_v7  ;;  %v10759_v5 = vadd.f32 %v11681_v42, %v5511_v4  ;;  %v10762_v33 = vadd.f32 %v11681_v42, %v5512_v15 }
 0x3cc   :  { %v10765_v17 = vadd.f32 %v11681_v42, %v5513_v9  ;;  %v10768_v30 = vadd.f32 %v11681_v42, %v5514_v62  ;;  %v10771_v56 = vadd.f32 %v11681_v42, %v5515_v1  ;;  %v10774_v21 = vadd.f32 %v11681_v42, %v5516_v13 }
 0x3cd   :  { %v10777_v7 = vadd.f32 %v11681_v42, %v5517_v40  ;;  %v10780_v4 = vadd.f32 %v11681_v42, %v5518_v63  ;;  %v10783_v15 = vadd.f32 %v11681_v42, %v5519_v24  ;;  %v10786_v9 = vadd.f32 %v11681_v42, %v5520_v48 }
 0x3ce   :  { %v10789_v62 = vadd.f32 %v11681_v42, %v5521_v41  ;;  %v10792_v1 = vadd.f32 %v11681_v42, %v5522_v8  ;;  %v10795_v13 = vadd.f32 %v11681_v42, %v5523_v35  ;;  %v10798_v40 = vadd.f32 %v11681_v42, %v5524_v55 }
 0x3cf   :  { %v10801_v63 = vadd.f32 %v11681_v42, %v5525_v52  ;;  %v10804_v24 = vadd.f32 %v11681_v42, %v5526_v10  ;;  %v10807_v48 = vadd.f32 %v11681_v42, %v5527_v49  ;;  %v10810_v41 = vadd.f32 %v11681_v42, %v5528_v20 }
 0x3d0   :  { %v10813_v8 = vadd.f32 %v11681_v42, %v5529_v23  ;;  %v10816_v35 = vadd.f32 %v11681_v42, %v5530_v25  ;;  %v10819_v55 = vadd.f32 %v11681_v42, %v5531_v38  ;;  %v10822_v52 = vadd.f32 %v11681_v42, %v5532_v12 }
 0x3d1   :  { %v10825_v10 = vadd.f32 %v11681_v42, %v5533_v36  ;;  %v10828_v49 = vadd.f32 %v11681_v42, %v5534_v19  ;;  %v10831_v20 = vadd.f32 %v11681_v42, %v5535_v18  ;;  %v10834_v23 = vadd.f32 %v11681_v42, %v5536_v14 }
 0x3d2   :  { %v10837_v25 = vadd.f32 %v11681_v42, %v5537_v59  ;;  %v10840_v38 = vadd.f32 %v11681_v42, %v5538_v51  ;;  %v10843_v12 = vadd.f32 %v11681_v42, %v5539_v32  ;;  %v10846_v36 = vadd.f32 %v11681_v42, %v5540_v22  ;;  %v11693_v22 = vld [vmem:[#allocation55_spill] sm:$0xff] }
 0x3d3   :  { %v10849_v19 = vadd.f32 %v11681_v42, %v5541_v57  ;;  %v10852_v18 = vadd.f32 %v11681_v42, %v5542_v29  ;;  %v10855_v14 = vadd.f32 %v11681_v42, %v5543_v54  ;;  %v10858_v59 = vadd.f32 %v11681_v42, %v5544_v0  ;;  %v11696_v29 = vld [vmem:[#allocation18_spill] sm:$0xff] }
 0x3d4   :  { %11686 = vst [vmem:[#allocation58_spill] sm:$0xff] %v10840_v38  ;;  %11687 = vst [vmem:[#allocation20_spill] sm:$0xff] %v10843_v12  ;;  %v10861_v51 = vadd.f32 %v11681_v42, %v5545_v61  ;;  %v10864_v32 = vadd.f32 %v11681_v42, %v5546_v16  ;;  %v11694_v12 = vld [vmem:[#allocation73_spill] sm:$0xff]  ;;  %v5618_v54 = vmax.f32 %v10699_v44, 0.0  ;;  %v5620_v0 = vmax.f32 %v10705_v26, 0.0 }
 0x3d5   :  { %11688 = vst [vmem:[#allocation59_spill] sm:$0xff] %v10846_v36  ;;  %11689 = vst [vmem:[#allocation21_spill] sm:$0xff] %v10849_v19  ;;  %v5614_v36 = vmax.f32 %v11693_v22, 0.0  ;;  %v5615_v57 = vmax.f32 %v11694_v12, 0.0  ;;  %v11695_v19 = vld [vmem:[#allocation56_spill] sm:$0xff]  ;;  %v5621_v61 = vmax.f32 %v10708_v50, 0.0 }
 0x3d6   :  { %11690 = vst [vmem:[#allocation60_spill] sm:$0xff] %v10852_v18  ;;  %11691 = vst [vmem:[#allocation25_spill] sm:$0xff] %v10855_v14  ;;  %v5616_v38 = vmax.f32 %v11695_v19, 0.0  ;;  %v5617_v18 = vmax.f32 %v11696_v29, 0.0  ;;  %v5619_v14 = vmax.f32 %v10702_v37, 0.0  ;;  %v5623_v16 = vmax.f32 %v10714_v39, 0.0 }
 0x3d7   :  { %11692 = vst [vmem:[#allocation61_spill] sm:$0xff] %v10861_v51  ;;  %v5622_v51 = vmax.f32 %v10711_v58, 0.0  ;;  %v5624_v42 = vmax.f32 %v10717_v47, 0.0  ;;  %v5625_v12 = vmax.f32 %v10720_v6, 0.0  ;;  %5674 = vst.msk [vmem:[%s11171_s5] sm:$0xff] %vm4984_vm2, %v5614_v36  ;;  %v5626_v44 = vmax.f32 %v10723_v45, 0.0 }
 0x3d8   :  { %5675 = vst.msk [vmem:[%s11171_s5 + $0x8] sm:$0xff] %vm4984_vm2, %v5615_v57  ;;  %5676 = vst.msk [vmem:[%s11171_s5 + $0x10] sm:$0xff] %vm4984_vm2, %v5616_v38  ;;  %v5627_v26 = vmax.f32 %v10726_v53, 0.0  ;;  %v5628_v58 = vmax.f32 %v10729_v31, 0.0  ;;  %v5629_v47 = vmax.f32 %v10732_v34, 0.0  ;;  %v5630_v37 = vmax.f32 %v10735_v60, 0.0 }
 0x3d9   :  { %5677 = vst.msk [vmem:[%s11171_s5 + $0x18] sm:$0xff] %vm4984_vm2, %v5617_v18  ;;  %5678 = vst.msk [vmem:[%s11171_s5 + $0x20] sm:$0xff] %vm4984_vm2, %v5618_v54  ;;  %v5631_v50 = vmax.f32 %v10738_v11, 0.0  ;;  %v5632_v39 = vmax.f32 %v10741_v2, 0.0  ;;  %v5633_v6 = vmax.f32 %v10744_v46, 0.0  ;;  %v5634_v45 = vmax.f32 %v10747_v43, 0.0 }
 0x3da   :  { %5679 = vst.msk [vmem:[%s11171_s5 + $0x28] sm:$0xff] %vm4984_vm2, %v5619_v14  ;;  %5680 = vst.msk [vmem:[%s11171_s5 + $0x30] sm:$0xff] %vm4984_vm2, %v5620_v0  ;;  %v5635_v53 = vmax.f32 %v10750_v28, 0.0  ;;  %v5636_v31 = vmax.f32 %v10753_v27, 0.0  ;;  %v5637_v34 = vmax.f32 %v10756_v3, 0.0  ;;  %v5638_v60 = vmax.f32 %v10759_v5, 0.0 }
 0x3db   :  { %5681 = vst.msk [vmem:[%s11171_s5 + $0x38] sm:$0xff] %vm4984_vm2, %v5621_v61  ;;  %5682 = vst.msk [vmem:[%s11171_s5 + $0x40] sm:$0xff] %vm4984_vm2, %v5622_v51  ;;  %v5639_v11 = vmax.f32 %v10762_v33, 0.0  ;;  %v5640_v2 = vmax.f32 %v10765_v17, 0.0  ;;  %v5641_v46 = vmax.f32 %v10768_v30, 0.0  ;;  %v5642_v43 = vmax.f32 %v10771_v56, 0.0 }
 0x3dc   :  { %5683 = vst.msk [vmem:[%s11171_s5 + $0x48] sm:$0xff] %vm4984_vm2, %v5623_v16  ;;  %5684 = vst.msk [vmem:[%s11171_s5 + $0x50] sm:$0xff] %vm4984_vm2, %v5624_v42  ;;  %v5643_v28 = vmax.f32 %v10774_v21, 0.0  ;;  %v5644_v27 = vmax.f32 %v10777_v7, 0.0  ;;  %v5645_v3 = vmax.f32 %v10780_v4, 0.0  ;;  %v5646_v5 = vmax.f32 %v10783_v15, 0.0 }
 0x3dd   :  { %5685 = vst.msk [vmem:[%s11171_s5 + $0x58] sm:$0xff] %vm4984_vm2, %v5625_v12  ;;  %5686 = vst.msk [vmem:[%s11171_s5 + $0x60] sm:$0xff] %vm4984_vm2, %v5626_v44  ;;  %v5647_v33 = vmax.f32 %v10786_v9, 0.0  ;;  %v5648_v17 = vmax.f32 %v10789_v62, 0.0  ;;  %v5649_v30 = vmax.f32 %v10792_v1, 0.0  ;;  %v5650_v56 = vmax.f32 %v10795_v13, 0.0 }
 0x3de   :  { %5687 = vst.msk [vmem:[%s11171_s5 + $0x68] sm:$0xff] %vm4984_vm2, %v5627_v26  ;;  %5688 = vst.msk [vmem:[%s11171_s5 + $0x70] sm:$0xff] %vm4984_vm2, %v5628_v58  ;;  %v5651_v21 = vmax.f32 %v10798_v40, 0.0  ;;  %v5652_v7 = vmax.f32 %v10801_v63, 0.0  ;;  %v5653_v4 = vmax.f32 %v10804_v24, 0.0  ;;  %v5654_v15 = vmax.f32 %v10807_v48, 0.0 }
 0x3df   :  { %5689 = vst.msk [vmem:[%s11171_s5 + $0x78] sm:$0xff] %vm4984_vm2, %v5629_v47  ;;  %5690 = vst.msk [vmem:[%s11171_s5 + $0x80] sm:$0xff] %vm4984_vm2, %v5630_v37  ;;  %v5655_v9 = vmax.f32 %v10810_v41, 0.0  ;;  %v5656_v62 = vmax.f32 %v10813_v8, 0.0  ;;  %v5657_v1 = vmax.f32 %v10816_v35, 0.0  ;;  %v5658_v13 = vmax.f32 %v10819_v55, 0.0 }
 0x3e0   :  { %5691 = vst.msk [vmem:[%s11171_s5 + $0x88] sm:$0xff] %vm4984_vm2, %v5631_v50  ;;  %5692 = vst.msk [vmem:[%s11171_s5 + $0x90] sm:$0xff] %vm4984_vm2, %v5632_v39  ;;  %v5659_v40 = vmax.f32 %v10822_v52, 0.0  ;;  %v5660_v63 = vmax.f32 %v10825_v10, 0.0  ;;  %v5661_v24 = vmax.f32 %v10828_v49, 0.0  ;;  %v5662_v48 = vmax.f32 %v10831_v20, 0.0 }
 0x3e1   :  { %5693 = vst.msk [vmem:[%s11171_s5 + $0x98] sm:$0xff] %vm4984_vm2, %v5633_v6  ;;  %5694 = vst.msk [vmem:[%s11171_s5 + $0xa0] sm:$0xff] %vm4984_vm2, %v5634_v45  ;;  %v5663_v41 = vmax.f32 %v10834_v23, 0.0  ;;  %v5664_v8 = vmax.f32 %v10837_v25, 0.0  ;;  %v11697_v35 = vld [vmem:[#allocation58_spill] sm:$0xff]  ;;  %v11698_v52 = vld [vmem:[#allocation20_spill] sm:$0xff] }
 0x3e2   :  { %5695 = vst.msk [vmem:[%s11171_s5 + $0xa8] sm:$0xff] %vm4984_vm2, %v5635_v53  ;;  %5696 = vst.msk [vmem:[%s11171_s5 + $0xb0] sm:$0xff] %vm4984_vm2, %v5636_v31  ;;  %v5665_v55 = vmax.f32 %v11697_v35, 0.0  ;;  %v5666_v10 = vmax.f32 %v11698_v52, 0.0  ;;  %v11699_v49 = vld [vmem:[#allocation59_spill] sm:$0xff]  ;;  %v11700_v23 = vld [vmem:[#allocation21_spill] sm:$0xff] }
 0x3e3   :  { %5697 = vst.msk [vmem:[%s11171_s5 + $0xb8] sm:$0xff] %vm4984_vm2, %v5637_v34  ;;  %5698 = vst.msk [vmem:[%s11171_s5 + $0xc0] sm:$0xff] %vm4984_vm2, %v5638_v60  ;;  %v5667_v20 = vmax.f32 %v11699_v49, 0.0  ;;  %v5668_v25 = vmax.f32 %v11700_v23, 0.0  ;;  %v11701_v38 = vld [vmem:[#allocation60_spill] sm:$0xff]  ;;  %v11702_v19 = vld [vmem:[#allocation25_spill] sm:$0xff] }
 0x3e4   :  { %5699 = vst.msk [vmem:[%s11171_s5 + $0xc8] sm:$0xff] %vm4984_vm2, %v5639_v11  ;;  %5700 = vst.msk [vmem:[%s11171_s5 + $0xd0] sm:$0xff] %vm4984_vm2, %v5640_v2  ;;  %v5669_v36 = vmax.f32 %v11701_v38, 0.0  ;;  %v5670_v18 = vmax.f32 %v11702_v19, 0.0  ;;  %v5671_v14 = vmax.f32 %v10858_v59, 0.0  ;;  %v11703_v51 = vld [vmem:[#allocation61_spill] sm:$0xff] }
 0x3e5   :  { %5701 = vst.msk [vmem:[%s11171_s5 + $0xd8] sm:$0xff] %vm4984_vm2, %v5641_v46  ;;  %5702 = vst.msk [vmem:[%s11171_s5 + $0xe0] sm:$0xff] %vm4984_vm2, %v5642_v43  ;;  %v5672_v22 = vmax.f32 %v11703_v51, 0.0  ;;  %v5673_v57 = vmax.f32 %v10864_v32, 0.0 }
 0x3e6   :  { %5703 = vst.msk [vmem:[%s11171_s5 + $0xe8] sm:$0xff] %vm4984_vm2, %v5643_v28  ;;  %5704 = vst.msk [vmem:[%s11171_s5 + $0xf0] sm:$0xff] %vm4984_vm2, %v5644_v27 }
 0x3e7   :  { %5705 = vst.msk [vmem:[%s11171_s5 + $0xf8] sm:$0xff] %vm4984_vm2, %v5645_v3  ;;  %5706 = vst.msk [vmem:[%s11171_s5 + $0x100] sm:$0xff] %vm4984_vm2, %v5646_v5 }
 0x3e8   :  { %5707 = vst.msk [vmem:[%s11171_s5 + $0x108] sm:$0xff] %vm4984_vm2, %v5647_v33  ;;  %5708 = vst.msk [vmem:[%s11171_s5 + $0x110] sm:$0xff] %vm4984_vm2, %v5648_v17 }
 0x3e9   :  { %5709 = vst.msk [vmem:[%s11171_s5 + $0x118] sm:$0xff] %vm4984_vm2, %v5649_v30  ;;  %5710 = vst.msk [vmem:[%s11171_s5 + $0x120] sm:$0xff] %vm4984_vm2, %v5650_v56 }
 0x3ea   :  { %5711 = vst.msk [vmem:[%s11171_s5 + $0x128] sm:$0xff] %vm4984_vm2, %v5651_v21  ;;  %5712 = vst.msk [vmem:[%s11171_s5 + $0x130] sm:$0xff] %vm4984_vm2, %v5652_v7 }
 0x3eb   :  { %5713 = vst.msk [vmem:[%s11171_s5 + $0x138] sm:$0xff] %vm4984_vm2, %v5653_v4  ;;  %5714 = vst.msk [vmem:[%s11171_s5 + $0x140] sm:$0xff] %vm4984_vm2, %v5654_v15 }
 0x3ec   :  { %5715 = vst.msk [vmem:[%s11171_s5 + $0x148] sm:$0xff] %vm4984_vm2, %v5655_v9  ;;  %5716 = vst.msk [vmem:[%s11171_s5 + $0x150] sm:$0xff] %vm4984_vm2, %v5656_v62 }
 0x3ed   :  { %5717 = vst.msk [vmem:[%s11171_s5 + $0x158] sm:$0xff] %vm4984_vm2, %v5657_v1  ;;  %5718 = vst.msk [vmem:[%s11171_s5 + $0x160] sm:$0xff] %vm4984_vm2, %v5658_v13 }
 0x3ee   :  { %5719 = vst.msk [vmem:[%s11171_s5 + $0x168] sm:$0xff] %vm4984_vm2, %v5659_v40  ;;  %5720 = vst.msk [vmem:[%s11171_s5 + $0x170] sm:$0xff] %vm4984_vm2, %v5660_v63 }
 0x3ef   :  { %5721 = vst.msk [vmem:[%s11171_s5 + $0x178] sm:$0xff] %vm4984_vm2, %v5661_v24  ;;  %5722 = vst.msk [vmem:[%s11171_s5 + $0x180] sm:$0xff] %vm4984_vm2, %v5662_v48 }
 0x3f0   :  { %5723 = vst.msk [vmem:[%s11171_s5 + $0x188] sm:$0xff] %vm4984_vm2, %v5663_v41  ;;  %5724 = vst.msk [vmem:[%s11171_s5 + $0x190] sm:$0xff] %vm4984_vm2, %v5664_v8 }
 0x3f1   :  { %5725 = vst.msk [vmem:[%s11171_s5 + $0x198] sm:$0xff] %vm4984_vm2, %v5665_v55  ;;  %5726 = vst.msk [vmem:[%s11171_s5 + $0x1a0] sm:$0xff] %vm4984_vm2, %v5666_v10 }
 0x3f2   :  { %5727 = vst.msk [vmem:[%s11171_s5 + $0x1a8] sm:$0xff] %vm4984_vm2, %v5667_v20  ;;  %5728 = vst.msk [vmem:[%s11171_s5 + $0x1b0] sm:$0xff] %vm4984_vm2, %v5668_v25 }
 0x3f3   :  { %5729 = vst.msk [vmem:[%s11171_s5 + $0x1b8] sm:$0xff] %vm4984_vm2, %v5669_v36  ;;  %5730 = vst.msk [vmem:[%s11171_s5 + $0x1c0] sm:$0xff] %vm4984_vm2, %v5670_v18 }
 0x3f4   :  { %5731 = vst.msk [vmem:[%s11171_s5 + $0x1c8] sm:$0xff] %vm4984_vm2, %v5671_v14  ;;  %5732 = vst.msk [vmem:[%s11171_s5 + $0x1d0] sm:$0xff] %vm4984_vm2, %v5672_v22 }
 0x3f5   :  { %5733 = vst.msk [vmem:[%s11171_s5 + $0x1d8] sm:$0x3f] %vm5102_vm3, %v5673_v57 }

</bundles_post_ra>
